<compile_context>
chip_gen: v7x
topology: tpu7x:2x2x1
jax: 0.10.0
libtpu: 0.0.40
codegen_flags: <defaults>
</compile_context>

<pallas_src>
import functools
import math

import jax
import jax.numpy as jnp
from jax.experimental import pallas as pl
from jax.experimental.pallas import tpu as pltpu


# --------------------------------------------------------------------------- #
# helpers
# --------------------------------------------------------------------------- #
def _layer_norm(x, gamma, beta, eps=1e-5):
    mean = jnp.mean(x, axis=-1, keepdims=True)
    var = jnp.mean((x - mean) ** 2, axis=-1, keepdims=True)
    return (x - mean) * jax.lax.rsqrt(var + eps) * gamma + beta


def _gelu_exact(x):
    # nn.GELU() default: exact (erf-based) GELU, computed in f32.
    # (tanh-approx on the EUP is faster on v6e/v7x but changes numerics.)
    return 0.5 * x * (1.0 + jax.lax.erf(x * (1.0 / math.sqrt(2.0))))


def _seq_tile(S, target):
    """Largest multiple of 8 that divides S and is <= target (else S itself)."""
    if S <= target:
        return S
    t = (target // 8) * 8
    while t >= 8:
        if S % t == 0:
            return t
        t -= 8
    return S


def _ff_tile(F, target):
    """Largest multiple of 128 that divides F and is <= target (else F itself)."""
    if F <= target:
        return F
    t = (target // 128) * 128
    while t >= 128:
        if F % t == 0:
            return t
        t -= 128
    return F


def _vmem_limit_bytes():
    # Raise the default scoped-VMEM limit but stay well inside physical VMEM
    # (64 MiB on v7x, 128 MiB on v5e/v6e).
    try:
        cap = int(pltpu.get_tpu_info().vmem_capacity_bytes)
        return int(min(cap * 3 // 4, 100 * 1024 * 1024))
    except Exception:
        return 64 * 1024 * 1024


def _const_spec(shape, single_buffer):
    """BlockSpec for a grid-invariant operand (weights / biases / LN params)."""
    zeros = (0,) * len(shape)
    if single_buffer:
        # grid-invariant -> never re-fetched; single buffering halves its VMEM.
        return pl.BlockSpec(shape, lambda *_: zeros, pipeline_mode=pl.Buffered(1))
    return pl.BlockSpec(shape, lambda *_: zeros)


# --------------------------------------------------------------------------- #
# kernels
# --------------------------------------------------------------------------- #
def _qkv_kernel(x_ref, g_ref, b_ref, wqkv_ref, bqkv_ref,
                q_ref, k_ref, v_ref, *, d_model, scale):
    """LN1 + fused qkv projection for one [ts, D] sequence tile.

    Single (ts, D) @ (D, 3D) matmul; q/k/v written lane-dense as [ts, D] bf16.
    The 1/sqrt(head_size) attention scale is applied to q in f32 here.
    """
    D = d_model
    x = x_ref[0]                                                    # (ts, D) f32
    xn = _layer_norm(x, g_ref[...], b_ref[...]).astype(jnp.bfloat16)
    y = jnp.dot(xn, wqkv_ref[...],
                preferred_element_type=jnp.float32) + bqkv_ref[...]  # (ts, 3D) f32
    q_ref[0] = (y[:, :D] * scale).astype(jnp.bfloat16)
    k_ref[0] = y[:, D:2 * D].astype(jnp.bfloat16)
    v_ref[0] = y[:, 2 * D:].astype(jnp.bfloat16)


def _attn_kernel(q_ref, k_ref, v_ref, xres_ref, wout_ref, bout_ref, o_ref,
                 m_scr, l_scr, acc_scr, *, num_heads, head_size):
    """Flash-style attention (per-head inner loop) + out_proj + residual."""
    ki = pl.program_id(2)

    @pl.when(ki == 0)
    def _():
        m_scr[...] = jnp.full(m_scr.shape, -jnp.inf, m_scr.dtype)
        l_scr[...] = jnp.zeros(l_scr.shape, l_scr.dtype)
        acc_scr[...] = jnp.zeros(acc_scr.shape, acc_scr.dtype)

    q = q_ref[0]                                                    # (tq, D) bf16
    k = k_ref[0]                                                    # (tk, D) bf16
    v = v_ref[0]                                                    # (tk, D) bf16

    for h in range(num_heads):                                      # static unroll
        lo, hi = h * head_size, (h + 1) * head_size
        qh = q[:, lo:hi]                                            # (tq, hd) bf16
        kh = k[:, lo:hi]                                            # (tk, hd) bf16
        vh = v[:, lo:hi]                                            # (tk, hd) bf16

        s = jax.lax.dot_general(qh, kh, (((1,), (1,)), ((), ())),
                                preferred_element_type=jnp.float32)  # (tq, tk) f32

        m_prev = m_scr[h]                                           # (tq, 1)
        m_new = jnp.maximum(m_prev, jnp.max(s, axis=-1, keepdims=True))
        alpha = jnp.exp(m_prev - m_new)                             # (tq, 1)
        p = jnp.exp(s - m_new)                                      # (tq, tk) f32
        l_scr[h] = alpha * l_scr[h] + jnp.sum(p, axis=-1, keepdims=True)
        m_scr[h] = m_new
        acc_scr[:, lo:hi] = alpha * acc_scr[:, lo:hi] + jnp.dot(
            p.astype(jnp.bfloat16), vh, preferred_element_type=jnp.float32)

    @pl.when(ki == pl.num_programs(2) - 1)
    def _():
        for h in range(num_heads):
            lo, hi = h * head_size, (h + 1) * head_size
            inv_l = pl.reciprocal(l_scr[h], approx=True)            # (tq, 1)
            acc_scr[:, lo:hi] = acc_scr[:, lo:hi] * inv_l
        out = jnp.dot(acc_scr[...].astype(jnp.bfloat16), wout_ref[...],
                      preferred_element_type=jnp.float32) + bout_ref[...]
        o_ref[0] = (xres_ref[0] + out).astype(o_ref.dtype)


def _mlp_kernel(x_ref, g_ref, b_ref, wfc_ref, bfc_ref, wproj_ref, bproj_ref,
                o_ref, xn_scr, acc_scr):
    """LN2 + MLP (tiled over mlp_width) + residual."""
    fi = pl.program_id(2)

    @pl.when(fi == 0)
    def _():
        xn_scr[...] = _layer_norm(x_ref[0], g_ref[...], b_ref[...]).astype(jnp.bfloat16)
        acc_scr[...] = jnp.zeros(acc_scr.shape, acc_scr.dtype)

    h = jnp.dot(xn_scr[...], wfc_ref[...],
                preferred_element_type=jnp.float32) + bfc_ref[...]   # (ts, tf) f32
    h = _gelu_exact(h)
    acc_scr[...] += jnp.dot(h.astype(jnp.bfloat16), wproj_ref[...],
                            preferred_element_type=jnp.float32)      # (ts, D)  f32

    @pl.when(fi == pl.num_programs(2) - 1)
    def _():
        o_ref[0] = (x_ref[0] + acc_scr[...] + bproj_ref[...]).astype(o_ref.dtype)


# --------------------------------------------------------------------------- #
# per-layer forward
# --------------------------------------------------------------------------- #
def _block_forward(x, lp, num_heads, *, single_buffer_weights, vmem_limit,
                   qkv_seq_tile=256, attn_q_tile=512, attn_kv_tile=256,
                   mlp_seq_tile=512, ff_tile_target=1024):
    B, S, D = x.shape
    assert D % num_heads == 0
    hd = D // num_heads
    mlp_width = lp["w_fc"].shape[1]

    ts_qkv = _seq_tile(S, qkv_seq_tile)
    tq = _seq_tile(S, attn_q_tile)          # q tile: larger -> more K/V reuse
    tk = _seq_tile(S, attn_kv_tile)         # kv tile
    ts_mlp = _seq_tile(S, mlp_seq_tile)     # MLP seq tile: larger -> weight reuse
    tf = _ff_tile(mlp_width, ff_tile_target)

    cspec = functools.partial(_const_spec, single_buffer=single_buffer_weights)

    def cparams(sem):
        return pltpu.CompilerParams(dimension_semantics=sem,
                                    vmem_limit_bytes=vmem_limit)

    # ---- 1) LN1 + fused qkv projection (lane-dense [B,S,D] bf16 outputs) -----
    qkv_shape = jax.ShapeDtypeStruct((B, S, D), jnp.bfloat16)
    q, k, v = pl.pallas_call(
        functools.partial(_qkv_kernel, d_model=D, scale=1.0 / math.sqrt(hd)),
        out_shape=(qkv_shape, qkv_shape, qkv_shape),
        grid_spec=pltpu.PrefetchScalarGridSpec(
            num_scalar_prefetch=0,
            grid=(B, S // ts_qkv),
            in_specs=[
                pl.BlockSpec((1, ts_qkv, D), lambda b, s: (b, s, 0)),
                cspec((1, D)), cspec((1, D)),               # ln_1 gamma/beta
                cspec((D, 3 * D)),                          # fused w_qkv (bf16)
                cspec((1, 3 * D)),                          # fused b_qkv (f32)
            ],
            out_specs=tuple(
                pl.BlockSpec((1, ts_qkv, D), lambda b, s: (b, s, 0))
                for _ in range(3)),
        ),
        compiler_params=cparams(("parallel", "parallel")),
    )(x, lp["ln1_g"], lp["ln1_b"], lp["w_qkv"], lp["b_qkv"])

    # ---- 2) flash attention (per-head loop) + out_proj + residual ------------
    x1 = pl.pallas_call(
        functools.partial(_attn_kernel, num_heads=num_heads, head_size=hd),
        out_shape=jax.ShapeDtypeStruct((B, S, D), x.dtype),
        grid_spec=pltpu.PrefetchScalarGridSpec(
            num_scalar_prefetch=0,
            grid=(B, S // tq, S // tk),
            in_specs=[
                pl.BlockSpec((1, tq, D), lambda b, qi, ki: (b, qi, 0)),   # q
                pl.BlockSpec((1, tk, D), lambda b, qi, ki: (b, ki, 0)),   # k
                pl.BlockSpec((1, tk, D), lambda b, qi, ki: (b, ki, 0)),   # v
                pl.BlockSpec((1, tq, D), lambda b, qi, ki: (b, qi, 0)),   # residual
                cspec((D, D)), cspec((1, D)),                             # out_proj
            ],
            out_specs=pl.BlockSpec((1, tq, D), lambda b, qi, ki: (b, qi, 0)),
            scratch_shapes=[
                pltpu.VMEM((num_heads, tq, 1), jnp.float32),  # running max (keepdims)
                pltpu.VMEM((num_heads, tq, 1), jnp.float32),  # running sum (keepdims)
                pltpu.VMEM((tq, D), jnp.float32),             # context accumulator
            ],
        ),
        compiler_params=cparams(("parallel", "parallel", "arbitrary")),
    )(q, k, v, x, lp["w_out"], lp["b_out"])

    # ---- 3) LN2 + MLP (mlp-width reduction) + residual -----------------------
    y = pl.pallas_call(
        _mlp_kernel,
        out_shape=jax.ShapeDtypeStruct((B, S, D), x.dtype),
        grid_spec=pltpu.PrefetchScalarGridSpec(
            num_scalar_prefetch=0,
            grid=(B, S // ts_mlp, mlp_width // tf),
            in_specs=[
                pl.BlockSpec((1, ts_mlp, D), lambda b, s, f: (b, s, 0)),
                cspec((1, D)), cspec((1, D)),                        # ln_2 gamma/beta
                pl.BlockSpec((D, tf), lambda b, s, f: (0, f)),       # c_fc W chunk
                pl.BlockSpec((1, tf), lambda b, s, f: (0, f)),       # c_fc b chunk
                pl.BlockSpec((tf, D), lambda b, s, f: (f, 0)),       # c_proj W chunk
                cspec((1, D)),                                       # c_proj b
            ],
            out_specs=pl.BlockSpec((1, ts_mlp, D), lambda b, s, f: (b, s, 0)),
            scratch_shapes=[
                pltpu.VMEM((ts_mlp, D), jnp.bfloat16),   # LN2(x1) cached across f tiles
                pltpu.VMEM((ts_mlp, D), jnp.float32),    # c_proj accumulator
            ],
        ),
        compiler_params=cparams(("parallel", "parallel", "arbitrary")),
    )(x1, lp["ln2_g"], lp["ln2_b"], lp["w_fc"], lp["b_fc"],
      lp["w_proj"], lp["b_proj"])
    return y


def transformer_block_forward(x, layers_params, num_heads, *,
                              single_buffer_weights=True):
    vmem_limit = _vmem_limit_bytes()
    for lp in layers_params:
        x = _block_forward(x, lp, num_heads,
                           single_buffer_weights=single_buffer_weights,
                           vmem_limit=vmem_limit)
    return x


# --------------------------------------------------------------------------- #
# host-side parameter prep
# --------------------------------------------------------------------------- #
def prepare_layer_params(p, num_heads):
    """De-interleave the per-head q|k|v in_proj columns and concatenate into a
    single (D, 3D) weight for one fused MXU pass. Weights cast to bf16; the
    1/sqrt(head_size) scale is applied in-kernel (f32), not folded here."""
    D = p["w_in"].shape[0]
    hd = D // num_heads
    bf16 = jnp.bfloat16

    w_in = p["w_in"].reshape(D, num_heads, 3 * hd)
    b_in = p["b_in"].reshape(num_heads, 3 * hd)
    w_q = w_in[:, :, :hd].reshape(D, D)
    w_k = w_in[:, :, hd:2 * hd].reshape(D, D)
    w_v = w_in[:, :, 2 * hd:].reshape(D, D)
    b_q = b_in[:, :hd].reshape(1, D)
    b_k = b_in[:, hd:2 * hd].reshape(1, D)
    b_v = b_in[:, 2 * hd:].reshape(1, D)

    w_qkv = jnp.concatenate([w_q, w_k, w_v], axis=1).astype(bf16)   # (D, 3D)
    b_qkv = jnp.concatenate([b_q, b_k, b_v], axis=1)                # (1, 3D) f32

    return {
        "ln1_g": p["ln1_g"], "ln1_b": p["ln1_b"],
        "w_qkv": w_qkv, "b_qkv": b_qkv,
        "w_out": p["w_out"].astype(bf16), "b_out": p["b_out"],
        "ln2_g": p["ln2_g"], "ln2_b": p["ln2_b"],
        "w_fc": p["w_fc"].astype(bf16), "b_fc": p["b_fc"],
        "w_proj": p["w_proj"].astype(bf16), "b_proj": p["b_proj"],
    }


def _round_weights_to_bf16(p):
    """bf16-roundtrip the big weights so the f32 reference sees the same values."""
    q = dict(p)
    for name in ("w_in", "w_out", "w_fc", "w_proj"):
        q[name] = p[name].astype(jnp.bfloat16).astype(jnp.float32)
    return q


# --------------------------------------------------------------------------- #
# pure-JAX reference (matches the PyTorch forward)
# --------------------------------------------------------------------------- #
def _block_reference(x, p, num_heads):
    B, S, D = x.shape
    hd = D // num_heads

    def ln(v, g, b):
        m = v.mean(-1, keepdims=True)
        var = ((v - m) ** 2).mean(-1, keepdims=True)
        return (v - m) / jnp.sqrt(var + 1e-5) * g + b

    xn = ln(x, p["ln1_g"][0], p["ln1_b"][0])
    qkv = xn @ p["w_in"] + p["b_in"][0]
    qkv = qkv.reshape(B, S, num_heads, 3 * hd)
    q, k, v = qkv[..., :hd], qkv[..., hd:2 * hd], qkv[..., 2 * hd:]
    s = jnp.einsum("bqhd,bkhd->bhqk", q, k) / math.sqrt(hd)
    pm = jax.nn.softmax(s, axis=-1)
    o = jnp.einsum("bhqk,bkhd->bqhd", pm, v).reshape(B, S, D)
    o = o @ p["w_out"] + p["b_out"][0]
    x1 = x + o
    xn2 = ln(x1, p["ln2_g"][0], p["ln2_b"][0])
    h = jax.nn.gelu(xn2 @ p["w_fc"] + p["b_fc"][0], approximate=False)
    h = h @ p["w_proj"] + p["b_proj"][0]
    return x1 + h


def transformer_block_reference(x, layers_raw, num_heads):
    for p in layers_raw:
        x = _block_reference(x, p, num_heads)
    return x


# --------------------------------------------------------------------------- #
# init + demo
# --------------------------------------------------------------------------- #
def init_params(key, d_model, mlp_width):
    ks = jax.random.split(key, 8)

    def w(k, shape, scale=0.05):
        return (scale * jax.random.normal(k, shape)).astype(jnp.float32)

    return {
        "ln1_g": jnp.ones((1, d_model), jnp.float32),
        "ln1_b": jnp.zeros((1, d_model), jnp.float32),
        "w_in": w(ks[0], (d_model, 3 * d_model)),
        "b_in": w(ks[1], (1, 3 * d_model)),
        "w_out": w(ks[2], (d_model, d_model)),
        "b_out": w(ks[3], (1, d_model)),
        "ln2_g": jnp.ones((1, d_model), jnp.float32),
        "ln2_b": jnp.zeros((1, d_model), jnp.float32),
        "w_fc": w(ks[4], (d_model, mlp_width)),
        "b_fc": w(ks[5], (1, mlp_width)),
        "w_proj": w(ks[6], (mlp_width, d_model)),
        "b_proj": w(ks[7], (1, d_model)),
    }


if __name__ == "__main__":
    B, S, D = 2, 8, 32          # batch, seq, d_model  (head_size = 8)
    n_head = 4
    layers = 2
    mlp_ratio = 4.0
    mlp_width = int(D * mlp_ratio)

    key = jax.random.PRNGKey(0)
    kx, kp = jax.random.split(key)
    x = jax.random.normal(kx, (B, S, D), dtype=jnp.float32)

    raw = [init_params(k, D, mlp_width) for k in jax.random.split(kp, layers)]
    ref_layers = [_round_weights_to_bf16(p) for p in raw]
    kernel_layers = [prepare_layer_params(p, n_head) for p in ref_layers]

    fwd = jax.jit(functools.partial(transformer_block_forward, num_heads=n_head))
    try:
        out = jax.block_until_ready(fwd(x, kernel_layers))
    except Exception:
        # Fallback if pipeline_mode=pl.Buffered(1) is unsupported by this JAX build.
        fwd = jax.jit(functools.partial(transformer_block_forward,
                                        num_heads=n_head,
                                        single_buffer_weights=False))
        out = jax.block_until_ready(fwd(x, kernel_layers))

    ref = transformer_block_reference(x, ref_layers, n_head)

    assert out.shape == (B, S, D)
    assert bool(jnp.all(jnp.isfinite(out)))
    max_err = float(jnp.max(jnp.abs(out - ref)))
    assert max_err < 2e-2, f"max abs err {max_err}"
    print("KERNEL_OK")
</pallas_src>

<mosaic_0001>
module attributes {stable_mosaic.version = 11 : i64} {
  func.func @_qkv_kernel(%arg0: i32, %arg1: i32, %arg2: memref<1x8x32xf32, #tpu.memory_space<vmem>>, %arg3: memref<1x32xf32, #tpu.memory_space<vmem>>, %arg4: memref<1x32xf32, #tpu.memory_space<vmem>>, %arg5: memref<32x96xbf16, #tpu.memory_space<vmem>>, %arg6: memref<1x96xf32, #tpu.memory_space<vmem>>, %arg7: memref<1x8x32xbf16, #tpu.memory_space<vmem>>, %arg8: memref<1x8x32xbf16, #tpu.memory_space<vmem>>, %arg9: memref<1x8x32xbf16, #tpu.memory_space<vmem>>) attributes {dimension_semantics = [#tpu.dimension_semantics<parallel>, #tpu.dimension_semantics<parallel>], iteration_bounds = array<i64: 2, 1>, scalar_prefetch = 0 : i64, scratch_operands = 0 : i64, tpu.core_type = #tpu.core_type<tc>, window_params = [{transform_indices = @transform_0, window_bounds = array<i64: 1, 8, 32>}, {pipeline_mode = #tpu.pipeline_mode<synchronous>, transform_indices = @transform_1, window_bounds = array<i64: 1, 32>}, {pipeline_mode = #tpu.pipeline_mode<synchronous>, transform_indices = @transform_2, window_bounds = array<i64: 1, 32>}, {pipeline_mode = #tpu.pipeline_mode<synchronous>, transform_indices = @transform_3, window_bounds = array<i64: 32, 96>}, {pipeline_mode = #tpu.pipeline_mode<synchronous>, transform_indices = @transform_4, window_bounds = array<i64: 1, 96>}, {transform_indices = @transform_5, window_bounds = array<i64: 1, 8, 32>}, {transform_indices = @transform_6, window_bounds = array<i64: 1, 8, 32>}, {transform_indices = @transform_7, window_bounds = array<i64: 1, 8, 32>}]} {
    %c0 = arith.constant 0 : index
    %c0_0 = arith.constant 0 : index
    %c0_1 = arith.constant 0 : index
    %0 = vector.load %arg2[%c0, %c0_0, %c0_1] : memref<1x8x32xf32, #tpu.memory_space<vmem>>, vector<1x8x32xf32>
    %1 = vector.shape_cast %0 : vector<1x8x32xf32> to vector<8x32xf32>
    %c0_2 = arith.constant 0 : index
    %c0_3 = arith.constant 0 : index
    %2 = vector.load %arg3[%c0_2, %c0_3] : memref<1x32xf32, #tpu.memory_space<vmem>>, vector<1x32xf32>
    %c0_4 = arith.constant 0 : index
    %c0_5 = arith.constant 0 : index
    %3 = vector.load %arg4[%c0_4, %c0_5] : memref<1x32xf32, #tpu.memory_space<vmem>>, vector<1x32xf32>
    %cst = arith.constant dense<0.000000e+00> : vector<8xf32>
    %4 = vector.multi_reduction <add>, %1, %cst [1] : vector<8x32xf32> to vector<8xf32>
    %5 = vector.shape_cast %4 : vector<8xf32> to vector<8x1xf32>
    %cst_6 = arith.constant 3.200000e+01 : f32
    %6 = vector.broadcast %cst_6 : f32 to vector<8x1xf32>
    %7 = arith.divf %5, %6 : vector<8x1xf32>
    %8 = vector.broadcast %7 : vector<8x1xf32> to vector<8x32xf32>
    %9 = arith.subf %1, %8 : vector<8x32xf32>
    %10 = arith.mulf %9, %9 : vector<8x32xf32>
    %cst_7 = arith.constant dense<0.000000e+00> : vector<8xf32>
    %11 = vector.multi_reduction <add>, %10, %cst_7 [1] : vector<8x32xf32> to vector<8xf32>
    %12 = vector.shape_cast %11 : vector<8xf32> to vector<8x1xf32>
    %cst_8 = arith.constant 3.200000e+01 : f32
    %13 = vector.broadcast %cst_8 : f32 to vector<8x1xf32>
    %14 = arith.divf %12, %13 : vector<8x1xf32>
    %15 = vector.broadcast %7 : vector<8x1xf32> to vector<8x32xf32>
    %16 = arith.subf %1, %15 : vector<8x32xf32>
    %cst_9 = arith.constant 9.99999974E-6 : f32
    %17 = vector.broadcast %cst_9 : f32 to vector<8x1xf32>
    %18 = arith.addf %14, %17 : vector<8x1xf32>
    %19 = math.rsqrt %18 : vector<8x1xf32>
    %20 = vector.broadcast %19 : vector<8x1xf32> to vector<8x32xf32>
    %21 = arith.mulf %16, %20 : vector<8x32xf32>
    %22 = vector.broadcast %2 : vector<1x32xf32> to vector<8x32xf32>
    %23 = arith.mulf %21, %22 : vector<8x32xf32>
    %24 = vector.broadcast %3 : vector<1x32xf32> to vector<8x32xf32>
    %25 = arith.addf %23, %24 : vector<8x32xf32>
    %26 = arith.truncf %25 : vector<8x32xf32> to vector<8x32xbf16>
    %c0_10 = arith.constant 0 : index
    %c0_11 = arith.constant 0 : index
    %27 = vector.load %arg5[%c0_10, %c0_11] : memref<32x96xbf16, #tpu.memory_space<vmem>>, vector<32x96xbf16>
    %cst_12 = arith.constant dense<0.000000e+00> : vector<8x96xf32>
    %28 = tpu.matmul %26, %27, %cst_12 {dimension_numbers = #tpu.dot_dimension_numbers<[1], [0], [0], [1], [0, 0, 1, 1], [], []>} : vector<8x32xbf16>, vector<32x96xbf16>, vector<8x96xf32> -> vector<8x96xf32>
    %c0_13 = arith.constant 0 : index
    %c0_14 = arith.constant 0 : index
    %29 = vector.load %arg6[%c0_13, %c0_14] : memref<1x96xf32, #tpu.memory_space<vmem>>, vector<1x96xf32>
    %30 = vector.broadcast %29 : vector<1x96xf32> to vector<8x96xf32>
    %31 = arith.addf %28, %30 : vector<8x96xf32>
    %32 = vector.extract_strided_slice %31 {offsets = [0, 0], sizes = [8, 32], strides = [1, 1]} : vector<8x96xf32> to vector<8x32xf32>
    %cst_15 = arith.constant 0.353553385 : f32
    %33 = vector.broadcast %cst_15 : f32 to vector<8x32xf32>
    %34 = arith.mulf %32, %33 : vector<8x32xf32>
    %35 = arith.truncf %34 : vector<8x32xf32> to vector<8x32xbf16>
    %c0_16 = arith.constant 0 : index
    %c0_17 = arith.constant 0 : index
    %c0_18 = arith.constant 0 : index
    %36 = vector.load %arg7[%c0_16, %c0_17, %c0_18] : memref<1x8x32xbf16, #tpu.memory_space<vmem>>, vector<1x8x32xbf16>
    %37 = vector.shape_cast %36 : vector<1x8x32xbf16> to vector<8x32xbf16>
    %38 = vector.shape_cast %35 : vector<8x32xbf16> to vector<1x8x32xbf16>
    tpu.vector_store %arg7[%c0_16, %c0_17, %c0_18], %38 {strides = array<i32>} : memref<1x8x32xbf16, #tpu.memory_space<vmem>>, vector<1x8x32xbf16>,
    %39 = vector.extract_strided_slice %31 {offsets = [0, 32], sizes = [8, 32], strides = [1, 1]} : vector<8x96xf32> to vector<8x32xf32>
    %40 = arith.truncf %39 : vector<8x32xf32> to vector<8x32xbf16>
    %c0_19 = arith.constant 0 : index
    %c0_20 = arith.constant 0 : index
    %c0_21 = arith.constant 0 : index
    %41 = vector.load %arg8[%c0_19, %c0_20, %c0_21] : memref<1x8x32xbf16, #tpu.memory_space<vmem>>, vector<1x8x32xbf16>
    %42 = vector.shape_cast %41 : vector<1x8x32xbf16> to vector<8x32xbf16>
    %43 = vector.shape_cast %40 : vector<8x32xbf16> to vector<1x8x32xbf16>
    tpu.vector_store %arg8[%c0_19, %c0_20, %c0_21], %43 {strides = array<i32>} : memref<1x8x32xbf16, #tpu.memory_space<vmem>>, vector<1x8x32xbf16>,
    %44 = vector.extract_strided_slice %31 {offsets = [0, 64], sizes = [8, 32], strides = [1, 1]} : vector<8x96xf32> to vector<8x32xf32>
    %45 = arith.truncf %44 : vector<8x32xf32> to vector<8x32xbf16>
    %c0_22 = arith.constant 0 : index
    %c0_23 = arith.constant 0 : index
    %c0_24 = arith.constant 0 : index
    %46 = vector.load %arg9[%c0_22, %c0_23, %c0_24] : memref<1x8x32xbf16, #tpu.memory_space<vmem>>, vector<1x8x32xbf16>
    %47 = vector.shape_cast %46 : vector<1x8x32xbf16> to vector<8x32xbf16>
    %48 = vector.shape_cast %45 : vector<8x32xbf16> to vector<1x8x32xbf16>
    tpu.vector_store %arg9[%c0_22, %c0_23, %c0_24], %48 {strides = array<i32>} : memref<1x8x32xbf16, #tpu.memory_space<vmem>>, vector<1x8x32xbf16>,
    return
  }
  func.func @transform_0(%arg0: i32, %arg1: i32) -> (i32, i32, i32) {
    %c0_i32 = arith.constant 0 : i32
    %c0_i32_0 = arith.constant 0 : i32
    return %arg0, %arg1, %c0_i32 : i32, i32, i32
  }
  func.func @transform_1(%arg0: i32, %arg1: i32) -> (i32, i32) {
    %c0_i32 = arith.constant 0 : i32
    %c0_i32_0 = arith.constant 0 : i32
    %c0_i32_1 = arith.constant 0 : i32
    return %c0_i32, %c0_i32_0 : i32, i32
  }
  func.func @transform_2(%arg0: i32, %arg1: i32) -> (i32, i32) {
    %c0_i32 = arith.constant 0 : i32
    %c0_i32_0 = arith.constant 0 : i32
    %c0_i32_1 = arith.constant 0 : i32
    return %c0_i32, %c0_i32_0 : i32, i32
  }
  func.func @transform_3(%arg0: i32, %arg1: i32) -> (i32, i32) {
    %c0_i32 = arith.constant 0 : i32
    %c0_i32_0 = arith.constant 0 : i32
    %c0_i32_1 = arith.constant 0 : i32
    return %c0_i32, %c0_i32_0 : i32, i32
  }
  func.func @transform_4(%arg0: i32, %arg1: i32) -> (i32, i32) {
    %c0_i32 = arith.constant 0 : i32
    %c0_i32_0 = arith.constant 0 : i32
    %c0_i32_1 = arith.constant 0 : i32
    return %c0_i32, %c0_i32_0 : i32, i32
  }
  func.func @transform_5(%arg0: i32, %arg1: i32) -> (i32, i32, i32) {
    %c0_i32 = arith.constant 0 : i32
    %c0_i32_0 = arith.constant 0 : i32
    return %arg0, %arg1, %c0_i32 : i32, i32, i32
  }
  func.func @transform_6(%arg0: i32, %arg1: i32) -> (i32, i32, i32) {
    %c0_i32 = arith.constant 0 : i32
    %c0_i32_0 = arith.constant 0 : i32
    return %arg0, %arg1, %c0_i32 : i32, i32, i32
  }
  func.func @transform_7(%arg0: i32, %arg1: i32) -> (i32, i32, i32) {
    %c0_i32 = arith.constant 0 : i32
    %c0_i32_0 = arith.constant 0 : i32
    return %arg0, %arg1, %c0_i32 : i32, i32, i32
  }
}

module attributes {stable_mosaic.version = 11 : i64} {
  func.func @_mlp_kernel(%arg0: i32, %arg1: i32, %arg2: i32, %arg3: memref<1x8x32xf32, #tpu.memory_space<vmem>>, %arg4: memref<1x32xf32, #tpu.memory_space<vmem>>, %arg5: memref<1x32xf32, #tpu.memory_space<vmem>>, %arg6: memref<32x128xbf16, #tpu.memory_space<vmem>>, %arg7: memref<1x128xf32, #tpu.memory_space<vmem>>, %arg8: memref<128x32xbf16, #tpu.memory_space<vmem>>, %arg9: memref<1x32xf32, #tpu.memory_space<vmem>>, %arg10: memref<1x8x32xf32, #tpu.memory_space<vmem>>, %arg11: memref<8x32xbf16, #tpu.memory_space<vmem>>, %arg12: memref<8x32xf32, #tpu.memory_space<vmem>>) attributes {dimension_semantics = [#tpu.dimension_semantics<parallel>, #tpu.dimension_semantics<parallel>, #tpu.dimension_semantics<arbitrary>], iteration_bounds = array<i64: 2, 1, 1>, scalar_prefetch = 0 : i64, scratch_operands = 2 : i64, tpu.core_type = #tpu.core_type<tc>, window_params = [{transform_indices = @transform_0, window_bounds = array<i64: 1, 8, 32>}, {pipeline_mode = #tpu.pipeline_mode<synchronous>, transform_indices = @transform_1, window_bounds = array<i64: 1, 32>}, {pipeline_mode = #tpu.pipeline_mode<synchronous>, transform_indices = @transform_2, window_bounds = array<i64: 1, 32>}, {transform_indices = @transform_3, window_bounds = array<i64: 32, 128>}, {transform_indices = @transform_4, window_bounds = array<i64: 1, 128>}, {transform_indices = @transform_5, window_bounds = array<i64: 128, 32>}, {pipeline_mode = #tpu.pipeline_mode<synchronous>, transform_indices = @transform_6, window_bounds = array<i64: 1, 32>}, {transform_indices = @transform_7, window_bounds = array<i64: 1, 8, 32>}]} {
    %c0_i32 = arith.constant 0 : i32
    %0 = arith.cmpi eq, %arg2, %c0_i32 : i32
    %1 = arith.extui %0 : i1 to i32
    %c0_i32_0 = arith.constant 0 : i32
    %2 = arith.cmpi ne, %1, %c0_i32_0 : i32
    scf.if %2 {
      %c0_18 = arith.constant 0 : index
      %c0_19 = arith.constant 0 : index
      %c0_20 = arith.constant 0 : index
      %26 = vector.load %arg3[%c0_18, %c0_19, %c0_20] : memref<1x8x32xf32, #tpu.memory_space<vmem>>, vector<1x8x32xf32>
      %27 = vector.shape_cast %26 : vector<1x8x32xf32> to vector<8x32xf32>
      %c0_21 = arith.constant 0 : index
      %c0_22 = arith.constant 0 : index
      %28 = vector.load %arg4[%c0_21, %c0_22] : memref<1x32xf32, #tpu.memory_space<vmem>>, vector<1x32xf32>
      %c0_23 = arith.constant 0 : index
      %c0_24 = arith.constant 0 : index
      %29 = vector.load %arg5[%c0_23, %c0_24] : memref<1x32xf32, #tpu.memory_space<vmem>>, vector<1x32xf32>
      %cst_25 = arith.constant dense<0.000000e+00> : vector<8xf32>
      %30 = vector.multi_reduction <add>, %27, %cst_25 [1] : vector<8x32xf32> to vector<8xf32>
      %31 = vector.shape_cast %30 : vector<8xf32> to vector<8x1xf32>
      %cst_26 = arith.constant 3.200000e+01 : f32
      %32 = vector.broadcast %cst_26 : f32 to vector<8x1xf32>
      %33 = arith.divf %31, %32 : vector<8x1xf32>
      %34 = vector.broadcast %33 : vector<8x1xf32> to vector<8x32xf32>
      %35 = arith.subf %27, %34 : vector<8x32xf32>
      %36 = arith.mulf %35, %35 : vector<8x32xf32>
      %cst_27 = arith.constant dense<0.000000e+00> : vector<8xf32>
      %37 = vector.multi_reduction <add>, %36, %cst_27 [1] : vector<8x32xf32> to vector<8xf32>
      %38 = vector.shape_cast %37 : vector<8xf32> to vector<8x1xf32>
      %cst_28 = arith.constant 3.200000e+01 : f32
      %39 = vector.broadcast %cst_28 : f32 to vector<8x1xf32>
      %40 = arith.divf %38, %39 : vector<8x1xf32>
      %41 = vector.broadcast %33 : vector<8x1xf32> to vector<8x32xf32>
      %42 = arith.subf %27, %41 : vector<8x32xf32>
      %cst_29 = arith.constant 9.99999974E-6 : f32
      %43 = vector.broadcast %cst_29 : f32 to vector<8x1xf32>
      %44 = arith.addf %40, %43 : vector<8x1xf32>
      %45 = math.rsqrt %44 : vector<8x1xf32>
      %46 = vector.broadcast %45 : vector<8x1xf32> to vector<8x32xf32>
      %47 = arith.mulf %42, %46 : vector<8x32xf32>
      %48 = vector.broadcast %28 : vector<1x32xf32> to vector<8x32xf32>
      %49 = arith.mulf %47, %48 : vector<8x32xf32>
      %50 = vector.broadcast %29 : vector<1x32xf32> to vector<8x32xf32>
      %51 = arith.addf %49, %50 : vector<8x32xf32>
      %52 = arith.truncf %51 : vector<8x32xf32> to vector<8x32xbf16>
      %c0_30 = arith.constant 0 : index
      %c0_31 = arith.constant 0 : index
      %53 = vector.load %arg11[%c0_30, %c0_31] : memref<8x32xbf16, #tpu.memory_space<vmem>>, vector<8x32xbf16>
      tpu.vector_store %arg11[%c0_30, %c0_31], %52 {strides = array<i32>} : memref<8x32xbf16, #tpu.memory_space<vmem>>, vector<8x32xbf16>,
      %cst_32 = arith.constant 0.000000e+00 : f32
      %54 = vector.broadcast %cst_32 : f32 to vector<8x32xf32>
      %c0_33 = arith.constant 0 : index
      %c0_34 = arith.constant 0 : index
      %55 = vector.load %arg12[%c0_33, %c0_34] : memref<8x32xf32, #tpu.memory_space<vmem>>, vector<8x32xf32>
      tpu.vector_store %arg12[%c0_33, %c0_34], %54 {strides = array<i32>} : memref<8x32xf32, #tpu.memory_space<vmem>>, vector<8x32xf32>,
    } else {
    }
    %c0 = arith.constant 0 : index
    %c0_1 = arith.constant 0 : index
    %3 = vector.load %arg11[%c0, %c0_1] : memref<8x32xbf16, #tpu.memory_space<vmem>>, vector<8x32xbf16>
    %c0_2 = arith.constant 0 : index
    %c0_3 = arith.constant 0 : index
    %4 = vector.load %arg6[%c0_2, %c0_3] : memref<32x128xbf16, #tpu.memory_space<vmem>>, vector<32x128xbf16>
    %cst = arith.constant dense<0.000000e+00> : vector<8x128xf32>
    %5 = tpu.matmul %3, %4, %cst {dimension_numbers = #tpu.dot_dimension_numbers<[1], [0], [0], [1], [0, 0, 1, 1], [], []>} : vector<8x32xbf16>, vector<32x128xbf16>, vector<8x128xf32> -> vector<8x128xf32>
    %c0_4 = arith.constant 0 : index
    %c0_5 = arith.constant 0 : index
    %6 = vector.load %arg7[%c0_4, %c0_5] : memref<1x128xf32, #tpu.memory_space<vmem>>, vector<1x128xf32>
    %7 = vector.broadcast %6 : vector<1x128xf32> to vector<8x128xf32>
    %8 = arith.addf %5, %7 : vector<8x128xf32>
    %cst_6 = arith.constant 5.000000e-01 : f32
    %9 = vector.broadcast %cst_6 : f32 to vector<8x128xf32>
    %10 = arith.mulf %9, %8 : vector<8x128xf32>
    %cst_7 = arith.constant 0.707106769 : f32
    %11 = vector.broadcast %cst_7 : f32 to vector<8x128xf32>
    %12 = arith.mulf %8, %11 : vector<8x128xf32>
    %13 = math.erf %12 : vector<8x128xf32>
    %cst_8 = arith.constant 1.000000e+00 : f32
    %14 = vector.broadcast %cst_8 : f32 to vector<8x128xf32>
    %15 = arith.addf %14, %13 : vector<8x128xf32>
    %16 = arith.mulf %10, %15 : vector<8x128xf32>
    %c0_9 = arith.constant 0 : index
    %c0_10 = arith.constant 0 : index
    %17 = vector.load %arg12[%c0_9, %c0_10] : memref<8x32xf32, #tpu.memory_space<vmem>>, vector<8x32xf32>
    %18 = arith.truncf %16 : vector<8x128xf32> to vector<8x128xbf16>
    %c0_11 = arith.constant 0 : index
    %c0_12 = arith.constant 0 : index
    %19 = vector.load %arg8[%c0_11, %c0_12] : memref<128x32xbf16, #tpu.memory_space<vmem>>, vector<128x32xbf16>
    %cst_13 = arith.constant dense<0.000000e+00> : vector<8x32xf32>
    %20 = tpu.matmul %18, %19, %cst_13 {dimension_numbers = #tpu.dot_dimension_numbers<[1], [0], [0], [1], [0, 0, 1, 1], [], []>} : vector<8x128xbf16>, vector<128x32xbf16>, vector<8x32xf32> -> vector<8x32xf32>
    %21 = arith.addf %17, %20 : vector<8x32xf32>
    %c0_14 = arith.constant 0 : index
    %c0_15 = arith.constant 0 : index
    %22 = vector.load %arg12[%c0_14, %c0_15] : memref<8x32xf32, #tpu.memory_space<vmem>>, vector<8x32xf32>
    tpu.vector_store %arg12[%c0_14, %c0_15], %21 {strides = array<i32>} : memref<8x32xf32, #tpu.memory_space<vmem>>, vector<8x32xf32>,
    %c0_i32_16 = arith.constant 0 : i32
    %23 = arith.cmpi eq, %arg2, %c0_i32_16 : i32
    %24 = arith.extui %23 : i1 to i32
    %c0_i32_17 = arith.constant 0 : i32
    %25 = arith.cmpi ne, %24, %c0_i32_17 : i32
    scf.if %25 {
      %c0_18 = arith.constant 0 : index
      %c0_19 = arith.constant 0 : index
      %c0_20 = arith.constant 0 : index
      %26 = vector.load %arg3[%c0_18, %c0_19, %c0_20] : memref<1x8x32xf32, #tpu.memory_space<vmem>>, vector<1x8x32xf32>
      %27 = vector.shape_cast %26 : vector<1x8x32xf32> to vector<8x32xf32>
      %c0_21 = arith.constant 0 : index
      %c0_22 = arith.constant 0 : index
      %28 = vector.load %arg12[%c0_21, %c0_22] : memref<8x32xf32, #tpu.memory_space<vmem>>, vector<8x32xf32>
      %29 = arith.addf %27, %28 : vector<8x32xf32>
      %c0_23 = arith.constant 0 : index
      %c0_24 = arith.constant 0 : index
      %30 = vector.load %arg9[%c0_23, %c0_24] : memref<1x32xf32, #tpu.memory_space<vmem>>, vector<1x32xf32>
      %31 = vector.broadcast %30 : vector<1x32xf32> to vector<8x32xf32>
      %32 = arith.addf %29, %31 : vector<8x32xf32>
      %c0_25 = arith.constant 0 : index
      %c0_26 = arith.constant 0 : index
      %c0_27 = arith.constant 0 : index
      %33 = vector.load %arg10[%c0_25, %c0_26, %c0_27] : memref<1x8x32xf32, #tpu.memory_space<vmem>>, vector<1x8x32xf32>
      %34 = vector.shape_cast %33 : vector<1x8x32xf32> to vector<8x32xf32>
      %35 = vector.shape_cast %32 : vector<8x32xf32> to vector<1x8x32xf32>
      tpu.vector_store %arg10[%c0_25, %c0_26, %c0_27], %35 {strides = array<i32>} : memref<1x8x32xf32, #tpu.memory_space<vmem>>, vector<1x8x32xf32>,
    } else {
    }
    return
  }
  func.func @transform_0(%arg0: i32, %arg1: i32, %arg2: i32) -> (i32, i32, i32) {
    %c0_i32 = arith.constant 0 : i32
    %c0_i32_0 = arith.constant 0 : i32
    return %arg0, %arg1, %c0_i32 : i32, i32, i32
  }
  func.func @transform_1(%arg0: i32, %arg1: i32, %arg2: i32) -> (i32, i32) {
    %c0_i32 = arith.constant 0 : i32
    %c0_i32_0 = arith.constant 0 : i32
    %c0_i32_1 = arith.constant 0 : i32
    return %c0_i32, %c0_i32_0 : i32, i32
  }
  func.func @transform_2(%arg0: i32, %arg1: i32, %arg2: i32) -> (i32, i32) {
    %c0_i32 = arith.constant 0 : i32
    %c0_i32_0 = arith.constant 0 : i32
    %c0_i32_1 = arith.constant 0 : i32
    return %c0_i32, %c0_i32_0 : i32, i32
  }
  func.func @transform_3(%arg0: i32, %arg1: i32, %arg2: i32) -> (i32, i32) {
    %c0_i32 = arith.constant 0 : i32
    %c0_i32_0 = arith.constant 0 : i32
    return %c0_i32, %arg2 : i32, i32
  }
  func.func @transform_4(%arg0: i32, %arg1: i32, %arg2: i32) -> (i32, i32) {
    %c0_i32 = arith.constant 0 : i32
    %c0_i32_0 = arith.constant 0 : i32
    return %c0_i32, %arg2 : i32, i32
  }
  func.func @transform_5(%arg0: i32, %arg1: i32, %arg2: i32) -> (i32, i32) {
    %c0_i32 = arith.constant 0 : i32
    %c0_i32_0 = arith.constant 0 : i32
    return %arg2, %c0_i32 : i32, i32
  }
  func.func @transform_6(%arg0: i32, %arg1: i32, %arg2: i32) -> (i32, i32) {
    %c0_i32 = arith.constant 0 : i32
    %c0_i32_0 = arith.constant 0 : i32
    %c0_i32_1 = arith.constant 0 : i32
    return %c0_i32, %c0_i32_0 : i32, i32
  }
  func.func @transform_7(%arg0: i32, %arg1: i32, %arg2: i32) -> (i32, i32, i32) {
    %c0_i32 = arith.constant 0 : i32
    %c0_i32_0 = arith.constant 0 : i32
    return %arg0, %arg1, %c0_i32 : i32, i32, i32
  }
}

module attributes {stable_mosaic.version = 11 : i64} {
  func.func @_attn_kernel(%arg0: i32, %arg1: i32, %arg2: i32, %arg3: memref<1x8x32xbf16, #tpu.memory_space<vmem>>, %arg4: memref<1x8x32xbf16, #tpu.memory_space<vmem>>, %arg5: memref<1x8x32xbf16, #tpu.memory_space<vmem>>, %arg6: memref<1x8x32xf32, #tpu.memory_space<vmem>>, %arg7: memref<32x32xbf16, #tpu.memory_space<vmem>>, %arg8: memref<1x32xf32, #tpu.memory_space<vmem>>, %arg9: memref<1x8x32xf32, #tpu.memory_space<vmem>>, %arg10: memref<4x8x1xf32, #tpu.memory_space<vmem>>, %arg11: memref<4x8x1xf32, #tpu.memory_space<vmem>>, %arg12: memref<8x32xf32, #tpu.memory_space<vmem>>) attributes {dimension_semantics = [#tpu.dimension_semantics<parallel>, #tpu.dimension_semantics<parallel>, #tpu.dimension_semantics<arbitrary>], iteration_bounds = array<i64: 2, 1, 1>, scalar_prefetch = 0 : i64, scratch_operands = 3 : i64, tpu.core_type = #tpu.core_type<tc>, window_params = [{transform_indices = @transform_0, window_bounds = array<i64: 1, 8, 32>}, {transform_indices = @transform_1, window_bounds = array<i64: 1, 8, 32>}, {transform_indices = @transform_2, window_bounds = array<i64: 1, 8, 32>}, {transform_indices = @transform_3, window_bounds = array<i64: 1, 8, 32>}, {pipeline_mode = #tpu.pipeline_mode<synchronous>, transform_indices = @transform_4, window_bounds = array<i64: 32, 32>}, {pipeline_mode = #tpu.pipeline_mode<synchronous>, transform_indices = @transform_5, window_bounds = array<i64: 1, 32>}, {transform_indices = @transform_6, window_bounds = array<i64: 1, 8, 32>}]} {
    %c0_i32 = arith.constant 0 : i32
    %0 = arith.cmpi eq, %arg2, %c0_i32 : i32
    %1 = arith.extui %0 : i1 to i32
    %c0_i32_0 = arith.constant 0 : i32
    %2 = arith.cmpi ne, %1, %c0_i32_0 : i32
    scf.if %2 {
      %cst_84 = arith.constant 0xFF800000 : f32
      %144 = vector.broadcast %cst_84 : f32 to vector<4x8x1xf32>
      %c0_85 = arith.constant 0 : index
      %c0_86 = arith.constant 0 : index
      %c0_87 = arith.constant 0 : index
      %145 = vector.load %arg10[%c0_85, %c0_86, %c0_87] : memref<4x8x1xf32, #tpu.memory_space<vmem>>, vector<4x8x1xf32>
      tpu.vector_store %arg10[%c0_85, %c0_86, %c0_87], %144 {strides = array<i32>} : memref<4x8x1xf32, #tpu.memory_space<vmem>>, vector<4x8x1xf32>,
      %cst_88 = arith.constant 0.000000e+00 : f32
      %146 = vector.broadcast %cst_88 : f32 to vector<4x8x1xf32>
      %c0_89 = arith.constant 0 : index
      %c0_90 = arith.constant 0 : index
      %c0_91 = arith.constant 0 : index
      %147 = vector.load %arg11[%c0_89, %c0_90, %c0_91] : memref<4x8x1xf32, #tpu.memory_space<vmem>>, vector<4x8x1xf32>
      tpu.vector_store %arg11[%c0_89, %c0_90, %c0_91], %146 {strides = array<i32>} : memref<4x8x1xf32, #tpu.memory_space<vmem>>, vector<4x8x1xf32>,
      %cst_92 = arith.constant 0.000000e+00 : f32
      %148 = vector.broadcast %cst_92 : f32 to vector<8x32xf32>
      %c0_93 = arith.constant 0 : index
      %c0_94 = arith.constant 0 : index
      %149 = vector.load %arg12[%c0_93, %c0_94] : memref<8x32xf32, #tpu.memory_space<vmem>>, vector<8x32xf32>
      tpu.vector_store %arg12[%c0_93, %c0_94], %148 {strides = array<i32>} : memref<8x32xf32, #tpu.memory_space<vmem>>, vector<8x32xf32>,
    } else {
    }
    %c0 = arith.constant 0 : index
    %c0_1 = arith.constant 0 : index
    %c0_2 = arith.constant 0 : index
    %3 = vector.load %arg3[%c0, %c0_1, %c0_2] : memref<1x8x32xbf16, #tpu.memory_space<vmem>>, vector<1x8x32xbf16>
    %4 = vector.shape_cast %3 : vector<1x8x32xbf16> to vector<8x32xbf16>
    %c0_3 = arith.constant 0 : index
    %c0_4 = arith.constant 0 : index
    %c0_5 = arith.constant 0 : index
    %5 = vector.load %arg4[%c0_3, %c0_4, %c0_5] : memref<1x8x32xbf16, #tpu.memory_space<vmem>>, vector<1x8x32xbf16>
    %6 = vector.shape_cast %5 : vector<1x8x32xbf16> to vector<8x32xbf16>
    %c0_6 = arith.constant 0 : index
    %c0_7 = arith.constant 0 : index
    %c0_8 = arith.constant 0 : index
    %7 = vector.load %arg5[%c0_6, %c0_7, %c0_8] : memref<1x8x32xbf16, #tpu.memory_space<vmem>>, vector<1x8x32xbf16>
    %8 = vector.shape_cast %7 : vector<1x8x32xbf16> to vector<8x32xbf16>
    %9 = vector.extract_strided_slice %4 {offsets = [0, 0], sizes = [8, 8], strides = [1, 1]} : vector<8x32xbf16> to vector<8x8xbf16>
    %10 = vector.extract_strided_slice %6 {offsets = [0, 0], sizes = [8, 8], strides = [1, 1]} : vector<8x32xbf16> to vector<8x8xbf16>
    %11 = vector.extract_strided_slice %8 {offsets = [0, 0], sizes = [8, 8], strides = [1, 1]} : vector<8x32xbf16> to vector<8x8xbf16>
    %cst = arith.constant dense<0.000000e+00> : vector<8x8xf32>
    %12 = tpu.matmul %9, %10, %cst {dimension_numbers = #tpu.dot_dimension_numbers<[1], [1], [0], [0], [0, 0, 1, 0], [], []>} : vector<8x8xbf16>, vector<8x8xbf16>, vector<8x8xf32> -> vector<8x8xf32>
    %c0_9 = arith.constant 0 : index
    %c0_10 = arith.constant 0 : index
    %c0_11 = arith.constant 0 : index
    %13 = vector.load %arg10[%c0_9, %c0_10, %c0_11] : memref<4x8x1xf32, #tpu.memory_space<vmem>>, vector<1x8x1xf32>
    %14 = vector.shape_cast %13 : vector<1x8x1xf32> to vector<8x1xf32>
    %cst_12 = arith.constant dense<0xFF800000> : vector<8xf32>
    %15 = vector.multi_reduction <maximumf>, %12, %cst_12 [1] : vector<8x8xf32> to vector<8xf32>
    %16 = vector.shape_cast %15 : vector<8xf32> to vector<8x1xf32>
    %17 = arith.maximumf %14, %16 : vector<8x1xf32>
    %18 = arith.subf %14, %17 : vector<8x1xf32>
    %19 = math.exp %18 : vector<8x1xf32>
    %20 = vector.broadcast %17 : vector<8x1xf32> to vector<8x8xf32>
    %21 = arith.subf %12, %20 : vector<8x8xf32>
    %22 = math.exp %21 : vector<8x8xf32>
    %c0_13 = arith.constant 0 : index
    %c0_14 = arith.constant 0 : index
    %c0_15 = arith.constant 0 : index
    %23 = vector.load %arg11[%c0_13, %c0_14, %c0_15] : memref<4x8x1xf32, #tpu.memory_space<vmem>>, vector<1x8x1xf32>
    %24 = vector.shape_cast %23 : vector<1x8x1xf32> to vector<8x1xf32>
    %25 = arith.mulf %19, %24 : vector<8x1xf32>
    %cst_16 = arith.constant dense<0.000000e+00> : vector<8xf32>
    %26 = vector.multi_reduction <add>, %22, %cst_16 [1] : vector<8x8xf32> to vector<8xf32>
    %27 = vector.shape_cast %26 : vector<8xf32> to vector<8x1xf32>
    %28 = arith.addf %25, %27 : vector<8x1xf32>
    %c0_17 = arith.constant 0 : index
    %c0_18 = arith.constant 0 : index
    %c0_19 = arith.constant 0 : index
    %29 = vector.load %arg11[%c0_17, %c0_18, %c0_19] : memref<4x8x1xf32, #tpu.memory_space<vmem>>, vector<1x8x1xf32>
    %30 = vector.shape_cast %29 : vector<1x8x1xf32> to vector<8x1xf32>
    %31 = vector.shape_cast %28 : vector<8x1xf32> to vector<1x8x1xf32>
    tpu.vector_store %arg11[%c0_17, %c0_18, %c0_19], %31 {strides = array<i32>} : memref<4x8x1xf32, #tpu.memory_space<vmem>>, vector<1x8x1xf32>,
    %c0_20 = arith.constant 0 : index
    %c0_21 = arith.constant 0 : index
    %c0_22 = arith.constant 0 : index
    %32 = vector.load %arg10[%c0_20, %c0_21, %c0_22] : memref<4x8x1xf32, #tpu.memory_space<vmem>>, vector<1x8x1xf32>
    %33 = vector.shape_cast %32 : vector<1x8x1xf32> to vector<8x1xf32>
    %34 = vector.shape_cast %17 : vector<8x1xf32> to vector<1x8x1xf32>
    tpu.vector_store %arg10[%c0_20, %c0_21, %c0_22], %34 {strides = array<i32>} : memref<4x8x1xf32, #tpu.memory_space<vmem>>, vector<1x8x1xf32>,
    %c0_23 = arith.constant 0 : index
    %c0_24 = arith.constant 0 : index
    %35 = vector.load %arg12[%c0_23, %c0_24] : memref<8x32xf32, #tpu.memory_space<vmem>>, vector<8x8xf32>
    %36 = vector.broadcast %19 : vector<8x1xf32> to vector<8x8xf32>
    %37 = arith.mulf %36, %35 : vector<8x8xf32>
    %38 = arith.truncf %22 : vector<8x8xf32> to vector<8x8xbf16>
    %cst_25 = arith.constant dense<0.000000e+00> : vector<8x8xf32>
    %39 = tpu.matmul %38, %11, %cst_25 {dimension_numbers = #tpu.dot_dimension_numbers<[1], [0], [0], [1], [0, 0, 1, 1], [], []>} : vector<8x8xbf16>, vector<8x8xbf16>, vector<8x8xf32> -> vector<8x8xf32>
    %40 = arith.addf %37, %39 : vector<8x8xf32>
    %c0_26 = arith.constant 0 : index
    %c0_27 = arith.constant 0 : index
    %41 = vector.load %arg12[%c0_26, %c0_27] : memref<8x32xf32, #tpu.memory_space<vmem>>, vector<8x8xf32>
    tpu.vector_store %arg12[%c0_26, %c0_27], %40 {strides = array<i32>} : memref<8x32xf32, #tpu.memory_space<vmem>>, vector<8x8xf32>,
    %42 = vector.extract_strided_slice %4 {offsets = [0, 8], sizes = [8, 8], strides = [1, 1]} : vector<8x32xbf16> to vector<8x8xbf16>
    %43 = vector.extract_strided_slice %6 {offsets = [0, 8], sizes = [8, 8], strides = [1, 1]} : vector<8x32xbf16> to vector<8x8xbf16>
    %44 = vector.extract_strided_slice %8 {offsets = [0, 8], sizes = [8, 8], strides = [1, 1]} : vector<8x32xbf16> to vector<8x8xbf16>
    %cst_28 = arith.constant dense<0.000000e+00> : vector<8x8xf32>
    %45 = tpu.matmul %42, %43, %cst_28 {dimension_numbers = #tpu.dot_dimension_numbers<[1], [1], [0], [0], [0, 0, 1, 0], [], []>} : vector<8x8xbf16>, vector<8x8xbf16>, vector<8x8xf32> -> vector<8x8xf32>
    %c1 = arith.constant 1 : index
    %c0_29 = arith.constant 0 : index
    %c0_30 = arith.constant 0 : index
    %46 = vector.load %arg10[%c1, %c0_29, %c0_30] : memref<4x8x1xf32, #tpu.memory_space<vmem>>, vector<1x8x1xf32>
    %47 = vector.shape_cast %46 : vector<1x8x1xf32> to vector<8x1xf32>
    %cst_31 = arith.constant dense<0xFF800000> : vector<8xf32>
    %48 = vector.multi_reduction <maximumf>, %45, %cst_31 [1] : vector<8x8xf32> to vector<8xf32>
    %49 = vector.shape_cast %48 : vector<8xf32> to vector<8x1xf32>
    %50 = arith.maximumf %47, %49 : vector<8x1xf32>
    %51 = arith.subf %47, %50 : vector<8x1xf32>
    %52 = math.exp %51 : vector<8x1xf32>
    %53 = vector.broadcast %50 : vector<8x1xf32> to vector<8x8xf32>
    %54 = arith.subf %45, %53 : vector<8x8xf32>
    %55 = math.exp %54 : vector<8x8xf32>
    %c1_32 = arith.constant 1 : index
    %c0_33 = arith.constant 0 : index
    %c0_34 = arith.constant 0 : index
    %56 = vector.load %arg11[%c1_32, %c0_33, %c0_34] : memref<4x8x1xf32, #tpu.memory_space<vmem>>, vector<1x8x1xf32>
    %57 = vector.shape_cast %56 : vector<1x8x1xf32> to vector<8x1xf32>
    %58 = arith.mulf %52, %57 : vector<8x1xf32>
    %cst_35 = arith.constant dense<0.000000e+00> : vector<8xf32>
    %59 = vector.multi_reduction <add>, %55, %cst_35 [1] : vector<8x8xf32> to vector<8xf32>
    %60 = vector.shape_cast %59 : vector<8xf32> to vector<8x1xf32>
    %61 = arith.addf %58, %60 : vector<8x1xf32>
    %c1_36 = arith.constant 1 : index
    %c0_37 = arith.constant 0 : index
    %c0_38 = arith.constant 0 : index
    %62 = vector.load %arg11[%c1_36, %c0_37, %c0_38] : memref<4x8x1xf32, #tpu.memory_space<vmem>>, vector<1x8x1xf32>
    %63 = vector.shape_cast %62 : vector<1x8x1xf32> to vector<8x1xf32>
    %64 = vector.shape_cast %61 : vector<8x1xf32> to vector<1x8x1xf32>
    tpu.vector_store %arg11[%c1_36, %c0_37, %c0_38], %64 {strides = array<i32>} : memref<4x8x1xf32, #tpu.memory_space<vmem>>, vector<1x8x1xf32>,
    %c1_39 = arith.constant 1 : index
    %c0_40 = arith.constant 0 : index
    %c0_41 = arith.constant 0 : index
    %65 = vector.load %arg10[%c1_39, %c0_40, %c0_41] : memref<4x8x1xf32, #tpu.memory_space<vmem>>, vector<1x8x1xf32>
    %66 = vector.shape_cast %65 : vector<1x8x1xf32> to vector<8x1xf32>
    %67 = vector.shape_cast %50 : vector<8x1xf32> to vector<1x8x1xf32>
    tpu.vector_store %arg10[%c1_39, %c0_40, %c0_41], %67 {strides = array<i32>} : memref<4x8x1xf32, #tpu.memory_space<vmem>>, vector<1x8x1xf32>,
    %c0_42 = arith.constant 0 : index
    %c8 = arith.constant 8 : index
    %68 = vector.load %arg12[%c0_42, %c8] : memref<8x32xf32, #tpu.memory_space<vmem>>, vector<8x8xf32>
    %69 = vector.broadcast %52 : vector<8x1xf32> to vector<8x8xf32>
    %70 = arith.mulf %69, %68 : vector<8x8xf32>
    %71 = arith.truncf %55 : vector<8x8xf32> to vector<8x8xbf16>
    %cst_43 = arith.constant dense<0.000000e+00> : vector<8x8xf32>
    %72 = tpu.matmul %71, %44, %cst_43 {dimension_numbers = #tpu.dot_dimension_numbers<[1], [0], [0], [1], [0, 0, 1, 1], [], []>} : vector<8x8xbf16>, vector<8x8xbf16>, vector<8x8xf32> -> vector<8x8xf32>
    %73 = arith.addf %70, %72 : vector<8x8xf32>
    %c0_44 = arith.constant 0 : index
    %c8_45 = arith.constant 8 : index
    %74 = vector.load %arg12[%c0_44, %c8_45] : memref<8x32xf32, #tpu.memory_space<vmem>>, vector<8x8xf32>
    tpu.vector_store %arg12[%c0_44, %c8_45], %73 {strides = array<i32>} : memref<8x32xf32, #tpu.memory_space<vmem>>, vector<8x8xf32>,
    %75 = vector.extract_strided_slice %4 {offsets = [0, 16], sizes = [8, 8], strides = [1, 1]} : vector<8x32xbf16> to vector<8x8xbf16>
    %76 = vector.extract_strided_slice %6 {offsets = [0, 16], sizes = [8, 8], strides = [1, 1]} : vector<8x32xbf16> to vector<8x8xbf16>
    %77 = vector.extract_strided_slice %8 {offsets = [0, 16], sizes = [8, 8], strides = [1, 1]} : vector<8x32xbf16> to vector<8x8xbf16>
    %cst_46 = arith.constant dense<0.000000e+00> : vector<8x8xf32>
    %78 = tpu.matmul %75, %76, %cst_46 {dimension_numbers = #tpu.dot_dimension_numbers<[1], [1], [0], [0], [0, 0, 1, 0], [], []>} : vector<8x8xbf16>, vector<8x8xbf16>, vector<8x8xf32> -> vector<8x8xf32>
    %c2 = arith.constant 2 : index
    %c0_47 = arith.constant 0 : index
    %c0_48 = arith.constant 0 : index
    %79 = vector.load %arg10[%c2, %c0_47, %c0_48] : memref<4x8x1xf32, #tpu.memory_space<vmem>>, vector<1x8x1xf32>
    %80 = vector.shape_cast %79 : vector<1x8x1xf32> to vector<8x1xf32>
    %cst_49 = arith.constant dense<0xFF800000> : vector<8xf32>
    %81 = vector.multi_reduction <maximumf>, %78, %cst_49 [1] : vector<8x8xf32> to vector<8xf32>
    %82 = vector.shape_cast %81 : vector<8xf32> to vector<8x1xf32>
    %83 = arith.maximumf %80, %82 : vector<8x1xf32>
    %84 = arith.subf %80, %83 : vector<8x1xf32>
    %85 = math.exp %84 : vector<8x1xf32>
    %86 = vector.broadcast %83 : vector<8x1xf32> to vector<8x8xf32>
    %87 = arith.subf %78, %86 : vector<8x8xf32>
    %88 = math.exp %87 : vector<8x8xf32>
    %c2_50 = arith.constant 2 : index
    %c0_51 = arith.constant 0 : index
    %c0_52 = arith.constant 0 : index
    %89 = vector.load %arg11[%c2_50, %c0_51, %c0_52] : memref<4x8x1xf32, #tpu.memory_space<vmem>>, vector<1x8x1xf32>
    %90 = vector.shape_cast %89 : vector<1x8x1xf32> to vector<8x1xf32>
    %91 = arith.mulf %85, %90 : vector<8x1xf32>
    %cst_53 = arith.constant dense<0.000000e+00> : vector<8xf32>
    %92 = vector.multi_reduction <add>, %88, %cst_53 [1] : vector<8x8xf32> to vector<8xf32>
    %93 = vector.shape_cast %92 : vector<8xf32> to vector<8x1xf32>
    %94 = arith.addf %91, %93 : vector<8x1xf32>
    %c2_54 = arith.constant 2 : index
    %c0_55 = arith.constant 0 : index
    %c0_56 = arith.constant 0 : index
    %95 = vector.load %arg11[%c2_54, %c0_55, %c0_56] : memref<4x8x1xf32, #tpu.memory_space<vmem>>, vector<1x8x1xf32>
    %96 = vector.shape_cast %95 : vector<1x8x1xf32> to vector<8x1xf32>
    %97 = vector.shape_cast %94 : vector<8x1xf32> to vector<1x8x1xf32>
    tpu.vector_store %arg11[%c2_54, %c0_55, %c0_56], %97 {strides = array<i32>} : memref<4x8x1xf32, #tpu.memory_space<vmem>>, vector<1x8x1xf32>,
    %c2_57 = arith.constant 2 : index
    %c0_58 = arith.constant 0 : index
    %c0_59 = arith.constant 0 : index
    %98 = vector.load %arg10[%c2_57, %c0_58, %c0_59] : memref<4x8x1xf32, #tpu.memory_space<vmem>>, vector<1x8x1xf32>
    %99 = vector.shape_cast %98 : vector<1x8x1xf32> to vector<8x1xf32>
    %100 = vector.shape_cast %83 : vector<8x1xf32> to vector<1x8x1xf32>
    tpu.vector_store %arg10[%c2_57, %c0_58, %c0_59], %100 {strides = array<i32>} : memref<4x8x1xf32, #tpu.memory_space<vmem>>, vector<1x8x1xf32>,
    %c0_60 = arith.constant 0 : index
    %c16 = arith.constant 16 : index
    %101 = vector.load %arg12[%c0_60, %c16] : memref<8x32xf32, #tpu.memory_space<vmem>>, vector<8x8xf32>
    %102 = vector.broadcast %85 : vector<8x1xf32> to vector<8x8xf32>
    %103 = arith.mulf %102, %101 : vector<8x8xf32>
    %104 = arith.truncf %88 : vector<8x8xf32> to vector<8x8xbf16>
    %cst_61 = arith.constant dense<0.000000e+00> : vector<8x8xf32>
    %105 = tpu.matmul %104, %77, %cst_61 {dimension_numbers = #tpu.dot_dimension_numbers<[1], [0], [0], [1], [0, 0, 1, 1], [], []>} : vector<8x8xbf16>, vector<8x8xbf16>, vector<8x8xf32> -> vector<8x8xf32>
    %106 = arith.addf %103, %105 : vector<8x8xf32>
    %c0_62 = arith.constant 0 : index
    %c16_63 = arith.constant 16 : index
    %107 = vector.load %arg12[%c0_62, %c16_63] : memref<8x32xf32, #tpu.memory_space<vmem>>, vector<8x8xf32>
    tpu.vector_store %arg12[%c0_62, %c16_63], %106 {strides = array<i32>} : memref<8x32xf32, #tpu.memory_space<vmem>>, vector<8x8xf32>,
    %108 = vector.extract_strided_slice %4 {offsets = [0, 24], sizes = [8, 8], strides = [1, 1]} : vector<8x32xbf16> to vector<8x8xbf16>
    %109 = vector.extract_strided_slice %6 {offsets = [0, 24], sizes = [8, 8], strides = [1, 1]} : vector<8x32xbf16> to vector<8x8xbf16>
    %110 = vector.extract_strided_slice %8 {offsets = [0, 24], sizes = [8, 8], strides = [1, 1]} : vector<8x32xbf16> to vector<8x8xbf16>
    %cst_64 = arith.constant dense<0.000000e+00> : vector<8x8xf32>
    %111 = tpu.matmul %108, %109, %cst_64 {dimension_numbers = #tpu.dot_dimension_numbers<[1], [1], [0], [0], [0, 0, 1, 0], [], []>} : vector<8x8xbf16>, vector<8x8xbf16>, vector<8x8xf32> -> vector<8x8xf32>
    %c3 = arith.constant 3 : index
    %c0_65 = arith.constant 0 : index
    %c0_66 = arith.constant 0 : index
    %112 = vector.load %arg10[%c3, %c0_65, %c0_66] : memref<4x8x1xf32, #tpu.memory_space<vmem>>, vector<1x8x1xf32>
    %113 = vector.shape_cast %112 : vector<1x8x1xf32> to vector<8x1xf32>
    %cst_67 = arith.constant dense<0xFF800000> : vector<8xf32>
    %114 = vector.multi_reduction <maximumf>, %111, %cst_67 [1] : vector<8x8xf32> to vector<8xf32>
    %115 = vector.shape_cast %114 : vector<8xf32> to vector<8x1xf32>
    %116 = arith.maximumf %113, %115 : vector<8x1xf32>
    %117 = arith.subf %113, %116 : vector<8x1xf32>
    %118 = math.exp %117 : vector<8x1xf32>
    %119 = vector.broadcast %116 : vector<8x1xf32> to vector<8x8xf32>
    %120 = arith.subf %111, %119 : vector<8x8xf32>
    %121 = math.exp %120 : vector<8x8xf32>
    %c3_68 = arith.constant 3 : index
    %c0_69 = arith.constant 0 : index
    %c0_70 = arith.constant 0 : index
    %122 = vector.load %arg11[%c3_68, %c0_69, %c0_70] : memref<4x8x1xf32, #tpu.memory_space<vmem>>, vector<1x8x1xf32>
    %123 = vector.shape_cast %122 : vector<1x8x1xf32> to vector<8x1xf32>
    %124 = arith.mulf %118, %123 : vector<8x1xf32>
    %cst_71 = arith.constant dense<0.000000e+00> : vector<8xf32>
    %125 = vector.multi_reduction <add>, %121, %cst_71 [1] : vector<8x8xf32> to vector<8xf32>
    %126 = vector.shape_cast %125 : vector<8xf32> to vector<8x1xf32>
    %127 = arith.addf %124, %126 : vector<8x1xf32>
    %c3_72 = arith.constant 3 : index
    %c0_73 = arith.constant 0 : index
    %c0_74 = arith.constant 0 : index
    %128 = vector.load %arg11[%c3_72, %c0_73, %c0_74] : memref<4x8x1xf32, #tpu.memory_space<vmem>>, vector<1x8x1xf32>
    %129 = vector.shape_cast %128 : vector<1x8x1xf32> to vector<8x1xf32>
    %130 = vector.shape_cast %127 : vector<8x1xf32> to vector<1x8x1xf32>
    tpu.vector_store %arg11[%c3_72, %c0_73, %c0_74], %130 {strides = array<i32>} : memref<4x8x1xf32, #tpu.memory_space<vmem>>, vector<1x8x1xf32>,
    %c3_75 = arith.constant 3 : index
    %c0_76 = arith.constant 0 : index
    %c0_77 = arith.constant 0 : index
    %131 = vector.load %arg10[%c3_75, %c0_76, %c0_77] : memref<4x8x1xf32, #tpu.memory_space<vmem>>, vector<1x8x1xf32>
    %132 = vector.shape_cast %131 : vector<1x8x1xf32> to vector<8x1xf32>
    %133 = vector.shape_cast %116 : vector<8x1xf32> to vector<1x8x1xf32>
    tpu.vector_store %arg10[%c3_75, %c0_76, %c0_77], %133 {strides = array<i32>} : memref<4x8x1xf32, #tpu.memory_space<vmem>>, vector<1x8x1xf32>,
    %c0_78 = arith.constant 0 : index
    %c24 = arith.constant 24 : index
    %134 = vector.load %arg12[%c0_78, %c24] : memref<8x32xf32, #tpu.memory_space<vmem>>, vector<8x8xf32>
    %135 = vector.broadcast %118 : vector<8x1xf32> to vector<8x8xf32>
    %136 = arith.mulf %135, %134 : vector<8x8xf32>
    %137 = arith.truncf %121 : vector<8x8xf32> to vector<8x8xbf16>
    %cst_79 = arith.constant dense<0.000000e+00> : vector<8x8xf32>
    %138 = tpu.matmul %137, %110, %cst_79 {dimension_numbers = #tpu.dot_dimension_numbers<[1], [0], [0], [1], [0, 0, 1, 1], [], []>} : vector<8x8xbf16>, vector<8x8xbf16>, vector<8x8xf32> -> vector<8x8xf32>
    %139 = arith.addf %136, %138 : vector<8x8xf32>
    %c0_80 = arith.constant 0 : index
    %c24_81 = arith.constant 24 : index
    %140 = vector.load %arg12[%c0_80, %c24_81] : memref<8x32xf32, #tpu.memory_space<vmem>>, vector<8x8xf32>
    tpu.vector_store %arg12[%c0_80, %c24_81], %139 {strides = array<i32>} : memref<8x32xf32, #tpu.memory_space<vmem>>, vector<8x8xf32>,
    %c0_i32_82 = arith.constant 0 : i32
    %141 = arith.cmpi eq, %arg2, %c0_i32_82 : i32
    %142 = arith.extui %141 : i1 to i32
    %c0_i32_83 = arith.constant 0 : i32
    %143 = arith.cmpi ne, %142, %c0_i32_83 : i32
    scf.if %143 {
      %c0_84 = arith.constant 0 : index
      %c0_85 = arith.constant 0 : index
      %c0_86 = arith.constant 0 : index
      %144 = vector.load %arg11[%c0_84, %c0_85, %c0_86] : memref<4x8x1xf32, #tpu.memory_space<vmem>>, vector<1x8x1xf32>
      %145 = vector.shape_cast %144 : vector<1x8x1xf32> to vector<8x1xf32>
      %146 = tpu.reciprocal %145 {approx = true} : vector<8x1xf32> -> vector<8x1xf32>
      %c0_87 = arith.constant 0 : index
      %c0_88 = arith.constant 0 : index
      %147 = vector.load %arg12[%c0_87, %c0_88] : memref<8x32xf32, #tpu.memory_space<vmem>>, vector<8x8xf32>
      %148 = vector.broadcast %146 : vector<8x1xf32> to vector<8x8xf32>
      %149 = arith.mulf %147, %148 : vector<8x8xf32>
      %c0_89 = arith.constant 0 : index
      %c0_90 = arith.constant 0 : index
      %150 = vector.load %arg12[%c0_89, %c0_90] : memref<8x32xf32, #tpu.memory_space<vmem>>, vector<8x8xf32>
      tpu.vector_store %arg12[%c0_89, %c0_90], %149 {strides = array<i32>} : memref<8x32xf32, #tpu.memory_space<vmem>>, vector<8x8xf32>,
      %c1_91 = arith.constant 1 : index
      %c0_92 = arith.constant 0 : index
      %c0_93 = arith.constant 0 : index
      %151 = vector.load %arg11[%c1_91, %c0_92, %c0_93] : memref<4x8x1xf32, #tpu.memory_space<vmem>>, vector<1x8x1xf32>
      %152 = vector.shape_cast %151 : vector<1x8x1xf32> to vector<8x1xf32>
      %153 = tpu.reciprocal %152 {approx = true} : vector<8x1xf32> -> vector<8x1xf32>
      %c0_94 = arith.constant 0 : index
      %c8_95 = arith.constant 8 : index
      %154 = vector.load %arg12[%c0_94, %c8_95] : memref<8x32xf32, #tpu.memory_space<vmem>>, vector<8x8xf32>
      %155 = vector.broadcast %153 : vector<8x1xf32> to vector<8x8xf32>
      %156 = arith.mulf %154, %155 : vector<8x8xf32>
      %c0_96 = arith.constant 0 : index
      %c8_97 = arith.constant 8 : index
      %157 = vector.load %arg12[%c0_96, %c8_97] : memref<8x32xf32, #tpu.memory_space<vmem>>, vector<8x8xf32>
      tpu.vector_store %arg12[%c0_96, %c8_97], %156 {strides = array<i32>} : memref<8x32xf32, #tpu.memory_space<vmem>>, vector<8x8xf32>,
      %c2_98 = arith.constant 2 : index
      %c0_99 = arith.constant 0 : index
      %c0_100 = arith.constant 0 : index
      %158 = vector.load %arg11[%c2_98, %c0_99, %c0_100] : memref<4x8x1xf32, #tpu.memory_space<vmem>>, vector<1x8x1xf32>
      %159 = vector.shape_cast %158 : vector<1x8x1xf32> to vector<8x1xf32>
      %160 = tpu.reciprocal %159 {approx = true} : vector<8x1xf32> -> vector<8x1xf32>
      %c0_101 = arith.constant 0 : index
      %c16_102 = arith.constant 16 : index
      %161 = vector.load %arg12[%c0_101, %c16_102] : memref<8x32xf32, #tpu.memory_space<vmem>>, vector<8x8xf32>
      %162 = vector.broadcast %160 : vector<8x1xf32> to vector<8x8xf32>
      %163 = arith.mulf %161, %162 : vector<8x8xf32>
      %c0_103 = arith.constant 0 : index
      %c16_104 = arith.constant 16 : index
      %164 = vector.load %arg12[%c0_103, %c16_104] : memref<8x32xf32, #tpu.memory_space<vmem>>, vector<8x8xf32>
      tpu.vector_store %arg12[%c0_103, %c16_104], %163 {strides = array<i32>} : memref<8x32xf32, #tpu.memory_space<vmem>>, vector<8x8xf32>,
      %c3_105 = arith.constant 3 : index
      %c0_106 = arith.constant 0 : index
      %c0_107 = arith.constant 0 : index
      %165 = vector.load %arg11[%c3_105, %c0_106, %c0_107] : memref<4x8x1xf32, #tpu.memory_space<vmem>>, vector<1x8x1xf32>
      %166 = vector.shape_cast %165 : vector<1x8x1xf32> to vector<8x1xf32>
      %167 = tpu.reciprocal %166 {approx = true} : vector<8x1xf32> -> vector<8x1xf32>
      %c0_108 = arith.constant 0 : index
      %c24_109 = arith.constant 24 : index
      %168 = vector.load %arg12[%c0_108, %c24_109] : memref<8x32xf32, #tpu.memory_space<vmem>>, vector<8x8xf32>
      %169 = vector.broadcast %167 : vector<8x1xf32> to vector<8x8xf32>
      %170 = arith.mulf %168, %169 : vector<8x8xf32>
      %c0_110 = arith.constant 0 : index
      %c24_111 = arith.constant 24 : index
      %171 = vector.load %arg12[%c0_110, %c24_111] : memref<8x32xf32, #tpu.memory_space<vmem>>, vector<8x8xf32>
      tpu.vector_store %arg12[%c0_110, %c24_111], %170 {strides = array<i32>} : memref<8x32xf32, #tpu.memory_space<vmem>>, vector<8x8xf32>,
      %c0_112 = arith.constant 0 : index
      %c0_113 = arith.constant 0 : index
      %172 = vector.load %arg12[%c0_112, %c0_113] : memref<8x32xf32, #tpu.memory_space<vmem>>, vector<8x32xf32>
      %173 = arith.truncf %172 : vector<8x32xf32> to vector<8x32xbf16>
      %c0_114 = arith.constant 0 : index
      %c0_115 = arith.constant 0 : index
      %174 = vector.load %arg7[%c0_114, %c0_115] : memref<32x32xbf16, #tpu.memory_space<vmem>>, vector<32x32xbf16>
      %cst_116 = arith.constant dense<0.000000e+00> : vector<8x32xf32>
      %175 = tpu.matmul %173, %174, %cst_116 {dimension_numbers = #tpu.dot_dimension_numbers<[1], [0], [0], [1], [0, 0, 1, 1], [], []>} : vector<8x32xbf16>, vector<32x32xbf16>, vector<8x32xf32> -> vector<8x32xf32>
      %c0_117 = arith.constant 0 : index
      %c0_118 = arith.constant 0 : index
      %176 = vector.load %arg8[%c0_117, %c0_118] : memref<1x32xf32, #tpu.memory_space<vmem>>, vector<1x32xf32>
      %177 = vector.broadcast %176 : vector<1x32xf32> to vector<8x32xf32>
      %178 = arith.addf %175, %177 : vector<8x32xf32>
      %c0_119 = arith.constant 0 : index
      %c0_120 = arith.constant 0 : index
      %c0_121 = arith.constant 0 : index
      %179 = vector.load %arg6[%c0_119, %c0_120, %c0_121] : memref<1x8x32xf32, #tpu.memory_space<vmem>>, vector<1x8x32xf32>
      %180 = vector.shape_cast %179 : vector<1x8x32xf32> to vector<8x32xf32>
      %181 = arith.addf %180, %178 : vector<8x32xf32>
      %c0_122 = arith.constant 0 : index
      %c0_123 = arith.constant 0 : index
      %c0_124 = arith.constant 0 : index
      %182 = vector.load %arg9[%c0_122, %c0_123, %c0_124] : memref<1x8x32xf32, #tpu.memory_space<vmem>>, vector<1x8x32xf32>
      %183 = vector.shape_cast %182 : vector<1x8x32xf32> to vector<8x32xf32>
      %184 = vector.shape_cast %181 : vector<8x32xf32> to vector<1x8x32xf32>
      tpu.vector_store %arg9[%c0_122, %c0_123, %c0_124], %184 {strides = array<i32>} : memref<1x8x32xf32, #tpu.memory_space<vmem>>, vector<1x8x32xf32>,
    } else {
    }
    return
  }
  func.func @transform_0(%arg0: i32, %arg1: i32, %arg2: i32) -> (i32, i32, i32) {
    %c0_i32 = arith.constant 0 : i32
    %c0_i32_0 = arith.constant 0 : i32
    return %arg0, %arg1, %c0_i32 : i32, i32, i32
  }
  func.func @transform_1(%arg0: i32, %arg1: i32, %arg2: i32) -> (i32, i32, i32) {
    %c0_i32 = arith.constant 0 : i32
    %c0_i32_0 = arith.constant 0 : i32
    return %arg0, %arg2, %c0_i32 : i32, i32, i32
  }
  func.func @transform_2(%arg0: i32, %arg1: i32, %arg2: i32) -> (i32, i32, i32) {
    %c0_i32 = arith.constant 0 : i32
    %c0_i32_0 = arith.constant 0 : i32
    return %arg0, %arg2, %c0_i32 : i32, i32, i32
  }
  func.func @transform_3(%arg0: i32, %arg1: i32, %arg2: i32) -> (i32, i32, i32) {
    %c0_i32 = arith.constant 0 : i32
    %c0_i32_0 = arith.constant 0 : i32
    return %arg0, %arg1, %c0_i32 : i32, i32, i32
  }
  func.func @transform_4(%arg0: i32, %arg1: i32, %arg2: i32) -> (i32, i32) {
    %c0_i32 = arith.constant 0 : i32
    %c0_i32_0 = arith.constant 0 : i32
    %c0_i32_1 = arith.constant 0 : i32
    return %c0_i32, %c0_i32_0 : i32, i32
  }
  func.func @transform_5(%arg0: i32, %arg1: i32, %arg2: i32) -> (i32, i32) {
    %c0_i32 = arith.constant 0 : i32
    %c0_i32_0 = arith.constant 0 : i32
    %c0_i32_1 = arith.constant 0 : i32
    return %c0_i32, %c0_i32_0 : i32, i32
  }
  func.func @transform_6(%arg0: i32, %arg1: i32, %arg2: i32) -> (i32, i32, i32) {
    %c0_i32 = arith.constant 0 : i32
    %c0_i32_0 = arith.constant 0 : i32
    return %arg0, %arg1, %c0_i32 : i32, i32, i32
  }
}

module attributes {stable_mosaic.version = 11 : i64} {
  func.func @_qkv_kernel(%arg0: i32, %arg1: i32, %arg2: memref<1x8x32xf32, #tpu.memory_space<vmem>>, %arg3: memref<1x32xf32, #tpu.memory_space<vmem>>, %arg4: memref<1x32xf32, #tpu.memory_space<vmem>>, %arg5: memref<32x96xbf16, #tpu.memory_space<vmem>>, %arg6: memref<1x96xf32, #tpu.memory_space<vmem>>, %arg7: memref<1x8x32xbf16, #tpu.memory_space<vmem>>, %arg8: memref<1x8x32xbf16, #tpu.memory_space<vmem>>, %arg9: memref<1x8x32xbf16, #tpu.memory_space<vmem>>) attributes {dimension_semantics = [#tpu.dimension_semantics<parallel>, #tpu.dimension_semantics<parallel>], iteration_bounds = array<i64: 2, 1>, scalar_prefetch = 0 : i64, scratch_operands = 0 : i64, tpu.core_type = #tpu.core_type<tc>, window_params = [{transform_indices = @transform_0, window_bounds = array<i64: 1, 8, 32>}, {pipeline_mode = #tpu.pipeline_mode<synchronous>, transform_indices = @transform_1, window_bounds = array<i64: 1, 32>}, {pipeline_mode = #tpu.pipeline_mode<synchronous>, transform_indices = @transform_2, window_bounds = array<i64: 1, 32>}, {pipeline_mode = #tpu.pipeline_mode<synchronous>, transform_indices = @transform_3, window_bounds = array<i64: 32, 96>}, {pipeline_mode = #tpu.pipeline_mode<synchronous>, transform_indices = @transform_4, window_bounds = array<i64: 1, 96>}, {transform_indices = @transform_5, window_bounds = array<i64: 1, 8, 32>}, {transform_indices = @transform_6, window_bounds = array<i64: 1, 8, 32>}, {transform_indices = @transform_7, window_bounds = array<i64: 1, 8, 32>}]} {
    %c0 = arith.constant 0 : index
    %c0_0 = arith.constant 0 : index
    %c0_1 = arith.constant 0 : index
    %0 = vector.load %arg2[%c0, %c0_0, %c0_1] : memref<1x8x32xf32, #tpu.memory_space<vmem>>, vector<1x8x32xf32>
    %1 = vector.shape_cast %0 : vector<1x8x32xf32> to vector<8x32xf32>
    %c0_2 = arith.constant 0 : index
    %c0_3 = arith.constant 0 : index
    %2 = vector.load %arg3[%c0_2, %c0_3] : memref<1x32xf32, #tpu.memory_space<vmem>>, vector<1x32xf32>
    %c0_4 = arith.constant 0 : index
    %c0_5 = arith.constant 0 : index
    %3 = vector.load %arg4[%c0_4, %c0_5] : memref<1x32xf32, #tpu.memory_space<vmem>>, vector<1x32xf32>
    %cst = arith.constant dense<0.000000e+00> : vector<8xf32>
    %4 = vector.multi_reduction <add>, %1, %cst [1] : vector<8x32xf32> to vector<8xf32>
    %5 = vector.shape_cast %4 : vector<8xf32> to vector<8x1xf32>
    %cst_6 = arith.constant 3.200000e+01 : f32
    %6 = vector.broadcast %cst_6 : f32 to vector<8x1xf32>
    %7 = arith.divf %5, %6 : vector<8x1xf32>
    %8 = vector.broadcast %7 : vector<8x1xf32> to vector<8x32xf32>
    %9 = arith.subf %1, %8 : vector<8x32xf32>
    %10 = arith.mulf %9, %9 : vector<8x32xf32>
    %cst_7 = arith.constant dense<0.000000e+00> : vector<8xf32>
    %11 = vector.multi_reduction <add>, %10, %cst_7 [1] : vector<8x32xf32> to vector<8xf32>
    %12 = vector.shape_cast %11 : vector<8xf32> to vector<8x1xf32>
    %cst_8 = arith.constant 3.200000e+01 : f32
    %13 = vector.broadcast %cst_8 : f32 to vector<8x1xf32>
    %14 = arith.divf %12, %13 : vector<8x1xf32>
    %15 = vector.broadcast %7 : vector<8x1xf32> to vector<8x32xf32>
    %16 = arith.subf %1, %15 : vector<8x32xf32>
    %cst_9 = arith.constant 9.99999974E-6 : f32
    %17 = vector.broadcast %cst_9 : f32 to vector<8x1xf32>
    %18 = arith.addf %14, %17 : vector<8x1xf32>
    %19 = math.rsqrt %18 : vector<8x1xf32>
    %20 = vector.broadcast %19 : vector<8x1xf32> to vector<8x32xf32>
    %21 = arith.mulf %16, %20 : vector<8x32xf32>
    %22 = vector.broadcast %2 : vector<1x32xf32> to vector<8x32xf32>
    %23 = arith.mulf %21, %22 : vector<8x32xf32>
    %24 = vector.broadcast %3 : vector<1x32xf32> to vector<8x32xf32>
    %25 = arith.addf %23, %24 : vector<8x32xf32>
    %26 = arith.truncf %25 : vector<8x32xf32> to vector<8x32xbf16>
    %c0_10 = arith.constant 0 : index
    %c0_11 = arith.constant 0 : index
    %27 = vector.load %arg5[%c0_10, %c0_11] : memref<32x96xbf16, #tpu.memory_space<vmem>>, vector<32x96xbf16>
    %cst_12 = arith.constant dense<0.000000e+00> : vector<8x96xf32>
    %28 = tpu.matmul %26, %27, %cst_12 {dimension_numbers = #tpu.dot_dimension_numbers<[1], [0], [0], [1], [0, 0, 1, 1], [], []>} : vector<8x32xbf16>, vector<32x96xbf16>, vector<8x96xf32> -> vector<8x96xf32>
    %c0_13 = arith.constant 0 : index
    %c0_14 = arith.constant 0 : index
    %29 = vector.load %arg6[%c0_13, %c0_14] : memref<1x96xf32, #tpu.memory_space<vmem>>, vector<1x96xf32>
    %30 = vector.broadcast %29 : vector<1x96xf32> to vector<8x96xf32>
    %31 = arith.addf %28, %30 : vector<8x96xf32>
    %32 = vector.extract_strided_slice %31 {offsets = [0, 0], sizes = [8, 32], strides = [1, 1]} : vector<8x96xf32> to vector<8x32xf32>
    %cst_15 = arith.constant 0.353553385 : f32
    %33 = vector.broadcast %cst_15 : f32 to vector<8x32xf32>
    %34 = arith.mulf %32, %33 : vector<8x32xf32>
    %35 = arith.truncf %34 : vector<8x32xf32> to vector<8x32xbf16>
    %c0_16 = arith.constant 0 : index
    %c0_17 = arith.constant 0 : index
    %c0_18 = arith.constant 0 : index
    %36 = vector.load %arg7[%c0_16, %c0_17, %c0_18] : memref<1x8x32xbf16, #tpu.memory_space<vmem>>, vector<1x8x32xbf16>
    %37 = vector.shape_cast %36 : vector<1x8x32xbf16> to vector<8x32xbf16>
    %38 = vector.shape_cast %35 : vector<8x32xbf16> to vector<1x8x32xbf16>
    tpu.vector_store %arg7[%c0_16, %c0_17, %c0_18], %38 {strides = array<i32>} : memref<1x8x32xbf16, #tpu.memory_space<vmem>>, vector<1x8x32xbf16>,
    %39 = vector.extract_strided_slice %31 {offsets = [0, 32], sizes = [8, 32], strides = [1, 1]} : vector<8x96xf32> to vector<8x32xf32>
    %40 = arith.truncf %39 : vector<8x32xf32> to vector<8x32xbf16>
    %c0_19 = arith.constant 0 : index
    %c0_20 = arith.constant 0 : index
    %c0_21 = arith.constant 0 : index
    %41 = vector.load %arg8[%c0_19, %c0_20, %c0_21] : memref<1x8x32xbf16, #tpu.memory_space<vmem>>, vector<1x8x32xbf16>
    %42 = vector.shape_cast %41 : vector<1x8x32xbf16> to vector<8x32xbf16>
    %43 = vector.shape_cast %40 : vector<8x32xbf16> to vector<1x8x32xbf16>
    tpu.vector_store %arg8[%c0_19, %c0_20, %c0_21], %43 {strides = array<i32>} : memref<1x8x32xbf16, #tpu.memory_space<vmem>>, vector<1x8x32xbf16>,
    %44 = vector.extract_strided_slice %31 {offsets = [0, 64], sizes = [8, 32], strides = [1, 1]} : vector<8x96xf32> to vector<8x32xf32>
    %45 = arith.truncf %44 : vector<8x32xf32> to vector<8x32xbf16>
    %c0_22 = arith.constant 0 : index
    %c0_23 = arith.constant 0 : index
    %c0_24 = arith.constant 0 : index
    %46 = vector.load %arg9[%c0_22, %c0_23, %c0_24] : memref<1x8x32xbf16, #tpu.memory_space<vmem>>, vector<1x8x32xbf16>
    %47 = vector.shape_cast %46 : vector<1x8x32xbf16> to vector<8x32xbf16>
    %48 = vector.shape_cast %45 : vector<8x32xbf16> to vector<1x8x32xbf16>
    tpu.vector_store %arg9[%c0_22, %c0_23, %c0_24], %48 {strides = array<i32>} : memref<1x8x32xbf16, #tpu.memory_space<vmem>>, vector<1x8x32xbf16>,
    return
  }
  func.func @transform_0(%arg0: i32, %arg1: i32) -> (i32, i32, i32) {
    %c0_i32 = arith.constant 0 : i32
    %c0_i32_0 = arith.constant 0 : i32
    return %arg0, %arg1, %c0_i32 : i32, i32, i32
  }
  func.func @transform_1(%arg0: i32, %arg1: i32) -> (i32, i32) {
    %c0_i32 = arith.constant 0 : i32
    %c0_i32_0 = arith.constant 0 : i32
    %c0_i32_1 = arith.constant 0 : i32
    return %c0_i32, %c0_i32_0 : i32, i32
  }
  func.func @transform_2(%arg0: i32, %arg1: i32) -> (i32, i32) {
    %c0_i32 = arith.constant 0 : i32
    %c0_i32_0 = arith.constant 0 : i32
    %c0_i32_1 = arith.constant 0 : i32
    return %c0_i32, %c0_i32_0 : i32, i32
  }
  func.func @transform_3(%arg0: i32, %arg1: i32) -> (i32, i32) {
    %c0_i32 = arith.constant 0 : i32
    %c0_i32_0 = arith.constant 0 : i32
    %c0_i32_1 = arith.constant 0 : i32
    return %c0_i32, %c0_i32_0 : i32, i32
  }
  func.func @transform_4(%arg0: i32, %arg1: i32) -> (i32, i32) {
    %c0_i32 = arith.constant 0 : i32
    %c0_i32_0 = arith.constant 0 : i32
    %c0_i32_1 = arith.constant 0 : i32
    return %c0_i32, %c0_i32_0 : i32, i32
  }
  func.func @transform_5(%arg0: i32, %arg1: i32) -> (i32, i32, i32) {
    %c0_i32 = arith.constant 0 : i32
    %c0_i32_0 = arith.constant 0 : i32
    return %arg0, %arg1, %c0_i32 : i32, i32, i32
  }
  func.func @transform_6(%arg0: i32, %arg1: i32) -> (i32, i32, i32) {
    %c0_i32 = arith.constant 0 : i32
    %c0_i32_0 = arith.constant 0 : i32
    return %arg0, %arg1, %c0_i32 : i32, i32, i32
  }
  func.func @transform_7(%arg0: i32, %arg1: i32) -> (i32, i32, i32) {
    %c0_i32 = arith.constant 0 : i32
    %c0_i32_0 = arith.constant 0 : i32
    return %arg0, %arg1, %c0_i32 : i32, i32, i32
  }
}

module attributes {stable_mosaic.version = 11 : i64} {
  func.func @_attn_kernel(%arg0: i32, %arg1: i32, %arg2: i32, %arg3: memref<1x8x32xbf16, #tpu.memory_space<vmem>>, %arg4: memref<1x8x32xbf16, #tpu.memory_space<vmem>>, %arg5: memref<1x8x32xbf16, #tpu.memory_space<vmem>>, %arg6: memref<1x8x32xf32, #tpu.memory_space<vmem>>, %arg7: memref<32x32xbf16, #tpu.memory_space<vmem>>, %arg8: memref<1x32xf32, #tpu.memory_space<vmem>>, %arg9: memref<1x8x32xf32, #tpu.memory_space<vmem>>, %arg10: memref<4x8x1xf32, #tpu.memory_space<vmem>>, %arg11: memref<4x8x1xf32, #tpu.memory_space<vmem>>, %arg12: memref<8x32xf32, #tpu.memory_space<vmem>>) attributes {dimension_semantics = [#tpu.dimension_semantics<parallel>, #tpu.dimension_semantics<parallel>, #tpu.dimension_semantics<arbitrary>], iteration_bounds = array<i64: 2, 1, 1>, scalar_prefetch = 0 : i64, scratch_operands = 3 : i64, tpu.core_type = #tpu.core_type<tc>, window_params = [{transform_indices = @transform_0, window_bounds = array<i64: 1, 8, 32>}, {transform_indices = @transform_1, window_bounds = array<i64: 1, 8, 32>}, {transform_indices = @transform_2, window_bounds = array<i64: 1, 8, 32>}, {transform_indices = @transform_3, window_bounds = array<i64: 1, 8, 32>}, {pipeline_mode = #tpu.pipeline_mode<synchronous>, transform_indices = @transform_4, window_bounds = array<i64: 32, 32>}, {pipeline_mode = #tpu.pipeline_mode<synchronous>, transform_indices = @transform_5, window_bounds = array<i64: 1, 32>}, {transform_indices = @transform_6, window_bounds = array<i64: 1, 8, 32>}]} {
    %c0_i32 = arith.constant 0 : i32
    %0 = arith.cmpi eq, %arg2, %c0_i32 : i32
    %1 = arith.extui %0 : i1 to i32
    %c0_i32_0 = arith.constant 0 : i32
    %2 = arith.cmpi ne, %1, %c0_i32_0 : i32
    scf.if %2 {
      %cst_84 = arith.constant 0xFF800000 : f32
      %144 = vector.broadcast %cst_84 : f32 to vector<4x8x1xf32>
      %c0_85 = arith.constant 0 : index
      %c0_86 = arith.constant 0 : index
      %c0_87 = arith.constant 0 : index
      %145 = vector.load %arg10[%c0_85, %c0_86, %c0_87] : memref<4x8x1xf32, #tpu.memory_space<vmem>>, vector<4x8x1xf32>
      tpu.vector_store %arg10[%c0_85, %c0_86, %c0_87], %144 {strides = array<i32>} : memref<4x8x1xf32, #tpu.memory_space<vmem>>, vector<4x8x1xf32>,
      %cst_88 = arith.constant 0.000000e+00 : f32
      %146 = vector.broadcast %cst_88 : f32 to vector<4x8x1xf32>
      %c0_89 = arith.constant 0 : index
      %c0_90 = arith.constant 0 : index
      %c0_91 = arith.constant 0 : index
      %147 = vector.load %arg11[%c0_89, %c0_90, %c0_91] : memref<4x8x1xf32, #tpu.memory_space<vmem>>, vector<4x8x1xf32>
      tpu.vector_store %arg11[%c0_89, %c0_90, %c0_91], %146 {strides = array<i32>} : memref<4x8x1xf32, #tpu.memory_space<vmem>>, vector<4x8x1xf32>,
      %cst_92 = arith.constant 0.000000e+00 : f32
      %148 = vector.broadcast %cst_92 : f32 to vector<8x32xf32>
      %c0_93 = arith.constant 0 : index
      %c0_94 = arith.constant 0 : index
      %149 = vector.load %arg12[%c0_93, %c0_94] : memref<8x32xf32, #tpu.memory_space<vmem>>, vector<8x32xf32>
      tpu.vector_store %arg12[%c0_93, %c0_94], %148 {strides = array<i32>} : memref<8x32xf32, #tpu.memory_space<vmem>>, vector<8x32xf32>,
    } else {
    }
    %c0 = arith.constant 0 : index
    %c0_1 = arith.constant 0 : index
    %c0_2 = arith.constant 0 : index
    %3 = vector.load %arg3[%c0, %c0_1, %c0_2] : memref<1x8x32xbf16, #tpu.memory_space<vmem>>, vector<1x8x32xbf16>
    %4 = vector.shape_cast %3 : vector<1x8x32xbf16> to vector<8x32xbf16>
    %c0_3 = arith.constant 0 : index
    %c0_4 = arith.constant 0 : index
    %c0_5 = arith.constant 0 : index
    %5 = vector.load %arg4[%c0_3, %c0_4, %c0_5] : memref<1x8x32xbf16, #tpu.memory_space<vmem>>, vector<1x8x32xbf16>
    %6 = vector.shape_cast %5 : vector<1x8x32xbf16> to vector<8x32xbf16>
    %c0_6 = arith.constant 0 : index
    %c0_7 = arith.constant 0 : index
    %c0_8 = arith.constant 0 : index
    %7 = vector.load %arg5[%c0_6, %c0_7, %c0_8] : memref<1x8x32xbf16, #tpu.memory_space<vmem>>, vector<1x8x32xbf16>
    %8 = vector.shape_cast %7 : vector<1x8x32xbf16> to vector<8x32xbf16>
    %9 = vector.extract_strided_slice %4 {offsets = [0, 0], sizes = [8, 8], strides = [1, 1]} : vector<8x32xbf16> to vector<8x8xbf16>
    %10 = vector.extract_strided_slice %6 {offsets = [0, 0], sizes = [8, 8], strides = [1, 1]} : vector<8x32xbf16> to vector<8x8xbf16>
    %11 = vector.extract_strided_slice %8 {offsets = [0, 0], sizes = [8, 8], strides = [1, 1]} : vector<8x32xbf16> to vector<8x8xbf16>
    %cst = arith.constant dense<0.000000e+00> : vector<8x8xf32>
    %12 = tpu.matmul %9, %10, %cst {dimension_numbers = #tpu.dot_dimension_numbers<[1], [1], [0], [0], [0, 0, 1, 0], [], []>} : vector<8x8xbf16>, vector<8x8xbf16>, vector<8x8xf32> -> vector<8x8xf32>
    %c0_9 = arith.constant 0 : index
    %c0_10 = arith.constant 0 : index
    %c0_11 = arith.constant 0 : index
    %13 = vector.load %arg10[%c0_9, %c0_10, %c0_11] : memref<4x8x1xf32, #tpu.memory_space<vmem>>, vector<1x8x1xf32>
    %14 = vector.shape_cast %13 : vector<1x8x1xf32> to vector<8x1xf32>
    %cst_12 = arith.constant dense<0xFF800000> : vector<8xf32>
    %15 = vector.multi_reduction <maximumf>, %12, %cst_12 [1] : vector<8x8xf32> to vector<8xf32>
    %16 = vector.shape_cast %15 : vector<8xf32> to vector<8x1xf32>
    %17 = arith.maximumf %14, %16 : vector<8x1xf32>
    %18 = arith.subf %14, %17 : vector<8x1xf32>
    %19 = math.exp %18 : vector<8x1xf32>
    %20 = vector.broadcast %17 : vector<8x1xf32> to vector<8x8xf32>
    %21 = arith.subf %12, %20 : vector<8x8xf32>
    %22 = math.exp %21 : vector<8x8xf32>
    %c0_13 = arith.constant 0 : index
    %c0_14 = arith.constant 0 : index
    %c0_15 = arith.constant 0 : index
    %23 = vector.load %arg11[%c0_13, %c0_14, %c0_15] : memref<4x8x1xf32, #tpu.memory_space<vmem>>, vector<1x8x1xf32>
    %24 = vector.shape_cast %23 : vector<1x8x1xf32> to vector<8x1xf32>
    %25 = arith.mulf %19, %24 : vector<8x1xf32>
    %cst_16 = arith.constant dense<0.000000e+00> : vector<8xf32>
    %26 = vector.multi_reduction <add>, %22, %cst_16 [1] : vector<8x8xf32> to vector<8xf32>
    %27 = vector.shape_cast %26 : vector<8xf32> to vector<8x1xf32>
    %28 = arith.addf %25, %27 : vector<8x1xf32>
    %c0_17 = arith.constant 0 : index
    %c0_18 = arith.constant 0 : index
    %c0_19 = arith.constant 0 : index
    %29 = vector.load %arg11[%c0_17, %c0_18, %c0_19] : memref<4x8x1xf32, #tpu.memory_space<vmem>>, vector<1x8x1xf32>
    %30 = vector.shape_cast %29 : vector<1x8x1xf32> to vector<8x1xf32>
    %31 = vector.shape_cast %28 : vector<8x1xf32> to vector<1x8x1xf32>
    tpu.vector_store %arg11[%c0_17, %c0_18, %c0_19], %31 {strides = array<i32>} : memref<4x8x1xf32, #tpu.memory_space<vmem>>, vector<1x8x1xf32>,
    %c0_20 = arith.constant 0 : index
    %c0_21 = arith.constant 0 : index
    %c0_22 = arith.constant 0 : index
    %32 = vector.load %arg10[%c0_20, %c0_21, %c0_22] : memref<4x8x1xf32, #tpu.memory_space<vmem>>, vector<1x8x1xf32>
    %33 = vector.shape_cast %32 : vector<1x8x1xf32> to vector<8x1xf32>
    %34 = vector.shape_cast %17 : vector<8x1xf32> to vector<1x8x1xf32>
    tpu.vector_store %arg10[%c0_20, %c0_21, %c0_22], %34 {strides = array<i32>} : memref<4x8x1xf32, #tpu.memory_space<vmem>>, vector<1x8x1xf32>,
    %c0_23 = arith.constant 0 : index
    %c0_24 = arith.constant 0 : index
    %35 = vector.load %arg12[%c0_23, %c0_24] : memref<8x32xf32, #tpu.memory_space<vmem>>, vector<8x8xf32>
    %36 = vector.broadcast %19 : vector<8x1xf32> to vector<8x8xf32>
    %37 = arith.mulf %36, %35 : vector<8x8xf32>
    %38 = arith.truncf %22 : vector<8x8xf32> to vector<8x8xbf16>
    %cst_25 = arith.constant dense<0.000000e+00> : vector<8x8xf32>
    %39 = tpu.matmul %38, %11, %cst_25 {dimension_numbers = #tpu.dot_dimension_numbers<[1], [0], [0], [1], [0, 0, 1, 1], [], []>} : vector<8x8xbf16>, vector<8x8xbf16>, vector<8x8xf32> -> vector<8x8xf32>
    %40 = arith.addf %37, %39 : vector<8x8xf32>
    %c0_26 = arith.constant 0 : index
    %c0_27 = arith.constant 0 : index
    %41 = vector.load %arg12[%c0_26, %c0_27] : memref<8x32xf32, #tpu.memory_space<vmem>>, vector<8x8xf32>
    tpu.vector_store %arg12[%c0_26, %c0_27], %40 {strides = array<i32>} : memref<8x32xf32, #tpu.memory_space<vmem>>, vector<8x8xf32>,
    %42 = vector.extract_strided_slice %4 {offsets = [0, 8], sizes = [8, 8], strides = [1, 1]} : vector<8x32xbf16> to vector<8x8xbf16>
    %43 = vector.extract_strided_slice %6 {offsets = [0, 8], sizes = [8, 8], strides = [1, 1]} : vector<8x32xbf16> to vector<8x8xbf16>
    %44 = vector.extract_strided_slice %8 {offsets = [0, 8], sizes = [8, 8], strides = [1, 1]} : vector<8x32xbf16> to vector<8x8xbf16>
    %cst_28 = arith.constant dense<0.000000e+00> : vector<8x8xf32>
    %45 = tpu.matmul %42, %43, %cst_28 {dimension_numbers = #tpu.dot_dimension_numbers<[1], [1], [0], [0], [0, 0, 1, 0], [], []>} : vector<8x8xbf16>, vector<8x8xbf16>, vector<8x8xf32> -> vector<8x8xf32>
    %c1 = arith.constant 1 : index
    %c0_29 = arith.constant 0 : index
    %c0_30 = arith.constant 0 : index
    %46 = vector.load %arg10[%c1, %c0_29, %c0_30] : memref<4x8x1xf32, #tpu.memory_space<vmem>>, vector<1x8x1xf32>
    %47 = vector.shape_cast %46 : vector<1x8x1xf32> to vector<8x1xf32>
    %cst_31 = arith.constant dense<0xFF800000> : vector<8xf32>
    %48 = vector.multi_reduction <maximumf>, %45, %cst_31 [1] : vector<8x8xf32> to vector<8xf32>
    %49 = vector.shape_cast %48 : vector<8xf32> to vector<8x1xf32>
    %50 = arith.maximumf %47, %49 : vector<8x1xf32>
    %51 = arith.subf %47, %50 : vector<8x1xf32>
    %52 = math.exp %51 : vector<8x1xf32>
    %53 = vector.broadcast %50 : vector<8x1xf32> to vector<8x8xf32>
    %54 = arith.subf %45, %53 : vector<8x8xf32>
    %55 = math.exp %54 : vector<8x8xf32>
    %c1_32 = arith.constant 1 : index
    %c0_33 = arith.constant 0 : index
    %c0_34 = arith.constant 0 : index
    %56 = vector.load %arg11[%c1_32, %c0_33, %c0_34] : memref<4x8x1xf32, #tpu.memory_space<vmem>>, vector<1x8x1xf32>
    %57 = vector.shape_cast %56 : vector<1x8x1xf32> to vector<8x1xf32>
    %58 = arith.mulf %52, %57 : vector<8x1xf32>
    %cst_35 = arith.constant dense<0.000000e+00> : vector<8xf32>
    %59 = vector.multi_reduction <add>, %55, %cst_35 [1] : vector<8x8xf32> to vector<8xf32>
    %60 = vector.shape_cast %59 : vector<8xf32> to vector<8x1xf32>
    %61 = arith.addf %58, %60 : vector<8x1xf32>
    %c1_36 = arith.constant 1 : index
    %c0_37 = arith.constant 0 : index
    %c0_38 = arith.constant 0 : index
    %62 = vector.load %arg11[%c1_36, %c0_37, %c0_38] : memref<4x8x1xf32, #tpu.memory_space<vmem>>, vector<1x8x1xf32>
    %63 = vector.shape_cast %62 : vector<1x8x1xf32> to vector<8x1xf32>
    %64 = vector.shape_cast %61 : vector<8x1xf32> to vector<1x8x1xf32>
    tpu.vector_store %arg11[%c1_36, %c0_37, %c0_38], %64 {strides = array<i32>} : memref<4x8x1xf32, #tpu.memory_space<vmem>>, vector<1x8x1xf32>,
    %c1_39 = arith.constant 1 : index
    %c0_40 = arith.constant 0 : index
    %c0_41 = arith.constant 0 : index
    %65 = vector.load %arg10[%c1_39, %c0_40, %c0_41] : memref<4x8x1xf32, #tpu.memory_space<vmem>>, vector<1x8x1xf32>
    %66 = vector.shape_cast %65 : vector<1x8x1xf32> to vector<8x1xf32>
    %67 = vector.shape_cast %50 : vector<8x1xf32> to vector<1x8x1xf32>
    tpu.vector_store %arg10[%c1_39, %c0_40, %c0_41], %67 {strides = array<i32>} : memref<4x8x1xf32, #tpu.memory_space<vmem>>, vector<1x8x1xf32>,
    %c0_42 = arith.constant 0 : index
    %c8 = arith.constant 8 : index
    %68 = vector.load %arg12[%c0_42, %c8] : memref<8x32xf32, #tpu.memory_space<vmem>>, vector<8x8xf32>
    %69 = vector.broadcast %52 : vector<8x1xf32> to vector<8x8xf32>
    %70 = arith.mulf %69, %68 : vector<8x8xf32>
    %71 = arith.truncf %55 : vector<8x8xf32> to vector<8x8xbf16>
    %cst_43 = arith.constant dense<0.000000e+00> : vector<8x8xf32>
    %72 = tpu.matmul %71, %44, %cst_43 {dimension_numbers = #tpu.dot_dimension_numbers<[1], [0], [0], [1], [0, 0, 1, 1], [], []>} : vector<8x8xbf16>, vector<8x8xbf16>, vector<8x8xf32> -> vector<8x8xf32>
    %73 = arith.addf %70, %72 : vector<8x8xf32>
    %c0_44 = arith.constant 0 : index
    %c8_45 = arith.constant 8 : index
    %74 = vector.load %arg12[%c0_44, %c8_45] : memref<8x32xf32, #tpu.memory_space<vmem>>, vector<8x8xf32>
    tpu.vector_store %arg12[%c0_44, %c8_45], %73 {strides = array<i32>} : memref<8x32xf32, #tpu.memory_space<vmem>>, vector<8x8xf32>,
    %75 = vector.extract_strided_slice %4 {offsets = [0, 16], sizes = [8, 8], strides = [1, 1]} : vector<8x32xbf16> to vector<8x8xbf16>
    %76 = vector.extract_strided_slice %6 {offsets = [0, 16], sizes = [8, 8], strides = [1, 1]} : vector<8x32xbf16> to vector<8x8xbf16>
    %77 = vector.extract_strided_slice %8 {offsets = [0, 16], sizes = [8, 8], strides = [1, 1]} : vector<8x32xbf16> to vector<8x8xbf16>
    %cst_46 = arith.constant dense<0.000000e+00> : vector<8x8xf32>
    %78 = tpu.matmul %75, %76, %cst_46 {dimension_numbers = #tpu.dot_dimension_numbers<[1], [1], [0], [0], [0, 0, 1, 0], [], []>} : vector<8x8xbf16>, vector<8x8xbf16>, vector<8x8xf32> -> vector<8x8xf32>
    %c2 = arith.constant 2 : index
    %c0_47 = arith.constant 0 : index
    %c0_48 = arith.constant 0 : index
    %79 = vector.load %arg10[%c2, %c0_47, %c0_48] : memref<4x8x1xf32, #tpu.memory_space<vmem>>, vector<1x8x1xf32>
    %80 = vector.shape_cast %79 : vector<1x8x1xf32> to vector<8x1xf32>
    %cst_49 = arith.constant dense<0xFF800000> : vector<8xf32>
    %81 = vector.multi_reduction <maximumf>, %78, %cst_49 [1] : vector<8x8xf32> to vector<8xf32>
    %82 = vector.shape_cast %81 : vector<8xf32> to vector<8x1xf32>
    %83 = arith.maximumf %80, %82 : vector<8x1xf32>
    %84 = arith.subf %80, %83 : vector<8x1xf32>
    %85 = math.exp %84 : vector<8x1xf32>
    %86 = vector.broadcast %83 : vector<8x1xf32> to vector<8x8xf32>
    %87 = arith.subf %78, %86 : vector<8x8xf32>
    %88 = math.exp %87 : vector<8x8xf32>
    %c2_50 = arith.constant 2 : index
    %c0_51 = arith.constant 0 : index
    %c0_52 = arith.constant 0 : index
    %89 = vector.load %arg11[%c2_50, %c0_51, %c0_52] : memref<4x8x1xf32, #tpu.memory_space<vmem>>, vector<1x8x1xf32>
    %90 = vector.shape_cast %89 : vector<1x8x1xf32> to vector<8x1xf32>
    %91 = arith.mulf %85, %90 : vector<8x1xf32>
    %cst_53 = arith.constant dense<0.000000e+00> : vector<8xf32>
    %92 = vector.multi_reduction <add>, %88, %cst_53 [1] : vector<8x8xf32> to vector<8xf32>
    %93 = vector.shape_cast %92 : vector<8xf32> to vector<8x1xf32>
    %94 = arith.addf %91, %93 : vector<8x1xf32>
    %c2_54 = arith.constant 2 : index
    %c0_55 = arith.constant 0 : index
    %c0_56 = arith.constant 0 : index
    %95 = vector.load %arg11[%c2_54, %c0_55, %c0_56] : memref<4x8x1xf32, #tpu.memory_space<vmem>>, vector<1x8x1xf32>
    %96 = vector.shape_cast %95 : vector<1x8x1xf32> to vector<8x1xf32>
    %97 = vector.shape_cast %94 : vector<8x1xf32> to vector<1x8x1xf32>
    tpu.vector_store %arg11[%c2_54, %c0_55, %c0_56], %97 {strides = array<i32>} : memref<4x8x1xf32, #tpu.memory_space<vmem>>, vector<1x8x1xf32>,
    %c2_57 = arith.constant 2 : index
    %c0_58 = arith.constant 0 : index
    %c0_59 = arith.constant 0 : index
    %98 = vector.load %arg10[%c2_57, %c0_58, %c0_59] : memref<4x8x1xf32, #tpu.memory_space<vmem>>, vector<1x8x1xf32>
    %99 = vector.shape_cast %98 : vector<1x8x1xf32> to vector<8x1xf32>
    %100 = vector.shape_cast %83 : vector<8x1xf32> to vector<1x8x1xf32>
    tpu.vector_store %arg10[%c2_57, %c0_58, %c0_59], %100 {strides = array<i32>} : memref<4x8x1xf32, #tpu.memory_space<vmem>>, vector<1x8x1xf32>,
    %c0_60 = arith.constant 0 : index
    %c16 = arith.constant 16 : index
    %101 = vector.load %arg12[%c0_60, %c16] : memref<8x32xf32, #tpu.memory_space<vmem>>, vector<8x8xf32>
    %102 = vector.broadcast %85 : vector<8x1xf32> to vector<8x8xf32>
    %103 = arith.mulf %102, %101 : vector<8x8xf32>
    %104 = arith.truncf %88 : vector<8x8xf32> to vector<8x8xbf16>
    %cst_61 = arith.constant dense<0.000000e+00> : vector<8x8xf32>
    %105 = tpu.matmul %104, %77, %cst_61 {dimension_numbers = #tpu.dot_dimension_numbers<[1], [0], [0], [1], [0, 0, 1, 1], [], []>} : vector<8x8xbf16>, vector<8x8xbf16>, vector<8x8xf32> -> vector<8x8xf32>
    %106 = arith.addf %103, %105 : vector<8x8xf32>
    %c0_62 = arith.constant 0 : index
    %c16_63 = arith.constant 16 : index
    %107 = vector.load %arg12[%c0_62, %c16_63] : memref<8x32xf32, #tpu.memory_space<vmem>>, vector<8x8xf32>
    tpu.vector_store %arg12[%c0_62, %c16_63], %106 {strides = array<i32>} : memref<8x32xf32, #tpu.memory_space<vmem>>, vector<8x8xf32>,
    %108 = vector.extract_strided_slice %4 {offsets = [0, 24], sizes = [8, 8], strides = [1, 1]} : vector<8x32xbf16> to vector<8x8xbf16>
    %109 = vector.extract_strided_slice %6 {offsets = [0, 24], sizes = [8, 8], strides = [1, 1]} : vector<8x32xbf16> to vector<8x8xbf16>
    %110 = vector.extract_strided_slice %8 {offsets = [0, 24], sizes = [8, 8], strides = [1, 1]} : vector<8x32xbf16> to vector<8x8xbf16>
    %cst_64 = arith.constant dense<0.000000e+00> : vector<8x8xf32>
    %111 = tpu.matmul %108, %109, %cst_64 {dimension_numbers = #tpu.dot_dimension_numbers<[1], [1], [0], [0], [0, 0, 1, 0], [], []>} : vector<8x8xbf16>, vector<8x8xbf16>, vector<8x8xf32> -> vector<8x8xf32>
    %c3 = arith.constant 3 : index
    %c0_65 = arith.constant 0 : index
    %c0_66 = arith.constant 0 : index
    %112 = vector.load %arg10[%c3, %c0_65, %c0_66] : memref<4x8x1xf32, #tpu.memory_space<vmem>>, vector<1x8x1xf32>
    %113 = vector.shape_cast %112 : vector<1x8x1xf32> to vector<8x1xf32>
    %cst_67 = arith.constant dense<0xFF800000> : vector<8xf32>
    %114 = vector.multi_reduction <maximumf>, %111, %cst_67 [1] : vector<8x8xf32> to vector<8xf32>
    %115 = vector.shape_cast %114 : vector<8xf32> to vector<8x1xf32>
    %116 = arith.maximumf %113, %115 : vector<8x1xf32>
    %117 = arith.subf %113, %116 : vector<8x1xf32>
    %118 = math.exp %117 : vector<8x1xf32>
    %119 = vector.broadcast %116 : vector<8x1xf32> to vector<8x8xf32>
    %120 = arith.subf %111, %119 : vector<8x8xf32>
    %121 = math.exp %120 : vector<8x8xf32>
    %c3_68 = arith.constant 3 : index
    %c0_69 = arith.constant 0 : index
    %c0_70 = arith.constant 0 : index
    %122 = vector.load %arg11[%c3_68, %c0_69, %c0_70] : memref<4x8x1xf32, #tpu.memory_space<vmem>>, vector<1x8x1xf32>
    %123 = vector.shape_cast %122 : vector<1x8x1xf32> to vector<8x1xf32>
    %124 = arith.mulf %118, %123 : vector<8x1xf32>
    %cst_71 = arith.constant dense<0.000000e+00> : vector<8xf32>
    %125 = vector.multi_reduction <add>, %121, %cst_71 [1] : vector<8x8xf32> to vector<8xf32>
    %126 = vector.shape_cast %125 : vector<8xf32> to vector<8x1xf32>
    %127 = arith.addf %124, %126 : vector<8x1xf32>
    %c3_72 = arith.constant 3 : index
    %c0_73 = arith.constant 0 : index
    %c0_74 = arith.constant 0 : index
    %128 = vector.load %arg11[%c3_72, %c0_73, %c0_74] : memref<4x8x1xf32, #tpu.memory_space<vmem>>, vector<1x8x1xf32>
    %129 = vector.shape_cast %128 : vector<1x8x1xf32> to vector<8x1xf32>
    %130 = vector.shape_cast %127 : vector<8x1xf32> to vector<1x8x1xf32>
    tpu.vector_store %arg11[%c3_72, %c0_73, %c0_74], %130 {strides = array<i32>} : memref<4x8x1xf32, #tpu.memory_space<vmem>>, vector<1x8x1xf32>,
    %c3_75 = arith.constant 3 : index
    %c0_76 = arith.constant 0 : index
    %c0_77 = arith.constant 0 : index
    %131 = vector.load %arg10[%c3_75, %c0_76, %c0_77] : memref<4x8x1xf32, #tpu.memory_space<vmem>>, vector<1x8x1xf32>
    %132 = vector.shape_cast %131 : vector<1x8x1xf32> to vector<8x1xf32>
    %133 = vector.shape_cast %116 : vector<8x1xf32> to vector<1x8x1xf32>
    tpu.vector_store %arg10[%c3_75, %c0_76, %c0_77], %133 {strides = array<i32>} : memref<4x8x1xf32, #tpu.memory_space<vmem>>, vector<1x8x1xf32>,
    %c0_78 = arith.constant 0 : index
    %c24 = arith.constant 24 : index
    %134 = vector.load %arg12[%c0_78, %c24] : memref<8x32xf32, #tpu.memory_space<vmem>>, vector<8x8xf32>
    %135 = vector.broadcast %118 : vector<8x1xf32> to vector<8x8xf32>
    %136 = arith.mulf %135, %134 : vector<8x8xf32>
    %137 = arith.truncf %121 : vector<8x8xf32> to vector<8x8xbf16>
    %cst_79 = arith.constant dense<0.000000e+00> : vector<8x8xf32>
    %138 = tpu.matmul %137, %110, %cst_79 {dimension_numbers = #tpu.dot_dimension_numbers<[1], [0], [0], [1], [0, 0, 1, 1], [], []>} : vector<8x8xbf16>, vector<8x8xbf16>, vector<8x8xf32> -> vector<8x8xf32>
    %139 = arith.addf %136, %138 : vector<8x8xf32>
    %c0_80 = arith.constant 0 : index
    %c24_81 = arith.constant 24 : index
    %140 = vector.load %arg12[%c0_80, %c24_81] : memref<8x32xf32, #tpu.memory_space<vmem>>, vector<8x8xf32>
    tpu.vector_store %arg12[%c0_80, %c24_81], %139 {strides = array<i32>} : memref<8x32xf32, #tpu.memory_space<vmem>>, vector<8x8xf32>,
    %c0_i32_82 = arith.constant 0 : i32
    %141 = arith.cmpi eq, %arg2, %c0_i32_82 : i32
    %142 = arith.extui %141 : i1 to i32
    %c0_i32_83 = arith.constant 0 : i32
    %143 = arith.cmpi ne, %142, %c0_i32_83 : i32
    scf.if %143 {
      %c0_84 = arith.constant 0 : index
      %c0_85 = arith.constant 0 : index
      %c0_86 = arith.constant 0 : index
      %144 = vector.load %arg11[%c0_84, %c0_85, %c0_86] : memref<4x8x1xf32, #tpu.memory_space<vmem>>, vector<1x8x1xf32>
      %145 = vector.shape_cast %144 : vector<1x8x1xf32> to vector<8x1xf32>
      %146 = tpu.reciprocal %145 {approx = true} : vector<8x1xf32> -> vector<8x1xf32>
      %c0_87 = arith.constant 0 : index
      %c0_88 = arith.constant 0 : index
      %147 = vector.load %arg12[%c0_87, %c0_88] : memref<8x32xf32, #tpu.memory_space<vmem>>, vector<8x8xf32>
      %148 = vector.broadcast %146 : vector<8x1xf32> to vector<8x8xf32>
      %149 = arith.mulf %147, %148 : vector<8x8xf32>
      %c0_89 = arith.constant 0 : index
      %c0_90 = arith.constant 0 : index
      %150 = vector.load %arg12[%c0_89, %c0_90] : memref<8x32xf32, #tpu.memory_space<vmem>>, vector<8x8xf32>
      tpu.vector_store %arg12[%c0_89, %c0_90], %149 {strides = array<i32>} : memref<8x32xf32, #tpu.memory_space<vmem>>, vector<8x8xf32>,
      %c1_91 = arith.constant 1 : index
      %c0_92 = arith.constant 0 : index
      %c0_93 = arith.constant 0 : index
      %151 = vector.load %arg11[%c1_91, %c0_92, %c0_93] : memref<4x8x1xf32, #tpu.memory_space<vmem>>, vector<1x8x1xf32>
      %152 = vector.shape_cast %151 : vector<1x8x1xf32> to vector<8x1xf32>
      %153 = tpu.reciprocal %152 {approx = true} : vector<8x1xf32> -> vector<8x1xf32>
      %c0_94 = arith.constant 0 : index
      %c8_95 = arith.constant 8 : index
      %154 = vector.load %arg12[%c0_94, %c8_95] : memref<8x32xf32, #tpu.memory_space<vmem>>, vector<8x8xf32>
      %155 = vector.broadcast %153 : vector<8x1xf32> to vector<8x8xf32>
      %156 = arith.mulf %154, %155 : vector<8x8xf32>
      %c0_96 = arith.constant 0 : index
      %c8_97 = arith.constant 8 : index
      %157 = vector.load %arg12[%c0_96, %c8_97] : memref<8x32xf32, #tpu.memory_space<vmem>>, vector<8x8xf32>
      tpu.vector_store %arg12[%c0_96, %c8_97], %156 {strides = array<i32>} : memref<8x32xf32, #tpu.memory_space<vmem>>, vector<8x8xf32>,
      %c2_98 = arith.constant 2 : index
      %c0_99 = arith.constant 0 : index
      %c0_100 = arith.constant 0 : index
      %158 = vector.load %arg11[%c2_98, %c0_99, %c0_100] : memref<4x8x1xf32, #tpu.memory_space<vmem>>, vector<1x8x1xf32>
      %159 = vector.shape_cast %158 : vector<1x8x1xf32> to vector<8x1xf32>
      %160 = tpu.reciprocal %159 {approx = true} : vector<8x1xf32> -> vector<8x1xf32>
      %c0_101 = arith.constant 0 : index
      %c16_102 = arith.constant 16 : index
      %161 = vector.load %arg12[%c0_101, %c16_102] : memref<8x32xf32, #tpu.memory_space<vmem>>, vector<8x8xf32>
      %162 = vector.broadcast %160 : vector<8x1xf32> to vector<8x8xf32>
      %163 = arith.mulf %161, %162 : vector<8x8xf32>
      %c0_103 = arith.constant 0 : index
      %c16_104 = arith.constant 16 : index
      %164 = vector.load %arg12[%c0_103, %c16_104] : memref<8x32xf32, #tpu.memory_space<vmem>>, vector<8x8xf32>
      tpu.vector_store %arg12[%c0_103, %c16_104], %163 {strides = array<i32>} : memref<8x32xf32, #tpu.memory_space<vmem>>, vector<8x8xf32>,
      %c3_105 = arith.constant 3 : index
      %c0_106 = arith.constant 0 : index
      %c0_107 = arith.constant 0 : index
      %165 = vector.load %arg11[%c3_105, %c0_106, %c0_107] : memref<4x8x1xf32, #tpu.memory_space<vmem>>, vector<1x8x1xf32>
      %166 = vector.shape_cast %165 : vector<1x8x1xf32> to vector<8x1xf32>
      %167 = tpu.reciprocal %166 {approx = true} : vector<8x1xf32> -> vector<8x1xf32>
      %c0_108 = arith.constant 0 : index
      %c24_109 = arith.constant 24 : index
      %168 = vector.load %arg12[%c0_108, %c24_109] : memref<8x32xf32, #tpu.memory_space<vmem>>, vector<8x8xf32>
      %169 = vector.broadcast %167 : vector<8x1xf32> to vector<8x8xf32>
      %170 = arith.mulf %168, %169 : vector<8x8xf32>
      %c0_110 = arith.constant 0 : index
      %c24_111 = arith.constant 24 : index
      %171 = vector.load %arg12[%c0_110, %c24_111] : memref<8x32xf32, #tpu.memory_space<vmem>>, vector<8x8xf32>
      tpu.vector_store %arg12[%c0_110, %c24_111], %170 {strides = array<i32>} : memref<8x32xf32, #tpu.memory_space<vmem>>, vector<8x8xf32>,
      %c0_112 = arith.constant 0 : index
      %c0_113 = arith.constant 0 : index
      %172 = vector.load %arg12[%c0_112, %c0_113] : memref<8x32xf32, #tpu.memory_space<vmem>>, vector<8x32xf32>
      %173 = arith.truncf %172 : vector<8x32xf32> to vector<8x32xbf16>
      %c0_114 = arith.constant 0 : index
      %c0_115 = arith.constant 0 : index
      %174 = vector.load %arg7[%c0_114, %c0_115] : memref<32x32xbf16, #tpu.memory_space<vmem>>, vector<32x32xbf16>
      %cst_116 = arith.constant dense<0.000000e+00> : vector<8x32xf32>
      %175 = tpu.matmul %173, %174, %cst_116 {dimension_numbers = #tpu.dot_dimension_numbers<[1], [0], [0], [1], [0, 0, 1, 1], [], []>} : vector<8x32xbf16>, vector<32x32xbf16>, vector<8x32xf32> -> vector<8x32xf32>
      %c0_117 = arith.constant 0 : index
      %c0_118 = arith.constant 0 : index
      %176 = vector.load %arg8[%c0_117, %c0_118] : memref<1x32xf32, #tpu.memory_space<vmem>>, vector<1x32xf32>
      %177 = vector.broadcast %176 : vector<1x32xf32> to vector<8x32xf32>
      %178 = arith.addf %175, %177 : vector<8x32xf32>
      %c0_119 = arith.constant 0 : index
      %c0_120 = arith.constant 0 : index
      %c0_121 = arith.constant 0 : index
      %179 = vector.load %arg6[%c0_119, %c0_120, %c0_121] : memref<1x8x32xf32, #tpu.memory_space<vmem>>, vector<1x8x32xf32>
      %180 = vector.shape_cast %179 : vector<1x8x32xf32> to vector<8x32xf32>
      %181 = arith.addf %180, %178 : vector<8x32xf32>
      %c0_122 = arith.constant 0 : index
      %c0_123 = arith.constant 0 : index
      %c0_124 = arith.constant 0 : index
      %182 = vector.load %arg9[%c0_122, %c0_123, %c0_124] : memref<1x8x32xf32, #tpu.memory_space<vmem>>, vector<1x8x32xf32>
      %183 = vector.shape_cast %182 : vector<1x8x32xf32> to vector<8x32xf32>
      %184 = vector.shape_cast %181 : vector<8x32xf32> to vector<1x8x32xf32>
      tpu.vector_store %arg9[%c0_122, %c0_123, %c0_124], %184 {strides = array<i32>} : memref<1x8x32xf32, #tpu.memory_space<vmem>>, vector<1x8x32xf32>,
    } else {
    }
    return
  }
  func.func @transform_0(%arg0: i32, %arg1: i32, %arg2: i32) -> (i32, i32, i32) {
    %c0_i32 = arith.constant 0 : i32
    %c0_i32_0 = arith.constant 0 : i32
    return %arg0, %arg1, %c0_i32 : i32, i32, i32
  }
  func.func @transform_1(%arg0: i32, %arg1: i32, %arg2: i32) -> (i32, i32, i32) {
    %c0_i32 = arith.constant 0 : i32
    %c0_i32_0 = arith.constant 0 : i32
    return %arg0, %arg2, %c0_i32 : i32, i32, i32
  }
  func.func @transform_2(%arg0: i32, %arg1: i32, %arg2: i32) -> (i32, i32, i32) {
    %c0_i32 = arith.constant 0 : i32
    %c0_i32_0 = arith.constant 0 : i32
    return %arg0, %arg2, %c0_i32 : i32, i32, i32
  }
  func.func @transform_3(%arg0: i32, %arg1: i32, %arg2: i32) -> (i32, i32, i32) {
    %c0_i32 = arith.constant 0 : i32
    %c0_i32_0 = arith.constant 0 : i32
    return %arg0, %arg1, %c0_i32 : i32, i32, i32
  }
  func.func @transform_4(%arg0: i32, %arg1: i32, %arg2: i32) -> (i32, i32) {
    %c0_i32 = arith.constant 0 : i32
    %c0_i32_0 = arith.constant 0 : i32
    %c0_i32_1 = arith.constant 0 : i32
    return %c0_i32, %c0_i32_0 : i32, i32
  }
  func.func @transform_5(%arg0: i32, %arg1: i32, %arg2: i32) -> (i32, i32) {
    %c0_i32 = arith.constant 0 : i32
    %c0_i32_0 = arith.constant 0 : i32
    %c0_i32_1 = arith.constant 0 : i32
    return %c0_i32, %c0_i32_0 : i32, i32
  }
  func.func @transform_6(%arg0: i32, %arg1: i32, %arg2: i32) -> (i32, i32, i32) {
    %c0_i32 = arith.constant 0 : i32
    %c0_i32_0 = arith.constant 0 : i32
    return %arg0, %arg1, %c0_i32 : i32, i32, i32
  }
}

module attributes {stable_mosaic.version = 11 : i64} {
  func.func @_mlp_kernel(%arg0: i32, %arg1: i32, %arg2: i32, %arg3: memref<1x8x32xf32, #tpu.memory_space<vmem>>, %arg4: memref<1x32xf32, #tpu.memory_space<vmem>>, %arg5: memref<1x32xf32, #tpu.memory_space<vmem>>, %arg6: memref<32x128xbf16, #tpu.memory_space<vmem>>, %arg7: memref<1x128xf32, #tpu.memory_space<vmem>>, %arg8: memref<128x32xbf16, #tpu.memory_space<vmem>>, %arg9: memref<1x32xf32, #tpu.memory_space<vmem>>, %arg10: memref<1x8x32xf32, #tpu.memory_space<vmem>>, %arg11: memref<8x32xbf16, #tpu.memory_space<vmem>>, %arg12: memref<8x32xf32, #tpu.memory_space<vmem>>) attributes {dimension_semantics = [#tpu.dimension_semantics<parallel>, #tpu.dimension_semantics<parallel>, #tpu.dimension_semantics<arbitrary>], iteration_bounds = array<i64: 2, 1, 1>, scalar_prefetch = 0 : i64, scratch_operands = 2 : i64, tpu.core_type = #tpu.core_type<tc>, window_params = [{transform_indices = @transform_0, window_bounds = array<i64: 1, 8, 32>}, {pipeline_mode = #tpu.pipeline_mode<synchronous>, transform_indices = @transform_1, window_bounds = array<i64: 1, 32>}, {pipeline_mode = #tpu.pipeline_mode<synchronous>, transform_indices = @transform_2, window_bounds = array<i64: 1, 32>}, {transform_indices = @transform_3, window_bounds = array<i64: 32, 128>}, {transform_indices = @transform_4, window_bounds = array<i64: 1, 128>}, {transform_indices = @transform_5, window_bounds = array<i64: 128, 32>}, {pipeline_mode = #tpu.pipeline_mode<synchronous>, transform_indices = @transform_6, window_bounds = array<i64: 1, 32>}, {transform_indices = @transform_7, window_bounds = array<i64: 1, 8, 32>}]} {
    %c0_i32 = arith.constant 0 : i32
    %0 = arith.cmpi eq, %arg2, %c0_i32 : i32
    %1 = arith.extui %0 : i1 to i32
    %c0_i32_0 = arith.constant 0 : i32
    %2 = arith.cmpi ne, %1, %c0_i32_0 : i32
    scf.if %2 {
      %c0_18 = arith.constant 0 : index
      %c0_19 = arith.constant 0 : index
      %c0_20 = arith.constant 0 : index
      %26 = vector.load %arg3[%c0_18, %c0_19, %c0_20] : memref<1x8x32xf32, #tpu.memory_space<vmem>>, vector<1x8x32xf32>
      %27 = vector.shape_cast %26 : vector<1x8x32xf32> to vector<8x32xf32>
      %c0_21 = arith.constant 0 : index
      %c0_22 = arith.constant 0 : index
      %28 = vector.load %arg4[%c0_21, %c0_22] : memref<1x32xf32, #tpu.memory_space<vmem>>, vector<1x32xf32>
      %c0_23 = arith.constant 0 : index
      %c0_24 = arith.constant 0 : index
      %29 = vector.load %arg5[%c0_23, %c0_24] : memref<1x32xf32, #tpu.memory_space<vmem>>, vector<1x32xf32>
      %cst_25 = arith.constant dense<0.000000e+00> : vector<8xf32>
      %30 = vector.multi_reduction <add>, %27, %cst_25 [1] : vector<8x32xf32> to vector<8xf32>
      %31 = vector.shape_cast %30 : vector<8xf32> to vector<8x1xf32>
      %cst_26 = arith.constant 3.200000e+01 : f32
      %32 = vector.broadcast %cst_26 : f32 to vector<8x1xf32>
      %33 = arith.divf %31, %32 : vector<8x1xf32>
      %34 = vector.broadcast %33 : vector<8x1xf32> to vector<8x32xf32>
      %35 = arith.subf %27, %34 : vector<8x32xf32>
      %36 = arith.mulf %35, %35 : vector<8x32xf32>
      %cst_27 = arith.constant dense<0.000000e+00> : vector<8xf32>
      %37 = vector.multi_reduction <add>, %36, %cst_27 [1] : vector<8x32xf32> to vector<8xf32>
      %38 = vector.shape_cast %37 : vector<8xf32> to vector<8x1xf32>
      %cst_28 = arith.constant 3.200000e+01 : f32
      %39 = vector.broadcast %cst_28 : f32 to vector<8x1xf32>
      %40 = arith.divf %38, %39 : vector<8x1xf32>
      %41 = vector.broadcast %33 : vector<8x1xf32> to vector<8x32xf32>
      %42 = arith.subf %27, %41 : vector<8x32xf32>
      %cst_29 = arith.constant 9.99999974E-6 : f32
      %43 = vector.broadcast %cst_29 : f32 to vector<8x1xf32>
      %44 = arith.addf %40, %43 : vector<8x1xf32>
      %45 = math.rsqrt %44 : vector<8x1xf32>
      %46 = vector.broadcast %45 : vector<8x1xf32> to vector<8x32xf32>
      %47 = arith.mulf %42, %46 : vector<8x32xf32>
      %48 = vector.broadcast %28 : vector<1x32xf32> to vector<8x32xf32>
      %49 = arith.mulf %47, %48 : vector<8x32xf32>
      %50 = vector.broadcast %29 : vector<1x32xf32> to vector<8x32xf32>
      %51 = arith.addf %49, %50 : vector<8x32xf32>
      %52 = arith.truncf %51 : vector<8x32xf32> to vector<8x32xbf16>
      %c0_30 = arith.constant 0 : index
      %c0_31 = arith.constant 0 : index
      %53 = vector.load %arg11[%c0_30, %c0_31] : memref<8x32xbf16, #tpu.memory_space<vmem>>, vector<8x32xbf16>
      tpu.vector_store %arg11[%c0_30, %c0_31], %52 {strides = array<i32>} : memref<8x32xbf16, #tpu.memory_space<vmem>>, vector<8x32xbf16>,
      %cst_32 = arith.constant 0.000000e+00 : f32
      %54 = vector.broadcast %cst_32 : f32 to vector<8x32xf32>
      %c0_33 = arith.constant 0 : index
      %c0_34 = arith.constant 0 : index
      %55 = vector.load %arg12[%c0_33, %c0_34] : memref<8x32xf32, #tpu.memory_space<vmem>>, vector<8x32xf32>
      tpu.vector_store %arg12[%c0_33, %c0_34], %54 {strides = array<i32>} : memref<8x32xf32, #tpu.memory_space<vmem>>, vector<8x32xf32>,
    } else {
    }
    %c0 = arith.constant 0 : index
    %c0_1 = arith.constant 0 : index
    %3 = vector.load %arg11[%c0, %c0_1] : memref<8x32xbf16, #tpu.memory_space<vmem>>, vector<8x32xbf16>
    %c0_2 = arith.constant 0 : index
    %c0_3 = arith.constant 0 : index
    %4 = vector.load %arg6[%c0_2, %c0_3] : memref<32x128xbf16, #tpu.memory_space<vmem>>, vector<32x128xbf16>
    %cst = arith.constant dense<0.000000e+00> : vector<8x128xf32>
    %5 = tpu.matmul %3, %4, %cst {dimension_numbers = #tpu.dot_dimension_numbers<[1], [0], [0], [1], [0, 0, 1, 1], [], []>} : vector<8x32xbf16>, vector<32x128xbf16>, vector<8x128xf32> -> vector<8x128xf32>
    %c0_4 = arith.constant 0 : index
    %c0_5 = arith.constant 0 : index
    %6 = vector.load %arg7[%c0_4, %c0_5] : memref<1x128xf32, #tpu.memory_space<vmem>>, vector<1x128xf32>
    %7 = vector.broadcast %6 : vector<1x128xf32> to vector<8x128xf32>
    %8 = arith.addf %5, %7 : vector<8x128xf32>
    %cst_6 = arith.constant 5.000000e-01 : f32
    %9 = vector.broadcast %cst_6 : f32 to vector<8x128xf32>
    %10 = arith.mulf %9, %8 : vector<8x128xf32>
    %cst_7 = arith.constant 0.707106769 : f32
    %11 = vector.broadcast %cst_7 : f32 to vector<8x128xf32>
    %12 = arith.mulf %8, %11 : vector<8x128xf32>
    %13 = math.erf %12 : vector<8x128xf32>
    %cst_8 = arith.constant 1.000000e+00 : f32
    %14 = vector.broadcast %cst_8 : f32 to vector<8x128xf32>
    %15 = arith.addf %14, %13 : vector<8x128xf32>
    %16 = arith.mulf %10, %15 : vector<8x128xf32>
    %c0_9 = arith.constant 0 : index
    %c0_10 = arith.constant 0 : index
    %17 = vector.load %arg12[%c0_9, %c0_10] : memref<8x32xf32, #tpu.memory_space<vmem>>, vector<8x32xf32>
    %18 = arith.truncf %16 : vector<8x128xf32> to vector<8x128xbf16>
    %c0_11 = arith.constant 0 : index
    %c0_12 = arith.constant 0 : index
    %19 = vector.load %arg8[%c0_11, %c0_12] : memref<128x32xbf16, #tpu.memory_space<vmem>>, vector<128x32xbf16>
    %cst_13 = arith.constant dense<0.000000e+00> : vector<8x32xf32>
    %20 = tpu.matmul %18, %19, %cst_13 {dimension_numbers = #tpu.dot_dimension_numbers<[1], [0], [0], [1], [0, 0, 1, 1], [], []>} : vector<8x128xbf16>, vector<128x32xbf16>, vector<8x32xf32> -> vector<8x32xf32>
    %21 = arith.addf %17, %20 : vector<8x32xf32>
    %c0_14 = arith.constant 0 : index
    %c0_15 = arith.constant 0 : index
    %22 = vector.load %arg12[%c0_14, %c0_15] : memref<8x32xf32, #tpu.memory_space<vmem>>, vector<8x32xf32>
    tpu.vector_store %arg12[%c0_14, %c0_15], %21 {strides = array<i32>} : memref<8x32xf32, #tpu.memory_space<vmem>>, vector<8x32xf32>,
    %c0_i32_16 = arith.constant 0 : i32
    %23 = arith.cmpi eq, %arg2, %c0_i32_16 : i32
    %24 = arith.extui %23 : i1 to i32
    %c0_i32_17 = arith.constant 0 : i32
    %25 = arith.cmpi ne, %24, %c0_i32_17 : i32
    scf.if %25 {
      %c0_18 = arith.constant 0 : index
      %c0_19 = arith.constant 0 : index
      %c0_20 = arith.constant 0 : index
      %26 = vector.load %arg3[%c0_18, %c0_19, %c0_20] : memref<1x8x32xf32, #tpu.memory_space<vmem>>, vector<1x8x32xf32>
      %27 = vector.shape_cast %26 : vector<1x8x32xf32> to vector<8x32xf32>
      %c0_21 = arith.constant 0 : index
      %c0_22 = arith.constant 0 : index
      %28 = vector.load %arg12[%c0_21, %c0_22] : memref<8x32xf32, #tpu.memory_space<vmem>>, vector<8x32xf32>
      %29 = arith.addf %27, %28 : vector<8x32xf32>
      %c0_23 = arith.constant 0 : index
      %c0_24 = arith.constant 0 : index
      %30 = vector.load %arg9[%c0_23, %c0_24] : memref<1x32xf32, #tpu.memory_space<vmem>>, vector<1x32xf32>
      %31 = vector.broadcast %30 : vector<1x32xf32> to vector<8x32xf32>
      %32 = arith.addf %29, %31 : vector<8x32xf32>
      %c0_25 = arith.constant 0 : index
      %c0_26 = arith.constant 0 : index
      %c0_27 = arith.constant 0 : index
      %33 = vector.load %arg10[%c0_25, %c0_26, %c0_27] : memref<1x8x32xf32, #tpu.memory_space<vmem>>, vector<1x8x32xf32>
      %34 = vector.shape_cast %33 : vector<1x8x32xf32> to vector<8x32xf32>
      %35 = vector.shape_cast %32 : vector<8x32xf32> to vector<1x8x32xf32>
      tpu.vector_store %arg10[%c0_25, %c0_26, %c0_27], %35 {strides = array<i32>} : memref<1x8x32xf32, #tpu.memory_space<vmem>>, vector<1x8x32xf32>,
    } else {
    }
    return
  }
  func.func @transform_0(%arg0: i32, %arg1: i32, %arg2: i32) -> (i32, i32, i32) {
    %c0_i32 = arith.constant 0 : i32
    %c0_i32_0 = arith.constant 0 : i32
    return %arg0, %arg1, %c0_i32 : i32, i32, i32
  }
  func.func @transform_1(%arg0: i32, %arg1: i32, %arg2: i32) -> (i32, i32) {
    %c0_i32 = arith.constant 0 : i32
    %c0_i32_0 = arith.constant 0 : i32
    %c0_i32_1 = arith.constant 0 : i32
    return %c0_i32, %c0_i32_0 : i32, i32
  }
  func.func @transform_2(%arg0: i32, %arg1: i32, %arg2: i32) -> (i32, i32) {
    %c0_i32 = arith.constant 0 : i32
    %c0_i32_0 = arith.constant 0 : i32
    %c0_i32_1 = arith.constant 0 : i32
    return %c0_i32, %c0_i32_0 : i32, i32
  }
  func.func @transform_3(%arg0: i32, %arg1: i32, %arg2: i32) -> (i32, i32) {
    %c0_i32 = arith.constant 0 : i32
    %c0_i32_0 = arith.constant 0 : i32
    return %c0_i32, %arg2 : i32, i32
  }
  func.func @transform_4(%arg0: i32, %arg1: i32, %arg2: i32) -> (i32, i32) {
    %c0_i32 = arith.constant 0 : i32
    %c0_i32_0 = arith.constant 0 : i32
    return %c0_i32, %arg2 : i32, i32
  }
  func.func @transform_5(%arg0: i32, %arg1: i32, %arg2: i32) -> (i32, i32) {
    %c0_i32 = arith.constant 0 : i32
    %c0_i32_0 = arith.constant 0 : i32
    return %arg2, %c0_i32 : i32, i32
  }
  func.func @transform_6(%arg0: i32, %arg1: i32, %arg2: i32) -> (i32, i32) {
    %c0_i32 = arith.constant 0 : i32
    %c0_i32_0 = arith.constant 0 : i32
    %c0_i32_1 = arith.constant 0 : i32
    return %c0_i32, %c0_i32_0 : i32, i32
  }
  func.func @transform_7(%arg0: i32, %arg1: i32, %arg2: i32) -> (i32, i32, i32) {
    %c0_i32 = arith.constant 0 : i32
    %c0_i32_0 = arith.constant 0 : i32
    return %arg0, %arg1, %c0_i32 : i32, i32, i32
  }
}

</mosaic_0001>

<bundles_post_ra>
// kernel: transformer_block_forward.6
= control target key start
LH: loop header
LB: loop body
LE: loop exit
PB: predicated region body
PF: predicated region fallthrough
CT: control target
= control target key end

     0   :  { %s1625_s0 = inlined_call_operand.hbm [shape: f32[2,8,32], index: 0, kind: input, shape index: {}]   ;;  %s1626_s1 = inlined_call_operand.hbm [shape: f32[1,32], index: 1, kind: input, shape index: {}]   ;;  %s1627_s2 = inlined_call_operand.hbm [shape: f32[1,32], index: 2, kind: input, shape index: {}]   ;;  %s1628_s3 = inlined_call_operand.hbm [shape: bf16[32,96], index: 3, kind: input, shape index: {}]   ;;  %s1629_s4 = inlined_call_operand.hbm [shape: f32[1,96], index: 4, kind: input, shape index: {}]   ;;  %s1630_s5 = inlined_call_operand.hbm [shape: bf16[2,8,32], index: 5, kind: output, shape index: {0}]   ;;  %s1631_s6 = inlined_call_operand.hbm [shape: bf16[2,8,32], index: 6, kind: output, shape index: {1}]   ;;  %s1632_s7 = inlined_call_operand.hbm [shape: bf16[2,8,32], index: 7, kind: output, shape index: {2}]  }
   0x1   :  { %1637 = sst [smem:[#allocation20_spill]] %s1626_s1 }
   0x2   :  { %1638 = sst [smem:[#allocation21_spill]] %s1627_s2 }
   0x3   :  { %13 = vsyncpa [#allocation3], 0 }
   0x4   :  { %15 = vsyncpa [#allocation3 + $0x1], 0 }
   0x5   :  { %16 = vsyncpa [#allocation6], 0 }
   0x6   :  { %17 = vsyncpa [#allocation9], 0 }
   0x7   :  { %18 = vsyncpa [#allocation4], 0 }
   0x8   :  { %20 = vsyncpa [#allocation4 + $0x1], 0 }
   0x9   :  { %21 = vsyncpa [#allocation13], 0 }
   0xa   :  { %23 = vsyncpa [#allocation13 + $0x1], 0  ;;  %s1252_s24 = smov 0   ;;  %s1254_s25 = smov 0  }
   0xb   :  { %s1256_s26 = smov 0   ;;  %s1258_s27 = smov 0  }
   0xc   :  { %s1260_s28 = smov 0   ;;  %s1262_s29 = smov 0  }
   0xd LB: > { %s1283_s30 = sadd.s32 4294967295, %s1196_s29   ;;  %p737_p0 = scmp.ge.s32.totalorder %s1196_s29, 1  ;;  %s1196_s29 = sphi %s1262_s29, %s29_s29   ;;  %s1192_s28 = sphi %s1260_s28, %s1663_s28   ;;  %s1188_s27 = sphi %s1258_s27, %s1662_s27   ;;  %s1184_s26 = sphi %s1256_s26, %s1661_s26   ;;  %s1180_s25 = sphi %s1254_s25, %s1660_s25   ;;  %s1176_s24 = sphi %s1252_s24, %s1659_s24  }
   0xe   : > { %p1633_p1 = scmp.eq.s32.totalorder %s1283_s30, 0  ;;  %p242_p2 = scmp.lt.s32.totalorder %s1196_s29, 3 }
   0xf   : > { %s1198_s9 = smov [#allocation5]   ;;  %s1199_s11 = smov [#allocation8]  }
  0x10   : > { %p1288_p3 = pnand %p737_p0, %p242_p2  ;;  %s255_s10 = sshll.u32 %s1198_s9, 4  ;;  %s256_s10 = int_to_ptr.vmem [resolvable:$true] %s255_s10 }
  0x11   : > { %s276_s12 = sshll.u32 %s1199_s11, 4  ;;  %s1200_s14 = smov [#allocation7]   ;;  %s1301_s12 = int_to_ptr.vmem [resolvable:$true] %s276_s12 }
  0x12   : > { %s1639_s8 = scalar_select %p1288_p3, 1, 0 }
  0x13   : > { %p805_p5 = pneg %p1288_p3  ;;  %s1303_s15 = sshll.u32 %s1200_s14, 4  ;;  %s267_s15 = int_to_ptr.vmem [resolvable:$true] %s1303_s15 }
  0x14   : > { %s1641_s1 = sld [smem:[#allocation20_spill]] }
  0x15   : > { %p1297_p6 = pnand %p805_p5, %p1633_p1 }
  0x17   : > { %p1313_p8 = pneg %p1297_p6 }
  0x1a   : > { %s904_s18 = scalar_lea.hbm %s1641_s1, 16 }
  0x1b   : > { %p905_p7 = scmp.ne.s32.totalorder %s1641_s1, %s904_s18  ;;  %p911_p11 = scmp.lt.u32.totalorder %s904_s18, %s1641_s1 }
  0x1d   : > { %p907_p9 = pnand %p1313_p8, %p905_p7 }
  0x1f   : > { %p908_p10 = pneg %p907_p9 }
  0x21   : > { %p913_p12 = pnand %p911_p11, %p908_p10 }
  0x23   : > { %916 = shalt.err (!%p913_p12)
}
  0x24   : > { %s917_s9 = scalar_lea.vmem %s256_s10, 16  ;;  %s924_s11 = scalar_lea.vmem %s256_s10, 32 }
  0x25   : > { %p918_p13 = scmp.ne.s32.totalorder %s256_s10, %s917_s9  ;;  %p925_p5 = scmp.lt.s32.totalorder %s256_s10, %s256_s10 }
  0x26   : > { %p926_p4 = scmp.lt.s32.totalorder %s924_s11, %s917_s9 }
  0x27   : > { %p920_p0 = pnand %p918_p13, %p1313_p8 }
  0x28   : > { %p927_p1 = por %p926_p4, %p925_p5 }
  0x29   : > { %p921_p2 = pneg %p920_p0 }
  0x2b   : > { %p928_p3 = pnand %p927_p1, %p921_p2 }
  0x2d   : > { %931 = shalt.err (!%p928_p3)
}
  0x2e   : > { %808 = dma.hbm_to_vmem [thread:$0]  (!%p1297_p6), %s1641_s1, 16, %s256_s10, [#allocation6]  }
  0x2f   : > { %s932_s19 = scalar_lea.hbm %s1628_s3, 256 }
  0x30   : > { %p933_p7 = scmp.ne.s32.totalorder %s1628_s3, %s932_s19  ;;  %p939_p1 = scmp.lt.u32.totalorder %s932_s19, %s1628_s3 }
  0x32   : > { %p935_p9 = pnand %p933_p7, %p1313_p8 }
  0x34   : > { %p936_p4 = pneg %p935_p9 }
  0x36   : > { %p941_p3 = pnand %p939_p1, %p936_p4 }
  0x38   : > { %944 = shalt.err (!%p941_p3)
}
  0x39   : > { %s945_s10 = scalar_lea.vmem %s1301_s12, 256  ;;  %p953_p13 = scmp.lt.s32.totalorder %s1301_s12, %s1301_s12 }
  0x3a   : > { %p946_p10 = scmp.ne.s32.totalorder %s1301_s12, %s945_s10  ;;  %p954_p0 = scmp.lt.s32.totalorder %s945_s10, %s945_s10 }
  0x3c   : > { %p948_p11 = pnand %p946_p10, %p1313_p8  ;;  %p955_p2 = por %p954_p0, %p953_p13 }
  0x3e   : > { %p949_p12 = pneg %p948_p11 }
  0x40   : > { %p956_p5 = pnand %p955_p2, %p949_p12 }
  0x42   : > { %959 = shalt.err (!%p956_p5)
}
  0x43   : > { %s1201_s11 = smov 64   ;;  %s1202_s14 = smov 4  }
  0x44   : > { %814 = dma.hbm_to_vmem [thread:$0]  (!%p1297_p6), %s1628_s3, 256, %s1301_s12, [#allocation9], %s1201_s11, %s1201_s11, %s1202_s14  }
  0x45   : > { %s1643_s2 = sld [smem:[#allocation21_spill]] }
  0x4b   : > { %s960_s20 = scalar_lea.hbm %s1643_s2, 16 }
  0x4c   : > { %p961_p7 = scmp.ne.s32.totalorder %s1643_s2, %s960_s20  ;;  %p967_p1 = scmp.lt.u32.totalorder %s960_s20, %s1643_s2 }
  0x4e   : > { %p963_p9 = pnand %p961_p7, %p1313_p8 }
  0x50   : > { %p964_p4 = pneg %p963_p9 }
  0x52   : > { %p969_p3 = pnand %p967_p1, %p964_p4 }
  0x54   : > { %972 = shalt.err (!%p969_p3)
}
  0x55   : > { %s973_s16 = scalar_lea.vmem %s267_s15, 16  ;;  %s980_s12 = scalar_lea.vmem %s267_s15, 32 }
  0x56   : > { %p974_p10 = scmp.ne.s32.totalorder %s267_s15, %s973_s16  ;;  %p981_p13 = scmp.lt.s32.totalorder %s267_s15, %s267_s15 }
  0x57   : > { %p982_p0 = scmp.lt.s32.totalorder %s980_s12, %s973_s16 }
  0x58   : > { %p976_p11 = pnand %p974_p10, %p1313_p8 }
  0x59   : > { %p983_p2 = por %p982_p0, %p981_p13 }
  0x5a   : > { %p977_p12 = pneg %p976_p11 }
  0x5c   : > { %p984_p5 = pnand %p983_p2, %p977_p12 }
  0x5e   : > { %987 = shalt.err (!%p984_p5)
}
  0x5f   : > { %811 = dma.hbm_to_vmem [thread:$0]  (!%p1297_p6), %s1643_s2, 16, %s267_s15, [#allocation6]  }
  0x60   : > { %s1203_s17 = smov [#allocation10]   ;;  %s988_s22 = scalar_lea.hbm %s1629_s4, 16 }
  0x61   : > { %s290_s18 = sshll.u32 %s1203_s17, 4  ;;  %p989_p7 = scmp.ne.s32.totalorder %s1629_s4, %s988_s22  ;;  %s291_s18 = int_to_ptr.vmem [resolvable:$true] %s290_s18 }
  0x62   : > { %p995_p1 = scmp.lt.u32.totalorder %s988_s22, %s1629_s4 }
  0x63   : > { %p991_p9 = pnand %p989_p7, %p1313_p8 }
  0x65   : > { %p992_p4 = pneg %p991_p9 }
  0x67   : > { %p997_p3 = pnand %p995_p1, %p992_p4 }
  0x69   : > { %1000 = shalt.err (!%p997_p3)
}
  0x6a   : > { %s1001_s15 = scalar_lea.vmem %s291_s18, 16  ;;  %s1008_s12 = scalar_lea.vmem %s291_s18, 32 }
  0x6b   : > { %p1002_p10 = scmp.ne.s32.totalorder %s291_s18, %s1001_s15  ;;  %p1009_p13 = scmp.lt.s32.totalorder %s291_s18, %s291_s18 }
  0x6c   : > { %p1010_p0 = scmp.lt.s32.totalorder %s1008_s12, %s1001_s15 }
  0x6d   : > { %p1004_p11 = pnand %p1002_p10, %p1313_p8 }
  0x6e   : > { %p1011_p2 = por %p1010_p0, %p1009_p13 }
  0x6f   : > { %p1005_p12 = pneg %p1004_p11 }
  0x71   : > { %p1012_p5 = pnand %p1011_p2, %p1005_p12 }
  0x73   : > { %1015 = shalt.err (!%p1012_p5)
}
  0x74   : > { %817 = dma.hbm_to_vmem [thread:$0]  (!%p1297_p6), %s1629_s4, 16, %s291_s18, [#allocation9]  }
  0x75   : > { %s1635_s21 = sadd.s32 4294967294, %s1196_s29   ;;  %s41_s17 = sadd.s32 1, %s1192_s28 }
  0x76   : > { %p43_p8 = scmp.ge.s32.totalorder %s41_s17, 2  ;;  %s50_s13 = sadd.s32 1, %s1184_s26 }
  0x77   : > { %p57_p7 = scmp.ne.s32.totalorder %s1184_s26, %s1180_s25  ;;  %p58_p9 = scmp.eq.s32.totalorder %s1196_s29, 0 }
  0x78   : > { %s1665_s17 = smov (%p43_p8, %s41_s17), 0  ;;  %p63_p1 = scmp.ne.s32.totalorder %s1180_s25, %s1176_s24 }
  0x79   : > { %p1397_p4 = por %p58_p9, %p57_p7  ;;  %s45_s18 = ssub.s32 %s1192_s28, %s1665_s17 }
  0x7a   : > { %p173_p6 = scmp.eq.s32.totalorder %s1283_s30, 1  ;;  %p48_p3 = scmp.eq.s32.totalorder %s45_s18, 0 }
  0x7b   : > { %p1645_p10 = scmp.eq.s32.totalorder %s1283_s30, 0  ;;  %p179_p13 = scmp.eq.s32.totalorder %s1635_s21, 1 }
  0x7c   : > { %p1412_p12 = por %p173_p6, %p57_p7  ;;  %p836_p2 = scmp.lt.s32.totalorder %s1196_s29, 2 }
  0x7d   : > { %p1408_p11 = por %p1645_p10, %p63_p1  ;;  %p1421_p0 = por %p179_p13, %p63_p1 }
  0x7e   : > { %s1647_s22 = scalar_select %p1412_p12, 1, 0 }
  0x7f   : > { %s1419_s23 = scalar_select %p48_p3, %s1184_s26, %s50_s13  }
  0x80   : > { %s1648_s9 = scalar_select %p1421_p0, 1, 0 }
  0x81   : > { %s301_s10 = sand.u32 1, %s1184_s26   ;;  %s744_s16 = sshll.u32 %s1192_s28, 7 }
  0x82   : > { %s743_s15 = sshll.u32 %s301_s10, 3  ;;  %s1431_s14 = scalar_lea.hbm %s1625_s0, %s744_s16 }
  0x83   : > { %s305_s18 = scalar_lea.vmem [#allocation2], %s743_s15  ;;  %p1435_p5 = pnand %p836_p2, %p1397_p4 }
  0x84   : > { %s313_s13 = sshll.u32 %s305_s18, 4  ;;  %s302_s1 = scalar_lea.sflag [#allocation3], %s301_s10  ;;  %s1439_s13 = int_to_ptr.vmem [resolvable:$true] %s313_s13 }
  0x85   : > { %s1016_s2 = scalar_lea.hbm %s1431_s14, 128  ;;  %p1018_p7 = pneg %p1435_p5 }
  0x86   : > { %p1017_p8 = scmp.ne.s32.totalorder %s1431_s14, %s1016_s2  ;;  %s1021_s19 = scalar_lea.hbm %s1625_s0, 256 }
  0x87   : > { %p1022_p4 = scmp.lt.u32.totalorder %s1431_s14, %s1625_s0  ;;  %p1023_p6 = scmp.lt.u32.totalorder %s1021_s19, %s1016_s2 }
  0x88   : > { %p1019_p9 = pnand %p1018_p7, %p1017_p8  ;;  %p1025_p10 = scmp.lt.u32.totalorder %s1016_s2, %s1431_s14 }
  0x89   : > { %p1024_p3 = por %p1023_p6, %p1022_p4 }
  0x8a   : > { %p1020_p1 = pneg %p1019_p9 }
  0x8b   : > { %p1026_p13 = por %p1025_p10, %p1024_p3 }
  0x8d   : > { %p1027_p2 = pnand %p1026_p13, %p1020_p1 }
  0x8f   : > { %1030 = shalt.err (!%p1027_p2)
}
  0x90   : > { %s1031_s10 = scalar_lea.vmem %s1439_s13, 128  ;;  %s1204_s18 = smov [#allocation2]  }
  0x91   : > { %p1032_p8 = scmp.ne.s32.totalorder %s1439_s13, %s1031_s10  ;;  %s1036_s16 = sshll.u32 %s1204_s18, 4  ;;  %s1037_s16 = int_to_ptr.vmem [resolvable:$false] %s1036_s16 }
  0x92   : > { %s1038_s15 = scalar_lea.vmem %s1037_s16, 256  ;;  %p1039_p12 = scmp.lt.s32.totalorder %s1439_s13, %s1037_s16 }
  0x93   : > { %p1034_p9 = pnand %p1032_p8, %p1018_p7  ;;  %p1040_p4 = scmp.lt.s32.totalorder %s1038_s15, %s1031_s10 }
  0x95   : > { %p1035_p0 = pneg %p1034_p9  ;;  %p1041_p6 = por %p1040_p4, %p1039_p12 }
  0x97   : > { %p1042_p3 = pnand %p1041_p6, %p1035_p0 }
  0x99   : > { %1045 = shalt.err (!%p1042_p3)
}
  0x9a   : > { %821 = dma.hbm_to_vmem [thread:$0]  (!%p1435_p5), %s1431_s14, 128, %s1439_s13, %s302_s1  }
  0x9b   : > { %p1650_p1 = scmp.ne.s32.totalorder %s1639_s8, 0 }
  0x9c   : > { %s1469_s2 = sand.u32 (!%p1650_p1), 1, %s1180_s25  }
  0x9d   : > { %322 = sbr.rel (%p1650_p1) target bundleno = 856 (0x358), region = 40  ;;  %s746_s19 = sshll.u32 (!%p1650_p1), %s1469_s2, 3 }
  0x9e   : > { %s325_s12 = scalar_lea.sflag (!%p1650_p1), [#allocation3], %s1469_s2  ;;  %s328_s11 = scalar_lea.vmem (!%p1650_p1), [#allocation2], %s746_s19 }
  0xa4   : > { %1155 = dma.done.wait (%p1408_p11), %s325_s12, 128  }
  0xa5   : > { %1157 = vsyncadd (%p1408_p11), %s325_s12, 4294967168  ;;  %p1651_p12 = scmp.eq.s32.totalorder %s1283_s30, 0 }
  0xa7   : > { %1159 = dma.done.wait (%p1651_p12), [#allocation6], 32   ;;  %p1652_p0 = pmov %p1651_p12 }
  0xa9   : > { %1161 = vsyncadd (%p1652_p0), [#allocation6], 4294967264  ;;  %p1653_p5 = pmov %p1652_p0 }
  0xaa   : > { %p1654_p7 = pmov %p1652_p0 }
  0xab   : > { %1163 = dma.done.wait (%p1653_p5), [#allocation9], 272  }
  0xac   : > { %1165 = vsyncadd (%p1654_p7), [#allocation9], 4294967024  ;;  %vm389_vm0 = vcmask 261120   ;;  %v386_v0 = vld [vmem:[%s328_s11] sm:$0xff]  ;;  %v900_v7 = vld [vmem:[#allocation8] sm:$0xff]   ;;  %v1205_v8 = vmov 0.0  }
  0xad   : > { %v390_v1 = vsel %vm389_vm0, %v386_v0, 0.0  ;;  %773 = vmatprep.subr.bf16.mxu0 %v1205_v8  ;;  %v901_v9 = vld [vmem:[#allocation8 + $0x8] sm:$0xff]   ;;  %vm1206_vm1 = vmmov 0   ;;  %v754_v14 = vld [vmem:[#allocation5] ss:$0 sm:$0xff]  ;;  %s1489_s1 = sshll.u32 %s1469_s2, 2 }
  0xae   : > { %391 = vadd.xlane.f32.xlu0 %v390_v1  ;;  %774 = vmatpush3.bf16.msra.mxu0 %v900_v7  ;;  %v755_v16 = vld [vmem:[#allocation7] ss:$0 sm:$0xff]  ;;  %v756_v20 = vld [vmem:[#allocation10] ss:$0 sm:$0xff]  ;;  %s1492_s8 = sshll.u32 %s1188_s27, 6  ;;  %s370_s21 = scalar_lea.vmem [#allocation11], %s1489_s1 }
  0xaf   : > { %777 = vmatprep.mubr.msk.bf16.mxu0 %vm1206_vm1, %v1205_v8  ;;  %775 = vmatprep.subr.bf16.mxu0 %v1205_v8  ;;  %s526_s20 = sshll.u32 %s370_s21, 4  ;;  %vm487_vm2 = vcmask 257024   ;;  %s1207_s14 = smov 96   ;;  %s1501_s20 = int_to_ptr.vmem [resolvable:$true] %s526_s20 }
  0xb0   : > { %s1499_s18 = scalar_lea.hbm %s1630_s5, %s1492_s8  ;;  %s502_s27 = scalar_lea.sflag [#allocation4], %s1469_s2 }
  0xb1   : > { %s1046_s16 = scalar_lea.vmem %s1501_s20, 64  ;;  %p1655_p10 = scmp.ne.s32.totalorder %s1647_s22, 0 }
  0xb2   : > { %776 = vmatpush3.bf16.msra.mxu0 %v901_v9  ;;  %p1047_p11 = scmp.ne.s32.totalorder %s1501_s20, %s1046_s16  ;;  %s1208_s15 = smov [#allocation11]  }
  0xb3   : > { %s1050_s19 = sshll.u32 %s1208_s15, 4  ;;  %s1051_s19 = int_to_ptr.vmem [resolvable:$false] %s1050_s19 }
  0xb4   : > { %p1048_p13 = pnand %p1047_p11, %p1655_p10  ;;  %s1052_s12 = scalar_lea.vmem %s1051_s19, 128 }
  0xb5   : > { %p1053_p8 = scmp.lt.s32.totalorder %s1501_s20, %s1051_s19  ;;  %p1054_p9 = scmp.lt.s32.totalorder %s1052_s12, %s1046_s16 }
  0xb6   : > { %p1049_p2 = pneg %p1048_p13 }
  0xb7   : > { %p1055_p4 = por %p1054_p9, %p1053_p8 }
  0xb9   : > { %p1056_p6 = pnand %p1055_p4, %p1049_p2 }
 0x13b   : > { %v392_v2 = vpop.xlane.xlu0 %391 }
 0x13c   : > { %v394_v3 = vmul.f32 0.03125, %v392_v2 }
 0x13e   : > { %v395_v4 = vsub.f32 %v386_v0, %v394_v3 }
 0x140   : > { %v396_v5 = vmul.f32 %v395_v4, %v395_v4 }
 0x142   : > { %v397_v6 = vsel %vm389_vm0, %v396_v5, 0.0 }
 0x143   : > { %398 = vadd.xlane.f32.xlu0 %v397_v6 }
 0x1d0   : > { %v399_v10 = vpop.xlane.xlu0 %398 }
 0x1d1   : > { %v400_v11 = vmul.f32 0.03125, %v399_v10 }
 0x1d3   : > { %v401_v12 = vadd.f32 1e-05, %v400_v11 }
 0x1d5   : > { %902 = vrsqrt.f32 %v401_v12 }
 0x1df   : > { %v903_v13 = vpop.eup %902 }
 0x1e0   : > { %v403_v15 = vmul.f32 %v903_v13, %v395_v4 }
 0x1e2   : > { %v410_v17 = vmul.f32 %v754_v14, %v403_v15 }
 0x1e4   : > { %v417_v18 = vadd.f32 %v755_v16, %v410_v17 }
 0x1e6   : > { %v418_v19 = vpack.c.bf16 %v417_v18, %v417_v18 }
 0x1e8   : > { %778 = vmatmul.mubr.msk.bf16.vlgmr.msra.gmra.mrb[0].mxu0 %vm389_vm0, %v418_v19 }
 0x2bb   : > { %v479_v21 = vpop.f32.mrb[0].mxu0 }
 0x2bc   : > { %v480_v22 = vadd.f32 %v756_v20, %v479_v21  ;;  %v779_v23 = vpop.f32.mrb[1].mxu0 }
 0x2bd   : > { %v482_v24 = vpop.f32.mrb[2].mxu0 }
 0x2be   : > { %v485_v25 = vmul.f32 0.35355338, %v480_v22  ;;  %v780_v26 = vpop.f32.mrb[3].mxu0  ;;  %v769_v27 = vpack.c.bf16 %v480_v22, %v480_v22 }
 0x2c0   : > { %v486_v28 = vpack.c.bf16 %v485_v25, %v485_v25  ;;  %493 = vrot.lane.b32.xlu1 %v769_v27, %s1207_s14 }
 0x2c2   : > { %488 = vst.msk [vmem:[%s370_s21] sm:$0xf] %vm487_vm2, %v486_v28 }
 0x2c3   : > { %1059 = shalt.err (!%p1056_p6)
}
 0x2c4   : > { %s1060_s2 = scalar_lea.hbm %s1499_s18, 64  ;;  %s1064_s14 = scalar_lea.hbm %s1630_s5, 128 }
 0x2c5   : > { %p1061_p3 = scmp.ne.s32.totalorder %s1499_s18, %s1060_s2  ;;  %p1065_p0 = scmp.lt.u32.totalorder %s1499_s18, %s1630_s5 }
 0x2c6   : > { %p1066_p5 = scmp.lt.u32.totalorder %s1064_s14, %s1060_s2  ;;  %p1068_p11 = scmp.lt.u32.totalorder %s1060_s2, %s1499_s18 }
 0x2c7   : > { %p1062_p1 = pnand %p1061_p3, %p1655_p10 }
 0x2c8   : > { %p1067_p7 = por %p1066_p5, %p1065_p0 }
 0x2c9   : > { %p1063_p12 = pneg %p1062_p1 }
 0x2ca   : > { %p1069_p13 = por %p1068_p11, %p1067_p7 }
 0x2cc   : > { %p1070_p2 = pnand %p1069_p13, %p1063_p12 }
 0x2ce   : > { %1073 = shalt.err (!%p1070_p2)
}
 0x2cf   : > { %799 = dma.vmem_to_hbm [thread:$0]  (%p1655_p10), %s1501_s20, 64, %s1499_s18, %s502_s27  }
 0x2d0   : > { %s1209_s16 = smov 64   ;;  %s506_s15 = sand.u32 1, %s1283_s30  }
 0x2d1   : > { %497 = vrot.lane.b32.xlu1 %v769_v27, %s1209_s16  ;;  %s377_s19 = scalar_lea.vmem [#allocation12], %s1489_s1  ;;  %s1532_s21 = scalar_lea.hbm %s1631_s6, %s1492_s8 }
 0x2d2   : > { %s540_s12 = sshll.u32 %s377_s19, 4  ;;  %s384_s14 = scalar_lea.vmem [#allocation14], %s1489_s1  ;;  %s1534_s12 = int_to_ptr.vmem [resolvable:$true] %s540_s12 }
 0x2d3   : > { %s1539_s13 = sshll.u32 %s384_s14, 4  ;;  %s1542_s30 = scalar_lea.sflag [#allocation13], %s506_s15  ;;  %s1573_s13 = int_to_ptr.vmem [resolvable:$true] %s1539_s13 }
 0x2d4   : > { %s1074_s20 = scalar_lea.vmem %s1534_s12, 64  ;;  %s1210_s18 = smov [#allocation12]  }
 0x2d5   : > { %p1075_p8 = scmp.ne.s32.totalorder %s1534_s12, %s1074_s20  ;;  %s1078_s27 = sshll.u32 %s1210_s18, 4  ;;  %s1079_s27 = int_to_ptr.vmem [resolvable:$false] %s1078_s27 }
 0x2d6   : > { %s1080_s10 = scalar_lea.vmem %s1079_s27, 128  ;;  %p1081_p6 = scmp.lt.s32.totalorder %s1534_s12, %s1079_s27 }
 0x2d7   : > { %p1076_p9 = pnand %p1075_p8, %p1655_p10  ;;  %p1082_p3 = scmp.lt.s32.totalorder %s1080_s10, %s1074_s20 }
 0x2d9   : > { %p1077_p4 = pneg %p1076_p9  ;;  %p1083_p1 = por %p1082_p3, %p1081_p6 }
 0x2db   : > { %p1084_p12 = pnand %p1083_p1, %p1077_p4 }
 0x332   : > { %v494_v29 = vpop.permute.xlu1 %493 }
 0x333   : > { %496 = vst.msk [vmem:[%s377_s19] sm:$0xf] %vm487_vm2, %v494_v29 }
 0x334   : > { %1087 = shalt.err (!%p1084_p12)
}
 0x335   : > { %s1088_s16 = scalar_lea.hbm %s1532_s21, 64  ;;  %s1092_s2 = scalar_lea.hbm %s1631_s6, 128 }
 0x336   : > { %p1089_p0 = scmp.ne.s32.totalorder %s1532_s21, %s1088_s16  ;;  %p1093_p11 = scmp.lt.u32.totalorder %s1532_s21, %s1631_s6 }
 0x337   : > { %p1094_p13 = scmp.lt.u32.totalorder %s1092_s2, %s1088_s16  ;;  %p1096_p8 = scmp.lt.u32.totalorder %s1088_s16, %s1532_s21 }
 0x338   : > { %p1090_p5 = pnand %p1089_p0, %p1655_p10 }
 0x339   : > { %p1095_p2 = por %p1094_p13, %p1093_p11 }
 0x33a   : > { %p1091_p7 = pneg %p1090_p5 }
 0x33b   : > { %p1097_p9 = por %p1096_p8, %p1095_p2 }
 0x33d   : > { %p1098_p4 = pnand %p1097_p9, %p1091_p7 }
 0x33f   : > { %1101 = shalt.err (!%p1098_p4)
}
 0x340   : > { %800 = dma.vmem_to_hbm [thread:$0]  (%p1655_p10), %s1534_s12, 64, %s1532_s21, %s1542_s30  }
 0x341   : > { %s1570_s10 = scalar_lea.hbm %s1632_s7, %s1492_s8  ;;  %s1102_s16 = scalar_lea.vmem %s1573_s13, 64 }
 0x342   : > { %p1103_p6 = scmp.ne.s32.totalorder %s1573_s13, %s1102_s16  ;;  %s1211_s12 = smov [#allocation14]  }
 0x343   : > { %v498_v30 = vpop.permute.xlu1 %497  ;;  %s1106_s21 = sshll.u32 %s1211_s12, 4  ;;  %s1107_s21 = int_to_ptr.vmem [resolvable:$false] %s1106_s21 }
 0x344   : > { %500 = vst.msk [vmem:[%s384_s14] sm:$0xf] %vm487_vm2, %v498_v30  ;;  %p1104_p3 = pnand %p1103_p6, %p1655_p10  ;;  %s1108_s15 = scalar_lea.vmem %s1107_s21, 128 }
 0x345   : > { %p1109_p12 = scmp.lt.s32.totalorder %s1573_s13, %s1107_s21  ;;  %p1110_p0 = scmp.lt.s32.totalorder %s1108_s15, %s1102_s16 }
 0x346   : > { %p1105_p1 = pneg %p1104_p3 }
 0x347   : > { %p1111_p5 = por %p1110_p0, %p1109_p12 }
 0x349   : > { %p1112_p7 = pnand %p1111_p5, %p1105_p1 }
 0x34b   : > { %1115 = shalt.err (!%p1112_p7)
}
 0x34c   : > { %s1116_s1 = scalar_lea.hbm %s1570_s10, 64  ;;  %s1120_s19 = scalar_lea.hbm %s1632_s7, 128 }
 0x34d   : > { %p1117_p11 = scmp.ne.s32.totalorder %s1570_s10, %s1116_s1  ;;  %p1121_p8 = scmp.lt.u32.totalorder %s1570_s10, %s1632_s7 }
 0x34e   : > { %p1122_p9 = scmp.lt.u32.totalorder %s1120_s19, %s1116_s1  ;;  %p1124_p6 = scmp.lt.u32.totalorder %s1116_s1, %s1570_s10 }
 0x34f   : > { %p1118_p13 = pnand %p1117_p11, %p1655_p10 }
 0x350   : > { %p1123_p4 = por %p1122_p9, %p1121_p8 }
 0x351   : > { %p1119_p2 = pneg %p1118_p13 }
 0x352   : > { %p1125_p3 = por %p1124_p6, %p1123_p4 }
 0x354   : > { %p1126_p1 = pnand %p1125_p3, %p1119_p2 }
 0x356   : > { %1129 = shalt.err (!%p1126_p1)
}
 0x357   : > { %801 = dma.vmem_to_hbm [thread:$0]  (%p1655_p10), %s1573_s13, 64, %s1570_s10, %s1542_s30  }
 0x358 PF: > { %s566_s18 = sand.u32 1, %s1176_s24   ;;  %p1656_p12 = scmp.ne.s32.totalorder %s1648_s9, 0 }
 0x359   : > { %p1657_p0 = scmp.ge.s32.totalorder %s1196_s29, 2  ;;  %s567_s20 = scalar_lea.sflag [#allocation4], %s566_s18 }
 0x35b   : > { %p823_p5 = pnand %p1657_p0, %p1656_p12 }
 0x35d   : > { %1167 = dma.done.wait (!%p823_p5), %s567_s20, 64  }
 0x35e   : > { %1169 = vsyncadd (!%p823_p5), %s567_s20, 4294967232  ;;  %s1658_s27 = sadd.s32 4294967294, %s1196_s29  }
 0x35f   : > { %s575_s16 = sand.u32 1, %s1658_s27  }
 0x360   : > { %s576_s12 = scalar_lea.sflag [#allocation13], %s575_s16 }
 0x361   : > { %1171 = dma.done.wait (!%p823_p5), %s576_s12, 128  }
 0x362   : > { %1173 = vsyncadd (!%p823_p5), %s576_s12, 4294967168  ;;  %s29_s29 = sadd.s32 1, %s1196_s29   ;;  %s1659_s24 = smov %s1180_s25 }
 0x363   : > { %p26_p10 = scmp.ge.s32.totalorder %s29_s29, 4   ;;  %s1660_s25 = smov %s1184_s26 }
 0x364   : > { %s1661_s26 = smov %s1419_s23  ;;  %s1662_s27 = smov %s1192_s28 }
 0x365   : > { %s1663_s28 = smov %s1665_s17  ;;  %28 = sbr.rel (!%p26_p10) target bundleno = 13 (0xd), region = 133 }
 0x36c   :  { %590 = vsyncpa [#allocation3], 1 }
 0x36d   :  { %592 = vsyncpa [#allocation3 + $0x1], 1 }
 0x36e   :  { %593 = vsyncpa [#allocation6], 1 }
 0x36f   :  { %594 = vsyncpa [#allocation9], 1 }
 0x370   :  { %595 = vsyncpa [#allocation4], 1 }
 0x371   :  { %597 = vsyncpa [#allocation4 + $0x1], 1 }
 0x372   :  { %598 = vsyncpa [#allocation13], 1 }
 0x373   :  { %600 = vsyncpa [#allocation13 + $0x1], 1 }

// kernel: transformer_block_forward.8
= control target key start
LH: loop header
LB: loop body
LE: loop exit
PB: predicated region body
PF: predicated region fallthrough
CT: control target
= control target key end

     0   :  { %s1728_s0 = inlined_call_operand.hbm [shape: f32[2,8,32], index: 0, kind: input, shape index: {}]   ;;  %s1729_s1 = inlined_call_operand.hbm [shape: f32[1,32], index: 1, kind: input, shape index: {}]   ;;  %s1730_s2 = inlined_call_operand.hbm [shape: f32[1,32], index: 2, kind: input, shape index: {}]   ;;  %s1731_s3 = inlined_call_operand.hbm [shape: bf16[32,128], index: 3, kind: input, shape index: {}]   ;;  %s1732_s4 = inlined_call_operand.hbm [shape: f32[1,128], index: 4, kind: input, shape index: {}]   ;;  %s1733_s5 = inlined_call_operand.hbm [shape: bf16[128,32], index: 5, kind: input, shape index: {}]   ;;  %s1734_s6 = inlined_call_operand.hbm [shape: f32[1,32], index: 6, kind: input, shape index: {}]   ;;  %s1735_s7 = inlined_call_operand.hbm [shape: f32[2,8,32], index: 7, kind: output, shape index: {}]  }
   0x1   :  { %1741 = sst [smem:[#allocation22_spill]] %s1729_s1 }
   0x2   :  { %1742 = sst [smem:[#allocation23_spill]] %s1731_s3 }
   0x3   :  { %12 = vsyncpa [#allocation5], 0 }
   0x4   :  { %14 = vsyncpa [#allocation5 + $0x1], 0 }
   0x5   :  { %15 = vsyncpa [#allocation8], 0 }
   0x6   :  { %16 = vsyncpa [#allocation11], 0 }
   0x7   :  { %17 = vsyncpa [#allocation14], 0 }
   0x8   :  { %18 = vsyncpa [#allocation6], 0 }
   0x9   :  { %20 = vsyncpa [#allocation6 + $0x1], 0  ;;  %s1385_s24 = smov 0   ;;  %s1387_s25 = smov 0  }
   0xa   :  { %s1389_s26 = smov 0   ;;  %s1391_s27 = smov 0  }
   0xb   :  { %s1393_s28 = smov 0   ;;  %s1395_s29 = smov 0  }
   0xc LB: > { %s1739_s30 = sadd.s32 4294967295, %s1331_s29   ;;  %p820_p0 = scmp.ge.s32.totalorder %s1331_s29, 1  ;;  %s1331_s29 = sphi %s1395_s29, %s26_s29   ;;  %s1327_s28 = sphi %s1393_s28, %s1765_s28   ;;  %s1323_s27 = sphi %s1391_s27, %s1764_s27   ;;  %s1319_s26 = sphi %s1389_s26, %s1763_s26   ;;  %s1315_s25 = sphi %s1387_s25, %s1762_s25   ;;  %s1311_s24 = sphi %s1385_s24, %s1761_s24  }
   0xd   : > { %p1419_p1 = scmp.eq.s32.totalorder %s1739_s30, 0  ;;  %p247_p2 = scmp.lt.s32.totalorder %s1331_s29, 3 }
   0xe   : > { %s1333_s10 = smov [#allocation7]   ;;  %s1334_s12 = smov [#allocation10]  }
   0xf   : > { %s1743_s8 = scalar_select %p1419_p1, 1, 0 }
  0x10   : > { %p1424_p3 = pnand %p820_p0, %p247_p2  ;;  %s260_s11 = sshll.u32 %s1333_s10, 4  ;;  %s261_s11 = int_to_ptr.vmem [resolvable:$true] %s260_s11 }
  0x11   : > { %s283_s13 = sshll.u32 %s1334_s12, 4  ;;  %s1335_s15 = smov [#allocation13]   ;;  %s1437_s13 = int_to_ptr.vmem [resolvable:$true] %s283_s13 }
  0x12   : > { %s1744_s9 = scalar_select %p1424_p3, 1, 0 }
  0x13   : > { %p926_p5 = pneg %p1424_p3  ;;  %s1439_s16 = sshll.u32 %s1335_s15, 4  ;;  %s313_s16 = int_to_ptr.vmem [resolvable:$true] %s1439_s16 }
  0x14   : > { %s1746_s1 = sld [smem:[#allocation22_spill]] }
  0x15   : > { %p1433_p6 = pnand %p926_p5, %p1419_p1 }
  0x17   : > { %p1449_p8 = pneg %p1433_p6 }
  0x1a   : > { %s1039_s19 = scalar_lea.hbm %s1746_s1, 16 }
  0x1b   : > { %p1040_p7 = scmp.ne.s32.totalorder %s1746_s1, %s1039_s19  ;;  %p1046_p11 = scmp.lt.u32.totalorder %s1039_s19, %s1746_s1 }
  0x1d   : > { %p1042_p9 = pnand %p1449_p8, %p1040_p7 }
  0x1f   : > { %p1043_p10 = pneg %p1042_p9 }
  0x21   : > { %p1048_p12 = pnand %p1046_p11, %p1043_p10 }
  0x23   : > { %1051 = shalt.err (!%p1048_p12)
}
  0x24   : > { %s1052_s12 = scalar_lea.vmem %s261_s11, 16  ;;  %s1059_s15 = scalar_lea.vmem %s261_s11, 32 }
  0x25   : > { %p1053_p13 = scmp.ne.s32.totalorder %s261_s11, %s1052_s12  ;;  %p1060_p5 = scmp.lt.s32.totalorder %s261_s11, %s261_s11 }
  0x26   : > { %p1061_p4 = scmp.lt.s32.totalorder %s1059_s15, %s1052_s12 }
  0x27   : > { %p1055_p0 = pnand %p1053_p13, %p1449_p8 }
  0x28   : > { %p1062_p3 = por %p1061_p4, %p1060_p5 }
  0x29   : > { %p1056_p2 = pneg %p1055_p0 }
  0x2b   : > { %p1063_p1 = pnand %p1062_p3, %p1056_p2 }
  0x2d   : > { %1066 = shalt.err (!%p1063_p1)
}
  0x2e   : > { %929 = dma.hbm_to_vmem [thread:$0]  (!%p1433_p6), %s1746_s1, 16, %s261_s11, [#allocation8]  }
  0x2f   : > { %s1748_s3 = sld [smem:[#allocation23_spill]] }
  0x35   : > { %s1067_s21 = scalar_lea.hbm %s1748_s3, 256 }
  0x36   : > { %p1068_p7 = scmp.ne.s32.totalorder %s1748_s3, %s1067_s21  ;;  %p1074_p1 = scmp.lt.u32.totalorder %s1067_s21, %s1748_s3 }
  0x38   : > { %p1070_p9 = pnand %p1068_p7, %p1449_p8 }
  0x3a   : > { %p1071_p4 = pneg %p1070_p9 }
  0x3c   : > { %p1076_p3 = pnand %p1074_p1, %p1071_p4 }
  0x3e   : > { %1079 = shalt.err (!%p1076_p3)
}
  0x3f   : > { %s1080_s11 = scalar_lea.vmem %s1437_s13, 256  ;;  %p1088_p13 = scmp.lt.s32.totalorder %s1437_s13, %s1437_s13 }
  0x40   : > { %p1081_p10 = scmp.ne.s32.totalorder %s1437_s13, %s1080_s11  ;;  %p1089_p0 = scmp.lt.s32.totalorder %s1080_s11, %s1080_s11 }
  0x42   : > { %p1083_p11 = pnand %p1081_p10, %p1449_p8  ;;  %p1090_p2 = por %p1089_p0, %p1088_p13 }
  0x44   : > { %p1084_p12 = pneg %p1083_p11 }
  0x46   : > { %p1091_p5 = pnand %p1090_p2, %p1084_p12 }
  0x48   : > { %1094 = shalt.err (!%p1091_p5)
}
  0x49   : > { %s1336_s17 = smov 64   ;;  %s1337_s18 = smov 4  }
  0x4a   : > { %935 = dma.hbm_to_vmem [thread:$0]  (!%p1433_p6), %s1748_s3, 256, %s1437_s13, [#allocation11], %s1336_s17, %s1336_s17, %s1337_s18  }
  0x4b   : > { %s1095_s10 = scalar_lea.hbm %s1733_s5, 1024 }
  0x4c   : > { %p1096_p7 = scmp.ne.s32.totalorder %s1733_s5, %s1095_s10  ;;  %p1102_p1 = scmp.lt.u32.totalorder %s1095_s10, %s1733_s5 }
  0x4e   : > { %p1098_p9 = pnand %p1096_p7, %p1449_p8 }
  0x50   : > { %p1099_p4 = pneg %p1098_p9 }
  0x52   : > { %p1104_p3 = pnand %p1102_p1, %p1099_p4 }
  0x54   : > { %1107 = shalt.err (!%p1104_p3)
}
  0x55   : > { %s1108_s19 = scalar_lea.vmem %s313_s16, 1024  ;;  %p1116_p13 = scmp.lt.s32.totalorder %s313_s16, %s313_s16 }
  0x56   : > { %p1109_p10 = scmp.ne.s32.totalorder %s313_s16, %s1108_s19  ;;  %p1117_p0 = scmp.lt.s32.totalorder %s1108_s19, %s1108_s19 }
  0x58   : > { %p1111_p11 = pnand %p1109_p10, %p1449_p8  ;;  %p1118_p2 = por %p1117_p0, %p1116_p13 }
  0x5a   : > { %p1112_p12 = pneg %p1111_p11 }
  0x5c   : > { %p1119_p5 = pnand %p1118_p2, %p1112_p12 }
  0x5e   : > { %1122 = shalt.err (!%p1119_p5)
}
  0x5f   : > { %941 = dma.hbm_to_vmem [thread:$0]  (!%p1433_p6), %s1733_s5, 1024, %s313_s16, [#allocation14], %s1336_s17, %s1336_s17, %s1337_s18  }
  0x60   : > { %s1338_s30 = smov [#allocation9]   ;;  %s1339_s23 = smov [#allocation12]  }
  0x61   : > { %s271_s21 = sshll.u32 %s1338_s30, 4  ;;  %s299_s10 = sshll.u32 %s1339_s23, 4  ;;  %s272_s21 = int_to_ptr.vmem [resolvable:$true] %s271_s21  ;;  %s300_s10 = int_to_ptr.vmem [resolvable:$true] %s299_s10 }
  0x62   : > { %s1123_s11 = scalar_lea.hbm %s1730_s2, 16 }
  0x63   : > { %p1124_p7 = scmp.ne.s32.totalorder %s1730_s2, %s1123_s11  ;;  %p1130_p1 = scmp.lt.u32.totalorder %s1123_s11, %s1730_s2 }
  0x65   : > { %p1126_p9 = pnand %p1124_p7, %p1449_p8 }
  0x67   : > { %p1127_p4 = pneg %p1126_p9 }
  0x69   : > { %p1132_p3 = pnand %p1130_p1, %p1127_p4 }
  0x6b   : > { %1135 = shalt.err (!%p1132_p3)
}
  0x6c   : > { %s1136_s16 = scalar_lea.vmem %s272_s21, 16  ;;  %s1143_s17 = scalar_lea.vmem %s272_s21, 32 }
  0x6d   : > { %p1137_p10 = scmp.ne.s32.totalorder %s272_s21, %s1136_s16  ;;  %p1144_p13 = scmp.lt.s32.totalorder %s272_s21, %s272_s21 }
  0x6e   : > { %p1145_p0 = scmp.lt.s32.totalorder %s1143_s17, %s1136_s16 }
  0x6f   : > { %p1139_p11 = pnand %p1137_p10, %p1449_p8 }
  0x70   : > { %p1146_p2 = por %p1145_p0, %p1144_p13 }
  0x71   : > { %p1140_p12 = pneg %p1139_p11 }
  0x73   : > { %p1147_p5 = pnand %p1146_p2, %p1140_p12 }
  0x75   : > { %1150 = shalt.err (!%p1147_p5)
}
  0x76   : > { %932 = dma.hbm_to_vmem [thread:$0]  (!%p1433_p6), %s1730_s2, 16, %s272_s21, [#allocation8]  }
  0x77   : > { %s1151_s30 = scalar_lea.hbm %s1732_s4, 16 }
  0x78   : > { %p1152_p7 = scmp.ne.s32.totalorder %s1732_s4, %s1151_s30  ;;  %p1158_p1 = scmp.lt.u32.totalorder %s1151_s30, %s1732_s4 }
  0x7a   : > { %p1154_p9 = pnand %p1152_p7, %p1449_p8 }
  0x7c   : > { %p1155_p4 = pneg %p1154_p9 }
  0x7e   : > { %p1160_p3 = pnand %p1158_p1, %p1155_p4 }
  0x80   : > { %1163 = shalt.err (!%p1160_p3)
}
  0x81   : > { %s1164_s19 = scalar_lea.vmem %s300_s10, 16  ;;  %s1171_s21 = scalar_lea.vmem %s300_s10, 32 }
  0x82   : > { %p1165_p10 = scmp.ne.s32.totalorder %s300_s10, %s1164_s19  ;;  %p1172_p13 = scmp.lt.s32.totalorder %s300_s10, %s300_s10 }
  0x83   : > { %p1173_p0 = scmp.lt.s32.totalorder %s1171_s21, %s1164_s19 }
  0x84   : > { %p1167_p11 = pnand %p1165_p10, %p1449_p8 }
  0x85   : > { %p1174_p2 = por %p1173_p0, %p1172_p13 }
  0x86   : > { %p1168_p12 = pneg %p1167_p11 }
  0x88   : > { %p1175_p5 = pnand %p1174_p2, %p1168_p12 }
  0x8a   : > { %1178 = shalt.err (!%p1175_p5)
}
  0x8b   : > { %938 = dma.hbm_to_vmem [thread:$0]  (!%p1433_p6), %s1732_s4, 16, %s300_s10, [#allocation11]  }
  0x8c   : > { %s1340_s17 = smov [#allocation15]   ;;  %s1179_s20 = scalar_lea.hbm %s1734_s6, 16 }
  0x8d   : > { %s326_s1 = sshll.u32 %s1340_s17, 4  ;;  %p1180_p7 = scmp.ne.s32.totalorder %s1734_s6, %s1179_s20  ;;  %s327_s1 = int_to_ptr.vmem [resolvable:$true] %s326_s1 }
  0x8e   : > { %p1186_p1 = scmp.lt.u32.totalorder %s1179_s20, %s1734_s6 }
  0x8f   : > { %p1182_p9 = pnand %p1180_p7, %p1449_p8 }
  0x91   : > { %p1183_p4 = pneg %p1182_p9 }
  0x93   : > { %p1188_p3 = pnand %p1186_p1, %p1183_p4 }
  0x95   : > { %1191 = shalt.err (!%p1188_p3)
}
  0x96   : > { %s1192_s10 = scalar_lea.vmem %s327_s1, 16  ;;  %s1199_s11 = scalar_lea.vmem %s327_s1, 32 }
  0x97   : > { %p1193_p10 = scmp.ne.s32.totalorder %s327_s1, %s1192_s10  ;;  %p1200_p13 = scmp.lt.s32.totalorder %s327_s1, %s327_s1 }
  0x98   : > { %p1201_p0 = scmp.lt.s32.totalorder %s1199_s11, %s1192_s10 }
  0x99   : > { %p1195_p11 = pnand %p1193_p10, %p1449_p8 }
  0x9a   : > { %p1202_p2 = por %p1201_p0, %p1200_p13 }
  0x9b   : > { %p1196_p12 = pneg %p1195_p11 }
  0x9d   : > { %p1203_p5 = pnand %p1202_p2, %p1196_p12 }
  0x9f   : > { %1206 = shalt.err (!%p1203_p5)
}
  0xa0   : > { %944 = dma.hbm_to_vmem [thread:$0]  (!%p1433_p6), %s1734_s6, 16, %s327_s1, [#allocation14]  }
  0xa1   : > { %s819_s22 = sadd.s32 4294967294, %s1331_s29   ;;  %s45_s13 = sadd.s32 1, %s1327_s28 }
  0xa2   : > { %p47_p8 = scmp.ge.s32.totalorder %s45_s13, 2  ;;  %s54_s14 = sadd.s32 1, %s1319_s26 }
  0xa3   : > { %p61_p7 = scmp.ne.s32.totalorder %s1319_s26, %s1315_s25  ;;  %p62_p9 = scmp.eq.s32.totalorder %s1331_s29, 0 }
  0xa4   : > { %s1767_s13 = smov (%p47_p8, %s45_s13), 0  ;;  %p67_p1 = scmp.ne.s32.totalorder %s1315_s25, %s1311_s24 }
  0xa5   : > { %p1569_p4 = por %p62_p9, %p61_p7  ;;  %s49_s17 = ssub.s32 %s1327_s28, %s1767_s13 }
  0xa6   : > { %s1750_s1 = sadd.s32 4294967295, %s1331_s29   ;;  %p52_p3 = scmp.eq.s32.totalorder %s49_s17, 0 }
  0xa7   : > { %p234_p6 = scmp.eq.s32.totalorder %s1750_s1, 1  ;;  %p1751_p10 = scmp.ne.s32.totalorder %s1743_s8, 0 }
  0xa8   : > { %p240_p13 = scmp.eq.s32.totalorder %s819_s22, 1  ;;  %p959_p2 = scmp.lt.s32.totalorder %s1331_s29, 2 }
  0xa9   : > { %p1581_p11 = por %p1751_p10, %p67_p1  ;;  %p1585_p12 = por %p234_p6, %p61_p7 }
  0xaa   : > { %s1590_s20 = scalar_select %p52_p3, %s1319_s26, %s54_s14  }
  0xab   : > { %s1753_s3 = scalar_select %p1585_p12, 1, 0 }
  0xac   : > { %p1592_p0 = por %p240_p13, %p67_p1  ;;  %s337_s23 = sand.u32 1, %s1319_s26  }
  0xad   : > { %s829_s12 = sshll.u32 %s1327_s28, 7  ;;  %s828_s15 = sshll.u32 %s337_s23, 3 }
  0xae   : > { %s1754_s30 = scalar_select %p1592_p0, 1, 0 }
  0xaf   : > { %s1602_s19 = scalar_lea.hbm %s1728_s0, %s829_s12  ;;  %s341_s21 = scalar_lea.vmem [#allocation4], %s828_s15 }
  0xb0   : > { %s349_s22 = sshll.u32 %s341_s21, 4  ;;  %p1606_p5 = pnand %p959_p2, %p1569_p4  ;;  %s1610_s22 = int_to_ptr.vmem [resolvable:$true] %s349_s22 }
  0xb1   : > { %s338_s17 = scalar_lea.sflag [#allocation5], %s337_s23  ;;  %s1207_s1 = scalar_lea.hbm %s1602_s19, 128 }
  0xb2   : > { %p1208_p8 = scmp.ne.s32.totalorder %s1602_s19, %s1207_s1  ;;  %p1209_p7 = pneg %p1606_p5 }
  0xb3   : > { %s1212_s16 = scalar_lea.hbm %s1728_s0, 256  ;;  %p1213_p4 = scmp.lt.u32.totalorder %s1602_s19, %s1728_s0 }
  0xb4   : > { %p1210_p9 = pnand %p1209_p7, %p1208_p8  ;;  %p1214_p6 = scmp.lt.u32.totalorder %s1212_s16, %s1207_s1 }
  0xb5   : > { %p1216_p10 = scmp.lt.u32.totalorder %s1207_s1, %s1602_s19 }
  0xb6   : > { %p1211_p1 = pneg %p1210_p9  ;;  %p1215_p3 = por %p1214_p6, %p1213_p4 }
  0xb8   : > { %p1217_p13 = por %p1216_p10, %p1215_p3 }
  0xba   : > { %p1218_p2 = pnand %p1217_p13, %p1211_p1 }
  0xbc   : > { %1221 = shalt.err (!%p1218_p2)
}
  0xbd   : > { %s1222_s23 = scalar_lea.vmem %s1610_s22, 128  ;;  %s1341_s21 = smov [#allocation4]  }
  0xbe   : > { %p1223_p8 = scmp.ne.s32.totalorder %s1610_s22, %s1222_s23  ;;  %s1227_s12 = sshll.u32 %s1341_s21, 4  ;;  %s1228_s12 = int_to_ptr.vmem [resolvable:$false] %s1227_s12 }
  0xbf   : > { %s1229_s15 = scalar_lea.vmem %s1228_s12, 256  ;;  %p1230_p12 = scmp.lt.s32.totalorder %s1610_s22, %s1228_s12 }
  0xc0   : > { %p1225_p9 = pnand %p1223_p8, %p1209_p7  ;;  %p1231_p4 = scmp.lt.s32.totalorder %s1229_s15, %s1222_s23 }
  0xc2   : > { %p1226_p0 = pneg %p1225_p9  ;;  %p1232_p6 = por %p1231_p4, %p1230_p12 }
  0xc4   : > { %p1233_p3 = pnand %p1232_p6, %p1226_p0 }
  0xc6   : > { %1236 = shalt.err (!%p1233_p3)
}
  0xc7   : > { %948 = dma.hbm_to_vmem [thread:$0]  (!%p1606_p5), %s1602_s19, 128, %s1610_s22, %s338_s17  }
  0xc8   : > { %p1756_p1 = scmp.ne.s32.totalorder %s1744_s9, 0 }
  0xc9   : > { %s1640_s1 = sand.u32 (!%p1756_p1), 1, %s1315_s25  }
  0xca   : > { %358 = sbr.rel (%p1756_p1) target bundleno = 1014 (0x3f6), region = 48  ;;  %s831_s16 = sshll.u32 (!%p1756_p1), %s1640_s1, 3 }
  0xcb   : > { %s361_s10 = scalar_lea.sflag (!%p1756_p1), [#allocation5], %s1640_s1  ;;  %s364_s11 = scalar_lea.vmem (!%p1756_p1), [#allocation4], %s831_s16 }
  0xd1   : > { %1290 = dma.done.wait (%p1581_p11), %s361_s10, 128  }
  0xd2   : > { %1292 = vsyncadd (%p1581_p11), %s361_s10, 4294967168  ;;  %p1757_p12 = scmp.ne.s32.totalorder %s1743_s8, 0 }
  0xd4   : > { %1294 = dma.done.wait (%p1757_p12), [#allocation8], 32  }
  0xd5   : > { %1296 = vsyncadd (%p1757_p12), [#allocation8], 4294967264 }
  0xd6   : > { %1298 = dma.done.wait (%p1757_p12), [#allocation11], 272  }
  0xd7   : > { %1300 = vsyncadd (%p1757_p12), [#allocation11], 4294967024 }
  0xd8   : > { %1302 = dma.done.wait (%p1757_p12), [#allocation14], 1040  }
  0xd9   : > { %1304 = vsyncadd (%p1757_p12), [#allocation14], 4294966256  ;;  %vm428_vm0 = vcmask 261120   ;;  %v1662_v0 = vld [vmem:[%s364_s11] sm:$0xff]  ;;  %v1025_v7 = vld [vmem:[#allocation10] sm:$0xff]   ;;  %v1342_v8 = vmov 0.0  }
  0xda   : > { %v429_v1 = vsel %vm428_vm0, %v1662_v0, 0.0  ;;  %870 = vmatprep.subr.bf16.mxu0 %v1342_v8  ;;  %460 = vst.msk [vmem:[#allocation3] sm:$0xff] %vm428_vm0, %v1342_v8  ;;  %878 = vmatprep.subr.bf16.mxu1 %v1342_v8  ;;  %v1026_v9 = vld [vmem:[#allocation10 + $0x8] sm:$0xff]   ;;  %vm1343_vm1 = vmmov 0   ;;  %v1027_v10 = vld [vmem:[#allocation13] sm:$0xff]   ;;  %v1028_v11 = vld [vmem:[#allocation13 + $0x8] sm:$0xff]  }
  0xdb   : > { %430 = vadd.xlane.f32.xlu0 %v429_v1  ;;  %871 = vmatpush3.bf16.msra.mxu0 %v1025_v7  ;;  %v1029_v12 = vld [vmem:[#allocation13 + $0x10] sm:$0xff]   ;;  %v839_v17 = vld [vmem:[#allocation7] ss:$0 sm:$0xff]  ;;  %v840_v19 = vld [vmem:[#allocation9] ss:$0 sm:$0xff]  ;;  %vm458_vm2 = vcmask 257024  }
  0xdc   : > { %874 = vmatprep.mubr.msk.bf16.mxu0 %vm1343_vm1, %v1342_v8  ;;  %872 = vmatprep.subr.bf16.mxu0 %v1342_v8  ;;  %v1030_v24 = vld [vmem:[#allocation13 + $0x18] sm:$0xff]   ;;  %v1031_v25 = vld [vmem:[#allocation13 + $0x20] sm:$0xff]   ;;  %v1032_v26 = vld [vmem:[#allocation13 + $0x28] sm:$0xff]   ;;  %s855_s8 = sshll.u32 %s1323_s27, 7  ;;  %s418_s9 = scalar_lea.vmem [#allocation16], %s831_s16 }
  0xdd   : > { %894 = vmatprep.mubr.msk.bf16.mxu1 %vm1343_vm1, %v1342_v8  ;;  %879 = vmatpush3.bf16.msra.mxu1 %v1027_v10  ;;  %v1033_v27 = vld [vmem:[#allocation13 + $0x30] sm:$0xff]   ;;  %v1034_v28 = vld [vmem:[#allocation13 + $0x38] sm:$0xff]   ;;  %v853_v48 = vld [vmem:[#allocation15] ss:$0 sm:$0xff]  ;;  %s672_s18 = sshll.u32 %s418_s9, 4  ;;  %s1678_s14 = scalar_lea.hbm %s1735_s7, %s855_s8  ;;  %s1680_s18 = int_to_ptr.vmem [resolvable:$true] %s672_s18 }
  0xde   : > { %880 = vmatprep.subr.bf16.mxu1 %v1342_v8  ;;  %v841_v29 = vld [vmem:[#allocation12] ss:$0 sm:$0xff]  ;;  %s658_s17 = scalar_lea.sflag [#allocation6], %s1640_s1  ;;  %s1237_s27 = scalar_lea.vmem %s1680_s18, 128 }
  0xdf   : > { %873 = vmatpush3.bf16.msra.mxu0 %v1026_v9  ;;  %p1238_p11 = scmp.ne.s32.totalorder %s1680_s18, %s1237_s27  ;;  %p1758_p0 = scmp.ne.s32.totalorder %s1753_s3, 0 }
  0xe0   : > { %s1344_s23 = smov [#allocation16]  }
  0xe1   : > { %881 = vmatpush3.bf16.msra.mxu1 %v1028_v11  ;;  %v534_v41 = vld [vmem:[#allocation3] sm:$0xff]  ;;  %p1239_p5 = pnand %p1238_p11, %p1758_p0  ;;  %s1241_s21 = sshll.u32 %s1344_s23, 4  ;;  %s1242_s21 = int_to_ptr.vmem [resolvable:$false] %s1241_s21 }
  0xe2   : > { %882 = vmatprep.subr.bf16.mxu1 %v1342_v8  ;;  %s1243_s12 = scalar_lea.vmem %s1242_s21, 256  ;;  %p1244_p10 = scmp.lt.s32.totalorder %s1680_s18, %s1242_s21 }
  0xe3   : > { %p1240_p7 = pneg %p1239_p5  ;;  %p1245_p13 = scmp.lt.s32.totalorder %s1243_s12, %s1237_s27 }
  0xe5   : > { %883 = vmatpush3.bf16.msra.mxu1 %v1029_v12  ;;  %p1246_p2 = por %p1245_p13, %p1244_p10 }
  0xe6   : > { %884 = vmatprep.subr.bf16.mxu1 %v1342_v8 }
  0xe7   : > { %p1247_p8 = pnand %p1246_p2, %p1240_p7 }
  0xe9   : > { %885 = vmatpush3.bf16.msra.mxu1 %v1030_v24 }
  0xea   : > { %886 = vmatprep.subr.bf16.mxu1 %v1342_v8 }
  0xed   : > { %887 = vmatpush3.bf16.msra.mxu1 %v1031_v25 }
  0xee   : > { %888 = vmatprep.subr.bf16.mxu1 %v1342_v8 }
  0xf1   : > { %889 = vmatpush3.bf16.msra.mxu1 %v1032_v26 }
  0xf2   : > { %890 = vmatprep.subr.bf16.mxu1 %v1342_v8 }
  0xf5   : > { %891 = vmatpush3.bf16.msra.mxu1 %v1033_v27 }
  0xf6   : > { %892 = vmatprep.subr.bf16.mxu1 %v1342_v8 }
  0xf9   : > { %893 = vmatpush3.bf16.msra.mxu1 %v1034_v28 }
 0x168   : > { %v431_v2 = vpop.xlane.xlu0 %430 }
 0x169   : > { %v433_v3 = vmul.f32 0.03125, %v431_v2 }
 0x16b   : > { %v434_v4 = vsub.f32 %v1662_v0, %v433_v3 }
 0x16d   : > { %v435_v5 = vmul.f32 %v434_v4, %v434_v4 }
 0x16f   : > { %v436_v6 = vsel %vm428_vm0, %v435_v5, 0.0 }
 0x170   : > { %437 = vadd.xlane.f32.xlu0 %v436_v6 }
 0x1fd   : > { %v438_v13 = vpop.xlane.xlu0 %437 }
 0x1fe   : > { %v439_v14 = vmul.f32 0.03125, %v438_v13 }
 0x200   : > { %v440_v15 = vadd.f32 1e-05, %v439_v14 }
 0x202   : > { %1035 = vrsqrt.f32 %v440_v15 }
 0x20c   : > { %v1036_v16 = vpop.eup %1035 }
 0x20d   : > { %v442_v18 = vmul.f32 %v1036_v16, %v434_v4 }
 0x20f   : > { %v449_v20 = vmul.f32 %v839_v17, %v442_v18 }
 0x211   : > { %v456_v21 = vadd.f32 %v840_v19, %v449_v20 }
 0x213   : > { %v457_v22 = vpack.c.bf16 %v456_v21, %v456_v21 }
 0x215   : > { %459 = vst.msk [vmem:[#allocation2] sm:$0xf] %vm458_vm2, %v457_v22 }
 0x21c   : > { %v461_v23 = vld [vmem:[#allocation2] sm:$0xf] }
 0x21d   : > { %875 = vmatmul.mubr.msk.bf16.vlgmr.msra.gmra.mrb[0].mxu0 %vm428_vm0, %v461_v23 }
 0x2f0   : > { %v523_v30 = vpop.f32.mrb[0].mxu0 }
 0x2f1   : > { %v524_v31 = vadd.f32 %v841_v29, %v523_v30  ;;  %v876_v32 = vpop.f32.mrb[1].mxu0 }
 0x2f2   : > { %v526_v33 = vpop.f32.mrb[2].mxu0 }
 0x2f3   : > { %v530_v34 = vmul.f32 0.70710677, %v524_v31  ;;  %v877_v35 = vpop.f32.mrb[3].mxu0  ;;  %v529_v37 = vmul.f32 0.5, %v524_v31 }
 0x2f5   : > { %1037 = verf.f32 %v530_v34 }
 0x2ff   : > { %v1038_v36 = vpop.eup %1037 }
 0x300   : > { %v532_v38 = vadd.f32 1.0, %v1038_v36 }
 0x302   : > { %v533_v39 = vmul.f32 %v532_v38, %v529_v37 }
 0x304   : > { %v535_v40 = vpack.c.bf16 %v533_v39, %v533_v39 }
 0x306   : > { %895 = vmatmul.mubr.bf16.vlgmr.msra.gmra.mrb[0].mxu1 %v535_v40 }
 0x3d9   : > { %v634_v42 = vpop.f32.mrb[0].mxu1 }
 0x3da   : > { %v640_v43 = vadd.f32 %v634_v42, %v534_v41  ;;  %v896_v44 = vpop.f32.mrb[1].mxu1 }
 0x3db   : > { %v637_v45 = vpop.f32.mrb[2].mxu1 }
 0x3dc   : > { %641 = vst.msk [vmem:[#allocation3] sm:$0xff] %vm428_vm0, %v640_v43  ;;  %v897_v46 = vpop.f32.mrb[3].mxu1 }
 0x3e3   : > { %v646_v47 = vld [vmem:[#allocation3] sm:$0xff] }
 0x3e4   : > { %v647_v49 = vadd.f32 %v646_v47, %v1662_v0 }
 0x3e6   : > { %v655_v50 = vadd.f32 %v853_v48, %v647_v49 }
 0x3e8   : > { %656 = vst.msk [vmem:[%s418_s9] sm:$0xff] %vm428_vm0, %v655_v50 }
 0x3e9   : > { %1250 = shalt.err (!%p1247_p8)
}
 0x3ea   : > { %s1251_s15 = scalar_lea.hbm %s1678_s14, 128  ;;  %s1255_s10 = scalar_lea.hbm %s1735_s7, 256 }
 0x3eb   : > { %p1252_p9 = scmp.ne.s32.totalorder %s1678_s14, %s1251_s15  ;;  %p1256_p3 = scmp.lt.u32.totalorder %s1678_s14, %s1735_s7 }
 0x3ec   : > { %p1257_p1 = scmp.lt.u32.totalorder %s1255_s10, %s1251_s15  ;;  %p1259_p11 = scmp.lt.u32.totalorder %s1251_s15, %s1678_s14 }
 0x3ed   : > { %p1253_p4 = pnand %p1252_p9, %p1758_p0 }
 0x3ee   : > { %p1258_p12 = por %p1257_p1, %p1256_p3 }
 0x3ef   : > { %p1254_p6 = pneg %p1253_p4 }
 0x3f0   : > { %p1260_p5 = por %p1259_p11, %p1258_p12 }
 0x3f2   : > { %p1261_p7 = pnand %p1260_p5, %p1254_p6 }
 0x3f4   : > { %1264 = shalt.err (!%p1261_p7)
}
 0x3f5   : > { %924 = dma.vmem_to_hbm [thread:$0]  (%p1758_p0), %s1680_s18, 128, %s1678_s14, %s658_s17  }
 0x3f6 PF: > { %s684_s9 = sand.u32 1, %s1311_s24   ;;  %p1759_p10 = scmp.ne.s32.totalorder %s1754_s30, 0 }
 0x3f7   : > { %p1760_p13 = scmp.ge.s32.totalorder %s1331_s29, 2  ;;  %s685_s19 = scalar_lea.sflag [#allocation6], %s684_s9 }
 0x3f9   : > { %p950_p2 = pnand %p1760_p13, %p1759_p10 }
 0x3fb   : > { %1306 = dma.done.wait (!%p950_p2), %s685_s19, 128  }
 0x3fc   : > { %1308 = vsyncadd (!%p950_p2), %s685_s19, 4294967168  ;;  %s26_s29 = sadd.s32 1, %s1331_s29   ;;  %s1761_s24 = smov %s1315_s25 }
 0x3fd   : > { %p23_p8 = scmp.ge.s32.totalorder %s26_s29, 4   ;;  %s1762_s25 = smov %s1319_s26 }
 0x3fe   : > { %s1763_s26 = smov %s1590_s20  ;;  %s1764_s27 = smov %s1327_s28 }
 0x3ff   : > { %s1765_s28 = smov %s1767_s13  ;;  %25 = sbr.rel (!%p23_p8) target bundleno = 12 (0xc), region = 128 }
 0x406   :  { %690 = vsyncpa [#allocation5], 1 }
 0x407   :  { %692 = vsyncpa [#allocation5 + $0x1], 1 }
 0x408   :  { %693 = vsyncpa [#allocation8], 1 }
 0x409   :  { %694 = vsyncpa [#allocation11], 1 }
 0x40a   :  { %695 = vsyncpa [#allocation14], 1 }
 0x40b   :  { %696 = vsyncpa [#allocation6], 1 }
 0x40c   :  { %698 = vsyncpa [#allocation6 + $0x1], 1 }

// kernel: transformer_block_forward.7
= control target key start
LH: loop header
LB: loop body
LE: loop exit
PB: predicated region body
PF: predicated region fallthrough
CT: control target
= control target key end

     0   :  { %s2370_s0 = inlined_call_operand.hbm [shape: bf16[2,8,32], index: 0, kind: input, shape index: {}]   ;;  %s2371_s1 = inlined_call_operand.hbm [shape: bf16[2,8,32], index: 1, kind: input, shape index: {}]   ;;  %s2372_s2 = inlined_call_operand.hbm [shape: bf16[2,8,32], index: 2, kind: input, shape index: {}]   ;;  %s2373_s3 = inlined_call_operand.hbm [shape: f32[2,8,32], index: 3, kind: input, shape index: {}]   ;;  %s2374_s4 = inlined_call_operand.hbm [shape: bf16[32,32], index: 4, kind: input, shape index: {}]   ;;  %s2375_s5 = inlined_call_operand.hbm [shape: f32[1,32], index: 5, kind: input, shape index: {}]   ;;  %s2376_s6 = inlined_call_operand.hbm [shape: f32[2,8,32], index: 6, kind: output, shape index: {}]  }
   0x1   :  { %2393 = sst [smem:[#allocation28_spill]] %s2371_s1 }
   0x2   :  { %2394 = sst [smem:[#allocation29_spill]] %s2374_s4 }
   0x3   :  { %11 = vsyncpa [#allocation6], 0 }
   0x4   :  { %13 = vsyncpa [#allocation6 + $0x1], 0 }
   0x5   :  { %14 = vsyncpa [#allocation9], 0 }
   0x6   :  { %16 = vsyncpa [#allocation9 + $0x1], 0 }
   0x7   :  { %17 = vsyncpa [#allocation12], 0 }
   0x8   :  { %19 = vsyncpa [#allocation12 + $0x1], 0 }
   0x9   :  { %20 = vsyncpa [#allocation15], 0 }
   0xa   :  { %21 = vsyncpa [#allocation7], 0 }
   0xb   :  { %23 = vsyncpa [#allocation7 + $0x1], 0  ;;  %s1896_s21 = smov 0   ;;  %s1898_s22 = smov 0  }
   0xc   :  { %s1900_s23 = smov 0   ;;  %s1902_s24 = smov 0  }
   0xd   :  { %s1904_s25 = smov 0   ;;  %s1906_s26 = smov 0  }
   0xe LB: > { %2395 = sst [smem:[#allocation23_spill]] %s1820_s21  ;;  %s1927_s27 = sadd.s32 4294967295, %s1840_s26   ;;  %s1840_s26 = sphi %s1906_s26, %s29_s26   ;;  %s1836_s25 = sphi %s1904_s25, %s2435_s25   ;;  %s1832_s24 = sphi %s1902_s24, %s2434_s24   ;;  %s1828_s23 = sphi %s1900_s23, %s2430_s23   ;;  %s1824_s22 = sphi %s1898_s22, %s2433_s22   ;;  %s1820_s21 = sphi %s1896_s21, %s2432_s21  }
   0xf   : > { %2396 = sst [smem:[#allocation24_spill]] %s1828_s23  ;;  %s1311_s28 = sadd.s32 4294967294, %s1840_s26  }
  0x10   : > { %p70_p0 = scmp.ne.s32.totalorder %s1824_s22, %s1820_s21  ;;  %p2377_p1 = scmp.eq.s32.totalorder %s1927_s27, 0 }
  0x11   : > { %p228_p3 = scmp.eq.s32.totalorder %s1311_s28, 1  ;;  %p1312_p5 = scmp.ge.s32.totalorder %s1840_s26, 1 }
  0x12   : > { %p1936_p4 = por %p2377_p1, %p70_p0  ;;  %p235_p7 = scmp.lt.s32.totalorder %s1840_s26, 3 }
  0x13   : > { %p1941_p6 = por %p228_p3, %p70_p0  ;;  %s1842_s8 = smov [#allocation13]  }
  0x14   : > { %s2397_s29 = scalar_select %p1936_p4, 1, 0 }
  0x15   : > { %s2398_s30 = scalar_select %p1941_p6, 1, 0 }
  0x16   : > { %p1946_p8 = pnand %p1312_p5, %p235_p7  ;;  %s247_s9 = sshll.u32 %s1842_s8, 4  ;;  %s248_s9 = int_to_ptr.vmem [resolvable:$true] %s247_s9 }
  0x17   : > { %2399 = sst [smem:[#allocation25_spill]] %s2398_s30  ;;  %s48_s11 = sadd.s32 1, %s1836_s25 }
  0x18   : > { %s2400_s7 = scalar_select %p1946_p8, 1, 0 }
  0x19   : > { %p1444_p9 = pneg %p1946_p8  ;;  %s2402_s4 = sld [smem:[#allocation29_spill]] }
  0x1b   : > { %p1955_p11 = pnand %p1444_p9, %p2377_p1 }
  0x1d   : > { %s2401_s10 = scalar_select %p1955_p11, 1, 0 }
  0x1e   : > { %p2384_p13 = pneg %p1955_p11 }
  0x1f   : > { %s1566_s14 = scalar_lea.hbm %s2402_s4, 256 }
  0x20   : > { %p1567_p12 = scmp.ne.s32.totalorder %s2402_s4, %s1566_s14  ;;  %p1573_p5 = scmp.lt.u32.totalorder %s1566_s14, %s2402_s4 }
  0x22   : > { %p1569_p0 = pnand %p2384_p13, %p1567_p12 }
  0x24   : > { %p1570_p3 = pneg %p1569_p0 }
  0x26   : > { %p1575_p7 = pnand %p1573_p5, %p1570_p3 }
  0x28   : > { %1578 = shalt.err (!%p1575_p7)
}
  0x29   : > { %s1579_s19 = scalar_lea.vmem %s248_s9, 256  ;;  %p1587_p2 = scmp.lt.s32.totalorder %s248_s9, %s248_s9 }
  0x2a   : > { %p1580_p9 = scmp.ne.s32.totalorder %s248_s9, %s1579_s19  ;;  %p1588_p6 = scmp.lt.s32.totalorder %s1579_s19, %s1579_s19 }
  0x2c   : > { %p1582_p10 = pnand %p1580_p9, %p2384_p13  ;;  %p1589_p4 = por %p1588_p6, %p1587_p2 }
  0x2e   : > { %p1583_p1 = pneg %p1582_p10 }
  0x30   : > { %p1590_p8 = pnand %p1589_p4, %p1583_p1 }
  0x32   : > { %1593 = shalt.err (!%p1590_p8)
}
  0x33   : > { %s1843_s20 = smov 64   ;;  %s1844_s28 = smov 4  }
  0x34   : > { %1447 = dma.hbm_to_vmem [thread:$0]  (!%p1955_p11), %s2402_s4, 256, %s248_s9, [#allocation12], %s1843_s20, %s1843_s20, %s1844_s28  }
  0x35   : > { %p50_p1 = scmp.ge.s32.totalorder %s48_s11, 2  ;;  %s57_s13 = sadd.s32 1, %s1828_s23 }
  0x36   : > { %p64_p2 = scmp.ne.s32.totalorder %s1828_s23, %s1824_s22  ;;  %p65_p4 = scmp.eq.s32.totalorder %s1840_s26, 0 }
  0x37   : > { %s2437_s11 = smov (%p50_p1, %s48_s11), 0  ;;  %p2404_p8 = scmp.eq.s32.totalorder %s1927_s27, 1 }
  0x38   : > { %2403 = sst [smem:[#allocation26_spill]] %s2437_s11  ;;  %p66_p6 = por %p65_p4, %p64_p2 }
  0x39   : > { %p1990_p10 = por %p2404_p8, %p64_p2  ;;  %s52_s15 = ssub.s32 %s1836_s25, %s2437_s11 }
  0x3a   : > { %p1470_p12 = scmp.lt.s32.totalorder %s1840_s26, 2  ;;  %p55_p0 = scmp.eq.s32.totalorder %s52_s15, 0 }
  0x3b   : > { %s2405_s14 = scalar_select %p1990_p10, 1, 0 }
  0x3c   : > { %s1998_s16 = sand.u32 1, %s1828_s23   ;;  %s2004_s17 = sshll.u32 %s1836_s25, 6 }
  0x3d   : > { %s2001_s9 = sshll.u32 %s1998_s16, 2  ;;  %p2009_p3 = pnand %p1470_p12, %p66_p6 }
  0x3e   : > { %s2007_s18 = scalar_select %p55_p0, %s1828_s23, %s57_s13  }
  0x3f   : > { %s2407_s19 = scalar_select %p2009_p3, 1, 0 }
  0x40   : > { %2406 = sst [smem:[#allocation27_spill]] %s2007_s18  ;;  %s2383_s20 = sand.u32 1, %s1840_s26  }
  0x41   : > { %s2408_s1 = sld [smem:[#allocation28_spill]]  ;;  %s295_s15 = scalar_lea.vmem [#allocation8], %s2001_s9 }
  0x42   : > { %s303_s4 = sshll.u32 %s295_s15, 4  ;;  %s2025_s13 = scalar_lea.sflag [#allocation9], %s2383_s20  ;;  %s2021_s4 = int_to_ptr.vmem [resolvable:$true] %s303_s4 }
  0x43   : > { %p2031_p7 = pneg %p2009_p3 }
  0x45   : > { %s2409_s18 = scalar_select %p2031_p7, 1, 0 }
  0x47   : > { %s2018_s12 = scalar_lea.hbm %s2408_s1, %s2004_s17  ;;  %s1599_s15 = scalar_lea.hbm %s2408_s1, 128 }
  0x48   : > { %s1594_s11 = scalar_lea.hbm %s2018_s12, 64  ;;  %p1600_p2 = scmp.lt.u32.totalorder %s2018_s12, %s2408_s1 }
  0x49   : > { %p1595_p5 = scmp.ne.s32.totalorder %s2018_s12, %s1594_s11  ;;  %p1601_p4 = scmp.lt.u32.totalorder %s1599_s15, %s1594_s11 }
  0x4a   : > { %p1603_p8 = scmp.lt.u32.totalorder %s1594_s11, %s2018_s12 }
  0x4b   : > { %p1597_p9 = pnand %p2031_p7, %p1595_p5  ;;  %p1602_p6 = por %p1601_p4, %p1600_p2 }
  0x4d   : > { %p1598_p1 = pneg %p1597_p9  ;;  %p1604_p12 = por %p1603_p8, %p1602_p6 }
  0x4f   : > { %p1605_p0 = pnand %p1604_p12, %p1598_p1 }
  0x51   : > { %1608 = shalt.err (!%p1605_p0)
}
  0x52   : > { %s1609_s20 = scalar_lea.vmem %s2021_s4, 64  ;;  %s1845_s28 = smov [#allocation8]  }
  0x53   : > { %p1610_p5 = scmp.ne.s32.totalorder %s2021_s4, %s1609_s20  ;;  %s1614_s8 = sshll.u32 %s1845_s28, 4  ;;  %s1615_s8 = int_to_ptr.vmem [resolvable:$false] %s1614_s8 }
  0x54   : > { %s1616_s23 = scalar_lea.vmem %s1615_s8, 128  ;;  %p1617_p10 = scmp.lt.s32.totalorder %s2021_s4, %s1615_s8 }
  0x55   : > { %p1612_p9 = pnand %p1610_p5, %p2031_p7  ;;  %p1618_p11 = scmp.lt.s32.totalorder %s1616_s23, %s1609_s20 }
  0x57   : > { %p1613_p13 = pneg %p1612_p9  ;;  %p1619_p2 = por %p1618_p11, %p1617_p10 }
  0x59   : > { %p1620_p4 = pnand %p1619_p2, %p1613_p13 }
  0x5b   : > { %1623 = shalt.err (!%p1620_p4)
}
  0x5c   : > { %1457 = dma.hbm_to_vmem [thread:$0]  (!%p2009_p3), %s2018_s12, 64, %s2021_s4, %s2025_s13  }
  0x5d   : > { %s1846_s30 = smov [#allocation14]   ;;  %s1624_s28 = scalar_lea.hbm %s2375_s5, 16 }
  0x5e   : > { %s261_s11 = sshll.u32 %s1846_s30, 4  ;;  %p1625_p11 = scmp.ne.s32.totalorder %s2375_s5, %s1624_s28  ;;  %s262_s11 = int_to_ptr.vmem [resolvable:$true] %s261_s11 }
  0x5f   : > { %p2410_p13 = scmp.ne.s32.totalorder %s2401_s10, 0  ;;  %p1631_p8 = scmp.lt.u32.totalorder %s1624_s28, %s2375_s5 }
  0x61   : > { %p2411_p10 = pneg %p2410_p13 }
  0x63   : > { %p1627_p1 = pnand %p1625_p11, %p2411_p10 }
  0x65   : > { %p1628_p6 = pneg %p1627_p1 }
  0x67   : > { %p1633_p12 = pnand %p1631_p8, %p1628_p6 }
  0x69   : > { %1636 = shalt.err (!%p1633_p12)
}
  0x6a   : > { %s1637_s4 = scalar_lea.vmem %s262_s11, 16  ;;  %p2412_p5 = pmov %p2411_p10 }
  0x6b   : > { %p1638_p0 = scmp.ne.s32.totalorder %s262_s11, %s1637_s4  ;;  %s1644_s1 = scalar_lea.vmem %s262_s11, 32 }
  0x6c   : > { %p1645_p4 = scmp.lt.s32.totalorder %s262_s11, %s262_s11  ;;  %p1646_p3 = scmp.lt.s32.totalorder %s1644_s1, %s1637_s4 }
  0x6d   : > { %p1640_p9 = pnand %p1638_p0, %p2412_p5 }
  0x6e   : > { %p1647_p7 = por %p1646_p3, %p1645_p4 }
  0x6f   : > { %p1641_p2 = pneg %p1640_p9 }
  0x71   : > { %p1648_p10 = pnand %p1647_p7, %p1641_p2 }
  0x73   : > { %1651 = shalt.err (!%p1648_p10)
}
  0x74   : > { %1450 = dma.hbm_to_vmem [thread:$0]  (!%p2410_p13), %s2375_s5, 16, %s262_s11, [#allocation15]  }
  0x75   : > { %s2079_s28 = scalar_lea.hbm %s2370_s0, %s2004_s17  ;;  %s276_s8 = scalar_lea.vmem [#allocation5], %s2001_s9 }
  0x76   : > { %s284_s20 = sshll.u32 %s276_s8, 4  ;;  %s273_s10 = scalar_lea.sflag [#allocation6], %s1998_s16  ;;  %s285_s20 = int_to_ptr.vmem [resolvable:$true] %s284_s20 }
  0x77   : > { %s1652_s23 = scalar_lea.hbm %s2079_s28, 64  ;;  %p2413_p7 = scmp.ne.s32.totalorder %s2409_s18, 0 }
  0x78   : > { %p1653_p3 = scmp.ne.s32.totalorder %s2079_s28, %s1652_s23  ;;  %s1657_s1 = scalar_lea.hbm %s2370_s0, 128 }
  0x79   : > { %p1658_p13 = scmp.lt.u32.totalorder %s2079_s28, %s2370_s0  ;;  %p1659_p6 = scmp.lt.u32.totalorder %s1657_s1, %s1652_s23 }
  0x7a   : > { %p1655_p11 = pnand %p1653_p3, %p2413_p7  ;;  %p1661_p12 = scmp.lt.u32.totalorder %s1652_s23, %s2079_s28 }
  0x7b   : > { %p1660_p8 = por %p1659_p6, %p1658_p13 }
  0x7c   : > { %p1656_p1 = pneg %p1655_p11 }
  0x7d   : > { %p1662_p0 = por %p1661_p12, %p1660_p8 }
  0x7f   : > { %p1663_p5 = pnand %p1662_p0, %p1656_p1 }
  0x81   : > { %1666 = shalt.err (!%p1663_p5)
}
  0x82   : > { %s1667_s30 = scalar_lea.vmem %s285_s20, 64  ;;  %s1847_s15 = smov [#allocation5]  }
  0x83   : > { %p1668_p9 = scmp.ne.s32.totalorder %s285_s20, %s1667_s30  ;;  %s1672_s8 = sshll.u32 %s1847_s15, 4  ;;  %s1673_s8 = int_to_ptr.vmem [resolvable:$false] %s1672_s8 }
  0x84   : > { %s1674_s4 = scalar_lea.vmem %s1673_s8, 128  ;;  %p1675_p10 = scmp.lt.s32.totalorder %s285_s20, %s1673_s8 }
  0x85   : > { %p1670_p2 = pnand %p1668_p9, %p2413_p7  ;;  %p1676_p3 = scmp.lt.s32.totalorder %s1674_s4, %s1667_s30 }
  0x87   : > { %p1671_p4 = pneg %p1670_p2  ;;  %p1677_p11 = por %p1676_p3, %p1675_p10 }
  0x89   : > { %p1678_p6 = pnand %p1677_p11, %p1671_p4 }
  0x8b   : > { %1681 = shalt.err (!%p1678_p6)
}
  0x8c   : > { %p2414_p13 = scmp.ne.s32.totalorder %s2407_s19, 0  ;;  %s2104_s1 = scalar_lea.hbm %s2372_s2, %s2004_s17 }
  0x8d   : > { %s314_s21 = scalar_lea.vmem [#allocation10], %s2001_s9  ;;  %s1322_s30 = sshll.u32 %s1998_s16, 3 }
  0x8e   : > { %1454 = dma.hbm_to_vmem [thread:$0]  (!%p2414_p13), %s2079_s28, 64, %s285_s20, %s273_s10  }
  0x8f   : > { %s322_s12 = sshll.u32 %s314_s21, 4  ;;  %s1682_s15 = scalar_lea.hbm %s2104_s1, 64  ;;  %s323_s12 = int_to_ptr.vmem [resolvable:$true] %s322_s12 }
  0x90   : > { %p1683_p1 = scmp.ne.s32.totalorder %s2104_s1, %s1682_s15  ;;  %s1687_s20 = scalar_lea.hbm %s2372_s2, 128 }
  0x91   : > { %p1688_p0 = scmp.lt.u32.totalorder %s2104_s1, %s2372_s2  ;;  %p1689_p5 = scmp.lt.u32.totalorder %s1687_s20, %s1682_s15 }
  0x92   : > { %p1685_p8 = pnand %p1683_p1, %p2413_p7  ;;  %p1691_p2 = scmp.lt.u32.totalorder %s1682_s15, %s2104_s1 }
  0x93   : > { %p1690_p9 = por %p1689_p5, %p1688_p0 }
  0x94   : > { %p1686_p12 = pneg %p1685_p8 }
  0x95   : > { %p1692_p4 = por %p1691_p2, %p1690_p9 }
  0x97   : > { %p1693_p10 = pnand %p1692_p4, %p1686_p12 }
  0x99   : > { %1696 = shalt.err (!%p1693_p10)
}
  0x9a   : > { %s1697_s9 = scalar_lea.vmem %s323_s12, 64  ;;  %s1848_s4 = smov [#allocation10]  }
  0x9b   : > { %p1698_p3 = scmp.ne.s32.totalorder %s323_s12, %s1697_s9  ;;  %s1702_s23 = sshll.u32 %s1848_s4, 4  ;;  %s1703_s23 = int_to_ptr.vmem [resolvable:$false] %s1702_s23 }
  0x9c   : > { %s1704_s11 = scalar_lea.vmem %s1703_s23, 128  ;;  %p1705_p1 = scmp.lt.s32.totalorder %s323_s12, %s1703_s23 }
  0x9d   : > { %p1700_p11 = pnand %p1698_p3, %p2413_p7  ;;  %p1706_p8 = scmp.lt.s32.totalorder %s1704_s11, %s1697_s9 }
  0x9f   : > { %p1701_p6 = pneg %p1700_p11  ;;  %p1707_p13 = por %p1706_p8, %p1705_p1 }
  0xa1   : > { %p1708_p0 = pnand %p1707_p13, %p1701_p6 }
  0xa3   : > { %1711 = shalt.err (!%p1708_p0)
}
  0xa4   : > { %p2415_p5 = scmp.ne.s32.totalorder %s2407_s19, 0  ;;  %s1323_s21 = sshll.u32 %s1836_s25, 7 }
  0xa5   : > { %s2130_s28 = scalar_lea.hbm %s2373_s3, %s1323_s21  ;;  %s333_s20 = scalar_lea.vmem [#allocation11], %s1322_s30 }
  0xa6   : > { %1460 = dma.hbm_to_vmem [thread:$0]  (!%p2415_p5), %s2104_s1, 64, %s323_s12, %s2025_s13  }
  0xa7   : > { %s341_s10 = sshll.u32 %s333_s20, 4  ;;  %s2416_s17 = sand.u32 1, %s1840_s26   ;;  %s342_s10 = int_to_ptr.vmem [resolvable:$true] %s341_s10 }
  0xa8   : > { %s330_s9 = scalar_lea.sflag [#allocation12], %s2416_s17  ;;  %s1712_s4 = scalar_lea.hbm %s2130_s28, 128 }
  0xa9   : > { %p1713_p13 = scmp.ne.s32.totalorder %s2130_s28, %s1712_s4  ;;  %s1717_s12 = scalar_lea.hbm %s2373_s3, 256 }
  0xaa   : > { %p1718_p2 = scmp.lt.u32.totalorder %s2130_s28, %s2373_s3  ;;  %p1719_p4 = scmp.lt.u32.totalorder %s1717_s12, %s1712_s4 }
  0xab   : > { %p1715_p12 = pnand %p1713_p13, %p2413_p7  ;;  %p1721_p3 = scmp.lt.u32.totalorder %s1712_s4, %s2130_s28 }
  0xac   : > { %p1720_p10 = por %p1719_p4, %p1718_p2 }
  0xad   : > { %p1716_p9 = pneg %p1715_p12 }
  0xae   : > { %p1722_p11 = por %p1721_p3, %p1720_p10 }
  0xb0   : > { %p1723_p6 = pnand %p1722_p11, %p1716_p9 }
  0xb2   : > { %1726 = shalt.err (!%p1723_p6)
}
  0xb3   : > { %s1727_s30 = scalar_lea.vmem %s342_s10, 128  ;;  %s1849_s11 = smov [#allocation11]  }
  0xb4   : > { %p1728_p1 = scmp.ne.s32.totalorder %s342_s10, %s1727_s30  ;;  %s1732_s21 = sshll.u32 %s1849_s11, 4  ;;  %s1733_s21 = int_to_ptr.vmem [resolvable:$false] %s1732_s21 }
  0xb5   : > { %s1734_s15 = scalar_lea.vmem %s1733_s21, 256  ;;  %p1735_p13 = scmp.lt.s32.totalorder %s342_s10, %s1733_s21 }
  0xb6   : > { %p1730_p8 = pnand %p1728_p1, %p2413_p7  ;;  %p1736_p12 = scmp.lt.s32.totalorder %s1734_s15, %s1727_s30 }
  0xb8   : > { %p1731_p0 = pneg %p1730_p8  ;;  %p1737_p5 = por %p1736_p12, %p1735_p13 }
  0xba   : > { %p1738_p2 = pnand %p1737_p5, %p1731_p0 }
  0xbc   : > { %1741 = shalt.err (!%p1738_p2)
}
  0xbd   : > { %p2417_p4 = scmp.ne.s32.totalorder %s2407_s19, 0  ;;  %p2418_p9 = scmp.ne.s32.totalorder %s2400_s7, 0 }
  0xbe   : > { %s2156_s18 = sand.u32 (!%p2418_p9), 1, %s1824_s22   ;;  %p2419_p7 = scmp.ne.s32.totalorder (!%p2418_p9), %s2397_s29, 0 }
  0xbf   : > { %1463 = dma.hbm_to_vmem [thread:$0]  (!%p2417_p4), %s2130_s28, 128, %s342_s10, %s330_s9  }
  0xc0   : > { %350 = sbr.rel (%p2418_p9) target bundleno = 1867 (0x74b), region = 44  ;;  %s2159_s8 = sshll.u32 (!%p2418_p9), %s2156_s18, 2 }
  0xc1   : > { %s353_s20 = scalar_lea.sflag (!%p2418_p9), [#allocation6], %s2156_s18  ;;  %s356_s17 = scalar_lea.vmem (!%p2418_p9), [#allocation5], %s2159_s8 }
  0xc7   : > { %1795 = dma.done.wait (%p2419_p7), %s353_s20, 64  }
  0xc8   : > { %1797 = vsyncadd (%p2419_p7), %s353_s20, 4294967232  ;;  %s361_s7 = sand.u32 1, %s1927_s27   ;;  %s365_s28 = scalar_lea.vmem [#allocation8], %s2159_s8 }
  0xc9   : > { %s362_s19 = scalar_lea.sflag [#allocation9], %s361_s7 }
  0xca   : > { %1799 = dma.done.wait (%p2419_p7), %s362_s19, 128  }
  0xcb   : > { %1801 = vsyncadd (%p2419_p7), %s362_s19, 4294967168  ;;  %s1328_s10 = sshll.u32 %s2156_s18, 3  ;;  %s374_s9 = scalar_lea.vmem [#allocation10], %s2159_s8 }
  0xcc   : > { %s380_s4 = scalar_lea.sflag [#allocation12], %s361_s7  ;;  %s2177_s13 = scalar_lea.vmem [#allocation11], %s1328_s10 }
  0xcd   : > { %1803 = dma.done.wait (%p2419_p7), %s380_s4, 128  }
  0xce   : > { %1805 = vsyncadd (%p2419_p7), %s380_s4, 4294967168  ;;  %p2420_p5 = scmp.eq.s32.totalorder %s1927_s27, 0 }
  0xd0   : > { %1807 = dma.done.wait (%p2420_p5), [#allocation12], 256   ;;  %p2421_p10 = pmov %p2420_p5 }
  0xd1   : > { %p2422_p3 = pmov %p2420_p5 }
  0xd2   : > { %1809 = vsyncadd (%p2421_p10), [#allocation12], 4294967040 }
  0xd3   : > { %1811 = dma.done.wait (%p2422_p3), [#allocation15], 16   ;;  %p2423_p11 = pmov %p2422_p3 }
  0xd4   : > { %v1850_v0 = vmov 0.0   ;;  %vm1851_vm0 = vmmov 0   ;;  %vm454_vm1 = vcmask 64512   ;;  %v452_v1 = vld [vmem:[%s365_s28] sm:$0xf]  ;;  %vm440_vm2 = vcmask 7168  }
  0xd5   : > { %1813 = vsyncadd (%p2423_p11), [#allocation15], 4294967280  ;;  %1370 = vmatprep.subr.bf16.mxu0 %v1850_v0  ;;  %1372 = vmatprep.mubr.msk.bf16.mxu0 %vm1851_vm0, %v1850_v0  ;;  %v459_v2 = vsel %vm454_vm1, %v452_v1, 0  ;;  %v451_v3 = vld [vmem:[%s356_s17] sm:$0xf]  ;;  %v1852_v4 = vmov -inf   ;;  %v1335_v11 = vcombine.low %v452_v1, %v452_v1 }
  0xd6   : > { %1376 = vmatprep.subr.bf16.mxu1 %v1850_v0  ;;  %1378 = vmatprep.mubr.msk.bf16.mxu1 %vm1851_vm0, %v1850_v0  ;;  %441 = vst.msk [vmem:[#allocation2] sm:$0xff] %vm440_vm2, %v1852_v4  ;;  %442 = vst.msk [vmem:[#allocation2 + $0x8] sm:$0xff] %vm440_vm2, %v1852_v4  ;;  %v1853_v10 = vmov 0   ;;  %s1854_s27 = smov 120   ;;  %v1334_v12 = vcombine.low %v451_v3, %v451_v3  ;;  %s1855_s29 = smov 112   ;;  %vm537_vm3 = vcmask 1043456  }
  0xd7   : > { %1371 = vmatpush3.bf16.xpose.msra.mxu0 %v459_v2  ;;  %443 = vst.msk [vmem:[#allocation2 + $0x10] sm:$0xff] %vm440_vm2, %v1852_v4  ;;  %444 = vst.msk [vmem:[#allocation2 + $0x18] sm:$0xff] %vm440_vm2, %v1852_v4  ;;  %1536 = vset.pattern.permute.xlu0 %v1853_v10  ;;  %s1856_s1 = smov 104   ;;  %v453_v17 = vld [vmem:[%s374_s9] sm:$0xf]  ;;  %vm449_vm4 = vcmask 261120  }
  0xd8   : > { %1388 = vmatprep.subr.bf16.mxu0 %v1850_v0  ;;  %445 = vst.msk [vmem:[#allocation3] sm:$0xff] %vm440_vm2, %v1850_v0  ;;  %446 = vst.msk [vmem:[#allocation3 + $0x8] sm:$0xff] %vm440_vm2, %v1850_v0  ;;  %1537 = vset.pattern.permute.xlu1 %v1853_v10  ;;  %v539_v18 = vsel %vm537_vm3, %v453_v17, 0  ;;  %v1337_v55 = vcombine.low %v453_v17, %v453_v17  ;;  %s1857_s12 = smov 8   ;;  %s1858_s23 = smov 16   ;;  %vm729_vm5 = vcmask 130112  }
  0xd9   : > { %447 = vst.msk [vmem:[#allocation3 + $0x10] sm:$0xff] %vm440_vm2, %v1850_v0  ;;  %448 = vst.msk [vmem:[#allocation3 + $0x18] sm:$0xff] %vm440_vm2, %v1850_v0  ;;  %591 = vrot.lane.b32.xlu1 %v1335_v11, %s1854_s27  ;;  %1377 = vmatpush3.bf16.msra.mxu1 %v539_v18  ;;  %s1859_s16 = smov 24   ;;  %vm868_vm6 = vcmask 195712   ;;  %vm1007_vm7 = vcmask 261312   ;;  %s1348_s30 = sshll.u32 %s1832_s24, 7 }
  0xda   : > { %1382 = vmatprep.subr.bf16.mxu1 %v1850_v0  ;;  %450 = vst.msk [vmem:[#allocation4] sm:$0xff] %vm449_vm4, %v1850_v0  ;;  %s434_s11 = scalar_lea.vmem [#allocation16], %s1328_s10  ;;  %s2320_s20 = scalar_lea.hbm %s2376_s6, %s1348_s30 }
  0xdb   : > { %s1139_s21 = sshll.u32 %s434_s11, 4  ;;  %s1125_s24 = scalar_lea.sflag [#allocation7], %s2156_s18  ;;  %s2322_s21 = int_to_ptr.vmem [resolvable:$true] %s1139_s21 }
  0xdc   : > { %s1742_s17 = scalar_lea.vmem %s2322_s21, 128  ;;  %p2424_p1 = scmp.ne.s32.totalorder %s2405_s14, 0 }
  0xdd   : > { %586 = vrot.lane.b32.xlu1 %v1334_v12, %s1854_s27  ;;  %v2221_v13 = vld [vmem:[#allocation2] sm:$0xff]  ;;  %v640_v52 = vld [vmem:[#allocation2 + $0x8] sm:$0xff]  ;;  %p1743_p6 = scmp.ne.s32.totalorder %s2322_s21, %s1742_s17  ;;  %s1860_s7 = smov [#allocation16]  }
  0xde   : > { %1373 = vmatmul.mubr.msk.bf16.vlgmr.msra.gmra.mrb[0].mxu0 %vm454_vm1, %v451_v3  ;;  %v2263_v56 = vld [vmem:[#allocation2 + $0x10] sm:$0xff]  ;;  %v921_v60 = vld [vmem:[#allocation2 + $0x18] sm:$0xff]  ;;  %s1746_s19 = sshll.u32 %s1860_s7, 4  ;;  %s1747_s19 = int_to_ptr.vmem [resolvable:$false] %s1746_s19 }
  0xdf   : > { %1390 = vmatprep.mubr.msk.bf16.mxu0 %vm1851_vm0, %v1850_v0  ;;  %p1744_p8 = pnand %p1743_p6, %p2424_p1  ;;  %s1748_s28 = scalar_lea.vmem %s1747_s19, 256 }
  0xe0   : > { %p1749_p13 = scmp.lt.s32.totalorder %s2322_s21, %s1747_s19  ;;  %p1750_p12 = scmp.lt.s32.totalorder %s1748_s28, %s1742_s17 }
  0xe1   : > { %733 = vrot.lane.b32.xlu1 %v1335_v11, %s1855_s29  ;;  %p1745_p0 = pneg %p1744_p8 }
  0xe2   : > { %p1751_p2 = por %p1750_p12, %p1749_p13 }
  0xe4   : > { %p1752_p4 = pnand %p1751_p2, %p1745_p0 }
  0xe5   : > { %731 = vrot.lane.b32.xlu1 %v1334_v12, %s1855_s29 }
  0xe9   : > { %872 = vrot.lane.b32.xlu1 %v1335_v11, %s1856_s1 }
  0xed   : > { %870 = vrot.lane.b32.xlu1 %v1334_v12, %s1856_s1 }
 0x14b   : > { %v592_v22 = vpop.permute.xlu1 %591 }
 0x14c   : > { %v597_v25 = vsel %vm454_vm1, %v592_v22, 0 }
 0x14f   : > { %v587_v23 = vpop.permute.xlu1 %586 }
 0x153   : > { %v734_v27 = vpop.permute.xlu1 %733 }
 0x154   : > { %v739_v29 = vsel %vm454_vm1, %v734_v27, 0 }
 0x157   : > { %v732_v28 = vpop.permute.xlu1 %731 }
 0x15b   : > { %v873_v30 = vpop.permute.xlu1 %872 }
 0x15c   : > { %v878_v31 = vsel %vm454_vm1, %v873_v30, 0 }
 0x15f   : > { %v871_v32 = vpop.permute.xlu1 %870 }
 0x1b1   : > { %v495_v5 = vpop.f32.mrb[0].mxu0 }
 0x1b2   : > { %v1374_v6 = vpop.f32.mrb[1].mxu0  ;;  %v502_v7 = vsel %vm454_vm1, %v495_v5, -inf }
 0x1b3   : > { %503 = vmax.xlane.f32.xlu0 %v502_v7  ;;  %v498_v8 = vpop.f32.mrb[2].mxu0 }
 0x1b4   : > { %v1375_v9 = vpop.f32.mrb[3].mxu0 }
 0x240   : > { %v504_v14 = vpop.xlane.xlu0 %503 }
 0x241   : > { %v2224_v15 = vmax.f32 %v2221_v13, %v504_v14 }
 0x243   : > { %v506_v16 = vsub.f32 %v2221_v13, %v2224_v15  ;;  %525 = vst.msk [vmem:[#allocation2] sm:$0xff] %vm440_vm2, %v2224_v15  ;;  %511 = vperm.xlu0 %1536, %v2224_v15   ;;  %v517_v15 = vld [vmem:[#allocation3] sm:$0xff] }
 0x245   : > { %v507_v30 = vmul.f32 1.442695, %v506_v16 }
 0x2c2   : > { %v512_v19 = vpop.permute.xlu0 %511 }
 0x2c3   : > { %v514_v20 = vsub.f32 %v495_v5, %v512_v19 }
 0x2c5   : > { %v515_v21 = vmul.f32 1.442695, %v514_v20 }
 0x2c7   : > { %1542 = vpow2.f32 %v515_v21 }
 0x2d1   : > { %v2235_v24 = vpop.eup %1542 }
 0x2d2   : > { %v533_v26 = vpack.c.bf16 %v2235_v24, %v2235_v24  ;;  %v519_v2 = vsel %vm454_vm1, %v2235_v24, 0.0 }
 0x2d4   : > { %1379 = vmatmul.mubr.msk.bf16.vlgmr.msra.gmra.mrb[0].mxu1 %vm454_vm1, %v533_v26 }
 0x2d5   : > { %1383 = vmatpush3.bf16.xpose.msra.mxu1 %v597_v25  ;;  %1384 = vmatprep.mubr.msk.bf16.mxu1 %vm1851_vm0, %v1850_v0 }
 0x2d6   : > { %1394 = vmatprep.subr.bf16.mxu1 %v1850_v0 }
 0x2dc   : > { %1385 = vmatmul.mubr.msk.bf16.vlgmr.msra.gmra.mrb[4].mxu1 %vm454_vm1, %v587_v23 }
 0x2dd   : > { %1395 = vmatpush3.bf16.xpose.msra.mxu1 %v739_v29  ;;  %1396 = vmatprep.mubr.msk.bf16.mxu1 %vm1851_vm0, %v1850_v0 }
 0x2de   : > { %1406 = vmatprep.subr.bf16.mxu1 %v1850_v0 }
 0x2e4   : > { %1397 = vmatmul.mubr.msk.bf16.vlgmr.msra.gmra.mrb[8].mxu1 %vm454_vm1, %v732_v28 }
 0x2e5   : > { %1407 = vmatpush3.bf16.xpose.msra.mxu1 %v878_v31  ;;  %1408 = vmatprep.mubr.msk.bf16.mxu1 %vm1851_vm0, %v1850_v0 }
 0x2e6   : > { %1418 = vmatprep.subr.bf16.mxu1 %v1850_v0 }
 0x2ec   : > { %1409 = vmatmul.mubr.msk.bf16.vlgmr.msra.gmra.mrb[12].mxu1 %vm454_vm1, %v871_v32 }
 0x2ed   : > { %1422 = vmatprep.mubr.msk.bf16.mxu1 %vm1851_vm0, %v1850_v0 }
 0x3a7   : > { %v2257_v33 = vpop.f32.mrb[0].mxu1 }
 0x3a8   : > { %v1380_v34 = vpop.f32.mrb[1].mxu1 }
 0x3a9   : > { %v578_v35 = vpop.f32.mrb[2].mxu1 }
 0x3aa   : > { %v1381_v36 = vpop.f32.mrb[3].mxu1 }
 0x3af   : > { %v633_v37 = vpop.f32.mrb[4].mxu1 }
 0x3b0   : > { %v1386_v38 = vpop.f32.mrb[5].mxu1  ;;  %v641_v39 = vsel %vm454_vm1, %v633_v37, -inf }
 0x3b1   : > { %642 = vmax.xlane.f32.xlu1 %v641_v39  ;;  %v636_v40 = vpop.f32.mrb[6].mxu1 }
 0x3b2   : > { %v1387_v41 = vpop.f32.mrb[7].mxu1 }
 0x3b7   : > { %v775_v42 = vpop.f32.mrb[8].mxu1 }
 0x3b8   : > { %v1398_v43 = vpop.f32.mrb[9].mxu1  ;;  %v783_v44 = vsel %vm454_vm1, %v775_v42, -inf }
 0x3b9   : > { %784 = vmax.xlane.f32.xlu0 %v783_v44  ;;  %v778_v45 = vpop.f32.mrb[10].mxu1 }
 0x3ba   : > { %v1399_v46 = vpop.f32.mrb[11].mxu1 }
 0x3bb   : > { %v799_v46 = vld [vmem:[#allocation3 + $0x10] sm:$0xff] }
 0x3bf   : > { %v914_v47 = vpop.f32.mrb[12].mxu1 }
 0x3c0   : > { %v1410_v48 = vpop.f32.mrb[13].mxu1  ;;  %v922_v49 = vsel %vm454_vm1, %v914_v47, -inf }
 0x3c1   : > { %923 = vmax.xlane.f32.xlu1 %v922_v49  ;;  %v917_v50 = vpop.f32.mrb[14].mxu1 }
 0x3c2   : > { %v1411_v51 = vpop.f32.mrb[15].mxu1 }
 0x3c3   : > { %v938_v51 = vld [vmem:[#allocation3 + $0x18] sm:$0xff] }
 0x43e   : > { %v643_v53 = vpop.xlane.xlu1 %642 }
 0x43f   : > { %v644_v54 = vmax.f32 %v640_v52, %v643_v53 }
 0x441   : > { %664 = vst.msk [vmem:[#allocation2 + $0x8] sm:$0xff] %vm440_vm2, %v644_v54  ;;  %650 = vperm.xlu1 %1537, %v644_v54   ;;  %v645_v1 = vsub.f32 %v640_v52, %v644_v54  ;;  %v526_v52 = vld [vmem:[#allocation4] sm:$0xff] }
 0x443   : > { %v646_v3 = vmul.f32 1.442695, %v645_v1 }
 0x445   : > { %676 = vrot.lane.b32.xlu1 %v1337_v55, %s1854_s27  ;;  %1544 = vpow2.f32 %v646_v3 }
 0x446   : > { %v785_v57 = vpop.xlane.xlu0 %784 }
 0x447   : > { %v786_v58 = vmax.f32 %v2263_v56, %v785_v57 }
 0x449   : > { %v787_v59 = vsub.f32 %v2263_v56, %v786_v58  ;;  %806 = vst.msk [vmem:[#allocation2 + $0x10] sm:$0xff] %vm440_vm2, %v786_v58  ;;  %792 = vperm.xlu0 %1536, %v786_v58  }
 0x44b   : > { %v788_v34 = vmul.f32 1.442695, %v787_v59 }
 0x44e   : > { %v924_v61 = vpop.xlane.xlu1 %923 }
 0x44f   : > { %v925_v62 = vmax.f32 %v921_v60, %v924_v61  ;;  %v2274_v4 = vpop.eup %1544 }
 0x451   : > { %v926_v63 = vsub.f32 %v921_v60, %v925_v62  ;;  %945 = vst.msk [vmem:[#allocation2 + $0x18] sm:$0xff] %vm440_vm2, %v925_v62  ;;  %931 = vperm.xlu1 %1537, %v925_v62  }
 0x453   : > { %v927_v35 = vmul.f32 1.442695, %v926_v63 }
 0x455   : > { %815 = vrot.lane.b32.xlu1 %v1337_v55, %s1855_s29 }
 0x459   : > { %954 = vrot.lane.b32.xlu1 %v1337_v55, %s1856_s1 }
 0x47d   : > { %520 = vadd.xlane.f32.xlu1 %v519_v2 }
 0x48e   : > { %668 = vperm.xlu1 %1537, %v2274_v4  }
 0x4c0   : > { %v651_v5 = vpop.permute.xlu1 %650 }
 0x4c1   : > { %v653_v6 = vsub.f32 %v633_v37, %v651_v5 }
 0x4c3   : > { %v654_v7 = vmul.f32 1.442695, %v653_v6 }
 0x4c4   : > { %v677_v8 = vpop.permute.xlu1 %676 }
 0x4c5   : > { %1546 = vpow2.f32 %v654_v7  ;;  %v682_v9 = vsel %vm537_vm3, %v677_v8, 0 }
 0x4c6   : > { %1389 = vmatpush3.bf16.msra.mxu0 %v682_v9 }
 0x4c7   : > { %1400 = vmatprep.subr.bf16.mxu0 %v1850_v0 }
 0x4c8   : > { %v793_v10 = vpop.permute.xlu0 %792 }
 0x4c9   : > { %v795_v11 = vsub.f32 %v775_v42, %v793_v10  ;;  %v657_v42 = vld [vmem:[#allocation3 + $0x8] sm:$0xff] }
 0x4ca   : > { %v658_v43 = vmul.f32 %v2274_v4, %v657_v42 }
 0x4cb   : > { %v796_v12 = vmul.f32 1.442695, %v795_v11 }
 0x4cd   : > { %1548 = vpow2.f32 %v796_v12 }
 0x4cf   : > { %v1547_v14 = vpop.eup %1546 }
 0x4d0   : > { %v932_v17 = vpop.permute.xlu1 %931  ;;  %v659_v18 = vsel %vm454_vm1, %v1547_v14, 0.0  ;;  %v672_v19 = vpack.c.bf16 %v1547_v14, %v1547_v14  ;;  %v1540_v14 = vld [vmem:[#allocation13] sm:$0xff]  }
 0x4d1   : > { %v934_v20 = vsub.f32 %v914_v47, %v932_v17  ;;  %660 = vadd.xlane.f32.xlu0 %v659_v18  ;;  %1419 = vmatpush3.bf16.msra.mxu1 %v1540_v14  ;;  %v1541_v17 = vld [vmem:[#allocation13 + $0x8] sm:$0xff]  }
 0x4d2   : > { %1391 = vmatmul.mubr.msk.bf16.vlgmr.msra.gmra.mrb[4].mxu0 %vm454_vm1, %v672_v19  ;;  %1420 = vmatprep.subr.bf16.mxu1 %v1850_v0 }
 0x4d3   : > { %v935_v21 = vmul.f32 1.442695, %v934_v20  ;;  %1402 = vmatprep.mubr.msk.bf16.mxu0 %vm1851_vm0, %v1850_v0 }
 0x4d4   : > { %v816_v22 = vpop.permute.xlu1 %815 }
 0x4d5   : > { %1550 = vpow2.f32 %v935_v21  ;;  %v821_v23 = vsel %vm537_vm3, %v816_v22, 0  ;;  %1421 = vmatpush3.bf16.msra.mxu1 %v1541_v17 }
 0x4d6   : > { %1401 = vmatpush3.bf16.msra.mxu0 %v821_v23  ;;  %1552 = vpow2.f32 %v507_v30 }
 0x4d7   : > { %v1549_v24 = vpop.eup %1548  ;;  %1412 = vmatprep.subr.bf16.mxu0 %v1850_v0  ;;  %1554 = vpow2.f32 %v788_v34 }
 0x4d8   : > { %v801_v25 = vsel %vm454_vm1, %v1549_v24, 0.0  ;;  %v814_v26 = vpack.c.bf16 %v1549_v24, %v1549_v24  ;;  %v955_v27 = vpop.permute.xlu1 %954  ;;  %1556 = vpow2.f32 %v927_v35 }
 0x4d9   : > { %802 = vadd.xlane.f32.xlu0 %v801_v25  ;;  %v960_v28 = vsel %vm537_vm3, %v955_v27, 0 }
 0x4da   : > { %1403 = vmatmul.mubr.msk.bf16.vlgmr.msra.gmra.mrb[8].mxu0 %vm454_vm1, %v814_v26 }
 0x4db   : > { %1413 = vmatpush3.bf16.msra.mxu0 %v960_v28  ;;  %1414 = vmatprep.mubr.msk.bf16.mxu0 %vm1851_vm0, %v1850_v0 }
 0x4df   : > { %v1551_v29 = vpop.eup %1550 }
 0x4e0   : > { %v940_v31 = vsel %vm454_vm1, %v1551_v29, 0.0  ;;  %v953_v32 = vpack.c.bf16 %v1551_v29, %v1551_v29  ;;  %v1553_v36 = vpop.eup %1552 }
 0x4e1   : > { %941 = vadd.xlane.f32.xlu1 %v940_v31  ;;  %v1555_v37 = vpop.eup %1554  ;;  %v518_v16 = vmul.f32 %v1553_v36, %v517_v15 }
 0x4e2   : > { %1415 = vmatmul.mubr.msk.bf16.vlgmr.msra.gmra.mrb[12].mxu0 %vm454_vm1, %v953_v32  ;;  %v1557_v13 = vpop.eup %1556  ;;  %v800_v47 = vmul.f32 %v1555_v37, %v799_v46 }
 0x4e3   : > { %v939_v53 = vmul.f32 %v1557_v13, %v938_v51 }
 0x4ef   : > { %529 = vperm.xlu0 %1536, %v1553_v36  }
 0x4f3   : > { %810 = vperm.xlu0 %1536, %v1555_v37  }
 0x4f7   : > { %949 = vperm.xlu0 %1536, %v1557_v13  }
 0x50a   : > { %v521_v38 = vpop.xlane.xlu1 %520 }
 0x50b   : > { %v522_v39 = vadd.f32 %v521_v38, %v518_v16 }
 0x50d   : > { %524 = vst.msk [vmem:[#allocation3] sm:$0xff] %vm440_vm2, %v522_v39 }
 0x50e   : > { %v669_v50 = vpop.permute.xlu1 %668 }
 0x514   : > { %v1012_v40 = vld [vmem:[#allocation3] sm:$0xff] }
 0x515   : > { %1558 = vrcp.f32 %v1012_v40 }
 0x51f   : > { %v1559_v41 = vpop.eup %1558 }
 0x520   : > { %1017 = vperm.xlu0 %1536, %v1559_v41  }
 0x55e   : > { %v661_v44 = vpop.xlane.xlu0 %660 }
 0x55f   : > { %v662_v45 = vadd.f32 %v661_v44, %v658_v43  ;;  %v1343_v43 = vld [vmem:[#allocation14] ss:$0 sm:$0xff] }
 0x561   : > { %663 = vst.msk [vmem:[#allocation3 + $0x8] sm:$0xff] %vm440_vm2, %v662_v45  ;;  %v1121_v45 = vld [vmem:[%s2177_s13] sm:$0xff] }
 0x566   : > { %v803_v48 = vpop.xlane.xlu0 %802 }
 0x567   : > { %v804_v49 = vadd.f32 %v803_v48, %v800_v47 }
 0x568   : > { %v1022_v2 = vld [vmem:[#allocation3 + $0x8] sm:$0xff] }
 0x569   : > { %805 = vst.msk [vmem:[#allocation3 + $0x10] sm:$0xff] %vm440_vm2, %v804_v49 }
 0x56e   : > { %v942_v54 = vpop.xlane.xlu1 %941  ;;  %v530_v55 = vpop.permute.xlu0 %529 }
 0x56f   : > { %v943_v56 = vadd.f32 %v942_v54, %v939_v53  ;;  %v532_v57 = vmul.f32 %v530_v55, %v526_v52 }
 0x570   : > { %v1032_v58 = vld [vmem:[#allocation3 + $0x10] sm:$0xff] }
 0x571   : > { %944 = vst.msk [vmem:[#allocation3 + $0x18] sm:$0xff] %vm440_vm2, %v943_v56  ;;  %v581_v59 = vadd.f32 %v2257_v33, %v532_v57  ;;  %1560 = vrcp.f32 %v1032_v58 }
 0x572   : > { %1562 = vrcp.f32 %v1022_v2  ;;  %v811_v22 = vpop.permute.xlu0 %810 }
 0x573   : > { %582 = vst.msk [vmem:[#allocation4] sm:$0xff] %vm454_vm1, %v581_v59 }
 0x576   : > { %v950_v27 = vpop.permute.xlu0 %949 }
 0x578   : > { %v1042_v33 = vld [vmem:[#allocation3 + $0x18] sm:$0xff] }
 0x579   : > { %1564 = vrcp.f32 %v1042_v33 }
 0x57a   : > { %v665_v18 = vld [vmem:[#allocation4] sm:$0xff] }
 0x57b   : > { %v1561_v60 = vpop.eup %1560  ;;  %v671_v19 = vmul.f32 %v669_v50, %v665_v18 }
 0x57c   : > { %1037 = vperm.xlu0 %1536, %v1561_v60   ;;  %v1563_v11 = vpop.eup %1562 }
 0x583   : > { %v1565_v12 = vpop.eup %1564 }
 0x59f   : > { %v1018_v31 = vpop.permute.xlu0 %1017 }
 0x5a5   : > { %v718_v61 = vpop.f32.mrb[4].mxu0 }
 0x5a6   : > { %v1392_v62 = vpop.f32.mrb[5].mxu0  ;;  %725 = vrot.lane.b32.xlu1 %v718_v61, %s1857_s12 }
 0x5a7   : > { %v721_v63 = vpop.f32.mrb[6].mxu0 }
 0x5a8   : > { %v1393_v1 = vpop.f32.mrb[7].mxu0 }
 0x5ad   : > { %v857_v3 = vpop.f32.mrb[8].mxu0 }
 0x5ae   : > { %v1404_v4 = vpop.f32.mrb[9].mxu0  ;;  %864 = vrot.lane.b32.xlu1 %v857_v3, %s1858_s23 }
 0x5af   : > { %v860_v5 = vpop.f32.mrb[10].mxu0 }
 0x5b0   : > { %v1405_v6 = vpop.f32.mrb[11].mxu0 }
 0x5b5   : > { %v996_v7 = vpop.f32.mrb[12].mxu0 }
 0x5b6   : > { %v1416_v8 = vpop.f32.mrb[13].mxu0  ;;  %1003 = vrot.lane.b32.xlu1 %v996_v7, %s1859_s16 }
 0x5b7   : > { %v999_v9 = vpop.f32.mrb[14].mxu0 }
 0x5b8   : > { %v1417_v10 = vpop.f32.mrb[15].mxu0 }
 0x5ba   : > { %1027 = vperm.xlu1 %1537, %v1563_v11  }
 0x5be   : > { %1047 = vperm.xlu1 %1537, %v1565_v12  }
 0x5fb   : > { %v1038_v13 = vpop.permute.xlu0 %1037 }
 0x618   : > { %v726_v20 = vpop.permute.xlu1 %725 }
 0x619   : > { %v728_v21 = vadd.f32 %v726_v20, %v671_v19 }
 0x61b   : > { %730 = vst.msk [vmem:[#allocation4] sm:$0xff] %vm729_vm5, %v728_v21 }
 0x620   : > { %v865_v25 = vpop.permute.xlu1 %864 }
 0x622   : > { %v807_v23 = vld [vmem:[#allocation4] sm:$0xff] }
 0x623   : > { %v813_v24 = vmul.f32 %v811_v22, %v807_v23 }
 0x625   : > { %v867_v26 = vadd.f32 %v865_v25, %v813_v24 }
 0x627   : > { %869 = vst.msk [vmem:[#allocation4] sm:$0xff] %vm868_vm6, %v867_v26 }
 0x628   : > { %v1004_v0 = vpop.permute.xlu1 %1003 }
 0x62e   : > { %v946_v28 = vld [vmem:[#allocation4] sm:$0xff] }
 0x62f   : > { %v952_v29 = vmul.f32 %v950_v27, %v946_v28 }
 0x631   : > { %v1006_v30 = vadd.f32 %v1004_v0, %v952_v29 }
 0x633   : > { %1008 = vst.msk [vmem:[#allocation4] sm:$0xff] %vm1007_vm7, %v1006_v30 }
 0x639   : > { %v1028_v35 = vpop.permute.xlu1 %1027 }
 0x63a   : > { %v1014_v32 = vld [vmem:[#allocation4] sm:$0xff] }
 0x63b   : > { %v1020_v34 = vmul.f32 %v1018_v31, %v1014_v32 }
 0x63d   : > { %1021 = vst.msk [vmem:[#allocation4] sm:$0xff] %vm454_vm1, %v1020_v34  ;;  %v1048_v38 = vpop.permute.xlu1 %1047 }
 0x644   : > { %v1024_v36 = vld [vmem:[#allocation4] sm:$0xff] }
 0x645   : > { %v1030_v37 = vmul.f32 %v1028_v35, %v1024_v36 }
 0x647   : > { %1031 = vst.msk [vmem:[#allocation4] sm:$0xff] %vm729_vm5, %v1030_v37 }
 0x64e   : > { %v1034_v15 = vld [vmem:[#allocation4] sm:$0xff] }
 0x64f   : > { %v1040_v16 = vmul.f32 %v1038_v13, %v1034_v15 }
 0x651   : > { %1041 = vst.msk [vmem:[#allocation4] sm:$0xff] %vm868_vm6, %v1040_v16 }
 0x658   : > { %v1044_v39 = vld [vmem:[#allocation4] sm:$0xff] }
 0x659   : > { %v1050_v40 = vmul.f32 %v1048_v38, %v1044_v39 }
 0x65b   : > { %1051 = vst.msk [vmem:[#allocation4] sm:$0xff] %vm1007_vm7, %v1050_v40 }
 0x662   : > { %v1052_v41 = vld [vmem:[#allocation4] sm:$0xff] }
 0x663   : > { %v1053_v42 = vpack.c.bf16 %v1052_v41, %v1052_v41 }
 0x665   : > { %1423 = vmatmul.mubr.msk.bf16.vlgmr.msra.gmra.mrb[16].mxu1 %vm449_vm4, %v1053_v42 }
 0x738   : > { %v1115_v44 = vpop.f32.mrb[16].mxu1 }
 0x739   : > { %v1116_v46 = vadd.f32 %v1343_v43, %v1115_v44  ;;  %v1424_v47 = vpop.f32.mrb[17].mxu1 }
 0x73a   : > { %v1118_v48 = vpop.f32.mrb[18].mxu1 }
 0x73b   : > { %v1122_v49 = vadd.f32 %v1121_v45, %v1116_v46  ;;  %v1425_v50 = vpop.f32.mrb[19].mxu1 }
 0x73d   : > { %1123 = vst.msk [vmem:[%s434_s11] sm:$0xff] %vm449_vm4, %v1122_v49 }
 0x73e   : > { %1755 = shalt.err (!%p1752_p4)
}
 0x73f   : > { %s1756_s18 = scalar_lea.hbm %s2320_s20, 128  ;;  %s1760_s4 = scalar_lea.hbm %s2376_s6, 256 }
 0x740   : > { %p1757_p9 = scmp.ne.s32.totalorder %s2320_s20, %s1756_s18  ;;  %p1761_p10 = scmp.lt.u32.totalorder %s2320_s20, %s2376_s6 }
 0x741   : > { %p1762_p3 = scmp.lt.u32.totalorder %s1760_s4, %s1756_s18  ;;  %p1764_p6 = scmp.lt.u32.totalorder %s1756_s18, %s2320_s20 }
 0x742   : > { %p1758_p7 = pnand %p1757_p9, %p2424_p1 }
 0x743   : > { %p1763_p11 = por %p1762_p3, %p1761_p10 }
 0x744   : > { %p1759_p5 = pneg %p1758_p7 }
 0x745   : > { %p1765_p8 = por %p1764_p6, %p1763_p11 }
 0x747   : > { %p1766_p0 = pnand %p1765_p8, %p1759_p5 }
 0x749   : > { %1769 = shalt.err (!%p1766_p0)
}
 0x74a   : > { %1442 = dma.vmem_to_hbm [thread:$0]  (%p2424_p1), %s2322_s21, 128, %s2320_s20, %s1125_s24  }
 0x74b PF: > { %s2425_s29 = sld [smem:[#allocation23_spill]]  ;;  %s2426_s1 = sld [smem:[#allocation25_spill]] }
 0x74c   : > { %p2428_p12 = scmp.ge.s32.totalorder %s1840_s26, 2 }
 0x751   : > { %s1151_s12 = sand.u32 1, %s2425_s29   ;;  %p2427_p13 = scmp.ne.s32.totalorder %s2426_s1, 0 }
 0x752   : > { %s1152_s23 = scalar_lea.sflag [#allocation7], %s1151_s12 }
 0x753   : > { %p1465_p2 = pnand %p2428_p12, %p2427_p13 }
 0x755   : > { %1815 = dma.done.wait (!%p1465_p2), %s1152_s23, 128  }
 0x756   : > { %1817 = vsyncadd (!%p1465_p2), %s1152_s23, 4294967168  ;;  %s29_s26 = sadd.s32 1, %s1840_s26   ;;  %s2429_s16 = sld [smem:[#allocation24_spill]] }
 0x757   : > { %p26_p4 = scmp.ge.s32.totalorder %s29_s26, 4   ;;  %s2430_s23 = sld [smem:[#allocation27_spill]] }
 0x758   : > { %s2431_s14 = sld [smem:[#allocation26_spill]]  ;;  %s2432_s21 = smov %s1824_s22 }
 0x759   : > { %s2434_s24 = smov %s1836_s25  ;;  %28 = sbr.rel (!%p26_p4) target bundleno = 14 (0xe), region = 148 }
 0x75c   : > { %s2433_s22 = smov %s2429_s16 }
 0x75e   : > { %s2435_s25 = smov %s2431_s14 }
 0x760   :  { %1157 = vsyncpa [#allocation6], 1 }
 0x761   :  { %1159 = vsyncpa [#allocation6 + $0x1], 1 }
 0x762   :  { %1160 = vsyncpa [#allocation9], 1 }
 0x763   :  { %1162 = vsyncpa [#allocation9 + $0x1], 1 }
 0x764   :  { %1163 = vsyncpa [#allocation12], 1 }
 0x765   :  { %1165 = vsyncpa [#allocation12 + $0x1], 1 }
 0x766   :  { %1166 = vsyncpa [#allocation15], 1 }
 0x767   :  { %1167 = vsyncpa [#allocation7], 1 }
 0x768   :  { %1169 = vsyncpa [#allocation7 + $0x1], 1 }

// kernel: transformer_block_forward.6
= control target key start
LH: loop header
LB: loop body
LE: loop exit
PB: predicated region body
PF: predicated region fallthrough
CT: control target
= control target key end

     0   :  { %s1625_s0 = inlined_call_operand.hbm [shape: f32[2,8,32], index: 0, kind: input, shape index: {}]   ;;  %s1626_s1 = inlined_call_operand.hbm [shape: f32[1,32], index: 1, kind: input, shape index: {}]   ;;  %s1627_s2 = inlined_call_operand.hbm [shape: f32[1,32], index: 2, kind: input, shape index: {}]   ;;  %s1628_s3 = inlined_call_operand.hbm [shape: bf16[32,96], index: 3, kind: input, shape index: {}]   ;;  %s1629_s4 = inlined_call_operand.hbm [shape: f32[1,96], index: 4, kind: input, shape index: {}]   ;;  %s1630_s5 = inlined_call_operand.hbm [shape: bf16[2,8,32], index: 5, kind: output, shape index: {0}]   ;;  %s1631_s6 = inlined_call_operand.hbm [shape: bf16[2,8,32], index: 6, kind: output, shape index: {1}]   ;;  %s1632_s7 = inlined_call_operand.hbm [shape: bf16[2,8,32], index: 7, kind: output, shape index: {2}]  }
   0x1   :  { %1637 = sst [smem:[#allocation20_spill]] %s1626_s1 }
   0x2   :  { %1638 = sst [smem:[#allocation21_spill]] %s1627_s2 }
   0x3   :  { %13 = vsyncpa [#allocation3], 0 }
   0x4   :  { %15 = vsyncpa [#allocation3 + $0x1], 0 }
   0x5   :  { %16 = vsyncpa [#allocation6], 0 }
   0x6   :  { %17 = vsyncpa [#allocation9], 0 }
   0x7   :  { %18 = vsyncpa [#allocation4], 0 }
   0x8   :  { %20 = vsyncpa [#allocation4 + $0x1], 0 }
   0x9   :  { %21 = vsyncpa [#allocation13], 0 }
   0xa   :  { %23 = vsyncpa [#allocation13 + $0x1], 0  ;;  %s1252_s24 = smov 0   ;;  %s1254_s25 = smov 0  }
   0xb   :  { %s1256_s26 = smov 0   ;;  %s1258_s27 = smov 0  }
   0xc   :  { %s1260_s28 = smov 0   ;;  %s1262_s29 = smov 0  }
   0xd LB: > { %s1283_s30 = sadd.s32 4294967295, %s1196_s29   ;;  %p737_p0 = scmp.ge.s32.totalorder %s1196_s29, 1  ;;  %s1196_s29 = sphi %s1262_s29, %s29_s29   ;;  %s1192_s28 = sphi %s1260_s28, %s1663_s28   ;;  %s1188_s27 = sphi %s1258_s27, %s1662_s27   ;;  %s1184_s26 = sphi %s1256_s26, %s1661_s26   ;;  %s1180_s25 = sphi %s1254_s25, %s1660_s25   ;;  %s1176_s24 = sphi %s1252_s24, %s1659_s24  }
   0xe   : > { %p1633_p1 = scmp.eq.s32.totalorder %s1283_s30, 0  ;;  %p242_p2 = scmp.lt.s32.totalorder %s1196_s29, 3 }
   0xf   : > { %s1198_s9 = smov [#allocation5]   ;;  %s1199_s11 = smov [#allocation8]  }
  0x10   : > { %p1288_p3 = pnand %p737_p0, %p242_p2  ;;  %s255_s10 = sshll.u32 %s1198_s9, 4  ;;  %s256_s10 = int_to_ptr.vmem [resolvable:$true] %s255_s10 }
  0x11   : > { %s276_s12 = sshll.u32 %s1199_s11, 4  ;;  %s1200_s14 = smov [#allocation7]   ;;  %s1301_s12 = int_to_ptr.vmem [resolvable:$true] %s276_s12 }
  0x12   : > { %s1639_s8 = scalar_select %p1288_p3, 1, 0 }
  0x13   : > { %p805_p5 = pneg %p1288_p3  ;;  %s1303_s15 = sshll.u32 %s1200_s14, 4  ;;  %s267_s15 = int_to_ptr.vmem [resolvable:$true] %s1303_s15 }
  0x14   : > { %s1641_s1 = sld [smem:[#allocation20_spill]] }
  0x15   : > { %p1297_p6 = pnand %p805_p5, %p1633_p1 }
  0x17   : > { %p1313_p8 = pneg %p1297_p6 }
  0x1a   : > { %s904_s18 = scalar_lea.hbm %s1641_s1, 16 }
  0x1b   : > { %p905_p7 = scmp.ne.s32.totalorder %s1641_s1, %s904_s18  ;;  %p911_p11 = scmp.lt.u32.totalorder %s904_s18, %s1641_s1 }
  0x1d   : > { %p907_p9 = pnand %p1313_p8, %p905_p7 }
  0x1f   : > { %p908_p10 = pneg %p907_p9 }
  0x21   : > { %p913_p12 = pnand %p911_p11, %p908_p10 }
  0x23   : > { %916 = shalt.err (!%p913_p12)
}
  0x24   : > { %s917_s9 = scalar_lea.vmem %s256_s10, 16  ;;  %s924_s11 = scalar_lea.vmem %s256_s10, 32 }
  0x25   : > { %p918_p13 = scmp.ne.s32.totalorder %s256_s10, %s917_s9  ;;  %p925_p5 = scmp.lt.s32.totalorder %s256_s10, %s256_s10 }
  0x26   : > { %p926_p4 = scmp.lt.s32.totalorder %s924_s11, %s917_s9 }
  0x27   : > { %p920_p0 = pnand %p918_p13, %p1313_p8 }
  0x28   : > { %p927_p1 = por %p926_p4, %p925_p5 }
  0x29   : > { %p921_p2 = pneg %p920_p0 }
  0x2b   : > { %p928_p3 = pnand %p927_p1, %p921_p2 }
  0x2d   : > { %931 = shalt.err (!%p928_p3)
}
  0x2e   : > { %808 = dma.hbm_to_vmem [thread:$0]  (!%p1297_p6), %s1641_s1, 16, %s256_s10, [#allocation6]  }
  0x2f   : > { %s932_s19 = scalar_lea.hbm %s1628_s3, 256 }
  0x30   : > { %p933_p7 = scmp.ne.s32.totalorder %s1628_s3, %s932_s19  ;;  %p939_p1 = scmp.lt.u32.totalorder %s932_s19, %s1628_s3 }
  0x32   : > { %p935_p9 = pnand %p933_p7, %p1313_p8 }
  0x34   : > { %p936_p4 = pneg %p935_p9 }
  0x36   : > { %p941_p3 = pnand %p939_p1, %p936_p4 }
  0x38   : > { %944 = shalt.err (!%p941_p3)
}
  0x39   : > { %s945_s10 = scalar_lea.vmem %s1301_s12, 256  ;;  %p953_p13 = scmp.lt.s32.totalorder %s1301_s12, %s1301_s12 }
  0x3a   : > { %p946_p10 = scmp.ne.s32.totalorder %s1301_s12, %s945_s10  ;;  %p954_p0 = scmp.lt.s32.totalorder %s945_s10, %s945_s10 }
  0x3c   : > { %p948_p11 = pnand %p946_p10, %p1313_p8  ;;  %p955_p2 = por %p954_p0, %p953_p13 }
  0x3e   : > { %p949_p12 = pneg %p948_p11 }
  0x40   : > { %p956_p5 = pnand %p955_p2, %p949_p12 }
  0x42   : > { %959 = shalt.err (!%p956_p5)
}
  0x43   : > { %s1201_s11 = smov 64   ;;  %s1202_s14 = smov 4  }
  0x44   : > { %814 = dma.hbm_to_vmem [thread:$0]  (!%p1297_p6), %s1628_s3, 256, %s1301_s12, [#allocation9], %s1201_s11, %s1201_s11, %s1202_s14  }
  0x45   : > { %s1643_s2 = sld [smem:[#allocation21_spill]] }
  0x4b   : > { %s960_s20 = scalar_lea.hbm %s1643_s2, 16 }
  0x4c   : > { %p961_p7 = scmp.ne.s32.totalorder %s1643_s2, %s960_s20  ;;  %p967_p1 = scmp.lt.u32.totalorder %s960_s20, %s1643_s2 }
  0x4e   : > { %p963_p9 = pnand %p961_p7, %p1313_p8 }
  0x50   : > { %p964_p4 = pneg %p963_p9 }
  0x52   : > { %p969_p3 = pnand %p967_p1, %p964_p4 }
  0x54   : > { %972 = shalt.err (!%p969_p3)
}
  0x55   : > { %s973_s16 = scalar_lea.vmem %s267_s15, 16  ;;  %s980_s12 = scalar_lea.vmem %s267_s15, 32 }
  0x56   : > { %p974_p10 = scmp.ne.s32.totalorder %s267_s15, %s973_s16  ;;  %p981_p13 = scmp.lt.s32.totalorder %s267_s15, %s267_s15 }
  0x57   : > { %p982_p0 = scmp.lt.s32.totalorder %s980_s12, %s973_s16 }
  0x58   : > { %p976_p11 = pnand %p974_p10, %p1313_p8 }
  0x59   : > { %p983_p2 = por %p982_p0, %p981_p13 }
  0x5a   : > { %p977_p12 = pneg %p976_p11 }
  0x5c   : > { %p984_p5 = pnand %p983_p2, %p977_p12 }
  0x5e   : > { %987 = shalt.err (!%p984_p5)
}
  0x5f   : > { %811 = dma.hbm_to_vmem [thread:$0]  (!%p1297_p6), %s1643_s2, 16, %s267_s15, [#allocation6]  }
  0x60   : > { %s1203_s17 = smov [#allocation10]   ;;  %s988_s22 = scalar_lea.hbm %s1629_s4, 16 }
  0x61   : > { %s290_s18 = sshll.u32 %s1203_s17, 4  ;;  %p989_p7 = scmp.ne.s32.totalorder %s1629_s4, %s988_s22  ;;  %s291_s18 = int_to_ptr.vmem [resolvable:$true] %s290_s18 }
  0x62   : > { %p995_p1 = scmp.lt.u32.totalorder %s988_s22, %s1629_s4 }
  0x63   : > { %p991_p9 = pnand %p989_p7, %p1313_p8 }
  0x65   : > { %p992_p4 = pneg %p991_p9 }
  0x67   : > { %p997_p3 = pnand %p995_p1, %p992_p4 }
  0x69   : > { %1000 = shalt.err (!%p997_p3)
}
  0x6a   : > { %s1001_s15 = scalar_lea.vmem %s291_s18, 16  ;;  %s1008_s12 = scalar_lea.vmem %s291_s18, 32 }
  0x6b   : > { %p1002_p10 = scmp.ne.s32.totalorder %s291_s18, %s1001_s15  ;;  %p1009_p13 = scmp.lt.s32.totalorder %s291_s18, %s291_s18 }
  0x6c   : > { %p1010_p0 = scmp.lt.s32.totalorder %s1008_s12, %s1001_s15 }
  0x6d   : > { %p1004_p11 = pnand %p1002_p10, %p1313_p8 }
  0x6e   : > { %p1011_p2 = por %p1010_p0, %p1009_p13 }
  0x6f   : > { %p1005_p12 = pneg %p1004_p11 }
  0x71   : > { %p1012_p5 = pnand %p1011_p2, %p1005_p12 }
  0x73   : > { %1015 = shalt.err (!%p1012_p5)
}
  0x74   : > { %817 = dma.hbm_to_vmem [thread:$0]  (!%p1297_p6), %s1629_s4, 16, %s291_s18, [#allocation9]  }
  0x75   : > { %s1635_s21 = sadd.s32 4294967294, %s1196_s29   ;;  %s41_s17 = sadd.s32 1, %s1192_s28 }
  0x76   : > { %p43_p8 = scmp.ge.s32.totalorder %s41_s17, 2  ;;  %s50_s13 = sadd.s32 1, %s1184_s26 }
  0x77   : > { %p57_p7 = scmp.ne.s32.totalorder %s1184_s26, %s1180_s25  ;;  %p58_p9 = scmp.eq.s32.totalorder %s1196_s29, 0 }
  0x78   : > { %s1665_s17 = smov (%p43_p8, %s41_s17), 0  ;;  %p63_p1 = scmp.ne.s32.totalorder %s1180_s25, %s1176_s24 }
  0x79   : > { %p1397_p4 = por %p58_p9, %p57_p7  ;;  %s45_s18 = ssub.s32 %s1192_s28, %s1665_s17 }
  0x7a   : > { %p173_p6 = scmp.eq.s32.totalorder %s1283_s30, 1  ;;  %p48_p3 = scmp.eq.s32.totalorder %s45_s18, 0 }
  0x7b   : > { %p1645_p10 = scmp.eq.s32.totalorder %s1283_s30, 0  ;;  %p179_p13 = scmp.eq.s32.totalorder %s1635_s21, 1 }
  0x7c   : > { %p1412_p12 = por %p173_p6, %p57_p7  ;;  %p836_p2 = scmp.lt.s32.totalorder %s1196_s29, 2 }
  0x7d   : > { %p1408_p11 = por %p1645_p10, %p63_p1  ;;  %p1421_p0 = por %p179_p13, %p63_p1 }
  0x7e   : > { %s1647_s22 = scalar_select %p1412_p12, 1, 0 }
  0x7f   : > { %s1419_s23 = scalar_select %p48_p3, %s1184_s26, %s50_s13  }
  0x80   : > { %s1648_s9 = scalar_select %p1421_p0, 1, 0 }
  0x81   : > { %s301_s10 = sand.u32 1, %s1184_s26   ;;  %s744_s16 = sshll.u32 %s1192_s28, 7 }
  0x82   : > { %s743_s15 = sshll.u32 %s301_s10, 3  ;;  %s1431_s14 = scalar_lea.hbm %s1625_s0, %s744_s16 }
  0x83   : > { %s305_s18 = scalar_lea.vmem [#allocation2], %s743_s15  ;;  %p1435_p5 = pnand %p836_p2, %p1397_p4 }
  0x84   : > { %s313_s13 = sshll.u32 %s305_s18, 4  ;;  %s302_s1 = scalar_lea.sflag [#allocation3], %s301_s10  ;;  %s1439_s13 = int_to_ptr.vmem [resolvable:$true] %s313_s13 }
  0x85   : > { %s1016_s2 = scalar_lea.hbm %s1431_s14, 128  ;;  %p1018_p7 = pneg %p1435_p5 }
  0x86   : > { %p1017_p8 = scmp.ne.s32.totalorder %s1431_s14, %s1016_s2  ;;  %s1021_s19 = scalar_lea.hbm %s1625_s0, 256 }
  0x87   : > { %p1022_p4 = scmp.lt.u32.totalorder %s1431_s14, %s1625_s0  ;;  %p1023_p6 = scmp.lt.u32.totalorder %s1021_s19, %s1016_s2 }
  0x88   : > { %p1019_p9 = pnand %p1018_p7, %p1017_p8  ;;  %p1025_p10 = scmp.lt.u32.totalorder %s1016_s2, %s1431_s14 }
  0x89   : > { %p1024_p3 = por %p1023_p6, %p1022_p4 }
  0x8a   : > { %p1020_p1 = pneg %p1019_p9 }
  0x8b   : > { %p1026_p13 = por %p1025_p10, %p1024_p3 }
  0x8d   : > { %p1027_p2 = pnand %p1026_p13, %p1020_p1 }
  0x8f   : > { %1030 = shalt.err (!%p1027_p2)
}
  0x90   : > { %s1031_s10 = scalar_lea.vmem %s1439_s13, 128  ;;  %s1204_s18 = smov [#allocation2]  }
  0x91   : > { %p1032_p8 = scmp.ne.s32.totalorder %s1439_s13, %s1031_s10  ;;  %s1036_s16 = sshll.u32 %s1204_s18, 4  ;;  %s1037_s16 = int_to_ptr.vmem [resolvable:$false] %s1036_s16 }
  0x92   : > { %s1038_s15 = scalar_lea.vmem %s1037_s16, 256  ;;  %p1039_p12 = scmp.lt.s32.totalorder %s1439_s13, %s1037_s16 }
  0x93   : > { %p1034_p9 = pnand %p1032_p8, %p1018_p7  ;;  %p1040_p4 = scmp.lt.s32.totalorder %s1038_s15, %s1031_s10 }
  0x95   : > { %p1035_p0 = pneg %p1034_p9  ;;  %p1041_p6 = por %p1040_p4, %p1039_p12 }
  0x97   : > { %p1042_p3 = pnand %p1041_p6, %p1035_p0 }
  0x99   : > { %1045 = shalt.err (!%p1042_p3)
}
  0x9a   : > { %821 = dma.hbm_to_vmem [thread:$0]  (!%p1435_p5), %s1431_s14, 128, %s1439_s13, %s302_s1  }
  0x9b   : > { %p1650_p1 = scmp.ne.s32.totalorder %s1639_s8, 0 }
  0x9c   : > { %s1469_s2 = sand.u32 (!%p1650_p1), 1, %s1180_s25  }
  0x9d   : > { %322 = sbr.rel (%p1650_p1) target bundleno = 856 (0x358), region = 40  ;;  %s746_s19 = sshll.u32 (!%p1650_p1), %s1469_s2, 3 }
  0x9e   : > { %s325_s12 = scalar_lea.sflag (!%p1650_p1), [#allocation3], %s1469_s2  ;;  %s328_s11 = scalar_lea.vmem (!%p1650_p1), [#allocation2], %s746_s19 }
  0xa4   : > { %1155 = dma.done.wait (%p1408_p11), %s325_s12, 128  }
  0xa5   : > { %1157 = vsyncadd (%p1408_p11), %s325_s12, 4294967168  ;;  %p1651_p12 = scmp.eq.s32.totalorder %s1283_s30, 0 }
  0xa7   : > { %1159 = dma.done.wait (%p1651_p12), [#allocation6], 32   ;;  %p1652_p0 = pmov %p1651_p12 }
  0xa9   : > { %1161 = vsyncadd (%p1652_p0), [#allocation6], 4294967264  ;;  %p1653_p5 = pmov %p1652_p0 }
  0xaa   : > { %p1654_p7 = pmov %p1652_p0 }
  0xab   : > { %1163 = dma.done.wait (%p1653_p5), [#allocation9], 272  }
  0xac   : > { %1165 = vsyncadd (%p1654_p7), [#allocation9], 4294967024  ;;  %vm389_vm0 = vcmask 261120   ;;  %v386_v0 = vld [vmem:[%s328_s11] sm:$0xff]  ;;  %v900_v7 = vld [vmem:[#allocation8] sm:$0xff]   ;;  %v1205_v8 = vmov 0.0  }
  0xad   : > { %v390_v1 = vsel %vm389_vm0, %v386_v0, 0.0  ;;  %773 = vmatprep.subr.bf16.mxu0 %v1205_v8  ;;  %v901_v9 = vld [vmem:[#allocation8 + $0x8] sm:$0xff]   ;;  %vm1206_vm1 = vmmov 0   ;;  %v754_v14 = vld [vmem:[#allocation5] ss:$0 sm:$0xff]  ;;  %s1489_s1 = sshll.u32 %s1469_s2, 2 }
  0xae   : > { %391 = vadd.xlane.f32.xlu0 %v390_v1  ;;  %774 = vmatpush3.bf16.msra.mxu0 %v900_v7  ;;  %v755_v16 = vld [vmem:[#allocation7] ss:$0 sm:$0xff]  ;;  %v756_v20 = vld [vmem:[#allocation10] ss:$0 sm:$0xff]  ;;  %s1492_s8 = sshll.u32 %s1188_s27, 6  ;;  %s370_s21 = scalar_lea.vmem [#allocation11], %s1489_s1 }
  0xaf   : > { %777 = vmatprep.mubr.msk.bf16.mxu0 %vm1206_vm1, %v1205_v8  ;;  %775 = vmatprep.subr.bf16.mxu0 %v1205_v8  ;;  %s526_s20 = sshll.u32 %s370_s21, 4  ;;  %vm487_vm2 = vcmask 257024   ;;  %s1207_s14 = smov 96   ;;  %s1501_s20 = int_to_ptr.vmem [resolvable:$true] %s526_s20 }
  0xb0   : > { %s1499_s18 = scalar_lea.hbm %s1630_s5, %s1492_s8  ;;  %s502_s27 = scalar_lea.sflag [#allocation4], %s1469_s2 }
  0xb1   : > { %s1046_s16 = scalar_lea.vmem %s1501_s20, 64  ;;  %p1655_p10 = scmp.ne.s32.totalorder %s1647_s22, 0 }
  0xb2   : > { %776 = vmatpush3.bf16.msra.mxu0 %v901_v9  ;;  %p1047_p11 = scmp.ne.s32.totalorder %s1501_s20, %s1046_s16  ;;  %s1208_s15 = smov [#allocation11]  }
  0xb3   : > { %s1050_s19 = sshll.u32 %s1208_s15, 4  ;;  %s1051_s19 = int_to_ptr.vmem [resolvable:$false] %s1050_s19 }
  0xb4   : > { %p1048_p13 = pnand %p1047_p11, %p1655_p10  ;;  %s1052_s12 = scalar_lea.vmem %s1051_s19, 128 }
  0xb5   : > { %p1053_p8 = scmp.lt.s32.totalorder %s1501_s20, %s1051_s19  ;;  %p1054_p9 = scmp.lt.s32.totalorder %s1052_s12, %s1046_s16 }
  0xb6   : > { %p1049_p2 = pneg %p1048_p13 }
  0xb7   : > { %p1055_p4 = por %p1054_p9, %p1053_p8 }
  0xb9   : > { %p1056_p6 = pnand %p1055_p4, %p1049_p2 }
 0x13b   : > { %v392_v2 = vpop.xlane.xlu0 %391 }
 0x13c   : > { %v394_v3 = vmul.f32 0.03125, %v392_v2 }
 0x13e   : > { %v395_v4 = vsub.f32 %v386_v0, %v394_v3 }
 0x140   : > { %v396_v5 = vmul.f32 %v395_v4, %v395_v4 }
 0x142   : > { %v397_v6 = vsel %vm389_vm0, %v396_v5, 0.0 }
 0x143   : > { %398 = vadd.xlane.f32.xlu0 %v397_v6 }
 0x1d0   : > { %v399_v10 = vpop.xlane.xlu0 %398 }
 0x1d1   : > { %v400_v11 = vmul.f32 0.03125, %v399_v10 }
 0x1d3   : > { %v401_v12 = vadd.f32 1e-05, %v400_v11 }
 0x1d5   : > { %902 = vrsqrt.f32 %v401_v12 }
 0x1df   : > { %v903_v13 = vpop.eup %902 }
 0x1e0   : > { %v403_v15 = vmul.f32 %v903_v13, %v395_v4 }
 0x1e2   : > { %v410_v17 = vmul.f32 %v754_v14, %v403_v15 }
 0x1e4   : > { %v417_v18 = vadd.f32 %v755_v16, %v410_v17 }
 0x1e6   : > { %v418_v19 = vpack.c.bf16 %v417_v18, %v417_v18 }
 0x1e8   : > { %778 = vmatmul.mubr.msk.bf16.vlgmr.msra.gmra.mrb[0].mxu0 %vm389_vm0, %v418_v19 }
 0x2bb   : > { %v479_v21 = vpop.f32.mrb[0].mxu0 }
 0x2bc   : > { %v480_v22 = vadd.f32 %v756_v20, %v479_v21  ;;  %v779_v23 = vpop.f32.mrb[1].mxu0 }
 0x2bd   : > { %v482_v24 = vpop.f32.mrb[2].mxu0 }
 0x2be   : > { %v485_v25 = vmul.f32 0.35355338, %v480_v22  ;;  %v780_v26 = vpop.f32.mrb[3].mxu0  ;;  %v769_v27 = vpack.c.bf16 %v480_v22, %v480_v22 }
 0x2c0   : > { %v486_v28 = vpack.c.bf16 %v485_v25, %v485_v25  ;;  %493 = vrot.lane.b32.xlu1 %v769_v27, %s1207_s14 }
 0x2c2   : > { %488 = vst.msk [vmem:[%s370_s21] sm:$0xf] %vm487_vm2, %v486_v28 }
 0x2c3   : > { %1059 = shalt.err (!%p1056_p6)
}
 0x2c4   : > { %s1060_s2 = scalar_lea.hbm %s1499_s18, 64  ;;  %s1064_s14 = scalar_lea.hbm %s1630_s5, 128 }
 0x2c5   : > { %p1061_p3 = scmp.ne.s32.totalorder %s1499_s18, %s1060_s2  ;;  %p1065_p0 = scmp.lt.u32.totalorder %s1499_s18, %s1630_s5 }
 0x2c6   : > { %p1066_p5 = scmp.lt.u32.totalorder %s1064_s14, %s1060_s2  ;;  %p1068_p11 = scmp.lt.u32.totalorder %s1060_s2, %s1499_s18 }
 0x2c7   : > { %p1062_p1 = pnand %p1061_p3, %p1655_p10 }
 0x2c8   : > { %p1067_p7 = por %p1066_p5, %p1065_p0 }
 0x2c9   : > { %p1063_p12 = pneg %p1062_p1 }
 0x2ca   : > { %p1069_p13 = por %p1068_p11, %p1067_p7 }
 0x2cc   : > { %p1070_p2 = pnand %p1069_p13, %p1063_p12 }
 0x2ce   : > { %1073 = shalt.err (!%p1070_p2)
}
 0x2cf   : > { %799 = dma.vmem_to_hbm [thread:$0]  (%p1655_p10), %s1501_s20, 64, %s1499_s18, %s502_s27  }
 0x2d0   : > { %s1209_s16 = smov 64   ;;  %s506_s15 = sand.u32 1, %s1283_s30  }
 0x2d1   : > { %497 = vrot.lane.b32.xlu1 %v769_v27, %s1209_s16  ;;  %s377_s19 = scalar_lea.vmem [#allocation12], %s1489_s1  ;;  %s1532_s21 = scalar_lea.hbm %s1631_s6, %s1492_s8 }
 0x2d2   : > { %s540_s12 = sshll.u32 %s377_s19, 4  ;;  %s384_s14 = scalar_lea.vmem [#allocation14], %s1489_s1  ;;  %s1534_s12 = int_to_ptr.vmem [resolvable:$true] %s540_s12 }
 0x2d3   : > { %s1539_s13 = sshll.u32 %s384_s14, 4  ;;  %s1542_s30 = scalar_lea.sflag [#allocation13], %s506_s15  ;;  %s1573_s13 = int_to_ptr.vmem [resolvable:$true] %s1539_s13 }
 0x2d4   : > { %s1074_s20 = scalar_lea.vmem %s1534_s12, 64  ;;  %s1210_s18 = smov [#allocation12]  }
 0x2d5   : > { %p1075_p8 = scmp.ne.s32.totalorder %s1534_s12, %s1074_s20  ;;  %s1078_s27 = sshll.u32 %s1210_s18, 4  ;;  %s1079_s27 = int_to_ptr.vmem [resolvable:$false] %s1078_s27 }
 0x2d6   : > { %s1080_s10 = scalar_lea.vmem %s1079_s27, 128  ;;  %p1081_p6 = scmp.lt.s32.totalorder %s1534_s12, %s1079_s27 }
 0x2d7   : > { %p1076_p9 = pnand %p1075_p8, %p1655_p10  ;;  %p1082_p3 = scmp.lt.s32.totalorder %s1080_s10, %s1074_s20 }
 0x2d9   : > { %p1077_p4 = pneg %p1076_p9  ;;  %p1083_p1 = por %p1082_p3, %p1081_p6 }
 0x2db   : > { %p1084_p12 = pnand %p1083_p1, %p1077_p4 }
 0x332   : > { %v494_v29 = vpop.permute.xlu1 %493 }
 0x333   : > { %496 = vst.msk [vmem:[%s377_s19] sm:$0xf] %vm487_vm2, %v494_v29 }
 0x334   : > { %1087 = shalt.err (!%p1084_p12)
}
 0x335   : > { %s1088_s16 = scalar_lea.hbm %s1532_s21, 64  ;;  %s1092_s2 = scalar_lea.hbm %s1631_s6, 128 }
 0x336   : > { %p1089_p0 = scmp.ne.s32.totalorder %s1532_s21, %s1088_s16  ;;  %p1093_p11 = scmp.lt.u32.totalorder %s1532_s21, %s1631_s6 }
 0x337   : > { %p1094_p13 = scmp.lt.u32.totalorder %s1092_s2, %s1088_s16  ;;  %p1096_p8 = scmp.lt.u32.totalorder %s1088_s16, %s1532_s21 }
 0x338   : > { %p1090_p5 = pnand %p1089_p0, %p1655_p10 }
 0x339   : > { %p1095_p2 = por %p1094_p13, %p1093_p11 }
 0x33a   : > { %p1091_p7 = pneg %p1090_p5 }
 0x33b   : > { %p1097_p9 = por %p1096_p8, %p1095_p2 }
 0x33d   : > { %p1098_p4 = pnand %p1097_p9, %p1091_p7 }
 0x33f   : > { %1101 = shalt.err (!%p1098_p4)
}
 0x340   : > { %800 = dma.vmem_to_hbm [thread:$0]  (%p1655_p10), %s1534_s12, 64, %s1532_s21, %s1542_s30  }
 0x341   : > { %s1570_s10 = scalar_lea.hbm %s1632_s7, %s1492_s8  ;;  %s1102_s16 = scalar_lea.vmem %s1573_s13, 64 }
 0x342   : > { %p1103_p6 = scmp.ne.s32.totalorder %s1573_s13, %s1102_s16  ;;  %s1211_s12 = smov [#allocation14]  }
 0x343   : > { %v498_v30 = vpop.permute.xlu1 %497  ;;  %s1106_s21 = sshll.u32 %s1211_s12, 4  ;;  %s1107_s21 = int_to_ptr.vmem [resolvable:$false] %s1106_s21 }
 0x344   : > { %500 = vst.msk [vmem:[%s384_s14] sm:$0xf] %vm487_vm2, %v498_v30  ;;  %p1104_p3 = pnand %p1103_p6, %p1655_p10  ;;  %s1108_s15 = scalar_lea.vmem %s1107_s21, 128 }
 0x345   : > { %p1109_p12 = scmp.lt.s32.totalorder %s1573_s13, %s1107_s21  ;;  %p1110_p0 = scmp.lt.s32.totalorder %s1108_s15, %s1102_s16 }
 0x346   : > { %p1105_p1 = pneg %p1104_p3 }
 0x347   : > { %p1111_p5 = por %p1110_p0, %p1109_p12 }
 0x349   : > { %p1112_p7 = pnand %p1111_p5, %p1105_p1 }
 0x34b   : > { %1115 = shalt.err (!%p1112_p7)
}
 0x34c   : > { %s1116_s1 = scalar_lea.hbm %s1570_s10, 64  ;;  %s1120_s19 = scalar_lea.hbm %s1632_s7, 128 }
 0x34d   : > { %p1117_p11 = scmp.ne.s32.totalorder %s1570_s10, %s1116_s1  ;;  %p1121_p8 = scmp.lt.u32.totalorder %s1570_s10, %s1632_s7 }
 0x34e   : > { %p1122_p9 = scmp.lt.u32.totalorder %s1120_s19, %s1116_s1  ;;  %p1124_p6 = scmp.lt.u32.totalorder %s1116_s1, %s1570_s10 }
 0x34f   : > { %p1118_p13 = pnand %p1117_p11, %p1655_p10 }
 0x350   : > { %p1123_p4 = por %p1122_p9, %p1121_p8 }
 0x351   : > { %p1119_p2 = pneg %p1118_p13 }
 0x352   : > { %p1125_p3 = por %p1124_p6, %p1123_p4 }
 0x354   : > { %p1126_p1 = pnand %p1125_p3, %p1119_p2 }
 0x356   : > { %1129 = shalt.err (!%p1126_p1)
}
 0x357   : > { %801 = dma.vmem_to_hbm [thread:$0]  (%p1655_p10), %s1573_s13, 64, %s1570_s10, %s1542_s30  }
 0x358 PF: > { %s566_s18 = sand.u32 1, %s1176_s24   ;;  %p1656_p12 = scmp.ne.s32.totalorder %s1648_s9, 0 }
 0x359   : > { %p1657_p0 = scmp.ge.s32.totalorder %s1196_s29, 2  ;;  %s567_s20 = scalar_lea.sflag [#allocation4], %s566_s18 }
 0x35b   : > { %p823_p5 = pnand %p1657_p0, %p1656_p12 }
 0x35d   : > { %1167 = dma.done.wait (!%p823_p5), %s567_s20, 64  }
 0x35e   : > { %1169 = vsyncadd (!%p823_p5), %s567_s20, 4294967232  ;;  %s1658_s27 = sadd.s32 4294967294, %s1196_s29  }
 0x35f   : > { %s575_s16 = sand.u32 1, %s1658_s27  }
 0x360   : > { %s576_s12 = scalar_lea.sflag [#allocation13], %s575_s16 }
 0x361   : > { %1171 = dma.done.wait (!%p823_p5), %s576_s12, 128  }
 0x362   : > { %1173 = vsyncadd (!%p823_p5), %s576_s12, 4294967168  ;;  %s29_s29 = sadd.s32 1, %s1196_s29   ;;  %s1659_s24 = smov %s1180_s25 }
 0x363   : > { %p26_p10 = scmp.ge.s32.totalorder %s29_s29, 4   ;;  %s1660_s25 = smov %s1184_s26 }
 0x364   : > { %s1661_s26 = smov %s1419_s23  ;;  %s1662_s27 = smov %s1192_s28 }
 0x365   : > { %s1663_s28 = smov %s1665_s17  ;;  %28 = sbr.rel (!%p26_p10) target bundleno = 13 (0xd), region = 133 }
 0x36c   :  { %590 = vsyncpa [#allocation3], 1 }
 0x36d   :  { %592 = vsyncpa [#allocation3 + $0x1], 1 }
 0x36e   :  { %593 = vsyncpa [#allocation6], 1 }
 0x36f   :  { %594 = vsyncpa [#allocation9], 1 }
 0x370   :  { %595 = vsyncpa [#allocation4], 1 }
 0x371   :  { %597 = vsyncpa [#allocation4 + $0x1], 1 }
 0x372   :  { %598 = vsyncpa [#allocation13], 1 }
 0x373   :  { %600 = vsyncpa [#allocation13 + $0x1], 1 }

// kernel: transformer_block_forward.8
= control target key start
LH: loop header
LB: loop body
LE: loop exit
PB: predicated region body
PF: predicated region fallthrough
CT: control target
= control target key end

     0   :  { %s1728_s0 = inlined_call_operand.hbm [shape: f32[2,8,32], index: 0, kind: input, shape index: {}]   ;;  %s1729_s1 = inlined_call_operand.hbm [shape: f32[1,32], index: 1, kind: input, shape index: {}]   ;;  %s1730_s2 = inlined_call_operand.hbm [shape: f32[1,32], index: 2, kind: input, shape index: {}]   ;;  %s1731_s3 = inlined_call_operand.hbm [shape: bf16[32,128], index: 3, kind: input, shape index: {}]   ;;  %s1732_s4 = inlined_call_operand.hbm [shape: f32[1,128], index: 4, kind: input, shape index: {}]   ;;  %s1733_s5 = inlined_call_operand.hbm [shape: bf16[128,32], index: 5, kind: input, shape index: {}]   ;;  %s1734_s6 = inlined_call_operand.hbm [shape: f32[1,32], index: 6, kind: input, shape index: {}]   ;;  %s1735_s7 = inlined_call_operand.hbm [shape: f32[2,8,32], index: 7, kind: output, shape index: {}]  }
   0x1   :  { %1741 = sst [smem:[#allocation22_spill]] %s1729_s1 }
   0x2   :  { %1742 = sst [smem:[#allocation23_spill]] %s1731_s3 }
   0x3   :  { %12 = vsyncpa [#allocation5], 0 }
   0x4   :  { %14 = vsyncpa [#allocation5 + $0x1], 0 }
   0x5   :  { %15 = vsyncpa [#allocation8], 0 }
   0x6   :  { %16 = vsyncpa [#allocation11], 0 }
   0x7   :  { %17 = vsyncpa [#allocation14], 0 }
   0x8   :  { %18 = vsyncpa [#allocation6], 0 }
   0x9   :  { %20 = vsyncpa [#allocation6 + $0x1], 0  ;;  %s1385_s24 = smov 0   ;;  %s1387_s25 = smov 0  }
   0xa   :  { %s1389_s26 = smov 0   ;;  %s1391_s27 = smov 0  }
   0xb   :  { %s1393_s28 = smov 0   ;;  %s1395_s29 = smov 0  }
   0xc LB: > { %s1739_s30 = sadd.s32 4294967295, %s1331_s29   ;;  %p820_p0 = scmp.ge.s32.totalorder %s1331_s29, 1  ;;  %s1331_s29 = sphi %s1395_s29, %s26_s29   ;;  %s1327_s28 = sphi %s1393_s28, %s1765_s28   ;;  %s1323_s27 = sphi %s1391_s27, %s1764_s27   ;;  %s1319_s26 = sphi %s1389_s26, %s1763_s26   ;;  %s1315_s25 = sphi %s1387_s25, %s1762_s25   ;;  %s1311_s24 = sphi %s1385_s24, %s1761_s24  }
   0xd   : > { %p1419_p1 = scmp.eq.s32.totalorder %s1739_s30, 0  ;;  %p247_p2 = scmp.lt.s32.totalorder %s1331_s29, 3 }
   0xe   : > { %s1333_s10 = smov [#allocation7]   ;;  %s1334_s12 = smov [#allocation10]  }
   0xf   : > { %s1743_s8 = scalar_select %p1419_p1, 1, 0 }
  0x10   : > { %p1424_p3 = pnand %p820_p0, %p247_p2  ;;  %s260_s11 = sshll.u32 %s1333_s10, 4  ;;  %s261_s11 = int_to_ptr.vmem [resolvable:$true] %s260_s11 }
  0x11   : > { %s283_s13 = sshll.u32 %s1334_s12, 4  ;;  %s1335_s15 = smov [#allocation13]   ;;  %s1437_s13 = int_to_ptr.vmem [resolvable:$true] %s283_s13 }
  0x12   : > { %s1744_s9 = scalar_select %p1424_p3, 1, 0 }
  0x13   : > { %p926_p5 = pneg %p1424_p3  ;;  %s1439_s16 = sshll.u32 %s1335_s15, 4  ;;  %s313_s16 = int_to_ptr.vmem [resolvable:$true] %s1439_s16 }
  0x14   : > { %s1746_s1 = sld [smem:[#allocation22_spill]] }
  0x15   : > { %p1433_p6 = pnand %p926_p5, %p1419_p1 }
  0x17   : > { %p1449_p8 = pneg %p1433_p6 }
  0x1a   : > { %s1039_s19 = scalar_lea.hbm %s1746_s1, 16 }
  0x1b   : > { %p1040_p7 = scmp.ne.s32.totalorder %s1746_s1, %s1039_s19  ;;  %p1046_p11 = scmp.lt.u32.totalorder %s1039_s19, %s1746_s1 }
  0x1d   : > { %p1042_p9 = pnand %p1449_p8, %p1040_p7 }
  0x1f   : > { %p1043_p10 = pneg %p1042_p9 }
  0x21   : > { %p1048_p12 = pnand %p1046_p11, %p1043_p10 }
  0x23   : > { %1051 = shalt.err (!%p1048_p12)
}
  0x24   : > { %s1052_s12 = scalar_lea.vmem %s261_s11, 16  ;;  %s1059_s15 = scalar_lea.vmem %s261_s11, 32 }
  0x25   : > { %p1053_p13 = scmp.ne.s32.totalorder %s261_s11, %s1052_s12  ;;  %p1060_p5 = scmp.lt.s32.totalorder %s261_s11, %s261_s11 }
  0x26   : > { %p1061_p4 = scmp.lt.s32.totalorder %s1059_s15, %s1052_s12 }
  0x27   : > { %p1055_p0 = pnand %p1053_p13, %p1449_p8 }
  0x28   : > { %p1062_p3 = por %p1061_p4, %p1060_p5 }
  0x29   : > { %p1056_p2 = pneg %p1055_p0 }
  0x2b   : > { %p1063_p1 = pnand %p1062_p3, %p1056_p2 }
  0x2d   : > { %1066 = shalt.err (!%p1063_p1)
}
  0x2e   : > { %929 = dma.hbm_to_vmem [thread:$0]  (!%p1433_p6), %s1746_s1, 16, %s261_s11, [#allocation8]  }
  0x2f   : > { %s1748_s3 = sld [smem:[#allocation23_spill]] }
  0x35   : > { %s1067_s21 = scalar_lea.hbm %s1748_s3, 256 }
  0x36   : > { %p1068_p7 = scmp.ne.s32.totalorder %s1748_s3, %s1067_s21  ;;  %p1074_p1 = scmp.lt.u32.totalorder %s1067_s21, %s1748_s3 }
  0x38   : > { %p1070_p9 = pnand %p1068_p7, %p1449_p8 }
  0x3a   : > { %p1071_p4 = pneg %p1070_p9 }
  0x3c   : > { %p1076_p3 = pnand %p1074_p1, %p1071_p4 }
  0x3e   : > { %1079 = shalt.err (!%p1076_p3)
}
  0x3f   : > { %s1080_s11 = scalar_lea.vmem %s1437_s13, 256  ;;  %p1088_p13 = scmp.lt.s32.totalorder %s1437_s13, %s1437_s13 }
  0x40   : > { %p1081_p10 = scmp.ne.s32.totalorder %s1437_s13, %s1080_s11  ;;  %p1089_p0 = scmp.lt.s32.totalorder %s1080_s11, %s1080_s11 }
  0x42   : > { %p1083_p11 = pnand %p1081_p10, %p1449_p8  ;;  %p1090_p2 = por %p1089_p0, %p1088_p13 }
  0x44   : > { %p1084_p12 = pneg %p1083_p11 }
  0x46   : > { %p1091_p5 = pnand %p1090_p2, %p1084_p12 }
  0x48   : > { %1094 = shalt.err (!%p1091_p5)
}
  0x49   : > { %s1336_s17 = smov 64   ;;  %s1337_s18 = smov 4  }
  0x4a   : > { %935 = dma.hbm_to_vmem [thread:$0]  (!%p1433_p6), %s1748_s3, 256, %s1437_s13, [#allocation11], %s1336_s17, %s1336_s17, %s1337_s18  }
  0x4b   : > { %s1095_s10 = scalar_lea.hbm %s1733_s5, 1024 }
  0x4c   : > { %p1096_p7 = scmp.ne.s32.totalorder %s1733_s5, %s1095_s10  ;;  %p1102_p1 = scmp.lt.u32.totalorder %s1095_s10, %s1733_s5 }
  0x4e   : > { %p1098_p9 = pnand %p1096_p7, %p1449_p8 }
  0x50   : > { %p1099_p4 = pneg %p1098_p9 }
  0x52   : > { %p1104_p3 = pnand %p1102_p1, %p1099_p4 }
  0x54   : > { %1107 = shalt.err (!%p1104_p3)
}
  0x55   : > { %s1108_s19 = scalar_lea.vmem %s313_s16, 1024  ;;  %p1116_p13 = scmp.lt.s32.totalorder %s313_s16, %s313_s16 }
  0x56   : > { %p1109_p10 = scmp.ne.s32.totalorder %s313_s16, %s1108_s19  ;;  %p1117_p0 = scmp.lt.s32.totalorder %s1108_s19, %s1108_s19 }
  0x58   : > { %p1111_p11 = pnand %p1109_p10, %p1449_p8  ;;  %p1118_p2 = por %p1117_p0, %p1116_p13 }
  0x5a   : > { %p1112_p12 = pneg %p1111_p11 }
  0x5c   : > { %p1119_p5 = pnand %p1118_p2, %p1112_p12 }
  0x5e   : > { %1122 = shalt.err (!%p1119_p5)
}
  0x5f   : > { %941 = dma.hbm_to_vmem [thread:$0]  (!%p1433_p6), %s1733_s5, 1024, %s313_s16, [#allocation14], %s1336_s17, %s1336_s17, %s1337_s18  }
  0x60   : > { %s1338_s30 = smov [#allocation9]   ;;  %s1339_s23 = smov [#allocation12]  }
  0x61   : > { %s271_s21 = sshll.u32 %s1338_s30, 4  ;;  %s299_s10 = sshll.u32 %s1339_s23, 4  ;;  %s272_s21 = int_to_ptr.vmem [resolvable:$true] %s271_s21  ;;  %s300_s10 = int_to_ptr.vmem [resolvable:$true] %s299_s10 }
  0x62   : > { %s1123_s11 = scalar_lea.hbm %s1730_s2, 16 }
  0x63   : > { %p1124_p7 = scmp.ne.s32.totalorder %s1730_s2, %s1123_s11  ;;  %p1130_p1 = scmp.lt.u32.totalorder %s1123_s11, %s1730_s2 }
  0x65   : > { %p1126_p9 = pnand %p1124_p7, %p1449_p8 }
  0x67   : > { %p1127_p4 = pneg %p1126_p9 }
  0x69   : > { %p1132_p3 = pnand %p1130_p1, %p1127_p4 }
  0x6b   : > { %1135 = shalt.err (!%p1132_p3)
}
  0x6c   : > { %s1136_s16 = scalar_lea.vmem %s272_s21, 16  ;;  %s1143_s17 = scalar_lea.vmem %s272_s21, 32 }
  0x6d   : > { %p1137_p10 = scmp.ne.s32.totalorder %s272_s21, %s1136_s16  ;;  %p1144_p13 = scmp.lt.s32.totalorder %s272_s21, %s272_s21 }
  0x6e   : > { %p1145_p0 = scmp.lt.s32.totalorder %s1143_s17, %s1136_s16 }
  0x6f   : > { %p1139_p11 = pnand %p1137_p10, %p1449_p8 }
  0x70   : > { %p1146_p2 = por %p1145_p0, %p1144_p13 }
  0x71   : > { %p1140_p12 = pneg %p1139_p11 }
  0x73   : > { %p1147_p5 = pnand %p1146_p2, %p1140_p12 }
  0x75   : > { %1150 = shalt.err (!%p1147_p5)
}
  0x76   : > { %932 = dma.hbm_to_vmem [thread:$0]  (!%p1433_p6), %s1730_s2, 16, %s272_s21, [#allocation8]  }
  0x77   : > { %s1151_s30 = scalar_lea.hbm %s1732_s4, 16 }
  0x78   : > { %p1152_p7 = scmp.ne.s32.totalorder %s1732_s4, %s1151_s30  ;;  %p1158_p1 = scmp.lt.u32.totalorder %s1151_s30, %s1732_s4 }
  0x7a   : > { %p1154_p9 = pnand %p1152_p7, %p1449_p8 }
  0x7c   : > { %p1155_p4 = pneg %p1154_p9 }
  0x7e   : > { %p1160_p3 = pnand %p1158_p1, %p1155_p4 }
  0x80   : > { %1163 = shalt.err (!%p1160_p3)
}
  0x81   : > { %s1164_s19 = scalar_lea.vmem %s300_s10, 16  ;;  %s1171_s21 = scalar_lea.vmem %s300_s10, 32 }
  0x82   : > { %p1165_p10 = scmp.ne.s32.totalorder %s300_s10, %s1164_s19  ;;  %p1172_p13 = scmp.lt.s32.totalorder %s300_s10, %s300_s10 }
  0x83   : > { %p1173_p0 = scmp.lt.s32.totalorder %s1171_s21, %s1164_s19 }
  0x84   : > { %p1167_p11 = pnand %p1165_p10, %p1449_p8 }
  0x85   : > { %p1174_p2 = por %p1173_p0, %p1172_p13 }
  0x86   : > { %p1168_p12 = pneg %p1167_p11 }
  0x88   : > { %p1175_p5 = pnand %p1174_p2, %p1168_p12 }
  0x8a   : > { %1178 = shalt.err (!%p1175_p5)
}
  0x8b   : > { %938 = dma.hbm_to_vmem [thread:$0]  (!%p1433_p6), %s1732_s4, 16, %s300_s10, [#allocation11]  }
  0x8c   : > { %s1340_s17 = smov [#allocation15]   ;;  %s1179_s20 = scalar_lea.hbm %s1734_s6, 16 }
  0x8d   : > { %s326_s1 = sshll.u32 %s1340_s17, 4  ;;  %p1180_p7 = scmp.ne.s32.totalorder %s1734_s6, %s1179_s20  ;;  %s327_s1 = int_to_ptr.vmem [resolvable:$true] %s326_s1 }
  0x8e   : > { %p1186_p1 = scmp.lt.u32.totalorder %s1179_s20, %s1734_s6 }
  0x8f   : > { %p1182_p9 = pnand %p1180_p7, %p1449_p8 }
  0x91   : > { %p1183_p4 = pneg %p1182_p9 }
  0x93   : > { %p1188_p3 = pnand %p1186_p1, %p1183_p4 }
  0x95   : > { %1191 = shalt.err (!%p1188_p3)
}
  0x96   : > { %s1192_s10 = scalar_lea.vmem %s327_s1, 16  ;;  %s1199_s11 = scalar_lea.vmem %s327_s1, 32 }
  0x97   : > { %p1193_p10 = scmp.ne.s32.totalorder %s327_s1, %s1192_s10  ;;  %p1200_p13 = scmp.lt.s32.totalorder %s327_s1, %s327_s1 }
  0x98   : > { %p1201_p0 = scmp.lt.s32.totalorder %s1199_s11, %s1192_s10 }
  0x99   : > { %p1195_p11 = pnand %p1193_p10, %p1449_p8 }
  0x9a   : > { %p1202_p2 = por %p1201_p0, %p1200_p13 }
  0x9b   : > { %p1196_p12 = pneg %p1195_p11 }
  0x9d   : > { %p1203_p5 = pnand %p1202_p2, %p1196_p12 }
  0x9f   : > { %1206 = shalt.err (!%p1203_p5)
}
  0xa0   : > { %944 = dma.hbm_to_vmem [thread:$0]  (!%p1433_p6), %s1734_s6, 16, %s327_s1, [#allocation14]  }
  0xa1   : > { %s819_s22 = sadd.s32 4294967294, %s1331_s29   ;;  %s45_s13 = sadd.s32 1, %s1327_s28 }
  0xa2   : > { %p47_p8 = scmp.ge.s32.totalorder %s45_s13, 2  ;;  %s54_s14 = sadd.s32 1, %s1319_s26 }
  0xa3   : > { %p61_p7 = scmp.ne.s32.totalorder %s1319_s26, %s1315_s25  ;;  %p62_p9 = scmp.eq.s32.totalorder %s1331_s29, 0 }
  0xa4   : > { %s1767_s13 = smov (%p47_p8, %s45_s13), 0  ;;  %p67_p1 = scmp.ne.s32.totalorder %s1315_s25, %s1311_s24 }
  0xa5   : > { %p1569_p4 = por %p62_p9, %p61_p7  ;;  %s49_s17 = ssub.s32 %s1327_s28, %s1767_s13 }
  0xa6   : > { %s1750_s1 = sadd.s32 4294967295, %s1331_s29   ;;  %p52_p3 = scmp.eq.s32.totalorder %s49_s17, 0 }
  0xa7   : > { %p234_p6 = scmp.eq.s32.totalorder %s1750_s1, 1  ;;  %p1751_p10 = scmp.ne.s32.totalorder %s1743_s8, 0 }
  0xa8   : > { %p240_p13 = scmp.eq.s32.totalorder %s819_s22, 1  ;;  %p959_p2 = scmp.lt.s32.totalorder %s1331_s29, 2 }
  0xa9   : > { %p1581_p11 = por %p1751_p10, %p67_p1  ;;  %p1585_p12 = por %p234_p6, %p61_p7 }
  0xaa   : > { %s1590_s20 = scalar_select %p52_p3, %s1319_s26, %s54_s14  }
  0xab   : > { %s1753_s3 = scalar_select %p1585_p12, 1, 0 }
  0xac   : > { %p1592_p0 = por %p240_p13, %p67_p1  ;;  %s337_s23 = sand.u32 1, %s1319_s26  }
  0xad   : > { %s829_s12 = sshll.u32 %s1327_s28, 7  ;;  %s828_s15 = sshll.u32 %s337_s23, 3 }
  0xae   : > { %s1754_s30 = scalar_select %p1592_p0, 1, 0 }
  0xaf   : > { %s1602_s19 = scalar_lea.hbm %s1728_s0, %s829_s12  ;;  %s341_s21 = scalar_lea.vmem [#allocation4], %s828_s15 }
  0xb0   : > { %s349_s22 = sshll.u32 %s341_s21, 4  ;;  %p1606_p5 = pnand %p959_p2, %p1569_p4  ;;  %s1610_s22 = int_to_ptr.vmem [resolvable:$true] %s349_s22 }
  0xb1   : > { %s338_s17 = scalar_lea.sflag [#allocation5], %s337_s23  ;;  %s1207_s1 = scalar_lea.hbm %s1602_s19, 128 }
  0xb2   : > { %p1208_p8 = scmp.ne.s32.totalorder %s1602_s19, %s1207_s1  ;;  %p1209_p7 = pneg %p1606_p5 }
  0xb3   : > { %s1212_s16 = scalar_lea.hbm %s1728_s0, 256  ;;  %p1213_p4 = scmp.lt.u32.totalorder %s1602_s19, %s1728_s0 }
  0xb4   : > { %p1210_p9 = pnand %p1209_p7, %p1208_p8  ;;  %p1214_p6 = scmp.lt.u32.totalorder %s1212_s16, %s1207_s1 }
  0xb5   : > { %p1216_p10 = scmp.lt.u32.totalorder %s1207_s1, %s1602_s19 }
  0xb6   : > { %p1211_p1 = pneg %p1210_p9  ;;  %p1215_p3 = por %p1214_p6, %p1213_p4 }
  0xb8   : > { %p1217_p13 = por %p1216_p10, %p1215_p3 }
  0xba   : > { %p1218_p2 = pnand %p1217_p13, %p1211_p1 }
  0xbc   : > { %1221 = shalt.err (!%p1218_p2)
}
  0xbd   : > { %s1222_s23 = scalar_lea.vmem %s1610_s22, 128  ;;  %s1341_s21 = smov [#allocation4]  }
  0xbe   : > { %p1223_p8 = scmp.ne.s32.totalorder %s1610_s22, %s1222_s23  ;;  %s1227_s12 = sshll.u32 %s1341_s21, 4  ;;  %s1228_s12 = int_to_ptr.vmem [resolvable:$false] %s1227_s12 }
  0xbf   : > { %s1229_s15 = scalar_lea.vmem %s1228_s12, 256  ;;  %p1230_p12 = scmp.lt.s32.totalorder %s1610_s22, %s1228_s12 }
  0xc0   : > { %p1225_p9 = pnand %p1223_p8, %p1209_p7  ;;  %p1231_p4 = scmp.lt.s32.totalorder %s1229_s15, %s1222_s23 }
  0xc2   : > { %p1226_p0 = pneg %p1225_p9  ;;  %p1232_p6 = por %p1231_p4, %p1230_p12 }
  0xc4   : > { %p1233_p3 = pnand %p1232_p6, %p1226_p0 }
  0xc6   : > { %1236 = shalt.err (!%p1233_p3)
}
  0xc7   : > { %948 = dma.hbm_to_vmem [thread:$0]  (!%p1606_p5), %s1602_s19, 128, %s1610_s22, %s338_s17  }
  0xc8   : > { %p1756_p1 = scmp.ne.s32.totalorder %s1744_s9, 0 }
  0xc9   : > { %s1640_s1 = sand.u32 (!%p1756_p1), 1, %s1315_s25  }
  0xca   : > { %358 = sbr.rel (%p1756_p1) target bundleno = 1014 (0x3f6), region = 48  ;;  %s831_s16 = sshll.u32 (!%p1756_p1), %s1640_s1, 3 }
  0xcb   : > { %s361_s10 = scalar_lea.sflag (!%p1756_p1), [#allocation5], %s1640_s1  ;;  %s364_s11 = scalar_lea.vmem (!%p1756_p1), [#allocation4], %s831_s16 }
  0xd1   : > { %1290 = dma.done.wait (%p1581_p11), %s361_s10, 128  }
  0xd2   : > { %1292 = vsyncadd (%p1581_p11), %s361_s10, 4294967168  ;;  %p1757_p12 = scmp.ne.s32.totalorder %s1743_s8, 0 }
  0xd4   : > { %1294 = dma.done.wait (%p1757_p12), [#allocation8], 32  }
  0xd5   : > { %1296 = vsyncadd (%p1757_p12), [#allocation8], 4294967264 }
  0xd6   : > { %1298 = dma.done.wait (%p1757_p12), [#allocation11], 272  }
  0xd7   : > { %1300 = vsyncadd (%p1757_p12), [#allocation11], 4294967024 }
  0xd8   : > { %1302 = dma.done.wait (%p1757_p12), [#allocation14], 1040  }
  0xd9   : > { %1304 = vsyncadd (%p1757_p12), [#allocation14], 4294966256  ;;  %vm428_vm0 = vcmask 261120   ;;  %v1662_v0 = vld [vmem:[%s364_s11] sm:$0xff]  ;;  %v1025_v7 = vld [vmem:[#allocation10] sm:$0xff]   ;;  %v1342_v8 = vmov 0.0  }
  0xda   : > { %v429_v1 = vsel %vm428_vm0, %v1662_v0, 0.0  ;;  %870 = vmatprep.subr.bf16.mxu0 %v1342_v8  ;;  %460 = vst.msk [vmem:[#allocation3] sm:$0xff] %vm428_vm0, %v1342_v8  ;;  %878 = vmatprep.subr.bf16.mxu1 %v1342_v8  ;;  %v1026_v9 = vld [vmem:[#allocation10 + $0x8] sm:$0xff]   ;;  %vm1343_vm1 = vmmov 0   ;;  %v1027_v10 = vld [vmem:[#allocation13] sm:$0xff]   ;;  %v1028_v11 = vld [vmem:[#allocation13 + $0x8] sm:$0xff]  }
  0xdb   : > { %430 = vadd.xlane.f32.xlu0 %v429_v1  ;;  %871 = vmatpush3.bf16.msra.mxu0 %v1025_v7  ;;  %v1029_v12 = vld [vmem:[#allocation13 + $0x10] sm:$0xff]   ;;  %v839_v17 = vld [vmem:[#allocation7] ss:$0 sm:$0xff]  ;;  %v840_v19 = vld [vmem:[#allocation9] ss:$0 sm:$0xff]  ;;  %vm458_vm2 = vcmask 257024  }
  0xdc   : > { %874 = vmatprep.mubr.msk.bf16.mxu0 %vm1343_vm1, %v1342_v8  ;;  %872 = vmatprep.subr.bf16.mxu0 %v1342_v8  ;;  %v1030_v24 = vld [vmem:[#allocation13 + $0x18] sm:$0xff]   ;;  %v1031_v25 = vld [vmem:[#allocation13 + $0x20] sm:$0xff]   ;;  %v1032_v26 = vld [vmem:[#allocation13 + $0x28] sm:$0xff]   ;;  %s855_s8 = sshll.u32 %s1323_s27, 7  ;;  %s418_s9 = scalar_lea.vmem [#allocation16], %s831_s16 }
  0xdd   : > { %894 = vmatprep.mubr.msk.bf16.mxu1 %vm1343_vm1, %v1342_v8  ;;  %879 = vmatpush3.bf16.msra.mxu1 %v1027_v10  ;;  %v1033_v27 = vld [vmem:[#allocation13 + $0x30] sm:$0xff]   ;;  %v1034_v28 = vld [vmem:[#allocation13 + $0x38] sm:$0xff]   ;;  %v853_v48 = vld [vmem:[#allocation15] ss:$0 sm:$0xff]  ;;  %s672_s18 = sshll.u32 %s418_s9, 4  ;;  %s1678_s14 = scalar_lea.hbm %s1735_s7, %s855_s8  ;;  %s1680_s18 = int_to_ptr.vmem [resolvable:$true] %s672_s18 }
  0xde   : > { %880 = vmatprep.subr.bf16.mxu1 %v1342_v8  ;;  %v841_v29 = vld [vmem:[#allocation12] ss:$0 sm:$0xff]  ;;  %s658_s17 = scalar_lea.sflag [#allocation6], %s1640_s1  ;;  %s1237_s27 = scalar_lea.vmem %s1680_s18, 128 }
  0xdf   : > { %873 = vmatpush3.bf16.msra.mxu0 %v1026_v9  ;;  %p1238_p11 = scmp.ne.s32.totalorder %s1680_s18, %s1237_s27  ;;  %p1758_p0 = scmp.ne.s32.totalorder %s1753_s3, 0 }
  0xe0   : > { %s1344_s23 = smov [#allocation16]  }
  0xe1   : > { %881 = vmatpush3.bf16.msra.mxu1 %v1028_v11  ;;  %v534_v41 = vld [vmem:[#allocation3] sm:$0xff]  ;;  %p1239_p5 = pnand %p1238_p11, %p1758_p0  ;;  %s1241_s21 = sshll.u32 %s1344_s23, 4  ;;  %s1242_s21 = int_to_ptr.vmem [resolvable:$false] %s1241_s21 }
  0xe2   : > { %882 = vmatprep.subr.bf16.mxu1 %v1342_v8  ;;  %s1243_s12 = scalar_lea.vmem %s1242_s21, 256  ;;  %p1244_p10 = scmp.lt.s32.totalorder %s1680_s18, %s1242_s21 }
  0xe3   : > { %p1240_p7 = pneg %p1239_p5  ;;  %p1245_p13 = scmp.lt.s32.totalorder %s1243_s12, %s1237_s27 }
  0xe5   : > { %883 = vmatpush3.bf16.msra.mxu1 %v1029_v12  ;;  %p1246_p2 = por %p1245_p13, %p1244_p10 }
  0xe6   : > { %884 = vmatprep.subr.bf16.mxu1 %v1342_v8 }
  0xe7   : > { %p1247_p8 = pnand %p1246_p2, %p1240_p7 }
  0xe9   : > { %885 = vmatpush3.bf16.msra.mxu1 %v1030_v24 }
  0xea   : > { %886 = vmatprep.subr.bf16.mxu1 %v1342_v8 }
  0xed   : > { %887 = vmatpush3.bf16.msra.mxu1 %v1031_v25 }
  0xee   : > { %888 = vmatprep.subr.bf16.mxu1 %v1342_v8 }
  0xf1   : > { %889 = vmatpush3.bf16.msra.mxu1 %v1032_v26 }
  0xf2   : > { %890 = vmatprep.subr.bf16.mxu1 %v1342_v8 }
  0xf5   : > { %891 = vmatpush3.bf16.msra.mxu1 %v1033_v27 }
  0xf6   : > { %892 = vmatprep.subr.bf16.mxu1 %v1342_v8 }
  0xf9   : > { %893 = vmatpush3.bf16.msra.mxu1 %v1034_v28 }
 0x168   : > { %v431_v2 = vpop.xlane.xlu0 %430 }
 0x169   : > { %v433_v3 = vmul.f32 0.03125, %v431_v2 }
 0x16b   : > { %v434_v4 = vsub.f32 %v1662_v0, %v433_v3 }
 0x16d   : > { %v435_v5 = vmul.f32 %v434_v4, %v434_v4 }
 0x16f   : > { %v436_v6 = vsel %vm428_vm0, %v435_v5, 0.0 }
 0x170   : > { %437 = vadd.xlane.f32.xlu0 %v436_v6 }
 0x1fd   : > { %v438_v13 = vpop.xlane.xlu0 %437 }
 0x1fe   : > { %v439_v14 = vmul.f32 0.03125, %v438_v13 }
 0x200   : > { %v440_v15 = vadd.f32 1e-05, %v439_v14 }
 0x202   : > { %1035 = vrsqrt.f32 %v440_v15 }
 0x20c   : > { %v1036_v16 = vpop.eup %1035 }
 0x20d   : > { %v442_v18 = vmul.f32 %v1036_v16, %v434_v4 }
 0x20f   : > { %v449_v20 = vmul.f32 %v839_v17, %v442_v18 }
 0x211   : > { %v456_v21 = vadd.f32 %v840_v19, %v449_v20 }
 0x213   : > { %v457_v22 = vpack.c.bf16 %v456_v21, %v456_v21 }
 0x215   : > { %459 = vst.msk [vmem:[#allocation2] sm:$0xf] %vm458_vm2, %v457_v22 }
 0x21c   : > { %v461_v23 = vld [vmem:[#allocation2] sm:$0xf] }
 0x21d   : > { %875 = vmatmul.mubr.msk.bf16.vlgmr.msra.gmra.mrb[0].mxu0 %vm428_vm0, %v461_v23 }
 0x2f0   : > { %v523_v30 = vpop.f32.mrb[0].mxu0 }
 0x2f1   : > { %v524_v31 = vadd.f32 %v841_v29, %v523_v30  ;;  %v876_v32 = vpop.f32.mrb[1].mxu0 }
 0x2f2   : > { %v526_v33 = vpop.f32.mrb[2].mxu0 }
 0x2f3   : > { %v530_v34 = vmul.f32 0.70710677, %v524_v31  ;;  %v877_v35 = vpop.f32.mrb[3].mxu0  ;;  %v529_v37 = vmul.f32 0.5, %v524_v31 }
 0x2f5   : > { %1037 = verf.f32 %v530_v34 }
 0x2ff   : > { %v1038_v36 = vpop.eup %1037 }
 0x300   : > { %v532_v38 = vadd.f32 1.0, %v1038_v36 }
 0x302   : > { %v533_v39 = vmul.f32 %v532_v38, %v529_v37 }
 0x304   : > { %v535_v40 = vpack.c.bf16 %v533_v39, %v533_v39 }
 0x306   : > { %895 = vmatmul.mubr.bf16.vlgmr.msra.gmra.mrb[0].mxu1 %v535_v40 }
 0x3d9   : > { %v634_v42 = vpop.f32.mrb[0].mxu1 }
 0x3da   : > { %v640_v43 = vadd.f32 %v634_v42, %v534_v41  ;;  %v896_v44 = vpop.f32.mrb[1].mxu1 }
 0x3db   : > { %v637_v45 = vpop.f32.mrb[2].mxu1 }
 0x3dc   : > { %641 = vst.msk [vmem:[#allocation3] sm:$0xff] %vm428_vm0, %v640_v43  ;;  %v897_v46 = vpop.f32.mrb[3].mxu1 }
 0x3e3   : > { %v646_v47 = vld [vmem:[#allocation3] sm:$0xff] }
 0x3e4   : > { %v647_v49 = vadd.f32 %v646_v47, %v1662_v0 }
 0x3e6   : > { %v655_v50 = vadd.f32 %v853_v48, %v647_v49 }
 0x3e8   : > { %656 = vst.msk [vmem:[%s418_s9] sm:$0xff] %vm428_vm0, %v655_v50 }
 0x3e9   : > { %1250 = shalt.err (!%p1247_p8)
}
 0x3ea   : > { %s1251_s15 = scalar_lea.hbm %s1678_s14, 128  ;;  %s1255_s10 = scalar_lea.hbm %s1735_s7, 256 }
 0x3eb   : > { %p1252_p9 = scmp.ne.s32.totalorder %s1678_s14, %s1251_s15  ;;  %p1256_p3 = scmp.lt.u32.totalorder %s1678_s14, %s1735_s7 }
 0x3ec   : > { %p1257_p1 = scmp.lt.u32.totalorder %s1255_s10, %s1251_s15  ;;  %p1259_p11 = scmp.lt.u32.totalorder %s1251_s15, %s1678_s14 }
 0x3ed   : > { %p1253_p4 = pnand %p1252_p9, %p1758_p0 }
 0x3ee   : > { %p1258_p12 = por %p1257_p1, %p1256_p3 }
 0x3ef   : > { %p1254_p6 = pneg %p1253_p4 }
 0x3f0   : > { %p1260_p5 = por %p1259_p11, %p1258_p12 }
 0x3f2   : > { %p1261_p7 = pnand %p1260_p5, %p1254_p6 }
 0x3f4   : > { %1264 = shalt.err (!%p1261_p7)
}
 0x3f5   : > { %924 = dma.vmem_to_hbm [thread:$0]  (%p1758_p0), %s1680_s18, 128, %s1678_s14, %s658_s17  }
 0x3f6 PF: > { %s684_s9 = sand.u32 1, %s1311_s24   ;;  %p1759_p10 = scmp.ne.s32.totalorder %s1754_s30, 0 }
 0x3f7   : > { %p1760_p13 = scmp.ge.s32.totalorder %s1331_s29, 2  ;;  %s685_s19 = scalar_lea.sflag [#allocation6], %s684_s9 }
 0x3f9   : > { %p950_p2 = pnand %p1760_p13, %p1759_p10 }
 0x3fb   : > { %1306 = dma.done.wait (!%p950_p2), %s685_s19, 128  }
 0x3fc   : > { %1308 = vsyncadd (!%p950_p2), %s685_s19, 4294967168  ;;  %s26_s29 = sadd.s32 1, %s1331_s29   ;;  %s1761_s24 = smov %s1315_s25 }
 0x3fd   : > { %p23_p8 = scmp.ge.s32.totalorder %s26_s29, 4   ;;  %s1762_s25 = smov %s1319_s26 }
 0x3fe   : > { %s1763_s26 = smov %s1590_s20  ;;  %s1764_s27 = smov %s1327_s28 }
 0x3ff   : > { %s1765_s28 = smov %s1767_s13  ;;  %25 = sbr.rel (!%p23_p8) target bundleno = 12 (0xc), region = 128 }
 0x406   :  { %690 = vsyncpa [#allocation5], 1 }
 0x407   :  { %692 = vsyncpa [#allocation5 + $0x1], 1 }
 0x408   :  { %693 = vsyncpa [#allocation8], 1 }
 0x409   :  { %694 = vsyncpa [#allocation11], 1 }
 0x40a   :  { %695 = vsyncpa [#allocation14], 1 }
 0x40b   :  { %696 = vsyncpa [#allocation6], 1 }
 0x40c   :  { %698 = vsyncpa [#allocation6 + $0x1], 1 }

// kernel: transformer_block_forward.7
= control target key start
LH: loop header
LB: loop body
LE: loop exit
PB: predicated region body
PF: predicated region fallthrough
CT: control target
= control target key end

     0   :  { %s2370_s0 = inlined_call_operand.hbm [shape: bf16[2,8,32], index: 0, kind: input, shape index: {}]   ;;  %s2371_s1 = inlined_call_operand.hbm [shape: bf16[2,8,32], index: 1, kind: input, shape index: {}]   ;;  %s2372_s2 = inlined_call_operand.hbm [shape: bf16[2,8,32], index: 2, kind: input, shape index: {}]   ;;  %s2373_s3 = inlined_call_operand.hbm [shape: f32[2,8,32], index: 3, kind: input, shape index: {}]   ;;  %s2374_s4 = inlined_call_operand.hbm [shape: bf16[32,32], index: 4, kind: input, shape index: {}]   ;;  %s2375_s5 = inlined_call_operand.hbm [shape: f32[1,32], index: 5, kind: input, shape index: {}]   ;;  %s2376_s6 = inlined_call_operand.hbm [shape: f32[2,8,32], index: 6, kind: output, shape index: {}]  }
   0x1   :  { %2393 = sst [smem:[#allocation28_spill]] %s2371_s1 }
   0x2   :  { %2394 = sst [smem:[#allocation29_spill]] %s2374_s4 }
   0x3   :  { %11 = vsyncpa [#allocation6], 0 }
   0x4   :  { %13 = vsyncpa [#allocation6 + $0x1], 0 }
   0x5   :  { %14 = vsyncpa [#allocation9], 0 }
   0x6   :  { %16 = vsyncpa [#allocation9 + $0x1], 0 }
   0x7   :  { %17 = vsyncpa [#allocation12], 0 }
   0x8   :  { %19 = vsyncpa [#allocation12 + $0x1], 0 }
   0x9   :  { %20 = vsyncpa [#allocation15], 0 }
   0xa   :  { %21 = vsyncpa [#allocation7], 0 }
   0xb   :  { %23 = vsyncpa [#allocation7 + $0x1], 0  ;;  %s1896_s21 = smov 0   ;;  %s1898_s22 = smov 0  }
   0xc   :  { %s1900_s23 = smov 0   ;;  %s1902_s24 = smov 0  }
   0xd   :  { %s1904_s25 = smov 0   ;;  %s1906_s26 = smov 0  }
   0xe LB: > { %2395 = sst [smem:[#allocation23_spill]] %s1820_s21  ;;  %s1927_s27 = sadd.s32 4294967295, %s1840_s26   ;;  %s1840_s26 = sphi %s1906_s26, %s29_s26   ;;  %s1836_s25 = sphi %s1904_s25, %s2435_s25   ;;  %s1832_s24 = sphi %s1902_s24, %s2434_s24   ;;  %s1828_s23 = sphi %s1900_s23, %s2430_s23   ;;  %s1824_s22 = sphi %s1898_s22, %s2433_s22   ;;  %s1820_s21 = sphi %s1896_s21, %s2432_s21  }
   0xf   : > { %2396 = sst [smem:[#allocation24_spill]] %s1828_s23  ;;  %s1311_s28 = sadd.s32 4294967294, %s1840_s26  }
  0x10   : > { %p70_p0 = scmp.ne.s32.totalorder %s1824_s22, %s1820_s21  ;;  %p2377_p1 = scmp.eq.s32.totalorder %s1927_s27, 0 }
  0x11   : > { %p228_p3 = scmp.eq.s32.totalorder %s1311_s28, 1  ;;  %p1312_p5 = scmp.ge.s32.totalorder %s1840_s26, 1 }
  0x12   : > { %p1936_p4 = por %p2377_p1, %p70_p0  ;;  %p235_p7 = scmp.lt.s32.totalorder %s1840_s26, 3 }
  0x13   : > { %p1941_p6 = por %p228_p3, %p70_p0  ;;  %s1842_s8 = smov [#allocation13]  }
  0x14   : > { %s2397_s29 = scalar_select %p1936_p4, 1, 0 }
  0x15   : > { %s2398_s30 = scalar_select %p1941_p6, 1, 0 }
  0x16   : > { %p1946_p8 = pnand %p1312_p5, %p235_p7  ;;  %s247_s9 = sshll.u32 %s1842_s8, 4  ;;  %s248_s9 = int_to_ptr.vmem [resolvable:$true] %s247_s9 }
  0x17   : > { %2399 = sst [smem:[#allocation25_spill]] %s2398_s30  ;;  %s48_s11 = sadd.s32 1, %s1836_s25 }
  0x18   : > { %s2400_s7 = scalar_select %p1946_p8, 1, 0 }
  0x19   : > { %p1444_p9 = pneg %p1946_p8  ;;  %s2402_s4 = sld [smem:[#allocation29_spill]] }
  0x1b   : > { %p1955_p11 = pnand %p1444_p9, %p2377_p1 }
  0x1d   : > { %s2401_s10 = scalar_select %p1955_p11, 1, 0 }
  0x1e   : > { %p2384_p13 = pneg %p1955_p11 }
  0x1f   : > { %s1566_s14 = scalar_lea.hbm %s2402_s4, 256 }
  0x20   : > { %p1567_p12 = scmp.ne.s32.totalorder %s2402_s4, %s1566_s14  ;;  %p1573_p5 = scmp.lt.u32.totalorder %s1566_s14, %s2402_s4 }
  0x22   : > { %p1569_p0 = pnand %p2384_p13, %p1567_p12 }
  0x24   : > { %p1570_p3 = pneg %p1569_p0 }
  0x26   : > { %p1575_p7 = pnand %p1573_p5, %p1570_p3 }
  0x28   : > { %1578 = shalt.err (!%p1575_p7)
}
  0x29   : > { %s1579_s19 = scalar_lea.vmem %s248_s9, 256  ;;  %p1587_p2 = scmp.lt.s32.totalorder %s248_s9, %s248_s9 }
  0x2a   : > { %p1580_p9 = scmp.ne.s32.totalorder %s248_s9, %s1579_s19  ;;  %p1588_p6 = scmp.lt.s32.totalorder %s1579_s19, %s1579_s19 }
  0x2c   : > { %p1582_p10 = pnand %p1580_p9, %p2384_p13  ;;  %p1589_p4 = por %p1588_p6, %p1587_p2 }
  0x2e   : > { %p1583_p1 = pneg %p1582_p10 }
  0x30   : > { %p1590_p8 = pnand %p1589_p4, %p1583_p1 }
  0x32   : > { %1593 = shalt.err (!%p1590_p8)
}
  0x33   : > { %s1843_s20 = smov 64   ;;  %s1844_s28 = smov 4  }
  0x34   : > { %1447 = dma.hbm_to_vmem [thread:$0]  (!%p1955_p11), %s2402_s4, 256, %s248_s9, [#allocation12], %s1843_s20, %s1843_s20, %s1844_s28  }
  0x35   : > { %p50_p1 = scmp.ge.s32.totalorder %s48_s11, 2  ;;  %s57_s13 = sadd.s32 1, %s1828_s23 }
  0x36   : > { %p64_p2 = scmp.ne.s32.totalorder %s1828_s23, %s1824_s22  ;;  %p65_p4 = scmp.eq.s32.totalorder %s1840_s26, 0 }
  0x37   : > { %s2437_s11 = smov (%p50_p1, %s48_s11), 0  ;;  %p2404_p8 = scmp.eq.s32.totalorder %s1927_s27, 1 }
  0x38   : > { %2403 = sst [smem:[#allocation26_spill]] %s2437_s11  ;;  %p66_p6 = por %p65_p4, %p64_p2 }
  0x39   : > { %p1990_p10 = por %p2404_p8, %p64_p2  ;;  %s52_s15 = ssub.s32 %s1836_s25, %s2437_s11 }
  0x3a   : > { %p1470_p12 = scmp.lt.s32.totalorder %s1840_s26, 2  ;;  %p55_p0 = scmp.eq.s32.totalorder %s52_s15, 0 }
  0x3b   : > { %s2405_s14 = scalar_select %p1990_p10, 1, 0 }
  0x3c   : > { %s1998_s16 = sand.u32 1, %s1828_s23   ;;  %s2004_s17 = sshll.u32 %s1836_s25, 6 }
  0x3d   : > { %s2001_s9 = sshll.u32 %s1998_s16, 2  ;;  %p2009_p3 = pnand %p1470_p12, %p66_p6 }
  0x3e   : > { %s2007_s18 = scalar_select %p55_p0, %s1828_s23, %s57_s13  }
  0x3f   : > { %s2407_s19 = scalar_select %p2009_p3, 1, 0 }
  0x40   : > { %2406 = sst [smem:[#allocation27_spill]] %s2007_s18  ;;  %s2383_s20 = sand.u32 1, %s1840_s26  }
  0x41   : > { %s2408_s1 = sld [smem:[#allocation28_spill]]  ;;  %s295_s15 = scalar_lea.vmem [#allocation8], %s2001_s9 }
  0x42   : > { %s303_s4 = sshll.u32 %s295_s15, 4  ;;  %s2025_s13 = scalar_lea.sflag [#allocation9], %s2383_s20  ;;  %s2021_s4 = int_to_ptr.vmem [resolvable:$true] %s303_s4 }
  0x43   : > { %p2031_p7 = pneg %p2009_p3 }
  0x45   : > { %s2409_s18 = scalar_select %p2031_p7, 1, 0 }
  0x47   : > { %s2018_s12 = scalar_lea.hbm %s2408_s1, %s2004_s17  ;;  %s1599_s15 = scalar_lea.hbm %s2408_s1, 128 }
  0x48   : > { %s1594_s11 = scalar_lea.hbm %s2018_s12, 64  ;;  %p1600_p2 = scmp.lt.u32.totalorder %s2018_s12, %s2408_s1 }
  0x49   : > { %p1595_p5 = scmp.ne.s32.totalorder %s2018_s12, %s1594_s11  ;;  %p1601_p4 = scmp.lt.u32.totalorder %s1599_s15, %s1594_s11 }
  0x4a   : > { %p1603_p8 = scmp.lt.u32.totalorder %s1594_s11, %s2018_s12 }
  0x4b   : > { %p1597_p9 = pnand %p2031_p7, %p1595_p5  ;;  %p1602_p6 = por %p1601_p4, %p1600_p2 }
  0x4d   : > { %p1598_p1 = pneg %p1597_p9  ;;  %p1604_p12 = por %p1603_p8, %p1602_p6 }
  0x4f   : > { %p1605_p0 = pnand %p1604_p12, %p1598_p1 }
  0x51   : > { %1608 = shalt.err (!%p1605_p0)
}
  0x52   : > { %s1609_s20 = scalar_lea.vmem %s2021_s4, 64  ;;  %s1845_s28 = smov [#allocation8]  }
  0x53   : > { %p1610_p5 = scmp.ne.s32.totalorder %s2021_s4, %s1609_s20  ;;  %s1614_s8 = sshll.u32 %s1845_s28, 4  ;;  %s1615_s8 = int_to_ptr.vmem [resolvable:$false] %s1614_s8 }
  0x54   : > { %s1616_s23 = scalar_lea.vmem %s1615_s8, 128  ;;  %p1617_p10 = scmp.lt.s32.totalorder %s2021_s4, %s1615_s8 }
  0x55   : > { %p1612_p9 = pnand %p1610_p5, %p2031_p7  ;;  %p1618_p11 = scmp.lt.s32.totalorder %s1616_s23, %s1609_s20 }
  0x57   : > { %p1613_p13 = pneg %p1612_p9  ;;  %p1619_p2 = por %p1618_p11, %p1617_p10 }
  0x59   : > { %p1620_p4 = pnand %p1619_p2, %p1613_p13 }
  0x5b   : > { %1623 = shalt.err (!%p1620_p4)
}
  0x5c   : > { %1457 = dma.hbm_to_vmem [thread:$0]  (!%p2009_p3), %s2018_s12, 64, %s2021_s4, %s2025_s13  }
  0x5d   : > { %s1846_s30 = smov [#allocation14]   ;;  %s1624_s28 = scalar_lea.hbm %s2375_s5, 16 }
  0x5e   : > { %s261_s11 = sshll.u32 %s1846_s30, 4  ;;  %p1625_p11 = scmp.ne.s32.totalorder %s2375_s5, %s1624_s28  ;;  %s262_s11 = int_to_ptr.vmem [resolvable:$true] %s261_s11 }
  0x5f   : > { %p2410_p13 = scmp.ne.s32.totalorder %s2401_s10, 0  ;;  %p1631_p8 = scmp.lt.u32.totalorder %s1624_s28, %s2375_s5 }
  0x61   : > { %p2411_p10 = pneg %p2410_p13 }
  0x63   : > { %p1627_p1 = pnand %p1625_p11, %p2411_p10 }
  0x65   : > { %p1628_p6 = pneg %p1627_p1 }
  0x67   : > { %p1633_p12 = pnand %p1631_p8, %p1628_p6 }
  0x69   : > { %1636 = shalt.err (!%p1633_p12)
}
  0x6a   : > { %s1637_s4 = scalar_lea.vmem %s262_s11, 16  ;;  %p2412_p5 = pmov %p2411_p10 }
  0x6b   : > { %p1638_p0 = scmp.ne.s32.totalorder %s262_s11, %s1637_s4  ;;  %s1644_s1 = scalar_lea.vmem %s262_s11, 32 }
  0x6c   : > { %p1645_p4 = scmp.lt.s32.totalorder %s262_s11, %s262_s11  ;;  %p1646_p3 = scmp.lt.s32.totalorder %s1644_s1, %s1637_s4 }
  0x6d   : > { %p1640_p9 = pnand %p1638_p0, %p2412_p5 }
  0x6e   : > { %p1647_p7 = por %p1646_p3, %p1645_p4 }
  0x6f   : > { %p1641_p2 = pneg %p1640_p9 }
  0x71   : > { %p1648_p10 = pnand %p1647_p7, %p1641_p2 }
  0x73   : > { %1651 = shalt.err (!%p1648_p10)
}
  0x74   : > { %1450 = dma.hbm_to_vmem [thread:$0]  (!%p2410_p13), %s2375_s5, 16, %s262_s11, [#allocation15]  }
  0x75   : > { %s2079_s28 = scalar_lea.hbm %s2370_s0, %s2004_s17  ;;  %s276_s8 = scalar_lea.vmem [#allocation5], %s2001_s9 }
  0x76   : > { %s284_s20 = sshll.u32 %s276_s8, 4  ;;  %s273_s10 = scalar_lea.sflag [#allocation6], %s1998_s16  ;;  %s285_s20 = int_to_ptr.vmem [resolvable:$true] %s284_s20 }
  0x77   : > { %s1652_s23 = scalar_lea.hbm %s2079_s28, 64  ;;  %p2413_p7 = scmp.ne.s32.totalorder %s2409_s18, 0 }
  0x78   : > { %p1653_p3 = scmp.ne.s32.totalorder %s2079_s28, %s1652_s23  ;;  %s1657_s1 = scalar_lea.hbm %s2370_s0, 128 }
  0x79   : > { %p1658_p13 = scmp.lt.u32.totalorder %s2079_s28, %s2370_s0  ;;  %p1659_p6 = scmp.lt.u32.totalorder %s1657_s1, %s1652_s23 }
  0x7a   : > { %p1655_p11 = pnand %p1653_p3, %p2413_p7  ;;  %p1661_p12 = scmp.lt.u32.totalorder %s1652_s23, %s2079_s28 }
  0x7b   : > { %p1660_p8 = por %p1659_p6, %p1658_p13 }
  0x7c   : > { %p1656_p1 = pneg %p1655_p11 }
  0x7d   : > { %p1662_p0 = por %p1661_p12, %p1660_p8 }
  0x7f   : > { %p1663_p5 = pnand %p1662_p0, %p1656_p1 }
  0x81   : > { %1666 = shalt.err (!%p1663_p5)
}
  0x82   : > { %s1667_s30 = scalar_lea.vmem %s285_s20, 64  ;;  %s1847_s15 = smov [#allocation5]  }
  0x83   : > { %p1668_p9 = scmp.ne.s32.totalorder %s285_s20, %s1667_s30  ;;  %s1672_s8 = sshll.u32 %s1847_s15, 4  ;;  %s1673_s8 = int_to_ptr.vmem [resolvable:$false] %s1672_s8 }
  0x84   : > { %s1674_s4 = scalar_lea.vmem %s1673_s8, 128  ;;  %p1675_p10 = scmp.lt.s32.totalorder %s285_s20, %s1673_s8 }
  0x85   : > { %p1670_p2 = pnand %p1668_p9, %p2413_p7  ;;  %p1676_p3 = scmp.lt.s32.totalorder %s1674_s4, %s1667_s30 }
  0x87   : > { %p1671_p4 = pneg %p1670_p2  ;;  %p1677_p11 = por %p1676_p3, %p1675_p10 }
  0x89   : > { %p1678_p6 = pnand %p1677_p11, %p1671_p4 }
  0x8b   : > { %1681 = shalt.err (!%p1678_p6)
}
  0x8c   : > { %p2414_p13 = scmp.ne.s32.totalorder %s2407_s19, 0  ;;  %s2104_s1 = scalar_lea.hbm %s2372_s2, %s2004_s17 }
  0x8d   : > { %s314_s21 = scalar_lea.vmem [#allocation10], %s2001_s9  ;;  %s1322_s30 = sshll.u32 %s1998_s16, 3 }
  0x8e   : > { %1454 = dma.hbm_to_vmem [thread:$0]  (!%p2414_p13), %s2079_s28, 64, %s285_s20, %s273_s10  }
  0x8f   : > { %s322_s12 = sshll.u32 %s314_s21, 4  ;;  %s1682_s15 = scalar_lea.hbm %s2104_s1, 64  ;;  %s323_s12 = int_to_ptr.vmem [resolvable:$true] %s322_s12 }
  0x90   : > { %p1683_p1 = scmp.ne.s32.totalorder %s2104_s1, %s1682_s15  ;;  %s1687_s20 = scalar_lea.hbm %s2372_s2, 128 }
  0x91   : > { %p1688_p0 = scmp.lt.u32.totalorder %s2104_s1, %s2372_s2  ;;  %p1689_p5 = scmp.lt.u32.totalorder %s1687_s20, %s1682_s15 }
  0x92   : > { %p1685_p8 = pnand %p1683_p1, %p2413_p7  ;;  %p1691_p2 = scmp.lt.u32.totalorder %s1682_s15, %s2104_s1 }
  0x93   : > { %p1690_p9 = por %p1689_p5, %p1688_p0 }
  0x94   : > { %p1686_p12 = pneg %p1685_p8 }
  0x95   : > { %p1692_p4 = por %p1691_p2, %p1690_p9 }
  0x97   : > { %p1693_p10 = pnand %p1692_p4, %p1686_p12 }
  0x99   : > { %1696 = shalt.err (!%p1693_p10)
}
  0x9a   : > { %s1697_s9 = scalar_lea.vmem %s323_s12, 64  ;;  %s1848_s4 = smov [#allocation10]  }
  0x9b   : > { %p1698_p3 = scmp.ne.s32.totalorder %s323_s12, %s1697_s9  ;;  %s1702_s23 = sshll.u32 %s1848_s4, 4  ;;  %s1703_s23 = int_to_ptr.vmem [resolvable:$false] %s1702_s23 }
  0x9c   : > { %s1704_s11 = scalar_lea.vmem %s1703_s23, 128  ;;  %p1705_p1 = scmp.lt.s32.totalorder %s323_s12, %s1703_s23 }
  0x9d   : > { %p1700_p11 = pnand %p1698_p3, %p2413_p7  ;;  %p1706_p8 = scmp.lt.s32.totalorder %s1704_s11, %s1697_s9 }
  0x9f   : > { %p1701_p6 = pneg %p1700_p11  ;;  %p1707_p13 = por %p1706_p8, %p1705_p1 }
  0xa1   : > { %p1708_p0 = pnand %p1707_p13, %p1701_p6 }
  0xa3   : > { %1711 = shalt.err (!%p1708_p0)
}
  0xa4   : > { %p2415_p5 = scmp.ne.s32.totalorder %s2407_s19, 0  ;;  %s1323_s21 = sshll.u32 %s1836_s25, 7 }
  0xa5   : > { %s2130_s28 = scalar_lea.hbm %s2373_s3, %s1323_s21  ;;  %s333_s20 = scalar_lea.vmem [#allocation11], %s1322_s30 }
  0xa6   : > { %1460 = dma.hbm_to_vmem [thread:$0]  (!%p2415_p5), %s2104_s1, 64, %s323_s12, %s2025_s13  }
  0xa7   : > { %s341_s10 = sshll.u32 %s333_s20, 4  ;;  %s2416_s17 = sand.u32 1, %s1840_s26   ;;  %s342_s10 = int_to_ptr.vmem [resolvable:$true] %s341_s10 }
  0xa8   : > { %s330_s9 = scalar_lea.sflag [#allocation12], %s2416_s17  ;;  %s1712_s4 = scalar_lea.hbm %s2130_s28, 128 }
  0xa9   : > { %p1713_p13 = scmp.ne.s32.totalorder %s2130_s28, %s1712_s4  ;;  %s1717_s12 = scalar_lea.hbm %s2373_s3, 256 }
  0xaa   : > { %p1718_p2 = scmp.lt.u32.totalorder %s2130_s28, %s2373_s3  ;;  %p1719_p4 = scmp.lt.u32.totalorder %s1717_s12, %s1712_s4 }
  0xab   : > { %p1715_p12 = pnand %p1713_p13, %p2413_p7  ;;  %p1721_p3 = scmp.lt.u32.totalorder %s1712_s4, %s2130_s28 }
  0xac   : > { %p1720_p10 = por %p1719_p4, %p1718_p2 }
  0xad   : > { %p1716_p9 = pneg %p1715_p12 }
  0xae   : > { %p1722_p11 = por %p1721_p3, %p1720_p10 }
  0xb0   : > { %p1723_p6 = pnand %p1722_p11, %p1716_p9 }
  0xb2   : > { %1726 = shalt.err (!%p1723_p6)
}
  0xb3   : > { %s1727_s30 = scalar_lea.vmem %s342_s10, 128  ;;  %s1849_s11 = smov [#allocation11]  }
  0xb4   : > { %p1728_p1 = scmp.ne.s32.totalorder %s342_s10, %s1727_s30  ;;  %s1732_s21 = sshll.u32 %s1849_s11, 4  ;;  %s1733_s21 = int_to_ptr.vmem [resolvable:$false] %s1732_s21 }
  0xb5   : > { %s1734_s15 = scalar_lea.vmem %s1733_s21, 256  ;;  %p1735_p13 = scmp.lt.s32.totalorder %s342_s10, %s1733_s21 }
  0xb6   : > { %p1730_p8 = pnand %p1728_p1, %p2413_p7  ;;  %p1736_p12 = scmp.lt.s32.totalorder %s1734_s15, %s1727_s30 }
  0xb8   : > { %p1731_p0 = pneg %p1730_p8  ;;  %p1737_p5 = por %p1736_p12, %p1735_p13 }
  0xba   : > { %p1738_p2 = pnand %p1737_p5, %p1731_p0 }
  0xbc   : > { %1741 = shalt.err (!%p1738_p2)
}
  0xbd   : > { %p2417_p4 = scmp.ne.s32.totalorder %s2407_s19, 0  ;;  %p2418_p9 = scmp.ne.s32.totalorder %s2400_s7, 0 }
  0xbe   : > { %s2156_s18 = sand.u32 (!%p2418_p9), 1, %s1824_s22   ;;  %p2419_p7 = scmp.ne.s32.totalorder (!%p2418_p9), %s2397_s29, 0 }
  0xbf   : > { %1463 = dma.hbm_to_vmem [thread:$0]  (!%p2417_p4), %s2130_s28, 128, %s342_s10, %s330_s9  }
  0xc0   : > { %350 = sbr.rel (%p2418_p9) target bundleno = 1867 (0x74b), region = 44  ;;  %s2159_s8 = sshll.u32 (!%p2418_p9), %s2156_s18, 2 }
  0xc1   : > { %s353_s20 = scalar_lea.sflag (!%p2418_p9), [#allocation6], %s2156_s18  ;;  %s356_s17 = scalar_lea.vmem (!%p2418_p9), [#allocation5], %s2159_s8 }
  0xc7   : > { %1795 = dma.done.wait (%p2419_p7), %s353_s20, 64  }
  0xc8   : > { %1797 = vsyncadd (%p2419_p7), %s353_s20, 4294967232  ;;  %s361_s7 = sand.u32 1, %s1927_s27   ;;  %s365_s28 = scalar_lea.vmem [#allocation8], %s2159_s8 }
  0xc9   : > { %s362_s19 = scalar_lea.sflag [#allocation9], %s361_s7 }
  0xca   : > { %1799 = dma.done.wait (%p2419_p7), %s362_s19, 128  }
  0xcb   : > { %1801 = vsyncadd (%p2419_p7), %s362_s19, 4294967168  ;;  %s1328_s10 = sshll.u32 %s2156_s18, 3  ;;  %s374_s9 = scalar_lea.vmem [#allocation10], %s2159_s8 }
  0xcc   : > { %s380_s4 = scalar_lea.sflag [#allocation12], %s361_s7  ;;  %s2177_s13 = scalar_lea.vmem [#allocation11], %s1328_s10 }
  0xcd   : > { %1803 = dma.done.wait (%p2419_p7), %s380_s4, 128  }
  0xce   : > { %1805 = vsyncadd (%p2419_p7), %s380_s4, 4294967168  ;;  %p2420_p5 = scmp.eq.s32.totalorder %s1927_s27, 0 }
  0xd0   : > { %1807 = dma.done.wait (%p2420_p5), [#allocation12], 256   ;;  %p2421_p10 = pmov %p2420_p5 }
  0xd1   : > { %p2422_p3 = pmov %p2420_p5 }
  0xd2   : > { %1809 = vsyncadd (%p2421_p10), [#allocation12], 4294967040 }
  0xd3   : > { %1811 = dma.done.wait (%p2422_p3), [#allocation15], 16   ;;  %p2423_p11 = pmov %p2422_p3 }
  0xd4   : > { %v1850_v0 = vmov 0.0   ;;  %vm1851_vm0 = vmmov 0   ;;  %vm454_vm1 = vcmask 64512   ;;  %v452_v1 = vld [vmem:[%s365_s28] sm:$0xf]  ;;  %vm440_vm2 = vcmask 7168  }
  0xd5   : > { %1813 = vsyncadd (%p2423_p11), [#allocation15], 4294967280  ;;  %1370 = vmatprep.subr.bf16.mxu0 %v1850_v0  ;;  %1372 = vmatprep.mubr.msk.bf16.mxu0 %vm1851_vm0, %v1850_v0  ;;  %v459_v2 = vsel %vm454_vm1, %v452_v1, 0  ;;  %v451_v3 = vld [vmem:[%s356_s17] sm:$0xf]  ;;  %v1852_v4 = vmov -inf   ;;  %v1335_v11 = vcombine.low %v452_v1, %v452_v1 }
  0xd6   : > { %1376 = vmatprep.subr.bf16.mxu1 %v1850_v0  ;;  %1378 = vmatprep.mubr.msk.bf16.mxu1 %vm1851_vm0, %v1850_v0  ;;  %441 = vst.msk [vmem:[#allocation2] sm:$0xff] %vm440_vm2, %v1852_v4  ;;  %442 = vst.msk [vmem:[#allocation2 + $0x8] sm:$0xff] %vm440_vm2, %v1852_v4  ;;  %v1853_v10 = vmov 0   ;;  %s1854_s27 = smov 120   ;;  %v1334_v12 = vcombine.low %v451_v3, %v451_v3  ;;  %s1855_s29 = smov 112   ;;  %vm537_vm3 = vcmask 1043456  }
  0xd7   : > { %1371 = vmatpush3.bf16.xpose.msra.mxu0 %v459_v2  ;;  %443 = vst.msk [vmem:[#allocation2 + $0x10] sm:$0xff] %vm440_vm2, %v1852_v4  ;;  %444 = vst.msk [vmem:[#allocation2 + $0x18] sm:$0xff] %vm440_vm2, %v1852_v4  ;;  %1536 = vset.pattern.permute.xlu0 %v1853_v10  ;;  %s1856_s1 = smov 104   ;;  %v453_v17 = vld [vmem:[%s374_s9] sm:$0xf]  ;;  %vm449_vm4 = vcmask 261120  }
  0xd8   : > { %1388 = vmatprep.subr.bf16.mxu0 %v1850_v0  ;;  %445 = vst.msk [vmem:[#allocation3] sm:$0xff] %vm440_vm2, %v1850_v0  ;;  %446 = vst.msk [vmem:[#allocation3 + $0x8] sm:$0xff] %vm440_vm2, %v1850_v0  ;;  %1537 = vset.pattern.permute.xlu1 %v1853_v10  ;;  %v539_v18 = vsel %vm537_vm3, %v453_v17, 0  ;;  %v1337_v55 = vcombine.low %v453_v17, %v453_v17  ;;  %s1857_s12 = smov 8   ;;  %s1858_s23 = smov 16   ;;  %vm729_vm5 = vcmask 130112  }
  0xd9   : > { %447 = vst.msk [vmem:[#allocation3 + $0x10] sm:$0xff] %vm440_vm2, %v1850_v0  ;;  %448 = vst.msk [vmem:[#allocation3 + $0x18] sm:$0xff] %vm440_vm2, %v1850_v0  ;;  %591 = vrot.lane.b32.xlu1 %v1335_v11, %s1854_s27  ;;  %1377 = vmatpush3.bf16.msra.mxu1 %v539_v18  ;;  %s1859_s16 = smov 24   ;;  %vm868_vm6 = vcmask 195712   ;;  %vm1007_vm7 = vcmask 261312   ;;  %s1348_s30 = sshll.u32 %s1832_s24, 7 }
  0xda   : > { %1382 = vmatprep.subr.bf16.mxu1 %v1850_v0  ;;  %450 = vst.msk [vmem:[#allocation4] sm:$0xff] %vm449_vm4, %v1850_v0  ;;  %s434_s11 = scalar_lea.vmem [#allocation16], %s1328_s10  ;;  %s2320_s20 = scalar_lea.hbm %s2376_s6, %s1348_s30 }
  0xdb   : > { %s1139_s21 = sshll.u32 %s434_s11, 4  ;;  %s1125_s24 = scalar_lea.sflag [#allocation7], %s2156_s18  ;;  %s2322_s21 = int_to_ptr.vmem [resolvable:$true] %s1139_s21 }
  0xdc   : > { %s1742_s17 = scalar_lea.vmem %s2322_s21, 128  ;;  %p2424_p1 = scmp.ne.s32.totalorder %s2405_s14, 0 }
  0xdd   : > { %586 = vrot.lane.b32.xlu1 %v1334_v12, %s1854_s27  ;;  %v2221_v13 = vld [vmem:[#allocation2] sm:$0xff]  ;;  %v640_v52 = vld [vmem:[#allocation2 + $0x8] sm:$0xff]  ;;  %p1743_p6 = scmp.ne.s32.totalorder %s2322_s21, %s1742_s17  ;;  %s1860_s7 = smov [#allocation16]  }
  0xde   : > { %1373 = vmatmul.mubr.msk.bf16.vlgmr.msra.gmra.mrb[0].mxu0 %vm454_vm1, %v451_v3  ;;  %v2263_v56 = vld [vmem:[#allocation2 + $0x10] sm:$0xff]  ;;  %v921_v60 = vld [vmem:[#allocation2 + $0x18] sm:$0xff]  ;;  %s1746_s19 = sshll.u32 %s1860_s7, 4  ;;  %s1747_s19 = int_to_ptr.vmem [resolvable:$false] %s1746_s19 }
  0xdf   : > { %1390 = vmatprep.mubr.msk.bf16.mxu0 %vm1851_vm0, %v1850_v0  ;;  %p1744_p8 = pnand %p1743_p6, %p2424_p1  ;;  %s1748_s28 = scalar_lea.vmem %s1747_s19, 256 }
  0xe0   : > { %p1749_p13 = scmp.lt.s32.totalorder %s2322_s21, %s1747_s19  ;;  %p1750_p12 = scmp.lt.s32.totalorder %s1748_s28, %s1742_s17 }
  0xe1   : > { %733 = vrot.lane.b32.xlu1 %v1335_v11, %s1855_s29  ;;  %p1745_p0 = pneg %p1744_p8 }
  0xe2   : > { %p1751_p2 = por %p1750_p12, %p1749_p13 }
  0xe4   : > { %p1752_p4 = pnand %p1751_p2, %p1745_p0 }
  0xe5   : > { %731 = vrot.lane.b32.xlu1 %v1334_v12, %s1855_s29 }
  0xe9   : > { %872 = vrot.lane.b32.xlu1 %v1335_v11, %s1856_s1 }
  0xed   : > { %870 = vrot.lane.b32.xlu1 %v1334_v12, %s1856_s1 }
 0x14b   : > { %v592_v22 = vpop.permute.xlu1 %591 }
 0x14c   : > { %v597_v25 = vsel %vm454_vm1, %v592_v22, 0 }
 0x14f   : > { %v587_v23 = vpop.permute.xlu1 %586 }
 0x153   : > { %v734_v27 = vpop.permute.xlu1 %733 }
 0x154   : > { %v739_v29 = vsel %vm454_vm1, %v734_v27, 0 }
 0x157   : > { %v732_v28 = vpop.permute.xlu1 %731 }
 0x15b   : > { %v873_v30 = vpop.permute.xlu1 %872 }
 0x15c   : > { %v878_v31 = vsel %vm454_vm1, %v873_v30, 0 }
 0x15f   : > { %v871_v32 = vpop.permute.xlu1 %870 }
 0x1b1   : > { %v495_v5 = vpop.f32.mrb[0].mxu0 }
 0x1b2   : > { %v1374_v6 = vpop.f32.mrb[1].mxu0  ;;  %v502_v7 = vsel %vm454_vm1, %v495_v5, -inf }
 0x1b3   : > { %503 = vmax.xlane.f32.xlu0 %v502_v7  ;;  %v498_v8 = vpop.f32.mrb[2].mxu0 }
 0x1b4   : > { %v1375_v9 = vpop.f32.mrb[3].mxu0 }
 0x240   : > { %v504_v14 = vpop.xlane.xlu0 %503 }
 0x241   : > { %v2224_v15 = vmax.f32 %v2221_v13, %v504_v14 }
 0x243   : > { %v506_v16 = vsub.f32 %v2221_v13, %v2224_v15  ;;  %525 = vst.msk [vmem:[#allocation2] sm:$0xff] %vm440_vm2, %v2224_v15  ;;  %511 = vperm.xlu0 %1536, %v2224_v15   ;;  %v517_v15 = vld [vmem:[#allocation3] sm:$0xff] }
 0x245   : > { %v507_v30 = vmul.f32 1.442695, %v506_v16 }
 0x2c2   : > { %v512_v19 = vpop.permute.xlu0 %511 }
 0x2c3   : > { %v514_v20 = vsub.f32 %v495_v5, %v512_v19 }
 0x2c5   : > { %v515_v21 = vmul.f32 1.442695, %v514_v20 }
 0x2c7   : > { %1542 = vpow2.f32 %v515_v21 }
 0x2d1   : > { %v2235_v24 = vpop.eup %1542 }
 0x2d2   : > { %v533_v26 = vpack.c.bf16 %v2235_v24, %v2235_v24  ;;  %v519_v2 = vsel %vm454_vm1, %v2235_v24, 0.0 }
 0x2d4   : > { %1379 = vmatmul.mubr.msk.bf16.vlgmr.msra.gmra.mrb[0].mxu1 %vm454_vm1, %v533_v26 }
 0x2d5   : > { %1383 = vmatpush3.bf16.xpose.msra.mxu1 %v597_v25  ;;  %1384 = vmatprep.mubr.msk.bf16.mxu1 %vm1851_vm0, %v1850_v0 }
 0x2d6   : > { %1394 = vmatprep.subr.bf16.mxu1 %v1850_v0 }
 0x2dc   : > { %1385 = vmatmul.mubr.msk.bf16.vlgmr.msra.gmra.mrb[4].mxu1 %vm454_vm1, %v587_v23 }
 0x2dd   : > { %1395 = vmatpush3.bf16.xpose.msra.mxu1 %v739_v29  ;;  %1396 = vmatprep.mubr.msk.bf16.mxu1 %vm1851_vm0, %v1850_v0 }
 0x2de   : > { %1406 = vmatprep.subr.bf16.mxu1 %v1850_v0 }
 0x2e4   : > { %1397 = vmatmul.mubr.msk.bf16.vlgmr.msra.gmra.mrb[8].mxu1 %vm454_vm1, %v732_v28 }
 0x2e5   : > { %1407 = vmatpush3.bf16.xpose.msra.mxu1 %v878_v31  ;;  %1408 = vmatprep.mubr.msk.bf16.mxu1 %vm1851_vm0, %v1850_v0 }
 0x2e6   : > { %1418 = vmatprep.subr.bf16.mxu1 %v1850_v0 }
 0x2ec   : > { %1409 = vmatmul.mubr.msk.bf16.vlgmr.msra.gmra.mrb[12].mxu1 %vm454_vm1, %v871_v32 }
 0x2ed   : > { %1422 = vmatprep.mubr.msk.bf16.mxu1 %vm1851_vm0, %v1850_v0 }
 0x3a7   : > { %v2257_v33 = vpop.f32.mrb[0].mxu1 }
 0x3a8   : > { %v1380_v34 = vpop.f32.mrb[1].mxu1 }
 0x3a9   : > { %v578_v35 = vpop.f32.mrb[2].mxu1 }
 0x3aa   : > { %v1381_v36 = vpop.f32.mrb[3].mxu1 }
 0x3af   : > { %v633_v37 = vpop.f32.mrb[4].mxu1 }
 0x3b0   : > { %v1386_v38 = vpop.f32.mrb[5].mxu1  ;;  %v641_v39 = vsel %vm454_vm1, %v633_v37, -inf }
 0x3b1   : > { %642 = vmax.xlane.f32.xlu1 %v641_v39  ;;  %v636_v40 = vpop.f32.mrb[6].mxu1 }
 0x3b2   : > { %v1387_v41 = vpop.f32.mrb[7].mxu1 }
 0x3b7   : > { %v775_v42 = vpop.f32.mrb[8].mxu1 }
 0x3b8   : > { %v1398_v43 = vpop.f32.mrb[9].mxu1  ;;  %v783_v44 = vsel %vm454_vm1, %v775_v42, -inf }
 0x3b9   : > { %784 = vmax.xlane.f32.xlu0 %v783_v44  ;;  %v778_v45 = vpop.f32.mrb[10].mxu1 }
 0x3ba   : > { %v1399_v46 = vpop.f32.mrb[11].mxu1 }
 0x3bb   : > { %v799_v46 = vld [vmem:[#allocation3 + $0x10] sm:$0xff] }
 0x3bf   : > { %v914_v47 = vpop.f32.mrb[12].mxu1 }
 0x3c0   : > { %v1410_v48 = vpop.f32.mrb[13].mxu1  ;;  %v922_v49 = vsel %vm454_vm1, %v914_v47, -inf }
 0x3c1   : > { %923 = vmax.xlane.f32.xlu1 %v922_v49  ;;  %v917_v50 = vpop.f32.mrb[14].mxu1 }
 0x3c2   : > { %v1411_v51 = vpop.f32.mrb[15].mxu1 }
 0x3c3   : > { %v938_v51 = vld [vmem:[#allocation3 + $0x18] sm:$0xff] }
 0x43e   : > { %v643_v53 = vpop.xlane.xlu1 %642 }
 0x43f   : > { %v644_v54 = vmax.f32 %v640_v52, %v643_v53 }
 0x441   : > { %664 = vst.msk [vmem:[#allocation2 + $0x8] sm:$0xff] %vm440_vm2, %v644_v54  ;;  %650 = vperm.xlu1 %1537, %v644_v54   ;;  %v645_v1 = vsub.f32 %v640_v52, %v644_v54  ;;  %v526_v52 = vld [vmem:[#allocation4] sm:$0xff] }
 0x443   : > { %v646_v3 = vmul.f32 1.442695, %v645_v1 }
 0x445   : > { %676 = vrot.lane.b32.xlu1 %v1337_v55, %s1854_s27  ;;  %1544 = vpow2.f32 %v646_v3 }
 0x446   : > { %v785_v57 = vpop.xlane.xlu0 %784 }
 0x447   : > { %v786_v58 = vmax.f32 %v2263_v56, %v785_v57 }
 0x449   : > { %v787_v59 = vsub.f32 %v2263_v56, %v786_v58  ;;  %806 = vst.msk [vmem:[#allocation2 + $0x10] sm:$0xff] %vm440_vm2, %v786_v58  ;;  %792 = vperm.xlu0 %1536, %v786_v58  }
 0x44b   : > { %v788_v34 = vmul.f32 1.442695, %v787_v59 }
 0x44e   : > { %v924_v61 = vpop.xlane.xlu1 %923 }
 0x44f   : > { %v925_v62 = vmax.f32 %v921_v60, %v924_v61  ;;  %v2274_v4 = vpop.eup %1544 }
 0x451   : > { %v926_v63 = vsub.f32 %v921_v60, %v925_v62  ;;  %945 = vst.msk [vmem:[#allocation2 + $0x18] sm:$0xff] %vm440_vm2, %v925_v62  ;;  %931 = vperm.xlu1 %1537, %v925_v62  }
 0x453   : > { %v927_v35 = vmul.f32 1.442695, %v926_v63 }
 0x455   : > { %815 = vrot.lane.b32.xlu1 %v1337_v55, %s1855_s29 }
 0x459   : > { %954 = vrot.lane.b32.xlu1 %v1337_v55, %s1856_s1 }
 0x47d   : > { %520 = vadd.xlane.f32.xlu1 %v519_v2 }
 0x48e   : > { %668 = vperm.xlu1 %1537, %v2274_v4  }
 0x4c0   : > { %v651_v5 = vpop.permute.xlu1 %650 }
 0x4c1   : > { %v653_v6 = vsub.f32 %v633_v37, %v651_v5 }
 0x4c3   : > { %v654_v7 = vmul.f32 1.442695, %v653_v6 }
 0x4c4   : > { %v677_v8 = vpop.permute.xlu1 %676 }
 0x4c5   : > { %1546 = vpow2.f32 %v654_v7  ;;  %v682_v9 = vsel %vm537_vm3, %v677_v8, 0 }
 0x4c6   : > { %1389 = vmatpush3.bf16.msra.mxu0 %v682_v9 }
 0x4c7   : > { %1400 = vmatprep.subr.bf16.mxu0 %v1850_v0 }
 0x4c8   : > { %v793_v10 = vpop.permute.xlu0 %792 }
 0x4c9   : > { %v795_v11 = vsub.f32 %v775_v42, %v793_v10  ;;  %v657_v42 = vld [vmem:[#allocation3 + $0x8] sm:$0xff] }
 0x4ca   : > { %v658_v43 = vmul.f32 %v2274_v4, %v657_v42 }
 0x4cb   : > { %v796_v12 = vmul.f32 1.442695, %v795_v11 }
 0x4cd   : > { %1548 = vpow2.f32 %v796_v12 }
 0x4cf   : > { %v1547_v14 = vpop.eup %1546 }
 0x4d0   : > { %v932_v17 = vpop.permute.xlu1 %931  ;;  %v659_v18 = vsel %vm454_vm1, %v1547_v14, 0.0  ;;  %v672_v19 = vpack.c.bf16 %v1547_v14, %v1547_v14  ;;  %v1540_v14 = vld [vmem:[#allocation13] sm:$0xff]  }
 0x4d1   : > { %v934_v20 = vsub.f32 %v914_v47, %v932_v17  ;;  %660 = vadd.xlane.f32.xlu0 %v659_v18  ;;  %1419 = vmatpush3.bf16.msra.mxu1 %v1540_v14  ;;  %v1541_v17 = vld [vmem:[#allocation13 + $0x8] sm:$0xff]  }
 0x4d2   : > { %1391 = vmatmul.mubr.msk.bf16.vlgmr.msra.gmra.mrb[4].mxu0 %vm454_vm1, %v672_v19  ;;  %1420 = vmatprep.subr.bf16.mxu1 %v1850_v0 }
 0x4d3   : > { %v935_v21 = vmul.f32 1.442695, %v934_v20  ;;  %1402 = vmatprep.mubr.msk.bf16.mxu0 %vm1851_vm0, %v1850_v0 }
 0x4d4   : > { %v816_v22 = vpop.permute.xlu1 %815 }
 0x4d5   : > { %1550 = vpow2.f32 %v935_v21  ;;  %v821_v23 = vsel %vm537_vm3, %v816_v22, 0  ;;  %1421 = vmatpush3.bf16.msra.mxu1 %v1541_v17 }
 0x4d6   : > { %1401 = vmatpush3.bf16.msra.mxu0 %v821_v23  ;;  %1552 = vpow2.f32 %v507_v30 }
 0x4d7   : > { %v1549_v24 = vpop.eup %1548  ;;  %1412 = vmatprep.subr.bf16.mxu0 %v1850_v0  ;;  %1554 = vpow2.f32 %v788_v34 }
 0x4d8   : > { %v801_v25 = vsel %vm454_vm1, %v1549_v24, 0.0  ;;  %v814_v26 = vpack.c.bf16 %v1549_v24, %v1549_v24  ;;  %v955_v27 = vpop.permute.xlu1 %954  ;;  %1556 = vpow2.f32 %v927_v35 }
 0x4d9   : > { %802 = vadd.xlane.f32.xlu0 %v801_v25  ;;  %v960_v28 = vsel %vm537_vm3, %v955_v27, 0 }
 0x4da   : > { %1403 = vmatmul.mubr.msk.bf16.vlgmr.msra.gmra.mrb[8].mxu0 %vm454_vm1, %v814_v26 }
 0x4db   : > { %1413 = vmatpush3.bf16.msra.mxu0 %v960_v28  ;;  %1414 = vmatprep.mubr.msk.bf16.mxu0 %vm1851_vm0, %v1850_v0 }
 0x4df   : > { %v1551_v29 = vpop.eup %1550 }
 0x4e0   : > { %v940_v31 = vsel %vm454_vm1, %v1551_v29, 0.0  ;;  %v953_v32 = vpack.c.bf16 %v1551_v29, %v1551_v29  ;;  %v1553_v36 = vpop.eup %1552 }
 0x4e1   : > { %941 = vadd.xlane.f32.xlu1 %v940_v31  ;;  %v1555_v37 = vpop.eup %1554  ;;  %v518_v16 = vmul.f32 %v1553_v36, %v517_v15 }
 0x4e2   : > { %1415 = vmatmul.mubr.msk.bf16.vlgmr.msra.gmra.mrb[12].mxu0 %vm454_vm1, %v953_v32  ;;  %v1557_v13 = vpop.eup %1556  ;;  %v800_v47 = vmul.f32 %v1555_v37, %v799_v46 }
 0x4e3   : > { %v939_v53 = vmul.f32 %v1557_v13, %v938_v51 }
 0x4ef   : > { %529 = vperm.xlu0 %1536, %v1553_v36  }
 0x4f3   : > { %810 = vperm.xlu0 %1536, %v1555_v37  }
 0x4f7   : > { %949 = vperm.xlu0 %1536, %v1557_v13  }
 0x50a   : > { %v521_v38 = vpop.xlane.xlu1 %520 }
 0x50b   : > { %v522_v39 = vadd.f32 %v521_v38, %v518_v16 }
 0x50d   : > { %524 = vst.msk [vmem:[#allocation3] sm:$0xff] %vm440_vm2, %v522_v39 }
 0x50e   : > { %v669_v50 = vpop.permute.xlu1 %668 }
 0x514   : > { %v1012_v40 = vld [vmem:[#allocation3] sm:$0xff] }
 0x515   : > { %1558 = vrcp.f32 %v1012_v40 }
 0x51f   : > { %v1559_v41 = vpop.eup %1558 }
 0x520   : > { %1017 = vperm.xlu0 %1536, %v1559_v41  }
 0x55e   : > { %v661_v44 = vpop.xlane.xlu0 %660 }
 0x55f   : > { %v662_v45 = vadd.f32 %v661_v44, %v658_v43  ;;  %v1343_v43 = vld [vmem:[#allocation14] ss:$0 sm:$0xff] }
 0x561   : > { %663 = vst.msk [vmem:[#allocation3 + $0x8] sm:$0xff] %vm440_vm2, %v662_v45  ;;  %v1121_v45 = vld [vmem:[%s2177_s13] sm:$0xff] }
 0x566   : > { %v803_v48 = vpop.xlane.xlu0 %802 }
 0x567   : > { %v804_v49 = vadd.f32 %v803_v48, %v800_v47 }
 0x568   : > { %v1022_v2 = vld [vmem:[#allocation3 + $0x8] sm:$0xff] }
 0x569   : > { %805 = vst.msk [vmem:[#allocation3 + $0x10] sm:$0xff] %vm440_vm2, %v804_v49 }
 0x56e   : > { %v942_v54 = vpop.xlane.xlu1 %941  ;;  %v530_v55 = vpop.permute.xlu0 %529 }
 0x56f   : > { %v943_v56 = vadd.f32 %v942_v54, %v939_v53  ;;  %v532_v57 = vmul.f32 %v530_v55, %v526_v52 }
 0x570   : > { %v1032_v58 = vld [vmem:[#allocation3 + $0x10] sm:$0xff] }
 0x571   : > { %944 = vst.msk [vmem:[#allocation3 + $0x18] sm:$0xff] %vm440_vm2, %v943_v56  ;;  %v581_v59 = vadd.f32 %v2257_v33, %v532_v57  ;;  %1560 = vrcp.f32 %v1032_v58 }
 0x572   : > { %1562 = vrcp.f32 %v1022_v2  ;;  %v811_v22 = vpop.permute.xlu0 %810 }
 0x573   : > { %582 = vst.msk [vmem:[#allocation4] sm:$0xff] %vm454_vm1, %v581_v59 }
 0x576   : > { %v950_v27 = vpop.permute.xlu0 %949 }
 0x578   : > { %v1042_v33 = vld [vmem:[#allocation3 + $0x18] sm:$0xff] }
 0x579   : > { %1564 = vrcp.f32 %v1042_v33 }
 0x57a   : > { %v665_v18 = vld [vmem:[#allocation4] sm:$0xff] }
 0x57b   : > { %v1561_v60 = vpop.eup %1560  ;;  %v671_v19 = vmul.f32 %v669_v50, %v665_v18 }
 0x57c   : > { %1037 = vperm.xlu0 %1536, %v1561_v60   ;;  %v1563_v11 = vpop.eup %1562 }
 0x583   : > { %v1565_v12 = vpop.eup %1564 }
 0x59f   : > { %v1018_v31 = vpop.permute.xlu0 %1017 }
 0x5a5   : > { %v718_v61 = vpop.f32.mrb[4].mxu0 }
 0x5a6   : > { %v1392_v62 = vpop.f32.mrb[5].mxu0  ;;  %725 = vrot.lane.b32.xlu1 %v718_v61, %s1857_s12 }
 0x5a7   : > { %v721_v63 = vpop.f32.mrb[6].mxu0 }
 0x5a8   : > { %v1393_v1 = vpop.f32.mrb[7].mxu0 }
 0x5ad   : > { %v857_v3 = vpop.f32.mrb[8].mxu0 }
 0x5ae   : > { %v1404_v4 = vpop.f32.mrb[9].mxu0  ;;  %864 = vrot.lane.b32.xlu1 %v857_v3, %s1858_s23 }
 0x5af   : > { %v860_v5 = vpop.f32.mrb[10].mxu0 }
 0x5b0   : > { %v1405_v6 = vpop.f32.mrb[11].mxu0 }
 0x5b5   : > { %v996_v7 = vpop.f32.mrb[12].mxu0 }
 0x5b6   : > { %v1416_v8 = vpop.f32.mrb[13].mxu0  ;;  %1003 = vrot.lane.b32.xlu1 %v996_v7, %s1859_s16 }
 0x5b7   : > { %v999_v9 = vpop.f32.mrb[14].mxu0 }
 0x5b8   : > { %v1417_v10 = vpop.f32.mrb[15].mxu0 }
 0x5ba   : > { %1027 = vperm.xlu1 %1537, %v1563_v11  }
 0x5be   : > { %1047 = vperm.xlu1 %1537, %v1565_v12  }
 0x5fb   : > { %v1038_v13 = vpop.permute.xlu0 %1037 }
 0x618   : > { %v726_v20 = vpop.permute.xlu1 %725 }
 0x619   : > { %v728_v21 = vadd.f32 %v726_v20, %v671_v19 }
 0x61b   : > { %730 = vst.msk [vmem:[#allocation4] sm:$0xff] %vm729_vm5, %v728_v21 }
 0x620   : > { %v865_v25 = vpop.permute.xlu1 %864 }
 0x622   : > { %v807_v23 = vld [vmem:[#allocation4] sm:$0xff] }
 0x623   : > { %v813_v24 = vmul.f32 %v811_v22, %v807_v23 }
 0x625   : > { %v867_v26 = vadd.f32 %v865_v25, %v813_v24 }
 0x627   : > { %869 = vst.msk [vmem:[#allocation4] sm:$0xff] %vm868_vm6, %v867_v26 }
 0x628   : > { %v1004_v0 = vpop.permute.xlu1 %1003 }
 0x62e   : > { %v946_v28 = vld [vmem:[#allocation4] sm:$0xff] }
 0x62f   : > { %v952_v29 = vmul.f32 %v950_v27, %v946_v28 }
 0x631   : > { %v1006_v30 = vadd.f32 %v1004_v0, %v952_v29 }
 0x633   : > { %1008 = vst.msk [vmem:[#allocation4] sm:$0xff] %vm1007_vm7, %v1006_v30 }
 0x639   : > { %v1028_v35 = vpop.permute.xlu1 %1027 }
 0x63a   : > { %v1014_v32 = vld [vmem:[#allocation4] sm:$0xff] }
 0x63b   : > { %v1020_v34 = vmul.f32 %v1018_v31, %v1014_v32 }
 0x63d   : > { %1021 = vst.msk [vmem:[#allocation4] sm:$0xff] %vm454_vm1, %v1020_v34  ;;  %v1048_v38 = vpop.permute.xlu1 %1047 }
 0x644   : > { %v1024_v36 = vld [vmem:[#allocation4] sm:$0xff] }
 0x645   : > { %v1030_v37 = vmul.f32 %v1028_v35, %v1024_v36 }
 0x647   : > { %1031 = vst.msk [vmem:[#allocation4] sm:$0xff] %vm729_vm5, %v1030_v37 }
 0x64e   : > { %v1034_v15 = vld [vmem:[#allocation4] sm:$0xff] }
 0x64f   : > { %v1040_v16 = vmul.f32 %v1038_v13, %v1034_v15 }
 0x651   : > { %1041 = vst.msk [vmem:[#allocation4] sm:$0xff] %vm868_vm6, %v1040_v16 }
 0x658   : > { %v1044_v39 = vld [vmem:[#allocation4] sm:$0xff] }
 0x659   : > { %v1050_v40 = vmul.f32 %v1048_v38, %v1044_v39 }
 0x65b   : > { %1051 = vst.msk [vmem:[#allocation4] sm:$0xff] %vm1007_vm7, %v1050_v40 }
 0x662   : > { %v1052_v41 = vld [vmem:[#allocation4] sm:$0xff] }
 0x663   : > { %v1053_v42 = vpack.c.bf16 %v1052_v41, %v1052_v41 }
 0x665   : > { %1423 = vmatmul.mubr.msk.bf16.vlgmr.msra.gmra.mrb[16].mxu1 %vm449_vm4, %v1053_v42 }
 0x738   : > { %v1115_v44 = vpop.f32.mrb[16].mxu1 }
 0x739   : > { %v1116_v46 = vadd.f32 %v1343_v43, %v1115_v44  ;;  %v1424_v47 = vpop.f32.mrb[17].mxu1 }
 0x73a   : > { %v1118_v48 = vpop.f32.mrb[18].mxu1 }
 0x73b   : > { %v1122_v49 = vadd.f32 %v1121_v45, %v1116_v46  ;;  %v1425_v50 = vpop.f32.mrb[19].mxu1 }
 0x73d   : > { %1123 = vst.msk [vmem:[%s434_s11] sm:$0xff] %vm449_vm4, %v1122_v49 }
 0x73e   : > { %1755 = shalt.err (!%p1752_p4)
}
 0x73f   : > { %s1756_s18 = scalar_lea.hbm %s2320_s20, 128  ;;  %s1760_s4 = scalar_lea.hbm %s2376_s6, 256 }
 0x740   : > { %p1757_p9 = scmp.ne.s32.totalorder %s2320_s20, %s1756_s18  ;;  %p1761_p10 = scmp.lt.u32.totalorder %s2320_s20, %s2376_s6 }
 0x741   : > { %p1762_p3 = scmp.lt.u32.totalorder %s1760_s4, %s1756_s18  ;;  %p1764_p6 = scmp.lt.u32.totalorder %s1756_s18, %s2320_s20 }
 0x742   : > { %p1758_p7 = pnand %p1757_p9, %p2424_p1 }
 0x743   : > { %p1763_p11 = por %p1762_p3, %p1761_p10 }
 0x744   : > { %p1759_p5 = pneg %p1758_p7 }
 0x745   : > { %p1765_p8 = por %p1764_p6, %p1763_p11 }
 0x747   : > { %p1766_p0 = pnand %p1765_p8, %p1759_p5 }
 0x749   : > { %1769 = shalt.err (!%p1766_p0)
}
 0x74a   : > { %1442 = dma.vmem_to_hbm [thread:$0]  (%p2424_p1), %s2322_s21, 128, %s2320_s20, %s1125_s24  }
 0x74b PF: > { %s2425_s29 = sld [smem:[#allocation23_spill]]  ;;  %s2426_s1 = sld [smem:[#allocation25_spill]] }
 0x74c   : > { %p2428_p12 = scmp.ge.s32.totalorder %s1840_s26, 2 }
 0x751   : > { %s1151_s12 = sand.u32 1, %s2425_s29   ;;  %p2427_p13 = scmp.ne.s32.totalorder %s2426_s1, 0 }
 0x752   : > { %s1152_s23 = scalar_lea.sflag [#allocation7], %s1151_s12 }
 0x753   : > { %p1465_p2 = pnand %p2428_p12, %p2427_p13 }
 0x755   : > { %1815 = dma.done.wait (!%p1465_p2), %s1152_s23, 128  }
 0x756   : > { %1817 = vsyncadd (!%p1465_p2), %s1152_s23, 4294967168  ;;  %s29_s26 = sadd.s32 1, %s1840_s26   ;;  %s2429_s16 = sld [smem:[#allocation24_spill]] }
 0x757   : > { %p26_p4 = scmp.ge.s32.totalorder %s29_s26, 4   ;;  %s2430_s23 = sld [smem:[#allocation27_spill]] }
 0x758   : > { %s2431_s14 = sld [smem:[#allocation26_spill]]  ;;  %s2432_s21 = smov %s1824_s22 }
 0x759   : > { %s2434_s24 = smov %s1836_s25  ;;  %28 = sbr.rel (!%p26_p4) target bundleno = 14 (0xe), region = 148 }
 0x75c   : > { %s2433_s22 = smov %s2429_s16 }
 0x75e   : > { %s2435_s25 = smov %s2431_s14 }
 0x760   :  { %1157 = vsyncpa [#allocation6], 1 }
 0x761   :  { %1159 = vsyncpa [#allocation6 + $0x1], 1 }
 0x762   :  { %1160 = vsyncpa [#allocation9], 1 }
 0x763   :  { %1162 = vsyncpa [#allocation9 + $0x1], 1 }
 0x764   :  { %1163 = vsyncpa [#allocation12], 1 }
 0x765   :  { %1165 = vsyncpa [#allocation12 + $0x1], 1 }
 0x766   :  { %1166 = vsyncpa [#allocation15], 1 }
 0x767   :  { %1167 = vsyncpa [#allocation7], 1 }
 0x768   :  { %1169 = vsyncpa [#allocation7 + $0x1], 1 }

</bundles_post_ra>
